<compile_context>
chip_gen: v6e
topology: v6e:2x2x1
jax: 0.10.0
libtpu: 0.0.40
codegen_flags: <defaults>
</compile_context>

<pallas_src>
import functools

import jax
import jax.numpy as jnp
from jax.experimental import pallas as pl
from jax.experimental.pallas import tpu as pltpu

EPS = 1e-5  # nn.BatchNorm3d default


def _round_up(v, m):
    return (v + m - 1) // m * m


# --------------------------------------------------------------------------
# Fused ResBlock forward (single pallas_call)
# --------------------------------------------------------------------------
def resblock_forward(x_ncdhw, p, *, compute_dtype=jnp.float32,
                     vmem_limit_bytes=48 * 1024 * 1024):
    N, Cin, D, H, W = x_ncdhw.shape
    Cout = p["w1"].shape[0]
    Dp, Hp, Wp = D + 2, H + 2, W + 2
    Cin_p = _round_up(Cin, 8)                  # pad channels to sublane multiple
    Rtot = N * Dp * Hp * Wp                    # flattened padded voxel count
    pad_off = Hp * Wp + Wp + 1                 # flat offset of voxel (+1,+1,+1)
    Rout = Rtot - 2 * pad_off                  # working columns (cover all voxels)
    Rout_p = _round_up(Rout, 128)              # lane-dense output / MXU N dim
    M = N * D * H * W                          # number of real voxels
    inv_m = 1.0 / float(M)

    pad_a = _round_up(pad_off, 128)            # 128-aligned h placement in hp
    delta = pad_a - pad_off                    # conv2 tap base shift
    W_hp = pad_a + Rout_p + pad_a              # hp scratch width (lane aligned)
    Rx = 2 * pad_off + Rout_p                  # xp_flat width needed by the taps

    # tap offsets in the flat padded layout (kd, kh, kw nested, kw fastest)
    offs = tuple(kd * Hp * Wp + kh * Wp + kw
                 for kd in range(3) for kh in range(3) for kw in range(3))

    # ---- VMEM budget guard (no im2col temporaries any more) ----------------
    cbytes = jnp.dtype(compute_dtype).itemsize
    est_vmem = (cbytes * (Cin_p * Rx + Cout * W_hp + 27 * Cout * (Cin_p + Cout))
                + 4 * Rout_p * (10 * Cout + Cin_p + 1))   # live f32 slabs + mask
    assert est_vmem < int(0.75 * vmem_limit_bytes), (
        "activations too large for the single-shot VMEM-resident kernel; "
        "see TODO(synk) about the column-tiled two-pass variant")

    # ---------------- host-side layout prep (cheap XLA ops) ----------------
    # zero-padded, channels-major, spatially flattened input: (Cin_p, Rx)
    xpad = jnp.pad(x_ncdhw, ((0, 0), (0, Cin_p - Cin), (1, 1), (1, 1), (1, 1)))
    xp_flat = jnp.transpose(xpad, (1, 0, 2, 3, 4)).reshape(Cin_p, Rtot)
    xp_flat = jnp.pad(xp_flat, ((0, 0), (0, Rx - Rtot))).astype(compute_dtype)

    # validity mask over the Rout_p working columns (1 where a real voxel lives)
    r = jnp.arange(Rout_p)
    dd = (r // (Hp * Wp)) % Dp
    hh = (r // Wp) % Hp
    ww = r % Wp
    mask = ((r < Rout) & (dd < D) & (hh < H) & (ww < W))
    mask = mask.astype(jnp.float32)[None, :]                       # (1, Rout_p)

    # per-tap conv weights: (27, Cout, Cin_p) / (27, Cout, Cout) / (Cout, Cin_p)
    w1s = jnp.transpose(p["w1"], (2, 3, 4, 0, 1)).reshape(27, Cout, Cin)
    w1s = jnp.pad(w1s, ((0, 0), (0, 0), (0, Cin_p - Cin))).astype(compute_dtype)
    w2s = jnp.transpose(p["w2"], (2, 3, 4, 0, 1)).reshape(27, Cout, Cout)
    w2s = w2s.astype(compute_dtype)
    wd = jnp.pad(p["wd"][:, :, 0, 0, 0],
                 ((0, 0), (0, Cin_p - Cin))).astype(compute_dtype)

    # BN affine params packed (conv biases b1/b2/bd are dropped: a per-channel
    # constant is exactly cancelled by the batch-statistics mean subtraction).
    bn = jnp.stack([p["g1"], p["be1"], p["g2"], p["be2"], p["gd"], p["bed"]])
    bn = bn.astype(jnp.float32)[:, :, None]                        # (6, Cout, 1)

    # ----------------------------- the kernel ------------------------------
    def kernel(xp_ref, mask_ref, w1_ref, w2_ref, wd_ref, bn_ref, o_ref, hp_ref):
        msk = mask_ref[...]                                        # (1, Rout_p)

        # conv1: 27 taps, each a small dot on a shifted contiguous column
        # window, accumulated in f32 (no (K, Rout) im2col buffer).
        acc1 = jnp.dot(w1_ref[0], xp_ref[:, offs[0]:offs[0] + Rout_p],
                       preferred_element_type=jnp.float32)
        for t in range(1, 27):
            o = offs[t]
            acc1 = acc1 + jnp.dot(w1_ref[t], xp_ref[:, o:o + Rout_p],
                                  preferred_element_type=jnp.float32)

        # 1x1x1 downsample on the skip path (reads the conv1 input, stays live
        # in VMEM; no zero-padded block weight needed).
        skip = jnp.dot(wd_ref[...], xp_ref[:, pad_off:pad_off + Rout_p],
                       preferred_element_type=jnp.float32)

        # BN1 (batch stats over the M valid voxels, single pass) + ReLU with a
        # fused per-channel scale/shift epilogue.
        macc1 = acc1 * msk
        mu1 = jnp.sum(macc1, axis=1, keepdims=True) * inv_m
        var1 = jnp.sum(macc1 * acc1, axis=1, keepdims=True) * inv_m - mu1 * mu1
        sc1 = bn_ref[0] * jax.lax.rsqrt(var1 + EPS)
        sh1 = bn_ref[1] - mu1 * sc1
        h = jnp.maximum(acc1 * sc1 + sh1, 0.0) * msk   # junk cols -> conv2 zeros
        # dropout=0.0 -> Dropout3d layer is None in the torch module (identity)

        # keep h on-chip: zero ONLY the two border column blocks (128-aligned),
        # then a lane-aligned, unmasked store of h at column pad_a.
        zero_col = jnp.zeros((Cout, pad_a), hp_ref.dtype)
        hp_ref[:, 0:pad_a] = zero_col
        hp_ref[:, pad_a + Rout_p:pad_a + Rout_p + pad_a] = zero_col
        hp_ref[:, pad_a:pad_a + Rout_p] = h.astype(hp_ref.dtype)

        # conv2: 27 taps accumulated from the VMEM-resident h (never hits HBM).
        acc2 = jnp.dot(w2_ref[0], hp_ref[:, delta + offs[0]:delta + offs[0] + Rout_p],
                       preferred_element_type=jnp.float32)
        for t in range(1, 27):
            o = delta + offs[t]
            acc2 = acc2 + jnp.dot(w2_ref[t], hp_ref[:, o:o + Rout_p],
                                  preferred_element_type=jnp.float32)

        # BN2 + BN(downsample): fused scale/shift, then add + ReLU in one pass.
        macc2 = acc2 * msk
        mu2 = jnp.sum(macc2, axis=1, keepdims=True) * inv_m
        var2 = jnp.sum(macc2 * acc2, axis=1, keepdims=True) * inv_m - mu2 * mu2
        sc2 = bn_ref[2] * jax.lax.rsqrt(var2 + EPS)
        sh2 = bn_ref[3] - mu2 * sc2

        mskd = skip * msk
        mud = jnp.sum(mskd, axis=1, keepdims=True) * inv_m
        vard = jnp.sum(mskd * skip, axis=1, keepdims=True) * inv_m - mud * mud
        scd = bn_ref[4] * jax.lax.rsqrt(vard + EPS)
        shd = bn_ref[5] - mud * scd

        # residual add + ReLU, lane-dense unmasked store (channels on sublanes)
        o_ref[...] = jnp.maximum(acc2 * sc2 + skip * scd + (sh2 + shd), 0.0)

    out_flat = pl.pallas_call(
        kernel,
        out_shape=jax.ShapeDtypeStruct((Cout, Rout_p), jnp.float32),
        in_specs=[pl.BlockSpec(memory_space=pltpu.MemorySpace.VMEM)] * 6,
        out_specs=pl.BlockSpec(memory_space=pltpu.MemorySpace.VMEM),
        scratch_shapes=[pltpu.VMEM((Cout, W_hp), compute_dtype)],
        compiler_params=pltpu.CompilerParams(vmem_limit_bytes=vmem_limit_bytes),
    )(xp_flat, mask, w1s, w2s, wd, bn)

    # ------------------- decode flat columns back to NCDHW -----------------
    # TODO(synk): when this block feeds another ResBlock, keep the flat
    #   channels-major layout and skip this transpose until the network edge.
    if Rtot >= Rout_p:
        out_full = jnp.pad(out_flat, ((0, 0), (0, Rtot - Rout_p)))
    else:
        out_full = out_flat[:, :Rtot]
    out = out_full.reshape(Cout, N, Dp, Hp, Wp)[:, :, :D, :H, :W]
    return jnp.transpose(out, (1, 0, 2, 3, 4))                # (N, Cout, D, H, W)


# --------------------------------------------------------------------------
# Pure-JAX reference (mirrors the PyTorch forward, incl. conv biases)
# --------------------------------------------------------------------------
def resblock_reference(x, p):
    dn = ("NCDHW", "OIDHW", "NCDHW")

    def conv3(x, w, b, pad):
        y = jax.lax.conv_general_dilated(
            x, w, window_strides=(1, 1, 1),
            padding=((pad, pad),) * 3, dimension_numbers=dn)
        return y + b[None, :, None, None, None]

    def bn(x, g, be):
        mean = x.mean(axis=(0, 2, 3, 4), keepdims=True)
        var = ((x - mean) ** 2).mean(axis=(0, 2, 3, 4), keepdims=True)
        xn = (x - mean) * jax.lax.rsqrt(var + EPS)
        return xn * g[None, :, None, None, None] + be[None, :, None, None, None]

    out = jnp.maximum(bn(conv3(x, p["w1"], p["b1"], 1), p["g1"], p["be1"]), 0.0)
    out = bn(conv3(out, p["w2"], p["b2"], 1), p["g2"], p["be2"])
    ident = bn(conv3(x, p["wd"], p["bd"], 0), p["gd"], p["bed"])
    return jnp.maximum(out + ident, 0.0)


# --------------------------------------------------------------------------
def _init_params(key, cin, cout):
    ks = jax.random.split(key, 8)
    f32 = jnp.float32
    return {
        "w1": 0.1 * jax.random.normal(ks[0], (cout, cin, 3, 3, 3), f32),
        "b1": 0.05 * jax.random.normal(ks[1], (cout,), f32),
        "g1": jnp.ones((cout,), f32) + 0.1 * jax.random.normal(ks[2], (cout,), f32),
        "be1": 0.05 * jax.random.normal(ks[3], (cout,), f32),
        "w2": 0.1 * jax.random.normal(ks[4], (cout, cout, 3, 3, 3), f32),
        "b2": 0.05 * jax.random.normal(ks[5], (cout,), f32),
        "g2": jnp.ones((cout,), f32),
        "be2": jnp.zeros((cout,), f32),
        "wd": 0.1 * jax.random.normal(ks[6], (cout, cin, 1, 1, 1), f32),
        "bd": 0.05 * jax.random.normal(ks[7], (cout,), f32),
        "gd": jnp.ones((cout,), f32),
        "bed": jnp.zeros((cout,), f32),
    }


if __name__ == "__main__":
    key = jax.random.PRNGKey(0)
    kx, kp = jax.random.split(key)

    N, Cin, Cout, D, H, W = 2, 4, 8, 8, 8, 8
    x = jax.random.normal(kx, (N, Cin, D, H, W), jnp.float32)
    params = _init_params(kp, Cin, Cout)

    ref = jax.block_until_ready(resblock_reference(x, params))

    # f32 path: exact agreement with the f32 reference.
    out = jax.block_until_ready(jax.jit(resblock_forward)(x, params))
    assert out.shape == (N, Cout, D, H, W), out.shape
    err = float(jnp.max(jnp.abs(out - ref)))
    assert jnp.allclose(out, ref, atol=1e-3, rtol=1e-3), err

    # bf16 MXU path (v6e/v7x throughput; BN stats stay in f32).  Loose sanity
    # bound only — bf16 matmuls are not expected to match the f32 reference
    # to 1e-3.
    fwd_bf16 = jax.jit(functools.partial(resblock_forward,
                                         compute_dtype=jnp.bfloat16))
    out_bf = jax.block_until_ready(fwd_bf16(x, params))
    assert out_bf.shape == (N, Cout, D, H, W), out_bf.shape
    assert bool(jnp.isfinite(out_bf).all())
    err_bf = float(jnp.max(jnp.abs(out_bf - ref)))
    assert err_bf < 0.5, err_bf

    print("KERNEL_OK")
</pallas_src>

<mosaic_0001>
module attributes {stable_mosaic.version = 11 : i64} {
  func.func @kernel(%arg0: memref<8x2014xf32, #tpu.memory_space<vmem>>, %arg1: memref<1x1792xf32, #tpu.memory_space<vmem>>, %arg2: memref<27x8x8xf32, #tpu.memory_space<vmem>>, %arg3: memref<27x8x8xf32, #tpu.memory_space<vmem>>, %arg4: memref<8x8xf32, #tpu.memory_space<vmem>>, %arg5: memref<6x8x1xf32, #tpu.memory_space<vmem>>, %arg6: memref<8x1792xf32, #tpu.memory_space<vmem>>, %arg7: memref<8x2048xf32, #tpu.memory_space<vmem>>) attributes {dimension_semantics = [], scalar_prefetch = 0 : i64, scratch_operands = 1 : i64, tpu.core_type = #tpu.core_type<tc>} {
    %c0 = arith.constant 0 : index
    %c0_0 = arith.constant 0 : index
    %0 = vector.load %arg1[%c0, %c0_0] : memref<1x1792xf32, #tpu.memory_space<vmem>>, vector<1x1792xf32>
    %c0_1 = arith.constant 0 : index
    %c0_2 = arith.constant 0 : index
    %c0_3 = arith.constant 0 : index
    %1 = vector.load %arg2[%c0_1, %c0_2, %c0_3] : memref<27x8x8xf32, #tpu.memory_space<vmem>>, vector<1x8x8xf32>
    %2 = vector.shape_cast %1 : vector<1x8x8xf32> to vector<8x8xf32>
    %c0_4 = arith.constant 0 : index
    %c0_5 = arith.constant 0 : index
    %3 = vector.load %arg0[%c0_4, %c0_5] : memref<8x2014xf32, #tpu.memory_space<vmem>>, vector<8x1792xf32>
    %cst = arith.constant dense<0.000000e+00> : vector<8x1792xf32>
    %4 = tpu.matmul %2, %3, %cst {dimension_numbers = #tpu.dot_dimension_numbers<[1], [0], [0], [1], [0, 0, 1, 1], [], []>} : vector<8x8xf32>, vector<8x1792xf32>, vector<8x1792xf32> -> vector<8x1792xf32>
    %c1 = arith.constant 1 : index
    %c0_6 = arith.constant 0 : index
    %c0_7 = arith.constant 0 : index
    %5 = vector.load %arg2[%c1, %c0_6, %c0_7] : memref<27x8x8xf32, #tpu.memory_space<vmem>>, vector<1x8x8xf32>
    %6 = vector.shape_cast %5 : vector<1x8x8xf32> to vector<8x8xf32>
    %c0_8 = arith.constant 0 : index
    %c1_9 = arith.constant 1 : index
    %7 = vector.load %arg0[%c0_8, %c1_9] : memref<8x2014xf32, #tpu.memory_space<vmem>>, vector<8x1792xf32>
    %cst_10 = arith.constant dense<0.000000e+00> : vector<8x1792xf32>
    %8 = tpu.matmul %6, %7, %cst_10 {dimension_numbers = #tpu.dot_dimension_numbers<[1], [0], [0], [1], [0, 0, 1, 1], [], []>} : vector<8x8xf32>, vector<8x1792xf32>, vector<8x1792xf32> -> vector<8x1792xf32>
    %9 = arith.addf %4, %8 : vector<8x1792xf32>
    %c2 = arith.constant 2 : index
    %c0_11 = arith.constant 0 : index
    %c0_12 = arith.constant 0 : index
    %10 = vector.load %arg2[%c2, %c0_11, %c0_12] : memref<27x8x8xf32, #tpu.memory_space<vmem>>, vector<1x8x8xf32>
    %11 = vector.shape_cast %10 : vector<1x8x8xf32> to vector<8x8xf32>
    %c0_13 = arith.constant 0 : index
    %c2_14 = arith.constant 2 : index
    %12 = vector.load %arg0[%c0_13, %c2_14] : memref<8x2014xf32, #tpu.memory_space<vmem>>, vector<8x1792xf32>
    %cst_15 = arith.constant dense<0.000000e+00> : vector<8x1792xf32>
    %13 = tpu.matmul %11, %12, %cst_15 {dimension_numbers = #tpu.dot_dimension_numbers<[1], [0], [0], [1], [0, 0, 1, 1], [], []>} : vector<8x8xf32>, vector<8x1792xf32>, vector<8x1792xf32> -> vector<8x1792xf32>
    %14 = arith.addf %9, %13 : vector<8x1792xf32>
    %c3 = arith.constant 3 : index
    %c0_16 = arith.constant 0 : index
    %c0_17 = arith.constant 0 : index
    %15 = vector.load %arg2[%c3, %c0_16, %c0_17] : memref<27x8x8xf32, #tpu.memory_space<vmem>>, vector<1x8x8xf32>
    %16 = vector.shape_cast %15 : vector<1x8x8xf32> to vector<8x8xf32>
    %c0_18 = arith.constant 0 : index
    %c10 = arith.constant 10 : index
    %17 = vector.load %arg0[%c0_18, %c10] : memref<8x2014xf32, #tpu.memory_space<vmem>>, vector<8x1792xf32>
    %cst_19 = arith.constant dense<0.000000e+00> : vector<8x1792xf32>
    %18 = tpu.matmul %16, %17, %cst_19 {dimension_numbers = #tpu.dot_dimension_numbers<[1], [0], [0], [1], [0, 0, 1, 1], [], []>} : vector<8x8xf32>, vector<8x1792xf32>, vector<8x1792xf32> -> vector<8x1792xf32>
    %19 = arith.addf %14, %18 : vector<8x1792xf32>
    %c4 = arith.constant 4 : index
    %c0_20 = arith.constant 0 : index
    %c0_21 = arith.constant 0 : index
    %20 = vector.load %arg2[%c4, %c0_20, %c0_21] : memref<27x8x8xf32, #tpu.memory_space<vmem>>, vector<1x8x8xf32>
    %21 = vector.shape_cast %20 : vector<1x8x8xf32> to vector<8x8xf32>
    %c0_22 = arith.constant 0 : index
    %c11 = arith.constant 11 : index
    %22 = vector.load %arg0[%c0_22, %c11] : memref<8x2014xf32, #tpu.memory_space<vmem>>, vector<8x1792xf32>
    %cst_23 = arith.constant dense<0.000000e+00> : vector<8x1792xf32>
    %23 = tpu.matmul %21, %22, %cst_23 {dimension_numbers = #tpu.dot_dimension_numbers<[1], [0], [0], [1], [0, 0, 1, 1], [], []>} : vector<8x8xf32>, vector<8x1792xf32>, vector<8x1792xf32> -> vector<8x1792xf32>
    %24 = arith.addf %19, %23 : vector<8x1792xf32>
    %c5 = arith.constant 5 : index
    %c0_24 = arith.constant 0 : index
    %c0_25 = arith.constant 0 : index
    %25 = vector.load %arg2[%c5, %c0_24, %c0_25] : memref<27x8x8xf32, #tpu.memory_space<vmem>>, vector<1x8x8xf32>
    %26 = vector.shape_cast %25 : vector<1x8x8xf32> to vector<8x8xf32>
    %c0_26 = arith.constant 0 : index
    %c12 = arith.constant 12 : index
    %27 = vector.load %arg0[%c0_26, %c12] : memref<8x2014xf32, #tpu.memory_space<vmem>>, vector<8x1792xf32>
    %cst_27 = arith.constant dense<0.000000e+00> : vector<8x1792xf32>
    %28 = tpu.matmul %26, %27, %cst_27 {dimension_numbers = #tpu.dot_dimension_numbers<[1], [0], [0], [1], [0, 0, 1, 1], [], []>} : vector<8x8xf32>, vector<8x1792xf32>, vector<8x1792xf32> -> vector<8x1792xf32>
    %29 = arith.addf %24, %28 : vector<8x1792xf32>
    %c6 = arith.constant 6 : index
    %c0_28 = arith.constant 0 : index
    %c0_29 = arith.constant 0 : index
    %30 = vector.load %arg2[%c6, %c0_28, %c0_29] : memref<27x8x8xf32, #tpu.memory_space<vmem>>, vector<1x8x8xf32>
    %31 = vector.shape_cast %30 : vector<1x8x8xf32> to vector<8x8xf32>
    %c0_30 = arith.constant 0 : index
    %c20 = arith.constant 20 : index
    %32 = vector.load %arg0[%c0_30, %c20] : memref<8x2014xf32, #tpu.memory_space<vmem>>, vector<8x1792xf32>
    %cst_31 = arith.constant dense<0.000000e+00> : vector<8x1792xf32>
    %33 = tpu.matmul %31, %32, %cst_31 {dimension_numbers = #tpu.dot_dimension_numbers<[1], [0], [0], [1], [0, 0, 1, 1], [], []>} : vector<8x8xf32>, vector<8x1792xf32>, vector<8x1792xf32> -> vector<8x1792xf32>
    %34 = arith.addf %29, %33 : vector<8x1792xf32>
    %c7 = arith.constant 7 : index
    %c0_32 = arith.constant 0 : index
    %c0_33 = arith.constant 0 : index
    %35 = vector.load %arg2[%c7, %c0_32, %c0_33] : memref<27x8x8xf32, #tpu.memory_space<vmem>>, vector<1x8x8xf32>
    %36 = vector.shape_cast %35 : vector<1x8x8xf32> to vector<8x8xf32>
    %c0_34 = arith.constant 0 : index
    %c21 = arith.constant 21 : index
    %37 = vector.load %arg0[%c0_34, %c21] : memref<8x2014xf32, #tpu.memory_space<vmem>>, vector<8x1792xf32>
    %cst_35 = arith.constant dense<0.000000e+00> : vector<8x1792xf32>
    %38 = tpu.matmul %36, %37, %cst_35 {dimension_numbers = #tpu.dot_dimension_numbers<[1], [0], [0], [1], [0, 0, 1, 1], [], []>} : vector<8x8xf32>, vector<8x1792xf32>, vector<8x1792xf32> -> vector<8x1792xf32>
    %39 = arith.addf %34, %38 : vector<8x1792xf32>
    %c8 = arith.constant 8 : index
    %c0_36 = arith.constant 0 : index
    %c0_37 = arith.constant 0 : index
    %40 = vector.load %arg2[%c8, %c0_36, %c0_37] : memref<27x8x8xf32, #tpu.memory_space<vmem>>, vector<1x8x8xf32>
    %41 = vector.shape_cast %40 : vector<1x8x8xf32> to vector<8x8xf32>
    %c0_38 = arith.constant 0 : index
    %c22 = arith.constant 22 : index
    %42 = vector.load %arg0[%c0_38, %c22] : memref<8x2014xf32, #tpu.memory_space<vmem>>, vector<8x1792xf32>
    %cst_39 = arith.constant dense<0.000000e+00> : vector<8x1792xf32>
    %43 = tpu.matmul %41, %42, %cst_39 {dimension_numbers = #tpu.dot_dimension_numbers<[1], [0], [0], [1], [0, 0, 1, 1], [], []>} : vector<8x8xf32>, vector<8x1792xf32>, vector<8x1792xf32> -> vector<8x1792xf32>
    %44 = arith.addf %39, %43 : vector<8x1792xf32>
    %c9 = arith.constant 9 : index
    %c0_40 = arith.constant 0 : index
    %c0_41 = arith.constant 0 : index
    %45 = vector.load %arg2[%c9, %c0_40, %c0_41] : memref<27x8x8xf32, #tpu.memory_space<vmem>>, vector<1x8x8xf32>
    %46 = vector.shape_cast %45 : vector<1x8x8xf32> to vector<8x8xf32>
    %c0_42 = arith.constant 0 : index
    %c100 = arith.constant 100 : index
    %47 = vector.load %arg0[%c0_42, %c100] : memref<8x2014xf32, #tpu.memory_space<vmem>>, vector<8x1792xf32>
    %cst_43 = arith.constant dense<0.000000e+00> : vector<8x1792xf32>
    %48 = tpu.matmul %46, %47, %cst_43 {dimension_numbers = #tpu.dot_dimension_numbers<[1], [0], [0], [1], [0, 0, 1, 1], [], []>} : vector<8x8xf32>, vector<8x1792xf32>, vector<8x1792xf32> -> vector<8x1792xf32>
    %49 = arith.addf %44, %48 : vector<8x1792xf32>
    %c10_44 = arith.constant 10 : index
    %c0_45 = arith.constant 0 : index
    %c0_46 = arith.constant 0 : index
    %50 = vector.load %arg2[%c10_44, %c0_45, %c0_46] : memref<27x8x8xf32, #tpu.memory_space<vmem>>, vector<1x8x8xf32>
    %51 = vector.shape_cast %50 : vector<1x8x8xf32> to vector<8x8xf32>
    %c0_47 = arith.constant 0 : index
    %c101 = arith.constant 101 : index
    %52 = vector.load %arg0[%c0_47, %c101] : memref<8x2014xf32, #tpu.memory_space<vmem>>, vector<8x1792xf32>
    %cst_48 = arith.constant dense<0.000000e+00> : vector<8x1792xf32>
    %53 = tpu.matmul %51, %52, %cst_48 {dimension_numbers = #tpu.dot_dimension_numbers<[1], [0], [0], [1], [0, 0, 1, 1], [], []>} : vector<8x8xf32>, vector<8x1792xf32>, vector<8x1792xf32> -> vector<8x1792xf32>
    %54 = arith.addf %49, %53 : vector<8x1792xf32>
    %c11_49 = arith.constant 11 : index
    %c0_50 = arith.constant 0 : index
    %c0_51 = arith.constant 0 : index
    %55 = vector.load %arg2[%c11_49, %c0_50, %c0_51] : memref<27x8x8xf32, #tpu.memory_space<vmem>>, vector<1x8x8xf32>
    %56 = vector.shape_cast %55 : vector<1x8x8xf32> to vector<8x8xf32>
    %c0_52 = arith.constant 0 : index
    %c102 = arith.constant 102 : index
    %57 = vector.load %arg0[%c0_52, %c102] : memref<8x2014xf32, #tpu.memory_space<vmem>>, vector<8x1792xf32>
    %cst_53 = arith.constant dense<0.000000e+00> : vector<8x1792xf32>
    %58 = tpu.matmul %56, %57, %cst_53 {dimension_numbers = #tpu.dot_dimension_numbers<[1], [0], [0], [1], [0, 0, 1, 1], [], []>} : vector<8x8xf32>, vector<8x1792xf32>, vector<8x1792xf32> -> vector<8x1792xf32>
    %59 = arith.addf %54, %58 : vector<8x1792xf32>
    %c12_54 = arith.constant 12 : index
    %c0_55 = arith.constant 0 : index
    %c0_56 = arith.constant 0 : index
    %60 = vector.load %arg2[%c12_54, %c0_55, %c0_56] : memref<27x8x8xf32, #tpu.memory_space<vmem>>, vector<1x8x8xf32>
    %61 = vector.shape_cast %60 : vector<1x8x8xf32> to vector<8x8xf32>
    %c0_57 = arith.constant 0 : index
    %c110 = arith.constant 110 : index
    %62 = vector.load %arg0[%c0_57, %c110] : memref<8x2014xf32, #tpu.memory_space<vmem>>, vector<8x1792xf32>
    %cst_58 = arith.constant dense<0.000000e+00> : vector<8x1792xf32>
    %63 = tpu.matmul %61, %62, %cst_58 {dimension_numbers = #tpu.dot_dimension_numbers<[1], [0], [0], [1], [0, 0, 1, 1], [], []>} : vector<8x8xf32>, vector<8x1792xf32>, vector<8x1792xf32> -> vector<8x1792xf32>
    %64 = arith.addf %59, %63 : vector<8x1792xf32>
    %c13 = arith.constant 13 : index
    %c0_59 = arith.constant 0 : index
    %c0_60 = arith.constant 0 : index
    %65 = vector.load %arg2[%c13, %c0_59, %c0_60] : memref<27x8x8xf32, #tpu.memory_space<vmem>>, vector<1x8x8xf32>
    %66 = vector.shape_cast %65 : vector<1x8x8xf32> to vector<8x8xf32>
    %c0_61 = arith.constant 0 : index
    %c111 = arith.constant 111 : index
    %67 = vector.load %arg0[%c0_61, %c111] : memref<8x2014xf32, #tpu.memory_space<vmem>>, vector<8x1792xf32>
    %cst_62 = arith.constant dense<0.000000e+00> : vector<8x1792xf32>
    %68 = tpu.matmul %66, %67, %cst_62 {dimension_numbers = #tpu.dot_dimension_numbers<[1], [0], [0], [1], [0, 0, 1, 1], [], []>} : vector<8x8xf32>, vector<8x1792xf32>, vector<8x1792xf32> -> vector<8x1792xf32>
    %69 = arith.addf %64, %68 : vector<8x1792xf32>
    %c14 = arith.constant 14 : index
    %c0_63 = arith.constant 0 : index
    %c0_64 = arith.constant 0 : index
    %70 = vector.load %arg2[%c14, %c0_63, %c0_64] : memref<27x8x8xf32, #tpu.memory_space<vmem>>, vector<1x8x8xf32>
    %71 = vector.shape_cast %70 : vector<1x8x8xf32> to vector<8x8xf32>
    %c0_65 = arith.constant 0 : index
    %c112 = arith.constant 112 : index
    %72 = vector.load %arg0[%c0_65, %c112] : memref<8x2014xf32, #tpu.memory_space<vmem>>, vector<8x1792xf32>
    %cst_66 = arith.constant dense<0.000000e+00> : vector<8x1792xf32>
    %73 = tpu.matmul %71, %72, %cst_66 {dimension_numbers = #tpu.dot_dimension_numbers<[1], [0], [0], [1], [0, 0, 1, 1], [], []>} : vector<8x8xf32>, vector<8x1792xf32>, vector<8x1792xf32> -> vector<8x1792xf32>
    %74 = arith.addf %69, %73 : vector<8x1792xf32>
    %c15 = arith.constant 15 : index
    %c0_67 = arith.constant 0 : index
    %c0_68 = arith.constant 0 : index
    %75 = vector.load %arg2[%c15, %c0_67, %c0_68] : memref<27x8x8xf32, #tpu.memory_space<vmem>>, vector<1x8x8xf32>
    %76 = vector.shape_cast %75 : vector<1x8x8xf32> to vector<8x8xf32>
    %c0_69 = arith.constant 0 : index
    %c120 = arith.constant 120 : index
    %77 = vector.load %arg0[%c0_69, %c120] : memref<8x2014xf32, #tpu.memory_space<vmem>>, vector<8x1792xf32>
    %cst_70 = arith.constant dense<0.000000e+00> : vector<8x1792xf32>
    %78 = tpu.matmul %76, %77, %cst_70 {dimension_numbers = #tpu.dot_dimension_numbers<[1], [0], [0], [1], [0, 0, 1, 1], [], []>} : vector<8x8xf32>, vector<8x1792xf32>, vector<8x1792xf32> -> vector<8x1792xf32>
    %79 = arith.addf %74, %78 : vector<8x1792xf32>
    %c16 = arith.constant 16 : index
    %c0_71 = arith.constant 0 : index
    %c0_72 = arith.constant 0 : index
    %80 = vector.load %arg2[%c16, %c0_71, %c0_72] : memref<27x8x8xf32, #tpu.memory_space<vmem>>, vector<1x8x8xf32>
    %81 = vector.shape_cast %80 : vector<1x8x8xf32> to vector<8x8xf32>
    %c0_73 = arith.constant 0 : index
    %c121 = arith.constant 121 : index
    %82 = vector.load %arg0[%c0_73, %c121] : memref<8x2014xf32, #tpu.memory_space<vmem>>, vector<8x1792xf32>
    %cst_74 = arith.constant dense<0.000000e+00> : vector<8x1792xf32>
    %83 = tpu.matmul %81, %82, %cst_74 {dimension_numbers = #tpu.dot_dimension_numbers<[1], [0], [0], [1], [0, 0, 1, 1], [], []>} : vector<8x8xf32>, vector<8x1792xf32>, vector<8x1792xf32> -> vector<8x1792xf32>
    %84 = arith.addf %79, %83 : vector<8x1792xf32>
    %c17 = arith.constant 17 : index
    %c0_75 = arith.constant 0 : index
    %c0_76 = arith.constant 0 : index
    %85 = vector.load %arg2[%c17, %c0_75, %c0_76] : memref<27x8x8xf32, #tpu.memory_space<vmem>>, vector<1x8x8xf32>
    %86 = vector.shape_cast %85 : vector<1x8x8xf32> to vector<8x8xf32>
    %c0_77 = arith.constant 0 : index
    %c122 = arith.constant 122 : index
    %87 = vector.load %arg0[%c0_77, %c122] : memref<8x2014xf32, #tpu.memory_space<vmem>>, vector<8x1792xf32>
    %cst_78 = arith.constant dense<0.000000e+00> : vector<8x1792xf32>
    %88 = tpu.matmul %86, %87, %cst_78 {dimension_numbers = #tpu.dot_dimension_numbers<[1], [0], [0], [1], [0, 0, 1, 1], [], []>} : vector<8x8xf32>, vector<8x1792xf32>, vector<8x1792xf32> -> vector<8x1792xf32>
    %89 = arith.addf %84, %88 : vector<8x1792xf32>
    %c18 = arith.constant 18 : index
    %c0_79 = arith.constant 0 : index
    %c0_80 = arith.constant 0 : index
    %90 = vector.load %arg2[%c18, %c0_79, %c0_80] : memref<27x8x8xf32, #tpu.memory_space<vmem>>, vector<1x8x8xf32>
    %91 = vector.shape_cast %90 : vector<1x8x8xf32> to vector<8x8xf32>
    %c0_81 = arith.constant 0 : index
    %c200 = arith.constant 200 : index
    %92 = vector.load %arg0[%c0_81, %c200] : memref<8x2014xf32, #tpu.memory_space<vmem>>, vector<8x1792xf32>
    %cst_82 = arith.constant dense<0.000000e+00> : vector<8x1792xf32>
    %93 = tpu.matmul %91, %92, %cst_82 {dimension_numbers = #tpu.dot_dimension_numbers<[1], [0], [0], [1], [0, 0, 1, 1], [], []>} : vector<8x8xf32>, vector<8x1792xf32>, vector<8x1792xf32> -> vector<8x1792xf32>
    %94 = arith.addf %89, %93 : vector<8x1792xf32>
    %c19 = arith.constant 19 : index
    %c0_83 = arith.constant 0 : index
    %c0_84 = arith.constant 0 : index
    %95 = vector.load %arg2[%c19, %c0_83, %c0_84] : memref<27x8x8xf32, #tpu.memory_space<vmem>>, vector<1x8x8xf32>
    %96 = vector.shape_cast %95 : vector<1x8x8xf32> to vector<8x8xf32>
    %c0_85 = arith.constant 0 : index
    %c201 = arith.constant 201 : index
    %97 = vector.load %arg0[%c0_85, %c201] : memref<8x2014xf32, #tpu.memory_space<vmem>>, vector<8x1792xf32>
    %cst_86 = arith.constant dense<0.000000e+00> : vector<8x1792xf32>
    %98 = tpu.matmul %96, %97, %cst_86 {dimension_numbers = #tpu.dot_dimension_numbers<[1], [0], [0], [1], [0, 0, 1, 1], [], []>} : vector<8x8xf32>, vector<8x1792xf32>, vector<8x1792xf32> -> vector<8x1792xf32>
    %99 = arith.addf %94, %98 : vector<8x1792xf32>
    %c20_87 = arith.constant 20 : index
    %c0_88 = arith.constant 0 : index
    %c0_89 = arith.constant 0 : index
    %100 = vector.load %arg2[%c20_87, %c0_88, %c0_89] : memref<27x8x8xf32, #tpu.memory_space<vmem>>, vector<1x8x8xf32>
    %101 = vector.shape_cast %100 : vector<1x8x8xf32> to vector<8x8xf32>
    %c0_90 = arith.constant 0 : index
    %c202 = arith.constant 202 : index
    %102 = vector.load %arg0[%c0_90, %c202] : memref<8x2014xf32, #tpu.memory_space<vmem>>, vector<8x1792xf32>
    %cst_91 = arith.constant dense<0.000000e+00> : vector<8x1792xf32>
    %103 = tpu.matmul %101, %102, %cst_91 {dimension_numbers = #tpu.dot_dimension_numbers<[1], [0], [0], [1], [0, 0, 1, 1], [], []>} : vector<8x8xf32>, vector<8x1792xf32>, vector<8x1792xf32> -> vector<8x1792xf32>
    %104 = arith.addf %99, %103 : vector<8x1792xf32>
    %c21_92 = arith.constant 21 : index
    %c0_93 = arith.constant 0 : index
    %c0_94 = arith.constant 0 : index
    %105 = vector.load %arg2[%c21_92, %c0_93, %c0_94] : memref<27x8x8xf32, #tpu.memory_space<vmem>>, vector<1x8x8xf32>
    %106 = vector.shape_cast %105 : vector<1x8x8xf32> to vector<8x8xf32>
    %c0_95 = arith.constant 0 : index
    %c210 = arith.constant 210 : index
    %107 = vector.load %arg0[%c0_95, %c210] : memref<8x2014xf32, #tpu.memory_space<vmem>>, vector<8x1792xf32>
    %cst_96 = arith.constant dense<0.000000e+00> : vector<8x1792xf32>
    %108 = tpu.matmul %106, %107, %cst_96 {dimension_numbers = #tpu.dot_dimension_numbers<[1], [0], [0], [1], [0, 0, 1, 1], [], []>} : vector<8x8xf32>, vector<8x1792xf32>, vector<8x1792xf32> -> vector<8x1792xf32>
    %109 = arith.addf %104, %108 : vector<8x1792xf32>
    %c22_97 = arith.constant 22 : index
    %c0_98 = arith.constant 0 : index
    %c0_99 = arith.constant 0 : index
    %110 = vector.load %arg2[%c22_97, %c0_98, %c0_99] : memref<27x8x8xf32, #tpu.memory_space<vmem>>, vector<1x8x8xf32>
    %111 = vector.shape_cast %110 : vector<1x8x8xf32> to vector<8x8xf32>
    %c0_100 = arith.constant 0 : index
    %c211 = arith.constant 211 : index
    %112 = vector.load %arg0[%c0_100, %c211] : memref<8x2014xf32, #tpu.memory_space<vmem>>, vector<8x1792xf32>
    %cst_101 = arith.constant dense<0.000000e+00> : vector<8x1792xf32>
    %113 = tpu.matmul %111, %112, %cst_101 {dimension_numbers = #tpu.dot_dimension_numbers<[1], [0], [0], [1], [0, 0, 1, 1], [], []>} : vector<8x8xf32>, vector<8x1792xf32>, vector<8x1792xf32> -> vector<8x1792xf32>
    %114 = arith.addf %109, %113 : vector<8x1792xf32>
    %c23 = arith.constant 23 : index
    %c0_102 = arith.constant 0 : index
    %c0_103 = arith.constant 0 : index
    %115 = vector.load %arg2[%c23, %c0_102, %c0_103] : memref<27x8x8xf32, #tpu.memory_space<vmem>>, vector<1x8x8xf32>
    %116 = vector.shape_cast %115 : vector<1x8x8xf32> to vector<8x8xf32>
    %c0_104 = arith.constant 0 : index
    %c212 = arith.constant 212 : index
    %117 = vector.load %arg0[%c0_104, %c212] : memref<8x2014xf32, #tpu.memory_space<vmem>>, vector<8x1792xf32>
    %cst_105 = arith.constant dense<0.000000e+00> : vector<8x1792xf32>
    %118 = tpu.matmul %116, %117, %cst_105 {dimension_numbers = #tpu.dot_dimension_numbers<[1], [0], [0], [1], [0, 0, 1, 1], [], []>} : vector<8x8xf32>, vector<8x1792xf32>, vector<8x1792xf32> -> vector<8x1792xf32>
    %119 = arith.addf %114, %118 : vector<8x1792xf32>
    %c24 = arith.constant 24 : index
    %c0_106 = arith.constant 0 : index
    %c0_107 = arith.constant 0 : index
    %120 = vector.load %arg2[%c24, %c0_106, %c0_107] : memref<27x8x8xf32, #tpu.memory_space<vmem>>, vector<1x8x8xf32>
    %121 = vector.shape_cast %120 : vector<1x8x8xf32> to vector<8x8xf32>
    %c0_108 = arith.constant 0 : index
    %c220 = arith.constant 220 : index
    %122 = vector.load %arg0[%c0_108, %c220] : memref<8x2014xf32, #tpu.memory_space<vmem>>, vector<8x1792xf32>
    %cst_109 = arith.constant dense<0.000000e+00> : vector<8x1792xf32>
    %123 = tpu.matmul %121, %122, %cst_109 {dimension_numbers = #tpu.dot_dimension_numbers<[1], [0], [0], [1], [0, 0, 1, 1], [], []>} : vector<8x8xf32>, vector<8x1792xf32>, vector<8x1792xf32> -> vector<8x1792xf32>
    %124 = arith.addf %119, %123 : vector<8x1792xf32>
    %c25 = arith.constant 25 : index
    %c0_110 = arith.constant 0 : index
    %c0_111 = arith.constant 0 : index
    %125 = vector.load %arg2[%c25, %c0_110, %c0_111] : memref<27x8x8xf32, #tpu.memory_space<vmem>>, vector<1x8x8xf32>
    %126 = vector.shape_cast %125 : vector<1x8x8xf32> to vector<8x8xf32>
    %c0_112 = arith.constant 0 : index
    %c221 = arith.constant 221 : index
    %127 = vector.load %arg0[%c0_112, %c221] : memref<8x2014xf32, #tpu.memory_space<vmem>>, vector<8x1792xf32>
    %cst_113 = arith.constant dense<0.000000e+00> : vector<8x1792xf32>
    %128 = tpu.matmul %126, %127, %cst_113 {dimension_numbers = #tpu.dot_dimension_numbers<[1], [0], [0], [1], [0, 0, 1, 1], [], []>} : vector<8x8xf32>, vector<8x1792xf32>, vector<8x1792xf32> -> vector<8x1792xf32>
    %129 = arith.addf %124, %128 : vector<8x1792xf32>
    %c26 = arith.constant 26 : index
    %c0_114 = arith.constant 0 : index
    %c0_115 = arith.constant 0 : index
    %130 = vector.load %arg2[%c26, %c0_114, %c0_115] : memref<27x8x8xf32, #tpu.memory_space<vmem>>, vector<1x8x8xf32>
    %131 = vector.shape_cast %130 : vector<1x8x8xf32> to vector<8x8xf32>
    %c0_116 = arith.constant 0 : index
    %c222 = arith.constant 222 : index
    %132 = vector.load %arg0[%c0_116, %c222] : memref<8x2014xf32, #tpu.memory_space<vmem>>, vector<8x1792xf32>
    %cst_117 = arith.constant dense<0.000000e+00> : vector<8x1792xf32>
    %133 = tpu.matmul %131, %132, %cst_117 {dimension_numbers = #tpu.dot_dimension_numbers<[1], [0], [0], [1], [0, 0, 1, 1], [], []>} : vector<8x8xf32>, vector<8x1792xf32>, vector<8x1792xf32> -> vector<8x1792xf32>
    %134 = arith.addf %129, %133 : vector<8x1792xf32>
    %c0_118 = arith.constant 0 : index
    %c0_119 = arith.constant 0 : index
    %135 = vector.load %arg4[%c0_118, %c0_119] : memref<8x8xf32, #tpu.memory_space<vmem>>, vector<8x8xf32>
    %c0_120 = arith.constant 0 : index
    %c111_121 = arith.constant 111 : index
    %136 = vector.load %arg0[%c0_120, %c111_121] : memref<8x2014xf32, #tpu.memory_space<vmem>>, vector<8x1792xf32>
    %cst_122 = arith.constant dense<0.000000e+00> : vector<8x1792xf32>
    %137 = tpu.matmul %135, %136, %cst_122 {dimension_numbers = #tpu.dot_dimension_numbers<[1], [0], [0], [1], [0, 0, 1, 1], [], []>} : vector<8x8xf32>, vector<8x1792xf32>, vector<8x1792xf32> -> vector<8x1792xf32>
    %138 = vector.broadcast %0 : vector<1x1792xf32> to vector<8x1792xf32>
    %139 = arith.mulf %134, %138 : vector<8x1792xf32>
    %cst_123 = arith.constant dense<0.000000e+00> : vector<8xf32>
    %140 = vector.multi_reduction <add>, %139, %cst_123 [1] : vector<8x1792xf32> to vector<8xf32>
    %141 = vector.shape_cast %140 : vector<8xf32> to vector<8x1xf32>
    %cst_124 = arith.constant 9.765625E-4 : f32
    %142 = vector.broadcast %cst_124 : f32 to vector<8x1xf32>
    %143 = arith.mulf %141, %142 : vector<8x1xf32>
    %144 = arith.mulf %139, %134 : vector<8x1792xf32>
    %cst_125 = arith.constant dense<0.000000e+00> : vector<8xf32>
    %145 = vector.multi_reduction <add>, %144, %cst_125 [1] : vector<8x1792xf32> to vector<8xf32>
    %146 = vector.shape_cast %145 : vector<8xf32> to vector<8x1xf32>
    %cst_126 = arith.constant 9.765625E-4 : f32
    %147 = vector.broadcast %cst_126 : f32 to vector<8x1xf32>
    %148 = arith.mulf %146, %147 : vector<8x1xf32>
    %149 = arith.mulf %143, %143 : vector<8x1xf32>
    %150 = arith.subf %148, %149 : vector<8x1xf32>
    %c0_127 = arith.constant 0 : index
    %c0_128 = arith.constant 0 : index
    %c0_129 = arith.constant 0 : index
    %151 = vector.load %arg5[%c0_127, %c0_128, %c0_129] : memref<6x8x1xf32, #tpu.memory_space<vmem>>, vector<1x8x1xf32>
    %152 = vector.shape_cast %151 : vector<1x8x1xf32> to vector<8x1xf32>
    %cst_130 = arith.constant 9.99999974E-6 : f32
    %153 = vector.broadcast %cst_130 : f32 to vector<8x1xf32>
    %154 = arith.addf %150, %153 : vector<8x1xf32>
    %155 = math.rsqrt %154 : vector<8x1xf32>
    %156 = arith.mulf %152, %155 : vector<8x1xf32>
    %c1_131 = arith.constant 1 : index
    %c0_132 = arith.constant 0 : index
    %c0_133 = arith.constant 0 : index
    %157 = vector.load %arg5[%c1_131, %c0_132, %c0_133] : memref<6x8x1xf32, #tpu.memory_space<vmem>>, vector<1x8x1xf32>
    %158 = vector.shape_cast %157 : vector<1x8x1xf32> to vector<8x1xf32>
    %159 = arith.mulf %143, %156 : vector<8x1xf32>
    %160 = arith.subf %158, %159 : vector<8x1xf32>
    %161 = vector.broadcast %156 : vector<8x1xf32> to vector<8x1792xf32>
    %162 = arith.mulf %134, %161 : vector<8x1792xf32>
    %163 = vector.broadcast %160 : vector<8x1xf32> to vector<8x1792xf32>
    %164 = arith.addf %162, %163 : vector<8x1792xf32>
    %cst_134 = arith.constant 0.000000e+00 : f32
    %165 = vector.broadcast %cst_134 : f32 to vector<8x1792xf32>
    %166 = arith.maximumf %164, %165 : vector<8x1792xf32>
    %167 = vector.broadcast %0 : vector<1x1792xf32> to vector<8x1792xf32>
    %168 = arith.mulf %166, %167 : vector<8x1792xf32>
    %cst_135 = arith.constant 0.000000e+00 : f32
    %169 = vector.broadcast %cst_135 : f32 to vector<8x128xf32>
    %c0_136 = arith.constant 0 : index
    %c0_137 = arith.constant 0 : index
    %170 = vector.load %arg7[%c0_136, %c0_137] : memref<8x2048xf32, #tpu.memory_space<vmem>>, vector<8x128xf32>
    tpu.vector_store %arg7[%c0_136, %c0_137], %169 {strides = array<i32>} : memref<8x2048xf32, #tpu.memory_space<vmem>>, vector<8x128xf32>,
    %c0_138 = arith.constant 0 : index
    %c1920 = arith.constant 1920 : index
    %171 = vector.load %arg7[%c0_138, %c1920] : memref<8x2048xf32, #tpu.memory_space<vmem>>, vector<8x128xf32>
    tpu.vector_store %arg7[%c0_138, %c1920], %169 {strides = array<i32>} : memref<8x2048xf32, #tpu.memory_space<vmem>>, vector<8x128xf32>,
    %c0_139 = arith.constant 0 : index
    %c128 = arith.constant 128 : index
    %172 = vector.load %arg7[%c0_139, %c128] : memref<8x2048xf32, #tpu.memory_space<vmem>>, vector<8x1792xf32>
    tpu.vector_store %arg7[%c0_139, %c128], %168 {strides = array<i32>} : memref<8x2048xf32, #tpu.memory_space<vmem>>, vector<8x1792xf32>,
    %c0_140 = arith.constant 0 : index
    %c0_141 = arith.constant 0 : index
    %c0_142 = arith.constant 0 : index
    %173 = vector.load %arg3[%c0_140, %c0_141, %c0_142] : memref<27x8x8xf32, #tpu.memory_space<vmem>>, vector<1x8x8xf32>
    %174 = vector.shape_cast %173 : vector<1x8x8xf32> to vector<8x8xf32>
    %c0_143 = arith.constant 0 : index
    %c17_144 = arith.constant 17 : index
    %175 = vector.load %arg7[%c0_143, %c17_144] : memref<8x2048xf32, #tpu.memory_space<vmem>>, vector<8x1792xf32>
    %cst_145 = arith.constant dense<0.000000e+00> : vector<8x1792xf32>
    %176 = tpu.matmul %174, %175, %cst_145 {dimension_numbers = #tpu.dot_dimension_numbers<[1], [0], [0], [1], [0, 0, 1, 1], [], []>} : vector<8x8xf32>, vector<8x1792xf32>, vector<8x1792xf32> -> vector<8x1792xf32>
    %c1_146 = arith.constant 1 : index
    %c0_147 = arith.constant 0 : index
    %c0_148 = arith.constant 0 : index
    %177 = vector.load %arg3[%c1_146, %c0_147, %c0_148] : memref<27x8x8xf32, #tpu.memory_space<vmem>>, vector<1x8x8xf32>
    %178 = vector.shape_cast %177 : vector<1x8x8xf32> to vector<8x8xf32>
    %c0_149 = arith.constant 0 : index
    %c18_150 = arith.constant 18 : index
    %179 = vector.load %arg7[%c0_149, %c18_150] : memref<8x2048xf32, #tpu.memory_space<vmem>>, vector<8x1792xf32>
    %cst_151 = arith.constant dense<0.000000e+00> : vector<8x1792xf32>
    %180 = tpu.matmul %178, %179, %cst_151 {dimension_numbers = #tpu.dot_dimension_numbers<[1], [0], [0], [1], [0, 0, 1, 1], [], []>} : vector<8x8xf32>, vector<8x1792xf32>, vector<8x1792xf32> -> vector<8x1792xf32>
    %181 = arith.addf %176, %180 : vector<8x1792xf32>
    %c2_152 = arith.constant 2 : index
    %c0_153 = arith.constant 0 : index
    %c0_154 = arith.constant 0 : index
    %182 = vector.load %arg3[%c2_152, %c0_153, %c0_154] : memref<27x8x8xf32, #tpu.memory_space<vmem>>, vector<1x8x8xf32>
    %183 = vector.shape_cast %182 : vector<1x8x8xf32> to vector<8x8xf32>
    %c0_155 = arith.constant 0 : index
    %c19_156 = arith.constant 19 : index
    %184 = vector.load %arg7[%c0_155, %c19_156] : memref<8x2048xf32, #tpu.memory_space<vmem>>, vector<8x1792xf32>
    %cst_157 = arith.constant dense<0.000000e+00> : vector<8x1792xf32>
    %185 = tpu.matmul %183, %184, %cst_157 {dimension_numbers = #tpu.dot_dimension_numbers<[1], [0], [0], [1], [0, 0, 1, 1], [], []>} : vector<8x8xf32>, vector<8x1792xf32>, vector<8x1792xf32> -> vector<8x1792xf32>
    %186 = arith.addf %181, %185 : vector<8x1792xf32>
    %c3_158 = arith.constant 3 : index
    %c0_159 = arith.constant 0 : index
    %c0_160 = arith.constant 0 : index
    %187 = vector.load %arg3[%c3_158, %c0_159, %c0_160] : memref<27x8x8xf32, #tpu.memory_space<vmem>>, vector<1x8x8xf32>
    %188 = vector.shape_cast %187 : vector<1x8x8xf32> to vector<8x8xf32>
    %c0_161 = arith.constant 0 : index
    %c27 = arith.constant 27 : index
    %189 = vector.load %arg7[%c0_161, %c27] : memref<8x2048xf32, #tpu.memory_space<vmem>>, vector<8x1792xf32>
    %cst_162 = arith.constant dense<0.000000e+00> : vector<8x1792xf32>
    %190 = tpu.matmul %188, %189, %cst_162 {dimension_numbers = #tpu.dot_dimension_numbers<[1], [0], [0], [1], [0, 0, 1, 1], [], []>} : vector<8x8xf32>, vector<8x1792xf32>, vector<8x1792xf32> -> vector<8x1792xf32>
    %191 = arith.addf %186, %190 : vector<8x1792xf32>
    %c4_163 = arith.constant 4 : index
    %c0_164 = arith.constant 0 : index
    %c0_165 = arith.constant 0 : index
    %192 = vector.load %arg3[%c4_163, %c0_164, %c0_165] : memref<27x8x8xf32, #tpu.memory_space<vmem>>, vector<1x8x8xf32>
    %193 = vector.shape_cast %192 : vector<1x8x8xf32> to vector<8x8xf32>
    %c0_166 = arith.constant 0 : index
    %c28 = arith.constant 28 : index
    %194 = vector.load %arg7[%c0_166, %c28] : memref<8x2048xf32, #tpu.memory_space<vmem>>, vector<8x1792xf32>
    %cst_167 = arith.constant dense<0.000000e+00> : vector<8x1792xf32>
    %195 = tpu.matmul %193, %194, %cst_167 {dimension_numbers = #tpu.dot_dimension_numbers<[1], [0], [0], [1], [0, 0, 1, 1], [], []>} : vector<8x8xf32>, vector<8x1792xf32>, vector<8x1792xf32> -> vector<8x1792xf32>
    %196 = arith.addf %191, %195 : vector<8x1792xf32>
    %c5_168 = arith.constant 5 : index
    %c0_169 = arith.constant 0 : index
    %c0_170 = arith.constant 0 : index
    %197 = vector.load %arg3[%c5_168, %c0_169, %c0_170] : memref<27x8x8xf32, #tpu.memory_space<vmem>>, vector<1x8x8xf32>
    %198 = vector.shape_cast %197 : vector<1x8x8xf32> to vector<8x8xf32>
    %c0_171 = arith.constant 0 : index
    %c29 = arith.constant 29 : index
    %199 = vector.load %arg7[%c0_171, %c29] : memref<8x2048xf32, #tpu.memory_space<vmem>>, vector<8x1792xf32>
    %cst_172 = arith.constant dense<0.000000e+00> : vector<8x1792xf32>
    %200 = tpu.matmul %198, %199, %cst_172 {dimension_numbers = #tpu.dot_dimension_numbers<[1], [0], [0], [1], [0, 0, 1, 1], [], []>} : vector<8x8xf32>, vector<8x1792xf32>, vector<8x1792xf32> -> vector<8x1792xf32>
    %201 = arith.addf %196, %200 : vector<8x1792xf32>
    %c6_173 = arith.constant 6 : index
    %c0_174 = arith.constant 0 : index
    %c0_175 = arith.constant 0 : index
    %202 = vector.load %arg3[%c6_173, %c0_174, %c0_175] : memref<27x8x8xf32, #tpu.memory_space<vmem>>, vector<1x8x8xf32>
    %203 = vector.shape_cast %202 : vector<1x8x8xf32> to vector<8x8xf32>
    %c0_176 = arith.constant 0 : index
    %c37 = arith.constant 37 : index
    %204 = vector.load %arg7[%c0_176, %c37] : memref<8x2048xf32, #tpu.memory_space<vmem>>, vector<8x1792xf32>
    %cst_177 = arith.constant dense<0.000000e+00> : vector<8x1792xf32>
    %205 = tpu.matmul %203, %204, %cst_177 {dimension_numbers = #tpu.dot_dimension_numbers<[1], [0], [0], [1], [0, 0, 1, 1], [], []>} : vector<8x8xf32>, vector<8x1792xf32>, vector<8x1792xf32> -> vector<8x1792xf32>
    %206 = arith.addf %201, %205 : vector<8x1792xf32>
    %c7_178 = arith.constant 7 : index
    %c0_179 = arith.constant 0 : index
    %c0_180 = arith.constant 0 : index
    %207 = vector.load %arg3[%c7_178, %c0_179, %c0_180] : memref<27x8x8xf32, #tpu.memory_space<vmem>>, vector<1x8x8xf32>
    %208 = vector.shape_cast %207 : vector<1x8x8xf32> to vector<8x8xf32>
    %c0_181 = arith.constant 0 : index
    %c38 = arith.constant 38 : index
    %209 = vector.load %arg7[%c0_181, %c38] : memref<8x2048xf32, #tpu.memory_space<vmem>>, vector<8x1792xf32>
    %cst_182 = arith.constant dense<0.000000e+00> : vector<8x1792xf32>
    %210 = tpu.matmul %208, %209, %cst_182 {dimension_numbers = #tpu.dot_dimension_numbers<[1], [0], [0], [1], [0, 0, 1, 1], [], []>} : vector<8x8xf32>, vector<8x1792xf32>, vector<8x1792xf32> -> vector<8x1792xf32>
    %211 = arith.addf %206, %210 : vector<8x1792xf32>
    %c8_183 = arith.constant 8 : index
    %c0_184 = arith.constant 0 : index
    %c0_185 = arith.constant 0 : index
    %212 = vector.load %arg3[%c8_183, %c0_184, %c0_185] : memref<27x8x8xf32, #tpu.memory_space<vmem>>, vector<1x8x8xf32>
    %213 = vector.shape_cast %212 : vector<1x8x8xf32> to vector<8x8xf32>
    %c0_186 = arith.constant 0 : index
    %c39 = arith.constant 39 : index
    %214 = vector.load %arg7[%c0_186, %c39] : memref<8x2048xf32, #tpu.memory_space<vmem>>, vector<8x1792xf32>
    %cst_187 = arith.constant dense<0.000000e+00> : vector<8x1792xf32>
    %215 = tpu.matmul %213, %214, %cst_187 {dimension_numbers = #tpu.dot_dimension_numbers<[1], [0], [0], [1], [0, 0, 1, 1], [], []>} : vector<8x8xf32>, vector<8x1792xf32>, vector<8x1792xf32> -> vector<8x1792xf32>
    %216 = arith.addf %211, %215 : vector<8x1792xf32>
    %c9_188 = arith.constant 9 : index
    %c0_189 = arith.constant 0 : index
    %c0_190 = arith.constant 0 : index
    %217 = vector.load %arg3[%c9_188, %c0_189, %c0_190] : memref<27x8x8xf32, #tpu.memory_space<vmem>>, vector<1x8x8xf32>
    %218 = vector.shape_cast %217 : vector<1x8x8xf32> to vector<8x8xf32>
    %c0_191 = arith.constant 0 : index
    %c117 = arith.constant 117 : index
    %219 = vector.load %arg7[%c0_191, %c117] : memref<8x2048xf32, #tpu.memory_space<vmem>>, vector<8x1792xf32>
    %cst_192 = arith.constant dense<0.000000e+00> : vector<8x1792xf32>
    %220 = tpu.matmul %218, %219, %cst_192 {dimension_numbers = #tpu.dot_dimension_numbers<[1], [0], [0], [1], [0, 0, 1, 1], [], []>} : vector<8x8xf32>, vector<8x1792xf32>, vector<8x1792xf32> -> vector<8x1792xf32>
    %221 = arith.addf %216, %220 : vector<8x1792xf32>
    %c10_193 = arith.constant 10 : index
    %c0_194 = arith.constant 0 : index
    %c0_195 = arith.constant 0 : index
    %222 = vector.load %arg3[%c10_193, %c0_194, %c0_195] : memref<27x8x8xf32, #tpu.memory_space<vmem>>, vector<1x8x8xf32>
    %223 = vector.shape_cast %222 : vector<1x8x8xf32> to vector<8x8xf32>
    %c0_196 = arith.constant 0 : index
    %c118 = arith.constant 118 : index
    %224 = vector.load %arg7[%c0_196, %c118] : memref<8x2048xf32, #tpu.memory_space<vmem>>, vector<8x1792xf32>
    %cst_197 = arith.constant dense<0.000000e+00> : vector<8x1792xf32>
    %225 = tpu.matmul %223, %224, %cst_197 {dimension_numbers = #tpu.dot_dimension_numbers<[1], [0], [0], [1], [0, 0, 1, 1], [], []>} : vector<8x8xf32>, vector<8x1792xf32>, vector<8x1792xf32> -> vector<8x1792xf32>
    %226 = arith.addf %221, %225 : vector<8x1792xf32>
    %c11_198 = arith.constant 11 : index
    %c0_199 = arith.constant 0 : index
    %c0_200 = arith.constant 0 : index
    %227 = vector.load %arg3[%c11_198, %c0_199, %c0_200] : memref<27x8x8xf32, #tpu.memory_space<vmem>>, vector<1x8x8xf32>
    %228 = vector.shape_cast %227 : vector<1x8x8xf32> to vector<8x8xf32>
    %c0_201 = arith.constant 0 : index
    %c119 = arith.constant 119 : index
    %229 = vector.load %arg7[%c0_201, %c119] : memref<8x2048xf32, #tpu.memory_space<vmem>>, vector<8x1792xf32>
    %cst_202 = arith.constant dense<0.000000e+00> : vector<8x1792xf32>
    %230 = tpu.matmul %228, %229, %cst_202 {dimension_numbers = #tpu.dot_dimension_numbers<[1], [0], [0], [1], [0, 0, 1, 1], [], []>} : vector<8x8xf32>, vector<8x1792xf32>, vector<8x1792xf32> -> vector<8x1792xf32>
    %231 = arith.addf %226, %230 : vector<8x1792xf32>
    %c12_203 = arith.constant 12 : index
    %c0_204 = arith.constant 0 : index
    %c0_205 = arith.constant 0 : index
    %232 = vector.load %arg3[%c12_203, %c0_204, %c0_205] : memref<27x8x8xf32, #tpu.memory_space<vmem>>, vector<1x8x8xf32>
    %233 = vector.shape_cast %232 : vector<1x8x8xf32> to vector<8x8xf32>
    %c0_206 = arith.constant 0 : index
    %c127 = arith.constant 127 : index
    %234 = vector.load %arg7[%c0_206, %c127] : memref<8x2048xf32, #tpu.memory_space<vmem>>, vector<8x1792xf32>
    %cst_207 = arith.constant dense<0.000000e+00> : vector<8x1792xf32>
    %235 = tpu.matmul %233, %234, %cst_207 {dimension_numbers = #tpu.dot_dimension_numbers<[1], [0], [0], [1], [0, 0, 1, 1], [], []>} : vector<8x8xf32>, vector<8x1792xf32>, vector<8x1792xf32> -> vector<8x1792xf32>
    %236 = arith.addf %231, %235 : vector<8x1792xf32>
    %c13_208 = arith.constant 13 : index
    %c0_209 = arith.constant 0 : index
    %c0_210 = arith.constant 0 : index
    %237 = vector.load %arg3[%c13_208, %c0_209, %c0_210] : memref<27x8x8xf32, #tpu.memory_space<vmem>>, vector<1x8x8xf32>
    %238 = vector.shape_cast %237 : vector<1x8x8xf32> to vector<8x8xf32>
    %c0_211 = arith.constant 0 : index
    %c128_212 = arith.constant 128 : index
    %239 = vector.load %arg7[%c0_211, %c128_212] : memref<8x2048xf32, #tpu.memory_space<vmem>>, vector<8x1792xf32>
    %cst_213 = arith.constant dense<0.000000e+00> : vector<8x1792xf32>
    %240 = tpu.matmul %238, %239, %cst_213 {dimension_numbers = #tpu.dot_dimension_numbers<[1], [0], [0], [1], [0, 0, 1, 1], [], []>} : vector<8x8xf32>, vector<8x1792xf32>, vector<8x1792xf32> -> vector<8x1792xf32>
    %241 = arith.addf %236, %240 : vector<8x1792xf32>
    %c14_214 = arith.constant 14 : index
    %c0_215 = arith.constant 0 : index
    %c0_216 = arith.constant 0 : index
    %242 = vector.load %arg3[%c14_214, %c0_215, %c0_216] : memref<27x8x8xf32, #tpu.memory_space<vmem>>, vector<1x8x8xf32>
    %243 = vector.shape_cast %242 : vector<1x8x8xf32> to vector<8x8xf32>
    %c0_217 = arith.constant 0 : index
    %c129 = arith.constant 129 : index
    %244 = vector.load %arg7[%c0_217, %c129] : memref<8x2048xf32, #tpu.memory_space<vmem>>, vector<8x1792xf32>
    %cst_218 = arith.constant dense<0.000000e+00> : vector<8x1792xf32>
    %245 = tpu.matmul %243, %244, %cst_218 {dimension_numbers = #tpu.dot_dimension_numbers<[1], [0], [0], [1], [0, 0, 1, 1], [], []>} : vector<8x8xf32>, vector<8x1792xf32>, vector<8x1792xf32> -> vector<8x1792xf32>
    %246 = arith.addf %241, %245 : vector<8x1792xf32>
    %c15_219 = arith.constant 15 : index
    %c0_220 = arith.constant 0 : index
    %c0_221 = arith.constant 0 : index
    %247 = vector.load %arg3[%c15_219, %c0_220, %c0_221] : memref<27x8x8xf32, #tpu.memory_space<vmem>>, vector<1x8x8xf32>
    %248 = vector.shape_cast %247 : vector<1x8x8xf32> to vector<8x8xf32>
    %c0_222 = arith.constant 0 : index
    %c137 = arith.constant 137 : index
    %249 = vector.load %arg7[%c0_222, %c137] : memref<8x2048xf32, #tpu.memory_space<vmem>>, vector<8x1792xf32>
    %cst_223 = arith.constant dense<0.000000e+00> : vector<8x1792xf32>
    %250 = tpu.matmul %248, %249, %cst_223 {dimension_numbers = #tpu.dot_dimension_numbers<[1], [0], [0], [1], [0, 0, 1, 1], [], []>} : vector<8x8xf32>, vector<8x1792xf32>, vector<8x1792xf32> -> vector<8x1792xf32>
    %251 = arith.addf %246, %250 : vector<8x1792xf32>
    %c16_224 = arith.constant 16 : index
    %c0_225 = arith.constant 0 : index
    %c0_226 = arith.constant 0 : index
    %252 = vector.load %arg3[%c16_224, %c0_225, %c0_226] : memref<27x8x8xf32, #tpu.memory_space<vmem>>, vector<1x8x8xf32>
    %253 = vector.shape_cast %252 : vector<1x8x8xf32> to vector<8x8xf32>
    %c0_227 = arith.constant 0 : index
    %c138 = arith.constant 138 : index
    %254 = vector.load %arg7[%c0_227, %c138] : memref<8x2048xf32, #tpu.memory_space<vmem>>, vector<8x1792xf32>
    %cst_228 = arith.constant dense<0.000000e+00> : vector<8x1792xf32>
    %255 = tpu.matmul %253, %254, %cst_228 {dimension_numbers = #tpu.dot_dimension_numbers<[1], [0], [0], [1], [0, 0, 1, 1], [], []>} : vector<8x8xf32>, vector<8x1792xf32>, vector<8x1792xf32> -> vector<8x1792xf32>
    %256 = arith.addf %251, %255 : vector<8x1792xf32>
    %c17_229 = arith.constant 17 : index
    %c0_230 = arith.constant 0 : index
    %c0_231 = arith.constant 0 : index
    %257 = vector.load %arg3[%c17_229, %c0_230, %c0_231] : memref<27x8x8xf32, #tpu.memory_space<vmem>>, vector<1x8x8xf32>
    %258 = vector.shape_cast %257 : vector<1x8x8xf32> to vector<8x8xf32>
    %c0_232 = arith.constant 0 : index
    %c139 = arith.constant 139 : index
    %259 = vector.load %arg7[%c0_232, %c139] : memref<8x2048xf32, #tpu.memory_space<vmem>>, vector<8x1792xf32>
    %cst_233 = arith.constant dense<0.000000e+00> : vector<8x1792xf32>
    %260 = tpu.matmul %258, %259, %cst_233 {dimension_numbers = #tpu.dot_dimension_numbers<[1], [0], [0], [1], [0, 0, 1, 1], [], []>} : vector<8x8xf32>, vector<8x1792xf32>, vector<8x1792xf32> -> vector<8x1792xf32>
    %261 = arith.addf %256, %260 : vector<8x1792xf32>
    %c18_234 = arith.constant 18 : index
    %c0_235 = arith.constant 0 : index
    %c0_236 = arith.constant 0 : index
    %262 = vector.load %arg3[%c18_234, %c0_235, %c0_236] : memref<27x8x8xf32, #tpu.memory_space<vmem>>, vector<1x8x8xf32>
    %263 = vector.shape_cast %262 : vector<1x8x8xf32> to vector<8x8xf32>
    %c0_237 = arith.constant 0 : index
    %c217 = arith.constant 217 : index
    %264 = vector.load %arg7[%c0_237, %c217] : memref<8x2048xf32, #tpu.memory_space<vmem>>, vector<8x1792xf32>
    %cst_238 = arith.constant dense<0.000000e+00> : vector<8x1792xf32>
    %265 = tpu.matmul %263, %264, %cst_238 {dimension_numbers = #tpu.dot_dimension_numbers<[1], [0], [0], [1], [0, 0, 1, 1], [], []>} : vector<8x8xf32>, vector<8x1792xf32>, vector<8x1792xf32> -> vector<8x1792xf32>
    %266 = arith.addf %261, %265 : vector<8x1792xf32>
    %c19_239 = arith.constant 19 : index
    %c0_240 = arith.constant 0 : index
    %c0_241 = arith.constant 0 : index
    %267 = vector.load %arg3[%c19_239, %c0_240, %c0_241] : memref<27x8x8xf32, #tpu.memory_space<vmem>>, vector<1x8x8xf32>
    %268 = vector.shape_cast %267 : vector<1x8x8xf32> to vector<8x8xf32>
    %c0_242 = arith.constant 0 : index
    %c218 = arith.constant 218 : index
    %269 = vector.load %arg7[%c0_242, %c218] : memref<8x2048xf32, #tpu.memory_space<vmem>>, vector<8x1792xf32>
    %cst_243 = arith.constant dense<0.000000e+00> : vector<8x1792xf32>
    %270 = tpu.matmul %268, %269, %cst_243 {dimension_numbers = #tpu.dot_dimension_numbers<[1], [0], [0], [1], [0, 0, 1, 1], [], []>} : vector<8x8xf32>, vector<8x1792xf32>, vector<8x1792xf32> -> vector<8x1792xf32>
    %271 = arith.addf %266, %270 : vector<8x1792xf32>
    %c20_244 = arith.constant 20 : index
    %c0_245 = arith.constant 0 : index
    %c0_246 = arith.constant 0 : index
    %272 = vector.load %arg3[%c20_244, %c0_245, %c0_246] : memref<27x8x8xf32, #tpu.memory_space<vmem>>, vector<1x8x8xf32>
    %273 = vector.shape_cast %272 : vector<1x8x8xf32> to vector<8x8xf32>
    %c0_247 = arith.constant 0 : index
    %c219 = arith.constant 219 : index
    %274 = vector.load %arg7[%c0_247, %c219] : memref<8x2048xf32, #tpu.memory_space<vmem>>, vector<8x1792xf32>
    %cst_248 = arith.constant dense<0.000000e+00> : vector<8x1792xf32>
    %275 = tpu.matmul %273, %274, %cst_248 {dimension_numbers = #tpu.dot_dimension_numbers<[1], [0], [0], [1], [0, 0, 1, 1], [], []>} : vector<8x8xf32>, vector<8x1792xf32>, vector<8x1792xf32> -> vector<8x1792xf32>
    %276 = arith.addf %271, %275 : vector<8x1792xf32>
    %c21_249 = arith.constant 21 : index
    %c0_250 = arith.constant 0 : index
    %c0_251 = arith.constant 0 : index
    %277 = vector.load %arg3[%c21_249, %c0_250, %c0_251] : memref<27x8x8xf32, #tpu.memory_space<vmem>>, vector<1x8x8xf32>
    %278 = vector.shape_cast %277 : vector<1x8x8xf32> to vector<8x8xf32>
    %c0_252 = arith.constant 0 : index
    %c227 = arith.constant 227 : index
    %279 = vector.load %arg7[%c0_252, %c227] : memref<8x2048xf32, #tpu.memory_space<vmem>>, vector<8x1792xf32>
    %cst_253 = arith.constant dense<0.000000e+00> : vector<8x1792xf32>
    %280 = tpu.matmul %278, %279, %cst_253 {dimension_numbers = #tpu.dot_dimension_numbers<[1], [0], [0], [1], [0, 0, 1, 1], [], []>} : vector<8x8xf32>, vector<8x1792xf32>, vector<8x1792xf32> -> vector<8x1792xf32>
    %281 = arith.addf %276, %280 : vector<8x1792xf32>
    %c22_254 = arith.constant 22 : index
    %c0_255 = arith.constant 0 : index
    %c0_256 = arith.constant 0 : index
    %282 = vector.load %arg3[%c22_254, %c0_255, %c0_256] : memref<27x8x8xf32, #tpu.memory_space<vmem>>, vector<1x8x8xf32>
    %283 = vector.shape_cast %282 : vector<1x8x8xf32> to vector<8x8xf32>
    %c0_257 = arith.constant 0 : index
    %c228 = arith.constant 228 : index
    %284 = vector.load %arg7[%c0_257, %c228] : memref<8x2048xf32, #tpu.memory_space<vmem>>, vector<8x1792xf32>
    %cst_258 = arith.constant dense<0.000000e+00> : vector<8x1792xf32>
    %285 = tpu.matmul %283, %284, %cst_258 {dimension_numbers = #tpu.dot_dimension_numbers<[1], [0], [0], [1], [0, 0, 1, 1], [], []>} : vector<8x8xf32>, vector<8x1792xf32>, vector<8x1792xf32> -> vector<8x1792xf32>
    %286 = arith.addf %281, %285 : vector<8x1792xf32>
    %c23_259 = arith.constant 23 : index
    %c0_260 = arith.constant 0 : index
    %c0_261 = arith.constant 0 : index
    %287 = vector.load %arg3[%c23_259, %c0_260, %c0_261] : memref<27x8x8xf32, #tpu.memory_space<vmem>>, vector<1x8x8xf32>
    %288 = vector.shape_cast %287 : vector<1x8x8xf32> to vector<8x8xf32>
    %c0_262 = arith.constant 0 : index
    %c229 = arith.constant 229 : index
    %289 = vector.load %arg7[%c0_262, %c229] : memref<8x2048xf32, #tpu.memory_space<vmem>>, vector<8x1792xf32>
    %cst_263 = arith.constant dense<0.000000e+00> : vector<8x1792xf32>
    %290 = tpu.matmul %288, %289, %cst_263 {dimension_numbers = #tpu.dot_dimension_numbers<[1], [0], [0], [1], [0, 0, 1, 1], [], []>} : vector<8x8xf32>, vector<8x1792xf32>, vector<8x1792xf32> -> vector<8x1792xf32>
    %291 = arith.addf %286, %290 : vector<8x1792xf32>
    %c24_264 = arith.constant 24 : index
    %c0_265 = arith.constant 0 : index
    %c0_266 = arith.constant 0 : index
    %292 = vector.load %arg3[%c24_264, %c0_265, %c0_266] : memref<27x8x8xf32, #tpu.memory_space<vmem>>, vector<1x8x8xf32>
    %293 = vector.shape_cast %292 : vector<1x8x8xf32> to vector<8x8xf32>
    %c0_267 = arith.constant 0 : index
    %c237 = arith.constant 237 : index
    %294 = vector.load %arg7[%c0_267, %c237] : memref<8x2048xf32, #tpu.memory_space<vmem>>, vector<8x1792xf32>
    %cst_268 = arith.constant dense<0.000000e+00> : vector<8x1792xf32>
    %295 = tpu.matmul %293, %294, %cst_268 {dimension_numbers = #tpu.dot_dimension_numbers<[1], [0], [0], [1], [0, 0, 1, 1], [], []>} : vector<8x8xf32>, vector<8x1792xf32>, vector<8x1792xf32> -> vector<8x1792xf32>
    %296 = arith.addf %291, %295 : vector<8x1792xf32>
    %c25_269 = arith.constant 25 : index
    %c0_270 = arith.constant 0 : index
    %c0_271 = arith.constant 0 : index
    %297 = vector.load %arg3[%c25_269, %c0_270, %c0_271] : memref<27x8x8xf32, #tpu.memory_space<vmem>>, vector<1x8x8xf32>
    %298 = vector.shape_cast %297 : vector<1x8x8xf32> to vector<8x8xf32>
    %c0_272 = arith.constant 0 : index
    %c238 = arith.constant 238 : index
    %299 = vector.load %arg7[%c0_272, %c238] : memref<8x2048xf32, #tpu.memory_space<vmem>>, vector<8x1792xf32>
    %cst_273 = arith.constant dense<0.000000e+00> : vector<8x1792xf32>
    %300 = tpu.matmul %298, %299, %cst_273 {dimension_numbers = #tpu.dot_dimension_numbers<[1], [0], [0], [1], [0, 0, 1, 1], [], []>} : vector<8x8xf32>, vector<8x1792xf32>, vector<8x1792xf32> -> vector<8x1792xf32>
    %301 = arith.addf %296, %300 : vector<8x1792xf32>
    %c26_274 = arith.constant 26 : index
    %c0_275 = arith.constant 0 : index
    %c0_276 = arith.constant 0 : index
    %302 = vector.load %arg3[%c26_274, %c0_275, %c0_276] : memref<27x8x8xf32, #tpu.memory_space<vmem>>, vector<1x8x8xf32>
    %303 = vector.shape_cast %302 : vector<1x8x8xf32> to vector<8x8xf32>
    %c0_277 = arith.constant 0 : index
    %c239 = arith.constant 239 : index
    %304 = vector.load %arg7[%c0_277, %c239] : memref<8x2048xf32, #tpu.memory_space<vmem>>, vector<8x1792xf32>
    %cst_278 = arith.constant dense<0.000000e+00> : vector<8x1792xf32>
    %305 = tpu.matmul %303, %304, %cst_278 {dimension_numbers = #tpu.dot_dimension_numbers<[1], [0], [0], [1], [0, 0, 1, 1], [], []>} : vector<8x8xf32>, vector<8x1792xf32>, vector<8x1792xf32> -> vector<8x1792xf32>
    %306 = arith.addf %301, %305 : vector<8x1792xf32>
    %307 = vector.broadcast %0 : vector<1x1792xf32> to vector<8x1792xf32>
    %308 = arith.mulf %306, %307 : vector<8x1792xf32>
    %cst_279 = arith.constant dense<0.000000e+00> : vector<8xf32>
    %309 = vector.multi_reduction <add>, %308, %cst_279 [1] : vector<8x1792xf32> to vector<8xf32>
    %310 = vector.shape_cast %309 : vector<8xf32> to vector<8x1xf32>
    %cst_280 = arith.constant 9.765625E-4 : f32
    %311 = vector.broadcast %cst_280 : f32 to vector<8x1xf32>
    %312 = arith.mulf %310, %311 : vector<8x1xf32>
    %313 = arith.mulf %308, %306 : vector<8x1792xf32>
    %cst_281 = arith.constant dense<0.000000e+00> : vector<8xf32>
    %314 = vector.multi_reduction <add>, %313, %cst_281 [1] : vector<8x1792xf32> to vector<8xf32>
    %315 = vector.shape_cast %314 : vector<8xf32> to vector<8x1xf32>
    %cst_282 = arith.constant 9.765625E-4 : f32
    %316 = vector.broadcast %cst_282 : f32 to vector<8x1xf32>
    %317 = arith.mulf %315, %316 : vector<8x1xf32>
    %318 = arith.mulf %312, %312 : vector<8x1xf32>
    %319 = arith.subf %317, %318 : vector<8x1xf32>
    %c2_283 = arith.constant 2 : index
    %c0_284 = arith.constant 0 : index
    %c0_285 = arith.constant 0 : index
    %320 = vector.load %arg5[%c2_283, %c0_284, %c0_285] : memref<6x8x1xf32, #tpu.memory_space<vmem>>, vector<1x8x1xf32>
    %321 = vector.shape_cast %320 : vector<1x8x1xf32> to vector<8x1xf32>
    %cst_286 = arith.constant 9.99999974E-6 : f32
    %322 = vector.broadcast %cst_286 : f32 to vector<8x1xf32>
    %323 = arith.addf %319, %322 : vector<8x1xf32>
    %324 = math.rsqrt %323 : vector<8x1xf32>
    %325 = arith.mulf %321, %324 : vector<8x1xf32>
    %c3_287 = arith.constant 3 : index
    %c0_288 = arith.constant 0 : index
    %c0_289 = arith.constant 0 : index
    %326 = vector.load %arg5[%c3_287, %c0_288, %c0_289] : memref<6x8x1xf32, #tpu.memory_space<vmem>>, vector<1x8x1xf32>
    %327 = vector.shape_cast %326 : vector<1x8x1xf32> to vector<8x1xf32>
    %328 = arith.mulf %312, %325 : vector<8x1xf32>
    %329 = arith.subf %327, %328 : vector<8x1xf32>
    %330 = vector.broadcast %0 : vector<1x1792xf32> to vector<8x1792xf32>
    %331 = arith.mulf %137, %330 : vector<8x1792xf32>
    %cst_290 = arith.constant dense<0.000000e+00> : vector<8xf32>
    %332 = vector.multi_reduction <add>, %331, %cst_290 [1] : vector<8x1792xf32> to vector<8xf32>
    %333 = vector.shape_cast %332 : vector<8xf32> to vector<8x1xf32>
    %cst_291 = arith.constant 9.765625E-4 : f32
    %334 = vector.broadcast %cst_291 : f32 to vector<8x1xf32>
    %335 = arith.mulf %333, %334 : vector<8x1xf32>
    %336 = arith.mulf %331, %137 : vector<8x1792xf32>
    %cst_292 = arith.constant dense<0.000000e+00> : vector<8xf32>
    %337 = vector.multi_reduction <add>, %336, %cst_292 [1] : vector<8x1792xf32> to vector<8xf32>
    %338 = vector.shape_cast %337 : vector<8xf32> to vector<8x1xf32>
    %cst_293 = arith.constant 9.765625E-4 : f32
    %339 = vector.broadcast %cst_293 : f32 to vector<8x1xf32>
    %340 = arith.mulf %338, %339 : vector<8x1xf32>
    %341 = arith.mulf %335, %335 : vector<8x1xf32>
    %342 = arith.subf %340, %341 : vector<8x1xf32>
    %c4_294 = arith.constant 4 : index
    %c0_295 = arith.constant 0 : index
    %c0_296 = arith.constant 0 : index
    %343 = vector.load %arg5[%c4_294, %c0_295, %c0_296] : memref<6x8x1xf32, #tpu.memory_space<vmem>>, vector<1x8x1xf32>
    %344 = vector.shape_cast %343 : vector<1x8x1xf32> to vector<8x1xf32>
    %cst_297 = arith.constant 9.99999974E-6 : f32
    %345 = vector.broadcast %cst_297 : f32 to vector<8x1xf32>
    %346 = arith.addf %342, %345 : vector<8x1xf32>
    %347 = math.rsqrt %346 : vector<8x1xf32>
    %348 = arith.mulf %344, %347 : vector<8x1xf32>
    %c5_298 = arith.constant 5 : index
    %c0_299 = arith.constant 0 : index
    %c0_300 = arith.constant 0 : index
    %349 = vector.load %arg5[%c5_298, %c0_299, %c0_300] : memref<6x8x1xf32, #tpu.memory_space<vmem>>, vector<1x8x1xf32>
    %350 = vector.shape_cast %349 : vector<1x8x1xf32> to vector<8x1xf32>
    %351 = arith.mulf %335, %348 : vector<8x1xf32>
    %352 = arith.subf %350, %351 : vector<8x1xf32>
    %353 = vector.broadcast %325 : vector<8x1xf32> to vector<8x1792xf32>
    %354 = arith.mulf %306, %353 : vector<8x1792xf32>
    %355 = vector.broadcast %348 : vector<8x1xf32> to vector<8x1792xf32>
    %356 = arith.mulf %137, %355 : vector<8x1792xf32>
    %357 = arith.addf %354, %356 : vector<8x1792xf32>
    %358 = arith.addf %329, %352 : vector<8x1xf32>
    %359 = vector.broadcast %358 : vector<8x1xf32> to vector<8x1792xf32>
    %360 = arith.addf %357, %359 : vector<8x1792xf32>
    %cst_301 = arith.constant 0.000000e+00 : f32
    %361 = vector.broadcast %cst_301 : f32 to vector<8x1792xf32>
    %362 = arith.maximumf %360, %361 : vector<8x1792xf32>
    %c0_302 = arith.constant 0 : index
    %c0_303 = arith.constant 0 : index
    %363 = vector.load %arg6[%c0_302, %c0_303] : memref<8x1792xf32, #tpu.memory_space<vmem>>, vector<8x1792xf32>
    tpu.vector_store %arg6[%c0_302, %c0_303], %362 {strides = array<i32>} : memref<8x1792xf32, #tpu.memory_space<vmem>>, vector<8x1792xf32>,
    return
  }
}

</mosaic_0001>

<bundles_post_ra>
// kernel: resblock_forward.1
= control target key start
LH: loop header
LB: loop body
LE: loop exit
PB: predicated region body
PF: predicated region fallthrough
CT: control target
= control target key end

     0   :  { %v39389_v2 = vmov 0.0   ;;  %s32526_s25 = smov 127   ;;  %s32527_s29 = smov 126   ;;  %vm88_vm0 = vcmask 1039360   ;;  %vm117_vm1 = vcmask 64512   ;;  %vm1150_vm2 = vcmask 1031168   ;;  %s39382_s0 = inlined_call_operand.vmem [shape: f32[8,2014], index: 0, kind: input, shape index: {}]   ;;  %s39383_s2 = inlined_call_operand.vmem [shape: f32[27,8,8], index: 2, kind: input, shape index: {}]   ;;  %s39384_s4 = inlined_call_operand.vmem [shape: f32[8,8], index: 4, kind: input, shape index: {}]   ;;  %s39385_s1 = inlined_call_operand.vmem [shape: f32[1,1792], index: 1, kind: input, shape index: {}]   ;;  %s39386_s5 = inlined_call_operand.vmem [shape: f32[6,8,1], index: 5, kind: input, shape index: {}]   ;;  %s39387_s3 = inlined_call_operand.vmem [shape: f32[27,8,8], index: 3, kind: input, shape index: {}]   ;;  %s39388_s6 = inlined_call_operand.vmem [shape: f32[8,1792], index: 6, kind: output, shape index: {}]  }
   0x1   :  { %v32610_v0 = vld [vmem:[%s39382_s0 + $0x10] sm:$0xff]  ;;  %v32615_v1 = vld [vmem:[%s39382_s0] sm:$0xff]  ;;  %185 = vmatprep.mubr.f32.mxu0 %v39389_v2  ;;  %256 = vmatprep.mubr.f32.mxu1 %v39389_v2  ;;  %v32626_v3 = vld [vmem:[%s39382_s0 + $0x18] sm:$0xff]  ;;  %s32528_s30 = smov 118   ;;  %s32529_s7 = smov 117   ;;  %vm1725_vm3 = vcmask 965632  }
   0x2   :  { %62 = vrot.lane.b32.xlu1 %v32610_v0, %s32526_s25  ;;  %58 = vrot.lane.b32.xlu0 %v32615_v1, %s32526_s25  ;;  %v32631_v4 = vld [vmem:[%s39382_s0 + $0x8] sm:$0xff]  ;;  %v32645_v6 = vld [vmem:[%s39382_s0 + $0x20] sm:$0xff]  ;;  %s32530_s8 = smov 116   ;;  %s32531_s13 = smov 108   ;;  %vm2300_vm4 = vcmask 957440   ;;  %vm2875_vm5 = vcmask 949248  }
   0x3   :  { %v32640_v5 = vld [vmem:[%s39382_s0 + $0x28] sm:$0xff]  ;;  %v32654_v7 = vld [vmem:[%s39382_s0 + $0x38] sm:$0xff]  ;;  %v32659_v8 = vld [vmem:[%s39382_s0 + $0x30] sm:$0xff]  ;;  %s32532_s18 = smov 107   ;;  %s32533_s21 = smov 106   ;;  %vm3450_vm6 = vcmask 883712  }
   0x4   :  { %v32668_v9 = vld [vmem:[%s39382_s0 + $0x48] sm:$0xff]  ;;  %v32673_v10 = vld [vmem:[%s39382_s0 + $0x40] sm:$0xff]  ;;  %v32682_v11 = vld [vmem:[%s39382_s0 + $0x58] sm:$0xff]  ;;  %s32534_s24 = smov 28   ;;  %s32535_s28 = smov 27   ;;  %vm4025_vm7 = vcmask 875520  }
   0x5   :  { %v32687_v12 = vld [vmem:[%s39382_s0 + $0x50] sm:$0xff]  ;;  %v32696_v13 = vld [vmem:[%s39382_s0 + $0x68] sm:$0xff]  ;;  %v32701_v14 = vld [vmem:[%s39382_s0 + $0x60] sm:$0xff]  ;;  %vm4600_vm8 = vcmask 867328   ;;  %vm5175_vm9 = vcmask 228352   ;;  %s32538_s26 = smov 17  }
   0x6   :  { %64 = vrot.lane.b32.xlu1 %v32626_v3, %s32526_s25  ;;  %60 = vrot.lane.b32.xlu0 %v32631_v4, %s32526_s25  ;;  %v32710_v15 = vld [vmem:[%s39382_s0 + $0x70] sm:$0xff]  ;;  %v32798_v22 = vld [vmem:[%s39383_s2 + $0x8] sm:$0xff]  ;;  %vm5750_vm10 = vcmask 220160   ;;  %vm6325_vm11 = vcmask 211968   ;;  %s32540_s11 = smov 8   ;;  %vm6900_vm12 = vcmask 146432  }
   0x7   :  { %v25_v46 = vld [vmem:[%s39383_s2] sm:$0xff]  ;;  %s32541_s14 = smov 7   ;;  %vm7475_vm13 = vcmask 138240   ;;  %s32542_s20 = smov 6   ;;  %vm8050_vm14 = vcmask 130048   ;;  %vm9199_vm15 = vcmask 56320  }
   0x8   :  { %s32544_s17 = smov 55   ;;  %s32545_s19 = smov 54  }
   0x9   :  { %s32546_s27 = smov 46   ;;  %s32551_s16 = smov 34  }
   0xa   :  { %68 = vrot.lane.b32.xlu1 %v32640_v5, %s32526_s25  ;;  %66 = vrot.lane.b32.xlu0 %v32645_v6, %s32526_s25  ;;  %s32556_s15 = smov 100   ;;  %s32559_s9 = smov 91  }
   0xb   :  { %s32564_s22 = smov 9   ;;  %s32566_s10 = smov 119  }
   0xe   :  { %72 = vrot.lane.b32.xlu1 %v32654_v7, %s32526_s25  ;;  %70 = vrot.lane.b32.xlu0 %v32659_v8, %s32526_s25 }
  0x12   :  { %76 = vrot.lane.b32.xlu1 %v32668_v9, %s32526_s25  ;;  %74 = vrot.lane.b32.xlu0 %v32673_v10, %s32526_s25 }
  0x16   :  { %80 = vrot.lane.b32.xlu1 %v32682_v11, %s32526_s25  ;;  %78 = vrot.lane.b32.xlu0 %v32687_v12, %s32526_s25 }
  0x1a   :  { %84 = vrot.lane.b32.xlu1 %v32696_v13, %s32526_s25  ;;  %82 = vrot.lane.b32.xlu0 %v32701_v14, %s32526_s25 }
  0x1e   :  { %1120 = vrot.lane.b32.xlu1 %v32615_v1, %s32527_s29  ;;  %86 = vrot.lane.b32.xlu0 %v32710_v15, %s32526_s25 }
  0x22   :  { %1124 = vrot.lane.b32.xlu1 %v32610_v0, %s32527_s29  ;;  %1122 = vrot.lane.b32.xlu0 %v32631_v4, %s32527_s29 }
  0x26   :  { %1128 = vrot.lane.b32.xlu1 %v32645_v6, %s32527_s29  ;;  %1126 = vrot.lane.b32.xlu0 %v32626_v3, %s32527_s29 }
  0x2a   :  { %1132 = vrot.lane.b32.xlu1 %v32659_v8, %s32527_s29  ;;  %1130 = vrot.lane.b32.xlu0 %v32640_v5, %s32527_s29 }
  0x2e   :  { %1136 = vrot.lane.b32.xlu1 %v32673_v10, %s32527_s29  ;;  %1134 = vrot.lane.b32.xlu0 %v32654_v7, %s32527_s29 }
  0x32   :  { %1140 = vrot.lane.b32.xlu1 %v32687_v12, %s32527_s29  ;;  %1138 = vrot.lane.b32.xlu0 %v32668_v9, %s32527_s29 }
  0x36   :  { %1144 = vrot.lane.b32.xlu1 %v32701_v14, %s32527_s29  ;;  %1142 = vrot.lane.b32.xlu0 %v32682_v11, %s32527_s29 }
  0x3a   :  { %1148 = vrot.lane.b32.xlu1 %v32710_v15, %s32527_s29  ;;  %1146 = vrot.lane.b32.xlu0 %v32696_v13, %s32527_s29  ;;  %s32565_s29 = smov 1  }
  0x3e   :  { %1697 = vrot.lane.b32.xlu1 %v32631_v4, %s32528_s30  ;;  %1695 = vrot.lane.b32.xlu0 %v32615_v1, %s32528_s30 }
  0x42   :  { %1701 = vrot.lane.b32.xlu1 %v32626_v3, %s32528_s30  ;;  %1699 = vrot.lane.b32.xlu0 %v32610_v0, %s32528_s30 }
  0x46   :  { %1705 = vrot.lane.b32.xlu1 %v32640_v5, %s32528_s30  ;;  %1703 = vrot.lane.b32.xlu0 %v32645_v6, %s32528_s30 }
  0x4a   :  { %1709 = vrot.lane.b32.xlu1 %v32654_v7, %s32528_s30  ;;  %1707 = vrot.lane.b32.xlu0 %v32659_v8, %s32528_s30 }
  0x4e   :  { %1713 = vrot.lane.b32.xlu1 %v32668_v9, %s32528_s30  ;;  %1711 = vrot.lane.b32.xlu0 %v32673_v10, %s32528_s30 }
  0x52   :  { %1717 = vrot.lane.b32.xlu1 %v32682_v11, %s32528_s30  ;;  %1715 = vrot.lane.b32.xlu0 %v32687_v12, %s32528_s30 }
  0x56   :  { %1721 = vrot.lane.b32.xlu1 %v32696_v13, %s32528_s30  ;;  %1719 = vrot.lane.b32.xlu0 %v32701_v14, %s32528_s30 }
  0x5a   :  { %2272 = vrot.lane.b32.xlu1 %v32631_v4, %s32529_s7  ;;  %1723 = vrot.lane.b32.xlu0 %v32710_v15, %s32528_s30 }
  0x5e   :  { %2270 = vrot.lane.b32.xlu1 %v32615_v1, %s32529_s7  ;;  %2274 = vrot.lane.b32.xlu0 %v32610_v0, %s32529_s7 }
  0x62   :  { %2278 = vrot.lane.b32.xlu1 %v32645_v6, %s32529_s7  ;;  %2276 = vrot.lane.b32.xlu0 %v32626_v3, %s32529_s7 }
  0x66   :  { %2282 = vrot.lane.b32.xlu1 %v32659_v8, %s32529_s7  ;;  %2280 = vrot.lane.b32.xlu0 %v32640_v5, %s32529_s7 }
  0x6a   :  { %2286 = vrot.lane.b32.xlu1 %v32673_v10, %s32529_s7  ;;  %2284 = vrot.lane.b32.xlu0 %v32654_v7, %s32529_s7 }
  0x6e   :  { %2290 = vrot.lane.b32.xlu1 %v32687_v12, %s32529_s7  ;;  %2288 = vrot.lane.b32.xlu0 %v32668_v9, %s32529_s7 }
  0x72   :  { %2294 = vrot.lane.b32.xlu1 %v32701_v14, %s32529_s7  ;;  %2292 = vrot.lane.b32.xlu0 %v32682_v11, %s32529_s7 }
  0x74   :  { %v63_v16 = vpop.permute.xlu1 %62  ;;  %v59_v17 = vpop.permute.xlu0 %58 }
  0x76   :  { %2298 = vrot.lane.b32.xlu1 %v32710_v15, %s32529_s7  ;;  %2296 = vrot.lane.b32.xlu0 %v32696_v13, %s32529_s7 }
  0x78   :  { %v65_v18 = vpop.permute.xlu1 %64  ;;  %v61_v19 = vpop.permute.xlu0 %60 }
  0x79   :  { %v90_v20 = vsel %vm88_vm0, %v61_v19, %v63_v16  ;;  %v89_v21 = vsel %vm88_vm0, %v59_v17, %v61_v19  ;;  %v91_v26 = vsel %vm88_vm0, %v63_v16, %v65_v18  ;;  %v31998_v16 = vld [vmem:[%s39383_s2 + $0x10] sm:$0xff] }
  0x7a   :  { %2849 = vrot.lane.b32.xlu1 %v32610_v0, %s32530_s8  ;;  %2847 = vrot.lane.b32.xlu0 %v32631_v4, %s32530_s8 }
  0x7b   :  { %151 = vmatprep.subr.mxu0 %v90_v20 }
  0x7c   :  { %152 = vmatpush1.msra.mxu0 %v89_v21  ;;  %v69_v23 = vpop.permute.xlu1 %68  ;;  %v67_v24 = vpop.permute.xlu0 %66 }
  0x7d   :  { %v92_v25 = vsel %vm88_vm0, %v65_v18, %v67_v24  ;;  %31984 = vmatmul.mubr.msk.f32.vlgmr.msra.gmra.mxu0 %vm117_vm1, %v32798_v22  ;;  %v93_v30 = vsel %vm88_vm0, %v67_v24, %v69_v23 }
  0x7e   :  { %2853 = vrot.lane.b32.xlu1 %v32645_v6, %s32530_s8  ;;  %2851 = vrot.lane.b32.xlu0 %v32626_v3, %s32530_s8 }
  0x7f   :  { %222 = vmatprep.subr.mxu1 %v92_v25  ;;  %327 = vmatprep.mubr.f32.mxu0 %v39389_v2 }
  0x80   :  { %223 = vmatpush1.msra.mxu1 %v91_v26  ;;  %v73_v27 = vpop.permute.xlu1 %72  ;;  %v71_v28 = vpop.permute.xlu0 %70 }
  0x81   :  { %v94_v29 = vsel %vm88_vm0, %v69_v23, %v71_v28  ;;  %31985 = vmatmul.mubr.msk.f32.vlgmr.msra.gmra.mxu1 %vm117_vm1, %v32798_v22  ;;  %v95_v34 = vsel %vm88_vm0, %v71_v28, %v73_v27 }
  0x82   :  { %2855 = vrot.lane.b32.xlu1 %v32640_v5, %s32530_s8  ;;  %2845 = vrot.lane.b32.xlu0 %v32615_v1, %s32530_s8 }
  0x83   :  { %293 = vmatprep.subr.mxu0 %v94_v29  ;;  %398 = vmatprep.mubr.f32.mxu1 %v39389_v2 }
  0x84   :  { %294 = vmatpush1.msra.mxu0 %v93_v30  ;;  %v77_v31 = vpop.permute.xlu1 %76  ;;  %v75_v32 = vpop.permute.xlu0 %74 }
  0x85   :  { %v96_v33 = vsel %vm88_vm0, %v73_v27, %v75_v32  ;;  %31986 = vmatmul.mubr.msk.f32.vlgmr.msra.gmra.mxu0 %vm117_vm1, %v32798_v22  ;;  %v97_v38 = vsel %vm88_vm0, %v75_v32, %v77_v31 }
  0x86   :  { %2859 = vrot.lane.b32.xlu1 %v32654_v7, %s32530_s8  ;;  %2857 = vrot.lane.b32.xlu0 %v32659_v8, %s32530_s8 }
  0x87   :  { %364 = vmatprep.subr.mxu1 %v96_v33  ;;  %469 = vmatprep.mubr.f32.mxu0 %v39389_v2 }
  0x88   :  { %365 = vmatpush1.msra.mxu1 %v95_v34  ;;  %v81_v35 = vpop.permute.xlu1 %80  ;;  %v79_v36 = vpop.permute.xlu0 %78 }
  0x89   :  { %v98_v37 = vsel %vm88_vm0, %v77_v31, %v79_v36  ;;  %31987 = vmatmul.mubr.msk.f32.vlgmr.msra.gmra.mxu1 %vm117_vm1, %v32798_v22  ;;  %v99_v42 = vsel %vm88_vm0, %v79_v36, %v81_v35 }
  0x8a   :  { %2863 = vrot.lane.b32.xlu1 %v32668_v9, %s32530_s8  ;;  %2861 = vrot.lane.b32.xlu0 %v32673_v10, %s32530_s8 }
  0x8b   :  { %435 = vmatprep.subr.mxu0 %v98_v37  ;;  %540 = vmatprep.mubr.f32.mxu1 %v39389_v2 }
  0x8c   :  { %436 = vmatpush1.msra.mxu0 %v97_v38  ;;  %v85_v39 = vpop.permute.xlu1 %84  ;;  %v83_v40 = vpop.permute.xlu0 %82 }
  0x8d   :  { %v100_v41 = vsel %vm88_vm0, %v81_v35, %v83_v40  ;;  %31988 = vmatmul.mubr.msk.f32.vlgmr.msra.gmra.mxu0 %vm117_vm1, %v32798_v22  ;;  %v101_v47 = vsel %vm88_vm0, %v83_v40, %v85_v39  ;;  %v32950_v35 = vld [vmem:[%s39383_s2 + $0x18] sm:$0xff] }
  0x8e   :  { %2867 = vrot.lane.b32.xlu1 %v32682_v11, %s32530_s8  ;;  %2865 = vrot.lane.b32.xlu0 %v32687_v12, %s32530_s8 }
  0x8f   :  { %506 = vmatprep.subr.mxu1 %v100_v41  ;;  %611 = vmatprep.mubr.f32.mxu0 %v39389_v2 }
  0x90   :  { %507 = vmatpush1.msra.mxu1 %v99_v42  ;;  %v1121_v43 = vpop.permute.xlu1 %1120  ;;  %v87_v44 = vpop.permute.xlu0 %86 }
  0x91   :  { %31989 = vmatmul.mubr.msk.f32.vlgmr.msra.gmra.mxu1 %vm117_vm1, %v32798_v22  ;;  %v102_v45 = vsel %vm88_vm0, %v85_v39, %v87_v44  ;;  %651 = vmatprep.subr.mxu1 %v32631_v4 }
  0x92   :  { %2871 = vrot.lane.b32.xlu1 %v32696_v13, %s32530_s8  ;;  %2869 = vrot.lane.b32.xlu0 %v32701_v14, %s32530_s8 }
  0x93   :  { %577 = vmatprep.subr.mxu0 %v102_v45  ;;  %652 = vmatpush1.msra.mxu1 %v32615_v1 }
  0x94   :  { %578 = vmatpush1.msra.mxu0 %v101_v47  ;;  %685 = vmatprep.mubr.f32.mxu1 %v39389_v2  ;;  %v1125_v48 = vpop.permute.xlu1 %1124  ;;  %v1123_v49 = vpop.permute.xlu0 %1122 }
  0x95   :  { %31990 = vmatmul.mubr.msk.f32.vlgmr.msra.gmra.mxu0 %vm117_vm1, %v32798_v22  ;;  %31991 = vmatmul.mubr.msk.f32.vlgmr.msra.gmra.mxu1 %vm117_vm1, %v25_v46  ;;  %v1152_v56 = vsel %vm1150_vm2, %v1123_v49, %v1125_v48  ;;  %v1151_v60 = vsel %vm1150_vm2, %v1121_v43, %v1123_v49 }
  0x96   :  { %3422 = vrot.lane.b32.xlu1 %v32631_v4, %s32531_s13  ;;  %2873 = vrot.lane.b32.xlu0 %v32710_v15, %s32530_s8  ;;  %s32536_s8 = smov 26  }
  0x97   :  { %722 = vmatprep.subr.mxu0 %v32626_v3  ;;  %793 = vmatprep.subr.mxu1 %v32640_v5 }
  0x98   :  { %723 = vmatpush1.msra.mxu0 %v32610_v0  ;;  %756 = vmatprep.mubr.f32.mxu0 %v39389_v2  ;;  %v1129_v50 = vpop.permute.xlu1 %1128  ;;  %v1127_v51 = vpop.permute.xlu0 %1126 }
  0x99   :  { %794 = vmatpush1.msra.mxu1 %v32645_v6  ;;  %827 = vmatprep.mubr.f32.mxu1 %v39389_v2  ;;  %v1154_v57 = vsel %vm1150_vm2, %v1127_v51, %v1129_v50  ;;  %v1153_v61 = vsel %vm1150_vm2, %v1125_v48, %v1127_v51 }
  0x9a   :  { %31992 = vmatmul.mubr.msk.f32.vlgmr.msra.gmra.mxu0 %vm117_vm1, %v25_v46  ;;  %31993 = vmatmul.mubr.msk.f32.vlgmr.msra.gmra.mxu1 %vm117_vm1, %v25_v46 }
  0x9b   :  { %864 = vmatprep.subr.mxu0 %v32654_v7  ;;  %935 = vmatprep.subr.mxu1 %v32668_v9 }
  0x9c   :  { %3420 = vrot.lane.b32.xlu1 %v32615_v1, %s32531_s13  ;;  %3424 = vrot.lane.b32.xlu0 %v32610_v0, %s32531_s13  ;;  %v1133_v52 = vpop.permute.xlu1 %1132  ;;  %v1131_v53 = vpop.permute.xlu0 %1130 }
  0x9d   :  { %865 = vmatpush1.msra.mxu0 %v32659_v8  ;;  %936 = vmatpush1.msra.mxu1 %v32673_v10  ;;  %v1156_v63 = vsel %vm1150_vm2, %v1131_v53, %v1133_v52  ;;  %v1155_v19 = vsel %vm1150_vm2, %v1129_v50, %v1131_v53 }
  0x9e   :  { %898 = vmatprep.mubr.f32.mxu0 %v39389_v2  ;;  %969 = vmatprep.mubr.f32.mxu1 %v39389_v2 }
  0x9f   :  { %1006 = vmatprep.subr.mxu0 %v32682_v11  ;;  %1077 = vmatprep.subr.mxu1 %v32696_v13 }
  0xa0   :  { %31994 = vmatmul.mubr.msk.f32.vlgmr.msra.gmra.mxu0 %vm117_vm1, %v25_v46  ;;  %31995 = vmatmul.mubr.msk.f32.vlgmr.msra.gmra.mxu1 %vm117_vm1, %v25_v46  ;;  %v1137_v54 = vpop.permute.xlu1 %1136  ;;  %v1135_v55 = vpop.permute.xlu0 %1134 }
  0xa1   :  { %1007 = vmatpush1.msra.mxu0 %v32687_v12  ;;  %1078 = vmatpush1.msra.mxu1 %v32701_v14  ;;  %v1158_v62 = vsel %vm1150_vm2, %v1135_v55, %v1137_v54  ;;  %v1157_v20 = vsel %vm1150_vm2, %v1133_v52, %v1135_v55 }
  0xa2   :  { %1212 = vmatprep.subr.mxu0 %v1152_v56  ;;  %1283 = vmatprep.subr.mxu1 %v1154_v57 }
  0xa3   :  { %3428 = vrot.lane.b32.xlu1 %v32645_v6, %s32531_s13  ;;  %3426 = vrot.lane.b32.xlu0 %v32626_v3, %s32531_s13 }
  0xa4   :  { %1040 = vmatprep.mubr.f32.mxu0 %v39389_v2  ;;  %1111 = vmatprep.mubr.f32.mxu1 %v39389_v2  ;;  %v1141_v58 = vpop.permute.xlu1 %1140  ;;  %v1139_v59 = vpop.permute.xlu0 %1138 }
  0xa5   :  { %31996 = vmatmul.mubr.msk.f32.vlgmr.msra.gmra.mxu0 %vm117_vm1, %v25_v46  ;;  %31997 = vmatmul.mubr.msk.f32.vlgmr.msra.gmra.mxu1 %vm117_vm1, %v25_v46  ;;  %v1160_v21 = vsel %vm1150_vm2, %v1139_v59, %v1141_v58  ;;  %v1159_v25 = vsel %vm1150_vm2, %v1137_v54, %v1139_v59 }
  0xa6   :  { %1213 = vmatpush1.msra.mxu0 %v1151_v60  ;;  %1284 = vmatpush1.msra.mxu1 %v1153_v61 }
  0xa7   :  { %1354 = vmatprep.subr.mxu0 %v1156_v63  ;;  %3432 = vrot.lane.b32.xlu1 %v32659_v8, %s32531_s13 }
  0xa8   :  { %3430 = vrot.lane.b32.xlu0 %v32640_v5, %s32531_s13  ;;  %1425 = vmatprep.subr.mxu1 %v1158_v62  ;;  %v1145_v17 = vpop.permute.xlu1 %1144  ;;  %v1143_v18 = vpop.permute.xlu0 %1142 }
  0xa9   :  { %1246 = vmatprep.mubr.f32.mxu0 %v39389_v2  ;;  %1317 = vmatprep.mubr.f32.mxu1 %v39389_v2  ;;  %v1162_v22 = vsel %vm1150_vm2, %v1143_v18, %v1145_v17  ;;  %v1161_v26 = vsel %vm1150_vm2, %v1141_v58, %v1143_v18 }
  0xaa   :  { %31999 = vmatmul.mubr.msk.f32.vlgmr.msra.gmra.mxu0 %vm117_vm1, %v31998_v16  ;;  %32000 = vmatmul.mubr.msk.f32.vlgmr.msra.gmra.mxu1 %vm117_vm1, %v31998_v16 }
  0xab   :  { %1355 = vmatpush1.msra.mxu0 %v1155_v19  ;;  %1426 = vmatpush1.msra.mxu1 %v1157_v20 }
  0xac   :  { %3436 = vrot.lane.b32.xlu1 %v32673_v10, %s32531_s13  ;;  %3434 = vrot.lane.b32.xlu0 %v32654_v7, %s32531_s13  ;;  %v1149_v23 = vpop.permute.xlu1 %1148  ;;  %v1147_v24 = vpop.permute.xlu0 %1146 }
  0xad   :  { %1496 = vmatprep.subr.mxu0 %v1160_v21  ;;  %1388 = vmatprep.mubr.f32.mxu0 %v39389_v2  ;;  %v1164_v27 = vsel %vm1150_vm2, %v1147_v24, %v1149_v23  ;;  %v1163_v30 = vsel %vm1150_vm2, %v1145_v17, %v1147_v24  ;;  %vm9774_vm2 = vcmask 48128  }
  0xae   :  { %32001 = vmatmul.mubr.msk.f32.vlgmr.msra.gmra.mxu0 %vm117_vm1, %v31998_v16  ;;  %1459 = vmatprep.mubr.f32.mxu1 %v39389_v2 }
  0xaf   :  { %1497 = vmatpush1.msra.mxu0 %v1159_v25  ;;  %1567 = vmatprep.subr.mxu1 %v1162_v22 }
  0xb0   :  { %3440 = vrot.lane.b32.xlu1 %v32687_v12, %s32531_s13  ;;  %3438 = vrot.lane.b32.xlu0 %v32668_v9, %s32531_s13  ;;  %v1698_v28 = vpop.permute.xlu1 %1697  ;;  %v1696_v29 = vpop.permute.xlu0 %1695 }
  0xb1   :  { %32002 = vmatmul.mubr.msk.f32.vlgmr.msra.gmra.mxu1 %vm117_vm1, %v31998_v16  ;;  %1530 = vmatprep.mubr.f32.mxu0 %v39389_v2  ;;  %v1726_v34 = vsel %vm1725_vm3, %v1696_v29, %v1698_v28 }
  0xb2   :  { %1568 = vmatpush1.msra.mxu1 %v1161_v26  ;;  %1638 = vmatprep.subr.mxu0 %v1164_v27 }
  0xb3   :  { %32003 = vmatmul.mubr.msk.f32.vlgmr.msra.gmra.mxu0 %vm117_vm1, %v31998_v16  ;;  %1601 = vmatprep.mubr.f32.mxu1 %v39389_v2 }
  0xb4   :  { %3444 = vrot.lane.b32.xlu1 %v32701_v14, %s32531_s13  ;;  %3442 = vrot.lane.b32.xlu0 %v32682_v11, %s32531_s13  ;;  %v1702_v31 = vpop.permute.xlu1 %1701  ;;  %v1700_v32 = vpop.permute.xlu0 %1699 }
  0xb5   :  { %1639 = vmatpush1.msra.mxu0 %v1163_v30  ;;  %v1727_v33 = vsel %vm1725_vm3, %v1698_v28, %v1700_v32  ;;  %32004 = vmatmul.mubr.msk.f32.vlgmr.msra.gmra.mxu1 %vm117_vm1, %v31998_v16  ;;  %v1728_v39 = vsel %vm1725_vm3, %v1700_v32, %v1702_v31 }
  0xb6   :  { %1787 = vmatprep.subr.mxu1 %v1727_v33  ;;  %1672 = vmatprep.mubr.f32.mxu0 %v39389_v2 }
  0xb7   :  { %1788 = vmatpush1.msra.mxu1 %v1726_v34  ;;  %32005 = vmatmul.mubr.msk.f32.vlgmr.msra.gmra.mxu0 %vm117_vm1, %v31998_v16  ;;  %v33019_v16 = vld [vmem:[%s39383_s2 + $0x20] sm:$0xff] }
  0xb8   :  { %3448 = vrot.lane.b32.xlu1 %v32710_v15, %s32531_s13  ;;  %3446 = vrot.lane.b32.xlu0 %v32696_v13, %s32531_s13  ;;  %v1706_v36 = vpop.permute.xlu1 %1705  ;;  %v1704_v37 = vpop.permute.xlu0 %1703  ;;  %s32561_s13 = smov 89  }
  0xb9   :  { %v1729_v38 = vsel %vm1725_vm3, %v1702_v31, %v1704_v37  ;;  %1821 = vmatprep.mubr.f32.mxu1 %v39389_v2  ;;  %1892 = vmatprep.mubr.f32.mxu0 %v39389_v2  ;;  %v1730_v43 = vsel %vm1725_vm3, %v1704_v37, %v1706_v36 }
  0xba   :  { %1858 = vmatprep.subr.mxu0 %v1729_v38  ;;  %32007 = vmatmul.mubr.msk.f32.vlgmr.msra.gmra.mxu1 %vm117_vm1, %v32950_v35 }
  0xbb   :  { %1859 = vmatpush1.msra.mxu0 %v1728_v39  ;;  %1963 = vmatprep.mubr.f32.mxu1 %v39389_v2 }
  0xbc   :  { %3999 = vrot.lane.b32.xlu1 %v32610_v0, %s32532_s18  ;;  %3997 = vrot.lane.b32.xlu0 %v32631_v4, %s32532_s18  ;;  %v1710_v40 = vpop.permute.xlu1 %1709  ;;  %v1708_v41 = vpop.permute.xlu0 %1707 }
  0xbd   :  { %v1731_v42 = vsel %vm1725_vm3, %v1706_v36, %v1708_v41  ;;  %32008 = vmatmul.mubr.msk.f32.vlgmr.msra.gmra.mxu0 %vm117_vm1, %v32950_v35  ;;  %v1732_v47 = vsel %vm1725_vm3, %v1708_v41, %v1710_v40 }
  0xbe   :  { %1929 = vmatprep.subr.mxu1 %v1731_v42  ;;  %2034 = vmatprep.mubr.f32.mxu0 %v39389_v2 }
  0xbf   :  { %1930 = vmatpush1.msra.mxu1 %v1730_v43 }
  0xc0   :  { %4003 = vrot.lane.b32.xlu1 %v32645_v6, %s32532_s18  ;;  %4001 = vrot.lane.b32.xlu0 %v32626_v3, %s32532_s18  ;;  %v1714_v44 = vpop.permute.xlu1 %1713  ;;  %v1712_v45 = vpop.permute.xlu0 %1711 }
  0xc1   :  { %v1733_v46 = vsel %vm1725_vm3, %v1710_v40, %v1712_v45  ;;  %32009 = vmatmul.mubr.msk.f32.vlgmr.msra.gmra.mxu1 %vm117_vm1, %v32950_v35  ;;  %v1734_v51 = vsel %vm1725_vm3, %v1712_v45, %v1714_v44 }
  0xc2   :  { %2000 = vmatprep.subr.mxu0 %v1733_v46  ;;  %2105 = vmatprep.mubr.f32.mxu1 %v39389_v2 }
  0xc3   :  { %2001 = vmatpush1.msra.mxu0 %v1732_v47 }
  0xc4   :  { %4005 = vrot.lane.b32.xlu1 %v32640_v5, %s32532_s18  ;;  %3995 = vrot.lane.b32.xlu0 %v32615_v1, %s32532_s18  ;;  %v1718_v48 = vpop.permute.xlu1 %1717  ;;  %v1716_v49 = vpop.permute.xlu0 %1715 }
  0xc5   :  { %v1735_v50 = vsel %vm1725_vm3, %v1714_v44, %v1716_v49  ;;  %32010 = vmatmul.mubr.msk.f32.vlgmr.msra.gmra.mxu0 %vm117_vm1, %v32950_v35  ;;  %v1736_v55 = vsel %vm1725_vm3, %v1716_v49, %v1718_v48 }
  0xc6   :  { %2071 = vmatprep.subr.mxu1 %v1735_v50  ;;  %2176 = vmatprep.mubr.f32.mxu0 %v39389_v2  ;;  %v32022_v50 = vld [vmem:[%s39383_s2 + $0x28] sm:$0xff] }
  0xc7   :  { %2072 = vmatpush1.msra.mxu1 %v1734_v51 }
  0xc8   :  { %4009 = vrot.lane.b32.xlu1 %v32654_v7, %s32532_s18  ;;  %4007 = vrot.lane.b32.xlu0 %v32659_v8, %s32532_s18  ;;  %v1722_v52 = vpop.permute.xlu1 %1721  ;;  %v1720_v53 = vpop.permute.xlu0 %1719 }
  0xc9   :  { %v1737_v54 = vsel %vm1725_vm3, %v1718_v48, %v1720_v53  ;;  %32011 = vmatmul.mubr.msk.f32.vlgmr.msra.gmra.mxu1 %vm117_vm1, %v32950_v35  ;;  %v1738_v59 = vsel %vm1725_vm3, %v1720_v53, %v1722_v52 }
  0xca   :  { %2142 = vmatprep.subr.mxu0 %v1737_v54  ;;  %2247 = vmatprep.mubr.f32.mxu1 %v39389_v2 }
  0xcb   :  { %2143 = vmatpush1.msra.mxu0 %v1736_v55 }
  0xcc   :  { %4013 = vrot.lane.b32.xlu1 %v32668_v9, %s32532_s18  ;;  %4011 = vrot.lane.b32.xlu0 %v32673_v10, %s32532_s18  ;;  %v2273_v56 = vpop.permute.xlu1 %2272  ;;  %v1724_v57 = vpop.permute.xlu0 %1723 }
  0xcd   :  { %v1739_v58 = vsel %vm1725_vm3, %v1722_v52, %v1724_v57  ;;  %32012 = vmatmul.mubr.msk.f32.vlgmr.msra.gmra.mxu0 %vm117_vm1, %v32950_v35 }
  0xce   :  { %2213 = vmatprep.subr.mxu1 %v1739_v58  ;;  %2396 = vmatprep.mubr.f32.mxu0 %v39389_v2 }
  0xcf   :  { %2214 = vmatpush1.msra.mxu1 %v1738_v59 }
  0xd0   :  { %4017 = vrot.lane.b32.xlu1 %v32682_v11, %s32532_s18  ;;  %4015 = vrot.lane.b32.xlu0 %v32687_v12, %s32532_s18  ;;  %v2271_v60 = vpop.permute.xlu1 %2270  ;;  %v2275_v61 = vpop.permute.xlu0 %2274 }
  0xd1   :  { %v2301_v62 = vsel %vm2300_vm4, %v2271_v60, %v2273_v56  ;;  %v2302_v63 = vsel %vm2300_vm4, %v2273_v56, %v2275_v61  ;;  %32013 = vmatmul.mubr.msk.f32.vlgmr.msra.gmra.mxu1 %vm117_vm1, %v32950_v35 }
  0xd2   :  { %2362 = vmatprep.subr.mxu0 %v2302_v63  ;;  %2467 = vmatprep.mubr.f32.mxu1 %v39389_v2 }
  0xd3   :  { %2363 = vmatpush1.msra.mxu0 %v2301_v62 }
  0xd4   :  { %4021 = vrot.lane.b32.xlu1 %v32696_v13, %s32532_s18  ;;  %4019 = vrot.lane.b32.xlu0 %v32701_v14, %s32532_s18  ;;  %v2279_v17 = vpop.permute.xlu1 %2278  ;;  %v2277_v18 = vpop.permute.xlu0 %2276 }
  0xd5   :  { %v2304_v19 = vsel %vm2300_vm4, %v2277_v18, %v2279_v17  ;;  %v2303_v20 = vsel %vm2300_vm4, %v2275_v61, %v2277_v18  ;;  %32015 = vmatmul.mubr.msk.f32.vlgmr.msra.gmra.mxu0 %vm117_vm1, %v33019_v16 }
  0xd6   :  { %2433 = vmatprep.subr.mxu1 %v2304_v19  ;;  %2538 = vmatprep.mubr.f32.mxu0 %v39389_v2 }
  0xd7   :  { %2434 = vmatpush1.msra.mxu1 %v2303_v20 }
  0xd8   :  { %4572 = vrot.lane.b32.xlu1 %v32631_v4, %s32533_s21  ;;  %4023 = vrot.lane.b32.xlu0 %v32710_v15, %s32532_s18  ;;  %v2283_v21 = vpop.permute.xlu1 %2282  ;;  %v2281_v22 = vpop.permute.xlu0 %2280  ;;  %s32549_s18 = smov 36  }
  0xd9   :  { %v2306_v23 = vsel %vm2300_vm4, %v2281_v22, %v2283_v21  ;;  %v2305_v24 = vsel %vm2300_vm4, %v2279_v17, %v2281_v22  ;;  %32016 = vmatmul.mubr.msk.f32.vlgmr.msra.gmra.mxu1 %vm117_vm1, %v33019_v16 }
  0xda   :  { %2504 = vmatprep.subr.mxu0 %v2306_v23  ;;  %2609 = vmatprep.mubr.f32.mxu1 %v39389_v2 }
  0xdb   :  { %2505 = vmatpush1.msra.mxu0 %v2305_v24 }
  0xdc   :  { %4570 = vrot.lane.b32.xlu1 %v32615_v1, %s32533_s21  ;;  %4574 = vrot.lane.b32.xlu0 %v32610_v0, %s32533_s21  ;;  %v2287_v25 = vpop.permute.xlu1 %2286  ;;  %v2285_v26 = vpop.permute.xlu0 %2284 }
  0xdd   :  { %v2308_v27 = vsel %vm2300_vm4, %v2285_v26, %v2287_v25  ;;  %v2307_v28 = vsel %vm2300_vm4, %v2283_v21, %v2285_v26  ;;  %32017 = vmatmul.mubr.msk.f32.vlgmr.msra.gmra.mxu0 %vm117_vm1, %v33019_v16 }
  0xde   :  { %2575 = vmatprep.subr.mxu1 %v2308_v27  ;;  %2680 = vmatprep.mubr.f32.mxu0 %v39389_v2 }
  0xdf   :  { %2576 = vmatpush1.msra.mxu1 %v2307_v28 }
  0xe0   :  { %4578 = vrot.lane.b32.xlu1 %v32645_v6, %s32533_s21  ;;  %4576 = vrot.lane.b32.xlu0 %v32626_v3, %s32533_s21  ;;  %v2291_v29 = vpop.permute.xlu1 %2290  ;;  %v2289_v30 = vpop.permute.xlu0 %2288 }
  0xe1   :  { %v2310_v31 = vsel %vm2300_vm4, %v2289_v30, %v2291_v29  ;;  %v2309_v32 = vsel %vm2300_vm4, %v2287_v25, %v2289_v30  ;;  %32018 = vmatmul.mubr.msk.f32.vlgmr.msra.gmra.mxu1 %vm117_vm1, %v33019_v16 }
  0xe2   :  { %2646 = vmatprep.subr.mxu0 %v2310_v31  ;;  %2751 = vmatprep.mubr.f32.mxu1 %v39389_v2 }
  0xe3   :  { %2647 = vmatpush1.msra.mxu0 %v2309_v32  ;;  %v33207_v32 = vld [vmem:[%s39382_s0 + $0x38] sm:$0xff] }
  0xe4   :  { %4582 = vrot.lane.b32.xlu1 %v32659_v8, %s32533_s21  ;;  %4580 = vrot.lane.b32.xlu0 %v32640_v5, %s32533_s21  ;;  %v2295_v33 = vpop.permute.xlu1 %2294  ;;  %v2293_v34 = vpop.permute.xlu0 %2292 }
  0xe5   :  { %v2312_v35 = vsel %vm2300_vm4, %v2293_v34, %v2295_v33  ;;  %v2311_v36 = vsel %vm2300_vm4, %v2291_v29, %v2293_v34  ;;  %32019 = vmatmul.mubr.msk.f32.vlgmr.msra.gmra.mxu0 %vm117_vm1, %v33019_v16 }
  0xe6   :  { %2717 = vmatprep.subr.mxu1 %v2312_v35  ;;  %2822 = vmatprep.mubr.f32.mxu0 %v39389_v2 }
  0xe7   :  { %2718 = vmatpush1.msra.mxu1 %v2311_v36 }
  0xe8   :  { %4586 = vrot.lane.b32.xlu1 %v32673_v10, %s32533_s21  ;;  %4584 = vrot.lane.b32.xlu0 %v32654_v7, %s32533_s21  ;;  %v2299_v37 = vpop.permute.xlu1 %2298  ;;  %v2297_v38 = vpop.permute.xlu0 %2296 }
  0xe9   :  { %v2314_v39 = vsel %vm2300_vm4, %v2297_v38, %v2299_v37  ;;  %v2313_v40 = vsel %vm2300_vm4, %v2295_v33, %v2297_v38  ;;  %32020 = vmatmul.mubr.msk.f32.vlgmr.msra.gmra.mxu1 %vm117_vm1, %v33019_v16  ;;  %v33219_v37 = vld [vmem:[%s39382_s0 + $0x50] sm:$0xff]  ;;  %v33226_v38 = vld [vmem:[%s39382_s0 + $0x48] sm:$0xff] }
  0xea   :  { %2788 = vmatprep.subr.mxu0 %v2314_v39  ;;  %2971 = vmatprep.mubr.f32.mxu1 %v39389_v2 }
  0xeb   :  { %2789 = vmatpush1.msra.mxu0 %v2313_v40 }
  0xec   :  { %4590 = vrot.lane.b32.xlu1 %v32687_v12, %s32533_s21  ;;  %4588 = vrot.lane.b32.xlu0 %v32668_v9, %s32533_s21  ;;  %v2850_v41 = vpop.permute.xlu1 %2849  ;;  %v2848_v42 = vpop.permute.xlu0 %2847 }
  0xed   :  { %v2877_v43 = vsel %vm2875_vm5, %v2848_v42, %v2850_v41  ;;  %32021 = vmatmul.mubr.msk.f32.vlgmr.msra.gmra.mxu0 %vm117_vm1, %v33019_v16 }
  0xee   :  { %2937 = vmatprep.subr.mxu1 %v2877_v43  ;;  %3042 = vmatprep.mubr.f32.mxu0 %v39389_v2  ;;  %v33238_v43 = vld [vmem:[%s39382_s0 + $0x60] sm:$0xff] }
  0xf0   :  { %4594 = vrot.lane.b32.xlu1 %v32701_v14, %s32533_s21  ;;  %4592 = vrot.lane.b32.xlu0 %v32682_v11, %s32533_s21  ;;  %v2854_v44 = vpop.permute.xlu1 %2853  ;;  %v2852_v45 = vpop.permute.xlu0 %2851 }
  0xf1   :  { %v2879_v46 = vsel %vm2875_vm5, %v2852_v45, %v2854_v44  ;;  %v2878_v47 = vsel %vm2875_vm5, %v2850_v41, %v2852_v45 }
  0xf2   :  { %3008 = vmatprep.subr.mxu0 %v2879_v46 }
  0xf3   :  { %3009 = vmatpush1.msra.mxu0 %v2878_v47 }
  0xf4   :  { %4598 = vrot.lane.b32.xlu1 %v32710_v15, %s32533_s21  ;;  %4596 = vrot.lane.b32.xlu0 %v32696_v13, %s32533_s21  ;;  %v2856_v48 = vpop.permute.xlu1 %2855  ;;  %v2846_v49 = vpop.permute.xlu0 %2845  ;;  %s32537_s21 = smov 18  }
  0xf5   :  { %v2876_v51 = vsel %vm2875_vm5, %v2846_v49, %v2848_v42  ;;  %32024 = vmatmul.mubr.msk.f32.vlgmr.msra.gmra.mxu0 %vm117_vm1, %v32022_v50  ;;  %v2880_v55 = vsel %vm2875_vm5, %v2854_v44, %v2856_v48  ;;  %v33245_v44 = vld [vmem:[%s39382_s0 + $0x58] sm:$0xff]  ;;  %v33263_v49 = vld [vmem:[%s39382_s0 + $0x68] sm:$0xff] }
  0xf6   :  { %2938 = vmatpush1.msra.mxu1 %v2876_v51  ;;  %3184 = vmatprep.mubr.f32.mxu0 %v39389_v2 }
  0xf7   :  { %32023 = vmatmul.mubr.msk.f32.vlgmr.msra.gmra.mxu1 %vm117_vm1, %v32022_v50 }
  0xf8   :  { %5149 = vrot.lane.b32.xlu1 %v32610_v0, %s32534_s24  ;;  %5147 = vrot.lane.b32.xlu0 %v32631_v4, %s32534_s24  ;;  %v2860_v52 = vpop.permute.xlu1 %2859  ;;  %v2858_v53 = vpop.permute.xlu0 %2857 }
  0xf9   :  { %v2881_v54 = vsel %vm2875_vm5, %v2856_v48, %v2858_v53  ;;  %3113 = vmatprep.mubr.f32.mxu1 %v39389_v2  ;;  %v2882_v59 = vsel %vm2875_vm5, %v2858_v53, %v2860_v52  ;;  %v33256_v48 = vld [vmem:[%s39382_s0 + $0x70] sm:$0xff] }
  0xfa   :  { %3079 = vmatprep.subr.mxu1 %v2881_v54  ;;  %v33273_v54 = vld [vmem:[%s39382_s0 + $0x10] sm:$0xff] }
  0xfb   :  { %3080 = vmatpush1.msra.mxu1 %v2880_v55  ;;  %v33280_v55 = vld [vmem:[%s39382_s0 + $0x8] sm:$0xff] }
  0xfc   :  { %5153 = vrot.lane.b32.xlu1 %v32645_v6, %s32534_s24  ;;  %5151 = vrot.lane.b32.xlu0 %v32626_v3, %s32534_s24  ;;  %v2864_v56 = vpop.permute.xlu1 %2863  ;;  %v2862_v57 = vpop.permute.xlu0 %2861 }
  0xfd   :  { %v2883_v58 = vsel %vm2875_vm5, %v2860_v52, %v2862_v57  ;;  %32025 = vmatmul.mubr.msk.f32.vlgmr.msra.gmra.mxu1 %vm117_vm1, %v32022_v50  ;;  %v2884_v63 = vsel %vm2875_vm5, %v2862_v57, %v2864_v56 }
  0xfe   :  { %3150 = vmatprep.subr.mxu0 %v2883_v58  ;;  %3255 = vmatprep.mubr.f32.mxu1 %v39389_v2  ;;  %v33287_v58 = vld [vmem:[%s39383_s2 + $0x38] sm:$0xff] }
  0xff   :  { %3151 = vmatpush1.msra.mxu0 %v2882_v59 }
 0x100   :  { %5155 = vrot.lane.b32.xlu1 %v32640_v5, %s32534_s24  ;;  %5145 = vrot.lane.b32.xlu0 %v32615_v1, %s32534_s24  ;;  %v2868_v60 = vpop.permute.xlu1 %2867  ;;  %v2866_v61 = vpop.permute.xlu0 %2865 }
 0x101   :  { %v2885_v62 = vsel %vm2875_vm5, %v2864_v56, %v2866_v61  ;;  %32026 = vmatmul.mubr.msk.f32.vlgmr.msra.gmra.mxu0 %vm117_vm1, %v32022_v50  ;;  %v2886_v18 = vsel %vm2875_vm5, %v2866_v61, %v2868_v60  ;;  %v33302_v61 = vld [vmem:[%s39382_s0 + $0x18] sm:$0xff] }
 0x102   :  { %3221 = vmatprep.subr.mxu1 %v2885_v62  ;;  %3326 = vmatprep.mubr.f32.mxu0 %v39389_v2 }
 0x103   :  { %3222 = vmatpush1.msra.mxu1 %v2884_v63 }
 0x104   :  { %5159 = vrot.lane.b32.xlu1 %v32654_v7, %s32534_s24  ;;  %5157 = vrot.lane.b32.xlu0 %v32659_v8, %s32534_s24  ;;  %v2872_v5 = vpop.permute.xlu1 %2871  ;;  %v2870_v16 = vpop.permute.xlu0 %2869 }
 0x105   :  { %v2887_v17 = vsel %vm2875_vm5, %v2868_v60, %v2870_v16  ;;  %32027 = vmatmul.mubr.msk.f32.vlgmr.msra.gmra.mxu1 %vm117_vm1, %v32022_v50  ;;  %v2888_v21 = vsel %vm2875_vm5, %v2870_v16, %v2872_v5  ;;  %v33295_v60 = vld [vmem:[%s39382_s0 + $0x20] sm:$0xff] }
 0x106   :  { %3292 = vmatprep.subr.mxu0 %v2887_v17  ;;  %3397 = vmatprep.mubr.f32.mxu1 %v39389_v2  ;;  %v33316_v16 = vld [vmem:[%s39382_s0] sm:$0xff] }
 0x107   :  { %3293 = vmatpush1.msra.mxu0 %v2886_v18 }
 0x108   :  { %5163 = vrot.lane.b32.xlu1 %v32668_v9, %s32534_s24  ;;  %5161 = vrot.lane.b32.xlu0 %v32673_v10, %s32534_s24  ;;  %v3423_v7 = vpop.permute.xlu1 %3422  ;;  %v2874_v19 = vpop.permute.xlu0 %2873 }
 0x109   :  { %v2889_v20 = vsel %vm2875_vm5, %v2872_v5, %v2874_v19  ;;  %32028 = vmatmul.mubr.msk.f32.vlgmr.msra.gmra.mxu0 %vm117_vm1, %v32022_v50  ;;  %vm10379_vm5 = vcmask 457728  }
 0x10a   :  { %3363 = vmatprep.subr.mxu1 %v2889_v20  ;;  %3546 = vmatprep.mubr.f32.mxu0 %v39389_v2  ;;  %v33329_v20 = vld [vmem:[%s39382_s0 + $0x30] sm:$0xff] }
 0x10b   :  { %3364 = vmatpush1.msra.mxu1 %v2888_v21 }
 0x10c   :  { %5167 = vrot.lane.b32.xlu1 %v32682_v11, %s32534_s24  ;;  %5165 = vrot.lane.b32.xlu0 %v32687_v12, %s32534_s24  ;;  %v33155_v11 = vld [vmem:[%s39383_s2 + $0x30] sm:$0xff] }
 0x10d   :  { %32029 = vmatmul.mubr.msk.f32.vlgmr.msra.gmra.mxu1 %vm117_vm1, %v32022_v50 }
 0x10e   :  { %v3421_v9 = vpop.permute.xlu1 %3420  ;;  %v3425_v10 = vpop.permute.xlu0 %3424  ;;  %3617 = vmatprep.mubr.f32.mxu1 %v39389_v2 }
 0x10f   :  { %v3451_v22 = vsel %vm3450_vm6, %v3421_v9, %v3423_v7  ;;  %v3452_v23 = vsel %vm3450_vm6, %v3423_v7, %v3425_v10 }
 0x110   :  { %5171 = vrot.lane.b32.xlu1 %v32696_v13, %s32534_s24  ;;  %5169 = vrot.lane.b32.xlu0 %v32701_v14, %s32534_s24 }
 0x111   :  { %3512 = vmatprep.subr.mxu0 %v3452_v23 }
 0x112   :  { %3513 = vmatpush1.msra.mxu0 %v3451_v22 }
 0x113   :  { %32031 = vmatmul.mubr.msk.f32.vlgmr.msra.gmra.mxu0 %vm117_vm1, %v33155_v11 }
 0x114   :  { %5722 = vrot.lane.b32.xlu1 %v32631_v4, %s32535_s28  ;;  %5173 = vrot.lane.b32.xlu0 %v32710_v15, %s32534_s24 }
 0x115   :  { %v3429_v12 = vpop.permute.xlu1 %3428  ;;  %v3427_v13 = vpop.permute.xlu0 %3426  ;;  %3688 = vmatprep.mubr.f32.mxu0 %v39389_v2 }
 0x116   :  { %v3454_v14 = vsel %vm3450_vm6, %v3427_v13, %v3429_v12  ;;  %v3453_v24 = vsel %vm3450_vm6, %v3425_v10, %v3427_v13 }
 0x117   :  { %3583 = vmatprep.subr.mxu1 %v3454_v14 }
 0x118   :  { %5720 = vrot.lane.b32.xlu1 %v32615_v1, %s32535_s28  ;;  %5724 = vrot.lane.b32.xlu0 %v32610_v0, %s32535_s28 }
 0x119   :  { %3584 = vmatpush1.msra.mxu1 %v3453_v24  ;;  %v3433_v4 = vpop.permute.xlu1 %3432 }
 0x11a   :  { %v3431_v25 = vpop.permute.xlu0 %3430  ;;  %32032 = vmatmul.mubr.msk.f32.vlgmr.msra.gmra.mxu1 %vm117_vm1, %v33155_v11 }
 0x11b   :  { %v3456_v15 = vsel %vm3450_vm6, %v3431_v25, %v3433_v4  ;;  %v3455_v26 = vsel %vm3450_vm6, %v3429_v12, %v3431_v25  ;;  %3759 = vmatprep.mubr.f32.mxu1 %v39389_v2 }
 0x11c   :  { %5728 = vrot.lane.b32.xlu1 %v32645_v6, %s32535_s28  ;;  %5726 = vrot.lane.b32.xlu0 %v32626_v3, %s32535_s28  ;;  %v33188_v6 = vld [vmem:[%s39382_s0 + $0x28] sm:$0xff] }
 0x11d   :  { %3654 = vmatprep.subr.mxu0 %v3456_v15 }
 0x11e   :  { %3655 = vmatpush1.msra.mxu0 %v3455_v26  ;;  %v3437_v0 = vpop.permute.xlu1 %3436  ;;  %v3435_v1 = vpop.permute.xlu0 %3434 }
 0x11f   :  { %v3458_v27 = vsel %vm3450_vm6, %v3435_v1, %v3437_v0  ;;  %v3457_v28 = vsel %vm3450_vm6, %v3433_v4, %v3435_v1  ;;  %32033 = vmatmul.mubr.msk.f32.vlgmr.msra.gmra.mxu0 %vm117_vm1, %v33155_v11 }
 0x120   :  { %5732 = vrot.lane.b32.xlu1 %v32659_v8, %s32535_s28  ;;  %5730 = vrot.lane.b32.xlu0 %v33188_v6, %s32535_s28  ;;  %v33200_v8 = vld [vmem:[%s39382_s0 + $0x40] sm:$0xff] }
 0x121   :  { %3725 = vmatprep.subr.mxu1 %v3458_v27  ;;  %3830 = vmatprep.mubr.f32.mxu0 %v39389_v2 }
 0x122   :  { %3726 = vmatpush1.msra.mxu1 %v3457_v28  ;;  %v3441_v3 = vpop.permute.xlu1 %3440  ;;  %v3439_v29 = vpop.permute.xlu0 %3438  ;;  %v33373_v28 = vld [vmem:[%s39383_s2 + $0x40] sm:$0xff] }
 0x123   :  { %v3460_v30 = vsel %vm3450_vm6, %v3439_v29, %v3441_v3  ;;  %v3459_v31 = vsel %vm3450_vm6, %v3437_v0, %v3439_v29  ;;  %32034 = vmatmul.mubr.msk.f32.vlgmr.msra.gmra.mxu1 %vm117_vm1, %v33155_v11 }
 0x124   :  { %5736 = vrot.lane.b32.xlu1 %v33200_v8, %s32535_s28  ;;  %5734 = vrot.lane.b32.xlu0 %v33207_v32, %s32535_s28 }
 0x125   :  { %3796 = vmatprep.subr.mxu0 %v3460_v30  ;;  %3901 = vmatprep.mubr.f32.mxu1 %v39389_v2 }
 0x126   :  { %3797 = vmatpush1.msra.mxu0 %v3459_v31  ;;  %v3445_v33 = vpop.permute.xlu1 %3444  ;;  %v3443_v34 = vpop.permute.xlu0 %3442 }
 0x127   :  { %v3462_v35 = vsel %vm3450_vm6, %v3443_v34, %v3445_v33  ;;  %v3461_v36 = vsel %vm3450_vm6, %v3441_v3, %v3443_v34  ;;  %32035 = vmatmul.mubr.msk.f32.vlgmr.msra.gmra.mxu0 %vm117_vm1, %v33155_v11 }
 0x128   :  { %5740 = vrot.lane.b32.xlu1 %v33219_v37, %s32535_s28  ;;  %5738 = vrot.lane.b32.xlu0 %v33226_v38, %s32535_s28 }
 0x129   :  { %3867 = vmatprep.subr.mxu1 %v3462_v35  ;;  %3972 = vmatprep.mubr.f32.mxu0 %v39389_v2 }
 0x12a   :  { %3868 = vmatpush1.msra.mxu1 %v3461_v36  ;;  %v3449_v39 = vpop.permute.xlu1 %3448  ;;  %v3447_v40 = vpop.permute.xlu0 %3446 }
 0x12b   :  { %v3464_v41 = vsel %vm3450_vm6, %v3447_v40, %v3449_v39  ;;  %v3463_v42 = vsel %vm3450_vm6, %v3445_v33, %v3447_v40  ;;  %32036 = vmatmul.mubr.msk.f32.vlgmr.msra.gmra.mxu1 %vm117_vm1, %v33155_v11  ;;  %vm10954_vm6 = vcmask 449536  }
 0x12c   :  { %5744 = vrot.lane.b32.xlu1 %v33238_v43, %s32535_s28  ;;  %5742 = vrot.lane.b32.xlu0 %v33245_v44, %s32535_s28 }
 0x12d   :  { %3938 = vmatprep.subr.mxu0 %v3464_v41  ;;  %4121 = vmatprep.mubr.f32.mxu1 %v39389_v2 }
 0x12e   :  { %3939 = vmatpush1.msra.mxu0 %v3463_v42  ;;  %v4000_v45 = vpop.permute.xlu1 %3999  ;;  %v3998_v46 = vpop.permute.xlu0 %3997 }
 0x12f   :  { %v4027_v47 = vsel %vm4025_vm7, %v3998_v46, %v4000_v45  ;;  %32037 = vmatmul.mubr.msk.f32.vlgmr.msra.gmra.mxu0 %vm117_vm1, %v33155_v11 }
 0x130   :  { %5748 = vrot.lane.b32.xlu1 %v33256_v48, %s32535_s28  ;;  %5746 = vrot.lane.b32.xlu0 %v33263_v49, %s32535_s28 }
 0x131   :  { %4087 = vmatprep.subr.mxu1 %v4027_v47  ;;  %4192 = vmatprep.mubr.f32.mxu0 %v39389_v2 }
 0x132   :  { %v4004_v50 = vpop.permute.xlu1 %4003  ;;  %v4002_v51 = vpop.permute.xlu0 %4001 }
 0x133   :  { %v4029_v52 = vsel %vm4025_vm7, %v4002_v51, %v4004_v50  ;;  %v4028_v53 = vsel %vm4025_vm7, %v4000_v45, %v4002_v51 }
 0x134   :  { %6299 = vrot.lane.b32.xlu1 %v33273_v54, %s32536_s8  ;;  %6297 = vrot.lane.b32.xlu0 %v33280_v55, %s32536_s8 }
 0x135   :  { %4158 = vmatprep.subr.mxu0 %v4029_v52 }
 0x136   :  { %4159 = vmatpush1.msra.mxu0 %v4028_v53  ;;  %v4006_v56 = vpop.permute.xlu1 %4005  ;;  %v3996_v57 = vpop.permute.xlu0 %3995 }
 0x137   :  { %v4026_v59 = vsel %vm4025_vm7, %v3996_v57, %v3998_v46  ;;  %32040 = vmatmul.mubr.msk.f32.vlgmr.msra.gmra.mxu0 %vm117_vm1, %v33287_v58  ;;  %v4030_v17 = vsel %vm4025_vm7, %v4004_v50, %v4006_v56 }
 0x138   :  { %6303 = vrot.lane.b32.xlu1 %v33295_v60, %s32536_s8  ;;  %6301 = vrot.lane.b32.xlu0 %v33302_v61, %s32536_s8 }
 0x139   :  { %4088 = vmatpush1.msra.mxu1 %v4026_v59  ;;  %4334 = vmatprep.mubr.f32.mxu0 %v39389_v2 }
 0x13a   :  { %v4010_v62 = vpop.permute.xlu1 %4009  ;;  %v4008_v63 = vpop.permute.xlu0 %4007  ;;  %32039 = vmatmul.mubr.msk.f32.vlgmr.msra.gmra.mxu1 %vm117_vm1, %v33287_v58 }
 0x13b   :  { %v4031_v5 = vsel %vm4025_vm7, %v4006_v56, %v4008_v63  ;;  %4263 = vmatprep.mubr.f32.mxu1 %v39389_v2  ;;  %v4032_v21 = vsel %vm4025_vm7, %v4008_v63, %v4010_v62 }
 0x13c   :  { %6305 = vrot.lane.b32.xlu1 %v33188_v6, %s32536_s8  ;;  %6295 = vrot.lane.b32.xlu0 %v33316_v16, %s32536_s8 }
 0x13d   :  { %4229 = vmatprep.subr.mxu1 %v4031_v5 }
 0x13e   :  { %4230 = vmatpush1.msra.mxu1 %v4030_v17  ;;  %v4014_v18 = vpop.permute.xlu1 %4013  ;;  %v4012_v7 = vpop.permute.xlu0 %4011 }
 0x13f   :  { %v4033_v19 = vsel %vm4025_vm7, %v4010_v62, %v4012_v7  ;;  %32041 = vmatmul.mubr.msk.f32.vlgmr.msra.gmra.mxu1 %vm117_vm1, %v33287_v58  ;;  %v4034_v23 = vsel %vm4025_vm7, %v4012_v7, %v4014_v18 }
 0x140   :  { %6309 = vrot.lane.b32.xlu1 %v33207_v32, %s32536_s8  ;;  %6307 = vrot.lane.b32.xlu0 %v33329_v20, %s32536_s8 }
 0x141   :  { %4300 = vmatprep.subr.mxu0 %v4033_v19  ;;  %4405 = vmatprep.mubr.f32.mxu1 %v39389_v2 }
 0x142   :  { %4301 = vmatpush1.msra.mxu0 %v4032_v21  ;;  %v4018_v9 = vpop.permute.xlu1 %4017  ;;  %v4016_v10 = vpop.permute.xlu0 %4015 }
 0x143   :  { %v4035_v22 = vsel %vm4025_vm7, %v4014_v18, %v4016_v10  ;;  %32042 = vmatmul.mubr.msk.f32.vlgmr.msra.gmra.mxu0 %vm117_vm1, %v33287_v58  ;;  %v4036_v14 = vsel %vm4025_vm7, %v4016_v10, %v4018_v9 }
 0x144   :  { %6313 = vrot.lane.b32.xlu1 %v33226_v38, %s32536_s8  ;;  %6311 = vrot.lane.b32.xlu0 %v33200_v8, %s32536_s8 }
 0x145   :  { %4371 = vmatprep.subr.mxu1 %v4035_v22  ;;  %4476 = vmatprep.mubr.f32.mxu0 %v39389_v2  ;;  %v33447_v22 = vld [vmem:[%s39383_s2 + $0x48] sm:$0xff] }
 0x146   :  { %4372 = vmatpush1.msra.mxu1 %v4034_v23  ;;  %v4022_v11 = vpop.permute.xlu1 %4021  ;;  %v4020_v12 = vpop.permute.xlu0 %4019 }
 0x147   :  { %v4037_v13 = vsel %vm4025_vm7, %v4018_v9, %v4020_v12  ;;  %32043 = vmatmul.mubr.msk.f32.vlgmr.msra.gmra.mxu1 %vm117_vm1, %v33287_v58  ;;  %v4038_v15 = vsel %vm4025_vm7, %v4020_v12, %v4022_v11 }
 0x148   :  { %6317 = vrot.lane.b32.xlu1 %v33245_v44, %s32536_s8  ;;  %6315 = vrot.lane.b32.xlu0 %v33219_v37, %s32536_s8 }
 0x149   :  { %4442 = vmatprep.subr.mxu0 %v4037_v13  ;;  %4547 = vmatprep.mubr.f32.mxu1 %v39389_v2 }
 0x14a   :  { %4443 = vmatpush1.msra.mxu0 %v4036_v14  ;;  %v4573_v24 = vpop.permute.xlu1 %4572  ;;  %v4024_v4 = vpop.permute.xlu0 %4023 }
 0x14b   :  { %v4039_v25 = vsel %vm4025_vm7, %v4022_v11, %v4024_v4  ;;  %32044 = vmatmul.mubr.msk.f32.vlgmr.msra.gmra.mxu0 %vm117_vm1, %v33287_v58  ;;  %vm11529_vm7 = vcmask 441344  }
 0x14c   :  { %6321 = vrot.lane.b32.xlu1 %v33263_v49, %s32536_s8  ;;  %6319 = vrot.lane.b32.xlu0 %v33238_v43, %s32536_s8 }
 0x14d   :  { %4513 = vmatprep.subr.mxu1 %v4039_v25  ;;  %4696 = vmatprep.mubr.f32.mxu0 %v39389_v2 }
 0x14e   :  { %4514 = vmatpush1.msra.mxu1 %v4038_v15  ;;  %v4571_v26 = vpop.permute.xlu1 %4570  ;;  %v4575_v0 = vpop.permute.xlu0 %4574 }
 0x14f   :  { %v4601_v1 = vsel %vm4600_vm8, %v4571_v26, %v4573_v24  ;;  %v4602_v27 = vsel %vm4600_vm8, %v4573_v24, %v4575_v0  ;;  %32045 = vmatmul.mubr.msk.f32.vlgmr.msra.gmra.mxu1 %vm117_vm1, %v33287_v58 }
 0x150   :  { %6872 = vrot.lane.b32.xlu1 %v33280_v55, %s32537_s21  ;;  %6323 = vrot.lane.b32.xlu0 %v33256_v48, %s32536_s8  ;;  %s32539_s8 = smov 16  }
 0x151   :  { %4662 = vmatprep.subr.mxu0 %v4602_v27  ;;  %4767 = vmatprep.mubr.f32.mxu1 %v39389_v2 }
 0x152   :  { %4663 = vmatpush1.msra.mxu0 %v4601_v1  ;;  %v4579_v3 = vpop.permute.xlu1 %4578  ;;  %v4577_v29 = vpop.permute.xlu0 %4576 }
 0x153   :  { %v4604_v30 = vsel %vm4600_vm8, %v4577_v29, %v4579_v3  ;;  %v4603_v31 = vsel %vm4600_vm8, %v4575_v0, %v4577_v29  ;;  %32047 = vmatmul.mubr.msk.f32.vlgmr.msra.gmra.mxu0 %vm117_vm1, %v33373_v28 }
 0x154   :  { %6870 = vrot.lane.b32.xlu1 %v33316_v16, %s32537_s21  ;;  %6874 = vrot.lane.b32.xlu0 %v33273_v54, %s32537_s21 }
 0x155   :  { %4733 = vmatprep.subr.mxu1 %v4604_v30  ;;  %4838 = vmatprep.mubr.f32.mxu0 %v39389_v2 }
 0x156   :  { %4734 = vmatpush1.msra.mxu1 %v4603_v31  ;;  %v4583_v33 = vpop.permute.xlu1 %4582  ;;  %v4581_v34 = vpop.permute.xlu0 %4580 }
 0x157   :  { %v4606_v35 = vsel %vm4600_vm8, %v4581_v34, %v4583_v33  ;;  %v4605_v36 = vsel %vm4600_vm8, %v4579_v3, %v4581_v34  ;;  %32048 = vmatmul.mubr.msk.f32.vlgmr.msra.gmra.mxu1 %vm117_vm1, %v33373_v28 }
 0x158   :  { %6878 = vrot.lane.b32.xlu1 %v33295_v60, %s32537_s21  ;;  %6876 = vrot.lane.b32.xlu0 %v33302_v61, %s32537_s21 }
 0x159   :  { %4804 = vmatprep.subr.mxu0 %v4606_v35  ;;  %4909 = vmatprep.mubr.f32.mxu1 %v39389_v2 }
 0x15a   :  { %4805 = vmatpush1.msra.mxu0 %v4605_v36  ;;  %v4587_v39 = vpop.permute.xlu1 %4586  ;;  %v4585_v40 = vpop.permute.xlu0 %4584 }
 0x15b   :  { %v4608_v41 = vsel %vm4600_vm8, %v4585_v40, %v4587_v39  ;;  %v4607_v42 = vsel %vm4600_vm8, %v4583_v33, %v4585_v40  ;;  %32049 = vmatmul.mubr.msk.f32.vlgmr.msra.gmra.mxu0 %vm117_vm1, %v33373_v28 }
 0x15c   :  { %6882 = vrot.lane.b32.xlu1 %v33329_v20, %s32537_s21  ;;  %6880 = vrot.lane.b32.xlu0 %v33188_v6, %s32537_s21 }
 0x15d   :  { %4875 = vmatprep.subr.mxu1 %v4608_v41  ;;  %4980 = vmatprep.mubr.f32.mxu0 %v39389_v2 }
 0x15e   :  { %4876 = vmatpush1.msra.mxu1 %v4607_v42  ;;  %v4591_v45 = vpop.permute.xlu1 %4590  ;;  %v4589_v46 = vpop.permute.xlu0 %4588  ;;  %v33513_v42 = vld [vmem:[%s39383_s2 + $0x50] sm:$0xff] }
 0x15f   :  { %v4610_v47 = vsel %vm4600_vm8, %v4589_v46, %v4591_v45  ;;  %v4609_v50 = vsel %vm4600_vm8, %v4587_v39, %v4589_v46  ;;  %32050 = vmatmul.mubr.msk.f32.vlgmr.msra.gmra.mxu1 %vm117_vm1, %v33373_v28 }
 0x160   :  { %6886 = vrot.lane.b32.xlu1 %v33200_v8, %s32537_s21  ;;  %6884 = vrot.lane.b32.xlu0 %v33207_v32, %s32537_s21 }
 0x161   :  { %4946 = vmatprep.subr.mxu0 %v4610_v47  ;;  %5051 = vmatprep.mubr.f32.mxu1 %v39389_v2 }
 0x162   :  { %4947 = vmatpush1.msra.mxu0 %v4609_v50  ;;  %v4595_v51 = vpop.permute.xlu1 %4594  ;;  %v4593_v52 = vpop.permute.xlu0 %4592 }
 0x163   :  { %v4612_v53 = vsel %vm4600_vm8, %v4593_v52, %v4595_v51  ;;  %v4611_v56 = vsel %vm4600_vm8, %v4591_v45, %v4593_v52  ;;  %32051 = vmatmul.mubr.msk.f32.vlgmr.msra.gmra.mxu0 %vm117_vm1, %v33373_v28 }
 0x164   :  { %6890 = vrot.lane.b32.xlu1 %v33219_v37, %s32537_s21  ;;  %6888 = vrot.lane.b32.xlu0 %v33226_v38, %s32537_s21 }
 0x165   :  { %5017 = vmatprep.subr.mxu1 %v4612_v53  ;;  %5122 = vmatprep.mubr.f32.mxu0 %v39389_v2 }
 0x166   :  { %5018 = vmatpush1.msra.mxu1 %v4611_v56  ;;  %v4599_v57 = vpop.permute.xlu1 %4598  ;;  %v4597_v58 = vpop.permute.xlu0 %4596 }
 0x167   :  { %v4614_v59 = vsel %vm4600_vm8, %v4597_v58, %v4599_v57  ;;  %v4613_v62 = vsel %vm4600_vm8, %v4595_v51, %v4597_v58  ;;  %32052 = vmatmul.mubr.msk.f32.vlgmr.msra.gmra.mxu1 %vm117_vm1, %v33373_v28  ;;  %v33529_v57 = vpop.f32.mrf.mxu0  ;;  %vm12104_vm8 = vcmask 375808  }
 0x168   :  { %6894 = vrot.lane.b32.xlu1 %v33238_v43, %s32537_s21  ;;  %6892 = vrot.lane.b32.xlu0 %v33245_v44, %s32537_s21 }
 0x169   :  { %5088 = vmatprep.subr.mxu0 %v4614_v59  ;;  %5271 = vmatprep.mubr.f32.mxu1 %v39389_v2  ;;  %v33536_v58 = vpop.f32.mrf.mxu0 }
 0x16a   :  { %5089 = vmatpush1.msra.mxu0 %v4613_v62  ;;  %v5150_v63 = vpop.permute.xlu1 %5149  ;;  %v5148_v5 = vpop.permute.xlu0 %5147 }
 0x16b   :  { %v5177_v17 = vsel %vm5175_vm9, %v5148_v5, %v5150_v63  ;;  %32053 = vmatmul.mubr.msk.f32.vlgmr.msra.gmra.mxu0 %vm117_vm1, %v33373_v28 }
 0x16c   :  { %6898 = vrot.lane.b32.xlu1 %v33256_v48, %s32537_s21  ;;  %6896 = vrot.lane.b32.xlu0 %v33263_v49, %s32537_s21 }
 0x16d   :  { %5237 = vmatprep.subr.mxu1 %v5177_v17  ;;  %5342 = vmatprep.mubr.f32.mxu0 %v39389_v2  ;;  %v33542_v17 = vpop.f32.mrf.mxu0 }
 0x16e   :  { %v5154_v18 = vpop.permute.xlu1 %5153  ;;  %v5152_v7 = vpop.permute.xlu0 %5151 }
 0x16f   :  { %v5179_v19 = vsel %vm5175_vm9, %v5152_v7, %v5154_v18  ;;  %v5178_v21 = vsel %vm5175_vm9, %v5150_v63, %v5152_v7  ;;  %v258_v7 = vpop.f32.mrf.mxu1 }
 0x170   :  { %7449 = vrot.lane.b32.xlu1 %v33273_v54, %s32538_s26  ;;  %7447 = vrot.lane.b32.xlu0 %v33280_v55, %s32538_s26 }
 0x171   :  { %5308 = vmatprep.subr.mxu0 %v5179_v19 }
 0x172   :  { %5309 = vmatpush1.msra.mxu0 %v5178_v21  ;;  %v5156_v9 = vpop.permute.xlu1 %5155  ;;  %v5146_v10 = vpop.permute.xlu0 %5145 }
 0x173   :  { %v5176_v23 = vsel %vm5175_vm9, %v5146_v10, %v5148_v5  ;;  %32056 = vmatmul.mubr.msk.f32.vlgmr.msra.gmra.mxu0 %vm117_vm1, %v33447_v22  ;;  %v5180_v14 = vsel %vm5175_vm9, %v5154_v18, %v5156_v9  ;;  %v33549_v18 = vpop.f32.mrf.mxu0 }
 0x174   :  { %7453 = vrot.lane.b32.xlu1 %v33295_v60, %s32538_s26  ;;  %7451 = vrot.lane.b32.xlu0 %v33302_v61, %s32538_s26 }
 0x175   :  { %5238 = vmatpush1.msra.mxu1 %v5176_v23  ;;  %5484 = vmatprep.mubr.f32.mxu0 %v39389_v2  ;;  %v33557_v23 = vpop.f32.mrf.mxu1 }
 0x176   :  { %v5160_v11 = vpop.permute.xlu1 %5159  ;;  %v5158_v12 = vpop.permute.xlu0 %5157  ;;  %32055 = vmatmul.mubr.msk.f32.vlgmr.msra.gmra.mxu1 %vm117_vm1, %v33447_v22 }
 0x177   :  { %v5181_v13 = vsel %vm5175_vm9, %v5156_v9, %v5158_v12  ;;  %5413 = vmatprep.mubr.f32.mxu1 %v39389_v2  ;;  %v5182_v15 = vsel %vm5175_vm9, %v5158_v12, %v5160_v11  ;;  %v400_v12 = vpop.f32.mrf.mxu1 }
 0x178   :  { %7455 = vrot.lane.b32.xlu1 %v33188_v6, %s32538_s26  ;;  %7445 = vrot.lane.b32.xlu0 %v33316_v16, %s32538_s26 }
 0x179   :  { %5379 = vmatprep.subr.mxu1 %v5181_v13 }
 0x17a   :  { %5380 = vmatpush1.msra.mxu1 %v5180_v14  ;;  %v5164_v24 = vpop.permute.xlu1 %5163  ;;  %v5162_v4 = vpop.permute.xlu0 %5161 }
 0x17b   :  { %v5183_v25 = vsel %vm5175_vm9, %v5160_v11, %v5162_v4  ;;  %32057 = vmatmul.mubr.msk.f32.vlgmr.msra.gmra.mxu1 %vm117_vm1, %v33447_v22  ;;  %v5184_v27 = vsel %vm5175_vm9, %v5162_v4, %v5164_v24 }
 0x17c   :  { %7459 = vrot.lane.b32.xlu1 %v33207_v32, %s32538_s26  ;;  %7457 = vrot.lane.b32.xlu0 %v33329_v20, %s32538_s26 }
 0x17d   :  { %5450 = vmatprep.subr.mxu0 %v5183_v25  ;;  %5555 = vmatprep.mubr.f32.mxu1 %v39389_v2 }
 0x17e   :  { %5451 = vmatpush1.msra.mxu0 %v5182_v15  ;;  %v5168_v26 = vpop.permute.xlu1 %5167  ;;  %v5166_v0 = vpop.permute.xlu0 %5165 }
 0x17f   :  { %v5185_v1 = vsel %vm5175_vm9, %v5164_v24, %v5166_v0  ;;  %32058 = vmatmul.mubr.msk.f32.vlgmr.msra.gmra.mxu0 %vm117_vm1, %v33447_v22  ;;  %v5186_v30 = vsel %vm5175_vm9, %v5166_v0, %v5168_v26  ;;  %v33572_v15 = vpop.f32.mrf.mxu1 }
 0x180   :  { %7463 = vrot.lane.b32.xlu1 %v33226_v38, %s32538_s26  ;;  %7461 = vrot.lane.b32.xlu0 %v33200_v8, %s32538_s26 }
 0x181   :  { %5521 = vmatprep.subr.mxu1 %v5185_v1  ;;  %5626 = vmatprep.mubr.f32.mxu0 %v39389_v2  ;;  %v542_v0 = vpop.f32.mrf.mxu1 }
 0x182   :  { %5522 = vmatpush1.msra.mxu1 %v5184_v27  ;;  %v5172_v28 = vpop.permute.xlu1 %5171  ;;  %v5170_v3 = vpop.permute.xlu0 %5169 }
 0x183   :  { %v5187_v29 = vsel %vm5175_vm9, %v5168_v26, %v5170_v3  ;;  %32059 = vmatmul.mubr.msk.f32.vlgmr.msra.gmra.mxu1 %vm117_vm1, %v33447_v22  ;;  %v5188_v35 = vsel %vm5175_vm9, %v5170_v3, %v5172_v28 }
 0x184   :  { %7467 = vrot.lane.b32.xlu1 %v33245_v44, %s32538_s26  ;;  %7465 = vrot.lane.b32.xlu0 %v33219_v37, %s32538_s26 }
 0x185   :  { %5592 = vmatprep.subr.mxu0 %v5187_v29  ;;  %5697 = vmatprep.mubr.f32.mxu1 %v39389_v2 }
 0x186   :  { %5593 = vmatpush1.msra.mxu0 %v5186_v30  ;;  %v5723_v31 = vpop.permute.xlu1 %5722  ;;  %v5174_v33 = vpop.permute.xlu0 %5173 }
 0x187   :  { %v5189_v34 = vsel %vm5175_vm9, %v5172_v28, %v5174_v33  ;;  %32060 = vmatmul.mubr.msk.f32.vlgmr.msra.gmra.mxu0 %vm117_vm1, %v33447_v22  ;;  %v33585_v30 = vpop.f32.mrf.mxu1 }
 0x188   :  { %7471 = vrot.lane.b32.xlu1 %v33263_v49, %s32538_s26  ;;  %7469 = vrot.lane.b32.xlu0 %v33238_v43, %s32538_s26 }
 0x189   :  { %5663 = vmatprep.subr.mxu1 %v5189_v34  ;;  %5846 = vmatprep.mubr.f32.mxu0 %v39389_v2  ;;  %v687_v34 = vpop.f32.mrf.mxu1 }
 0x18a   :  { %5664 = vmatpush1.msra.mxu1 %v5188_v35  ;;  %v5721_v36 = vpop.permute.xlu1 %5720  ;;  %v5725_v39 = vpop.permute.xlu0 %5724 }
 0x18b   :  { %v5751_v40 = vsel %vm5750_vm10, %v5721_v36, %v5723_v31  ;;  %v5752_v41 = vsel %vm5750_vm10, %v5723_v31, %v5725_v39  ;;  %32061 = vmatmul.mubr.msk.f32.vlgmr.msra.gmra.mxu1 %vm117_vm1, %v33447_v22  ;;  %v33555_v22 = vpop.f32.mrf.mxu0 }
 0x18c   :  { %8022 = vrot.lane.b32.xlu1 %v33280_v55, %s32539_s8  ;;  %7473 = vrot.lane.b32.xlu0 %v33256_v48, %s32538_s26 }
 0x18d   :  { %5812 = vmatprep.subr.mxu0 %v5752_v41  ;;  %5917 = vmatprep.mubr.f32.mxu1 %v39389_v2  ;;  %v33564_v11 = vpop.f32.mrf.mxu0 }
 0x18e   :  { %5813 = vmatpush1.msra.mxu0 %v5751_v40  ;;  %v5729_v45 = vpop.permute.xlu1 %5728  ;;  %v5727_v46 = vpop.permute.xlu0 %5726 }
 0x18f   :  { %v5754_v47 = vsel %vm5750_vm10, %v5727_v46, %v5729_v45  ;;  %v5753_v50 = vsel %vm5750_vm10, %v5725_v39, %v5727_v46  ;;  %32063 = vmatmul.mubr.msk.f32.vlgmr.msra.gmra.mxu0 %vm117_vm1, %v33513_v42  ;;  %v33570_v25 = vpop.f32.mrf.mxu0  ;;  %v688_v39 = vadd.f32 %v687_v34, %v33529_v57 }
 0x190   :  { %8020 = vrot.lane.b32.xlu1 %v33316_v16, %s32539_s8  ;;  %8024 = vrot.lane.b32.xlu0 %v33273_v54, %s32539_s8 }
 0x191   :  { %5883 = vmatprep.subr.mxu1 %v5754_v47  ;;  %5988 = vmatprep.mubr.f32.mxu0 %v39389_v2  ;;  %v33579_v26 = vpop.f32.mrf.mxu0 }
 0x192   :  { %5884 = vmatpush1.msra.mxu1 %v5753_v50  ;;  %v5733_v51 = vpop.permute.xlu1 %5732  ;;  %v5731_v52 = vpop.permute.xlu0 %5730  ;;  %39438 = vst [vmem:[#allocation3_spill] sm:$0xff] %v33579_v26 }
 0x193   :  { %v5756_v53 = vsel %vm5750_vm10, %v5731_v52, %v5733_v51  ;;  %v5755_v56 = vsel %vm5750_vm10, %v5729_v45, %v5731_v52  ;;  %32064 = vmatmul.mubr.msk.f32.vlgmr.msra.gmra.mxu1 %vm117_vm1, %v33513_v42  ;;  %v758_v29 = vpop.f32.mrf.mxu0  ;;  %v33600_v45 = vpop.f32.mrf.mxu1 }
 0x194   :  { %8028 = vrot.lane.b32.xlu1 %v33295_v60, %s32539_s8  ;;  %8026 = vrot.lane.b32.xlu0 %v33302_v61, %s32539_s8  ;;  %v33591_v31 = vadd.f32 %v758_v29, %v258_v7 }
 0x195   :  { %5954 = vmatprep.subr.mxu0 %v5756_v53  ;;  %6059 = vmatprep.mubr.f32.mxu1 %v39389_v2  ;;  %v33594_v33 = vpop.f32.mrf.mxu0  ;;  %v829_v50 = vpop.f32.mrf.mxu1 }
 0x196   :  { %5955 = vmatpush1.msra.mxu0 %v5755_v56  ;;  %v5737_v59 = vpop.permute.xlu1 %5736  ;;  %v5735_v62 = vpop.permute.xlu0 %5734 }
 0x197   :  { %v5758_v63 = vsel %vm5750_vm10, %v5735_v62, %v5737_v59  ;;  %v5757_v5 = vsel %vm5750_vm10, %v5733_v51, %v5735_v62  ;;  %32065 = vmatmul.mubr.msk.f32.vlgmr.msra.gmra.mxu0 %vm117_vm1, %v33513_v42  ;;  %v900_v41 = vpop.f32.mrf.mxu0 }
 0x198   :  { %8032 = vrot.lane.b32.xlu1 %v33329_v20, %s32539_s8  ;;  %8030 = vrot.lane.b32.xlu0 %v33188_v6, %s32539_s8  ;;  %v33606_v46 = vadd.f32 %v900_v41, %v400_v12 }
 0x199   :  { %6025 = vmatprep.subr.mxu1 %v5758_v63  ;;  %6130 = vmatprep.mubr.f32.mxu0 %v39389_v2  ;;  %v33609_v47 = vpop.f32.mrf.mxu0 }
 0x19a   :  { %6026 = vmatpush1.msra.mxu1 %v5757_v5  ;;  %v5741_v19 = vpop.permute.xlu1 %5740  ;;  %v5739_v21 = vpop.permute.xlu0 %5738 }
 0x19b   :  { %v5760_v9 = vsel %vm5750_vm10, %v5739_v21, %v5741_v19  ;;  %v5759_v10 = vsel %vm5750_vm10, %v5737_v59, %v5739_v21  ;;  %32066 = vmatmul.mubr.msk.f32.vlgmr.msra.gmra.mxu1 %vm117_vm1, %v33513_v42  ;;  %v1042_v57 = vpop.f32.mrf.mxu0  ;;  %v33614_v59 = vpop.f32.mrf.mxu1 }
 0x19c   :  { %8036 = vrot.lane.b32.xlu1 %v33200_v8, %s32539_s8  ;;  %8034 = vrot.lane.b32.xlu0 %v33207_v32, %s32539_s8  ;;  %v33620_v62 = vadd.f32 %v1042_v57, %v542_v0 }
 0x19d   :  { %6096 = vmatprep.subr.mxu0 %v5760_v9  ;;  %6201 = vmatprep.mubr.f32.mxu1 %v39389_v2  ;;  %v33622_v63 = vpop.f32.mrf.mxu0  ;;  %v971_v5 = vpop.f32.mrf.mxu1 }
 0x19e   :  { %6097 = vmatpush1.msra.mxu0 %v5759_v10  ;;  %v5745_v13 = vpop.permute.xlu1 %5744  ;;  %v5743_v14 = vpop.permute.xlu0 %5742  ;;  %v972_v21 = vadd.f32 %v971_v5, %v33555_v22 }
 0x19f   :  { %v5762_v24 = vsel %vm5750_vm10, %v5743_v14, %v5745_v13  ;;  %v5761_v4 = vsel %vm5750_vm10, %v5741_v19, %v5743_v14  ;;  %32067 = vmatmul.mubr.msk.f32.vlgmr.msra.gmra.mxu0 %vm117_vm1, %v33513_v42  ;;  %v33627_v19 = vld [vmem:[%s39383_s2 + $0x58] sm:$0xff]  ;;  %v1248_v10 = vpop.f32.mrf.mxu0  ;;  %v33633_v12 = vpop.f32.mrf.mxu1 }
 0x1a0   :  { %8040 = vrot.lane.b32.xlu1 %v33219_v37, %s32539_s8  ;;  %8038 = vrot.lane.b32.xlu0 %v33226_v38, %s32539_s8 }
 0x1a1   :  { %6167 = vmatprep.subr.mxu1 %v5762_v24  ;;  %6272 = vmatprep.mubr.f32.mxu0 %v39389_v2  ;;  %v33642_v22 = vpop.f32.mrf.mxu0  ;;  %v1113_v14 = vpop.f32.mrf.mxu1 }
 0x1a2   :  { %6168 = vmatpush1.msra.mxu1 %v5761_v4  ;;  %v5749_v1 = vpop.permute.xlu1 %5748  ;;  %v5747_v27 = vpop.permute.xlu0 %5746  ;;  %39439 = vst [vmem:[#allocation4_spill] sm:$0xff] %v33642_v22  ;;  %v1114_v0 = vadd.f32 %v1113_v14, %v33570_v25 }
 0x1a3   :  { %v5764_v28 = vsel %vm5750_vm10, %v5747_v27, %v5749_v1  ;;  %v5763_v3 = vsel %vm5750_vm10, %v5745_v13, %v5747_v27  ;;  %32068 = vmatmul.mubr.msk.f32.vlgmr.msra.gmra.mxu1 %vm117_vm1, %v33513_v42  ;;  %v33639_v13 = vadd.f32 %v1248_v10, %v688_v39  ;;  %v1390_v27 = vpop.f32.mrf.mxu0 }
 0x1a4   :  { %8044 = vrot.lane.b32.xlu1 %v33238_v43, %s32539_s8  ;;  %8042 = vrot.lane.b32.xlu0 %v33245_v44, %s32539_s8 }
 0x1a5   :  { %6238 = vmatprep.subr.mxu0 %v5764_v28  ;;  %6421 = vmatprep.mubr.f32.mxu1 %v39389_v2  ;;  %v33649_v28 = vpop.f32.mrf.mxu1  ;;  %v33658_v34 = vpop.f32.mrf.mxu0 }
 0x1a6   :  { %6239 = vmatpush1.msra.mxu0 %v5763_v3  ;;  %v6300_v35 = vpop.permute.xlu1 %6299  ;;  %v6298_v36 = vpop.permute.xlu0 %6297  ;;  %39440 = vst [vmem:[#allocation5_spill] sm:$0xff] %v33649_v28  ;;  %39441 = vst [vmem:[#allocation6_spill] sm:$0xff] %v33658_v34 }
 0x1a7   :  { %v6327_v40 = vsel %vm6325_vm11, %v6298_v36, %v6300_v35  ;;  %32069 = vmatmul.mubr.msk.f32.vlgmr.msra.gmra.mxu0 %vm117_vm1, %v33513_v42  ;;  %v830_v42 = vadd.f32 %v829_v50, %v33542_v17  ;;  %v1319_v25 = vpop.f32.mrf.mxu1 }
 0x1a8   :  { %8048 = vrot.lane.b32.xlu1 %v33256_v48, %s32539_s8  ;;  %8046 = vrot.lane.b32.xlu0 %v33263_v49, %s32539_s8  ;;  %v1681_v39 = vadd.f32 %v1319_v25, %v33591_v31 }
 0x1a9   :  { %6387 = vmatprep.subr.mxu1 %v6327_v40  ;;  %6492 = vmatprep.mubr.f32.mxu0 %v39389_v2  ;;  %v33655_v3 = vadd.f32 %v1390_v27, %v830_v42  ;;  %v33664_v41 = vpop.f32.mrf.mxu1 }
 0x1aa   :  { %v6304_v51 = vpop.permute.xlu1 %6303  ;;  %v6302_v52 = vpop.permute.xlu0 %6301  ;;  %39442 = vst [vmem:[#allocation7_spill] sm:$0xff] %v33664_v41 }
 0x1ab   :  { %v6329_v53 = vsel %vm6325_vm11, %v6302_v52, %v6304_v51  ;;  %v6328_v56 = vsel %vm6325_vm11, %v6300_v35, %v6302_v52  ;;  %v1461_v52 = vpop.f32.mrf.mxu1 }
 0x1ac   :  { %8599 = vrot.lane.b32.xlu1 %v33273_v54, %s32540_s11  ;;  %8597 = vrot.lane.b32.xlu0 %v33280_v55, %s32540_s11 }
 0x1ad   :  { %6458 = vmatprep.subr.mxu0 %v6329_v53  ;;  %v33680_v5 = vpop.f32.mrf.mxu1 }
 0x1ae   :  { %6459 = vmatpush1.msra.mxu0 %v6328_v56  ;;  %v6306_v17 = vpop.permute.xlu1 %6305  ;;  %v6296_v7 = vpop.permute.xlu0 %6295  ;;  %v1685_v56 = vadd.f32 %v1461_v52, %v33606_v46  ;;  %39444 = vst [vmem:[#allocation9_spill] sm:$0xff] %v33680_v5 }
 0x1af   :  { %v6326_v9 = vsel %vm6325_vm11, %v6296_v7, %v6298_v36  ;;  %32072 = vmatmul.mubr.msk.f32.vlgmr.msra.gmra.mxu0 %vm117_vm1, %v33627_v19  ;;  %v6330_v29 = vsel %vm6325_vm11, %v6304_v51, %v6306_v17 }
 0x1b0   :  { %8603 = vrot.lane.b32.xlu1 %v33295_v60, %s32540_s11  ;;  %8601 = vrot.lane.b32.xlu0 %v33302_v61, %s32540_s11 }
 0x1b1   :  { %6388 = vmatpush1.msra.mxu1 %v6326_v9  ;;  %6634 = vmatprep.mubr.f32.mxu0 %v39389_v2 }
 0x1b2   :  { %v6310_v24 = vpop.permute.xlu1 %6309  ;;  %v6308_v4 = vpop.permute.xlu0 %6307  ;;  %32071 = vmatmul.mubr.msk.f32.vlgmr.msra.gmra.mxu1 %vm117_vm1, %v33627_v19 }
 0x1b3   :  { %v6331_v1 = vsel %vm6325_vm11, %v6306_v17, %v6308_v4  ;;  %6563 = vmatprep.mubr.f32.mxu1 %v39389_v2  ;;  %v6332_v51 = vsel %vm6325_vm11, %v6308_v4, %v6310_v24 }
 0x1b4   :  { %8605 = vrot.lane.b32.xlu1 %v33188_v6, %s32540_s11  ;;  %8595 = vrot.lane.b32.xlu0 %v33316_v16, %s32540_s11  ;;  %v1532_v6 = vpop.f32.mrf.mxu0 }
 0x1b5   :  { %6529 = vmatprep.subr.mxu1 %v6331_v1  ;;  %v33670_v50 = vadd.f32 %v1532_v6, %v972_v21  ;;  %v1603_v21 = vpop.f32.mrf.mxu1 }
 0x1b6   :  { %6530 = vmatpush1.msra.mxu1 %v6330_v29  ;;  %v6314_v35 = vpop.permute.xlu1 %6313  ;;  %v6312_v36 = vpop.permute.xlu0 %6311  ;;  %v1689_v14 = vadd.f32 %v1603_v21, %v33620_v62 }
 0x1b7   :  { %v6333_v40 = vsel %vm6325_vm11, %v6310_v24, %v6312_v36  ;;  %32073 = vmatmul.mubr.msk.f32.vlgmr.msra.gmra.mxu1 %vm117_vm1, %v33627_v19  ;;  %v33674_v31 = vpop.f32.mrf.mxu0  ;;  %v6334_v7 = vsel %vm6325_vm11, %v6312_v36, %v6314_v35  ;;  %v33696_v24 = vpop.f32.mrf.mxu1 }
 0x1b8   :  { %8609 = vrot.lane.b32.xlu1 %v33207_v32, %s32540_s11  ;;  %8607 = vrot.lane.b32.xlu0 %v33329_v20, %s32540_s11  ;;  %39443 = vst [vmem:[#allocation8_spill] sm:$0xff] %v33674_v31  ;;  %39446 = vst [vmem:[#allocation11_spill] sm:$0xff] %v33696_v24 }
 0x1b9   :  { %6600 = vmatprep.subr.mxu0 %v6333_v40  ;;  %6705 = vmatprep.mubr.f32.mxu1 %v39389_v2  ;;  %v1674_v57 = vpop.f32.mrf.mxu0  ;;  %v1823_v1 = vpop.f32.mrf.mxu1 }
 0x1ba   :  { %6601 = vmatpush1.msra.mxu0 %v6332_v51  ;;  %v6318_v42 = vpop.permute.xlu1 %6317  ;;  %v6316_v53 = vpop.permute.xlu0 %6315  ;;  %v33686_v17 = vadd.f32 %v1674_v57, %v1114_v0  ;;  %v2254_v25 = vadd.f32 %v1823_v1, %v33639_v13 }
 0x1bb   :  { %v6335_v32 = vsel %vm6325_vm11, %v6314_v35, %v6316_v53  ;;  %32074 = vmatmul.mubr.msk.f32.vlgmr.msra.gmra.mxu0 %vm117_vm1, %v33627_v19  ;;  %v33690_v46 = vpop.f32.mrf.mxu0  ;;  %v6336_v0 = vsel %vm6325_vm11, %v6316_v53, %v6318_v42  ;;  %v33712_v35 = vpop.f32.mrf.mxu1 }
 0x1bc   :  { %8613 = vrot.lane.b32.xlu1 %v33226_v38, %s32540_s11  ;;  %8611 = vrot.lane.b32.xlu0 %v33200_v8, %s32540_s11  ;;  %39445 = vst [vmem:[#allocation10_spill] sm:$0xff] %v33690_v46  ;;  %39448 = vst [vmem:[#allocation13_spill] sm:$0xff] %v33712_v35 }
 0x1bd   :  { %6671 = vmatprep.subr.mxu1 %v6335_v32  ;;  %6776 = vmatprep.mubr.f32.mxu0 %v39389_v2  ;;  %v1894_v8 = vpop.f32.mrf.mxu0  ;;  %v1965_v40 = vpop.f32.mrf.mxu1 }
 0x1be   :  { %6672 = vmatpush1.msra.mxu1 %v6334_v7  ;;  %v6322_v9 = vpop.permute.xlu1 %6321  ;;  %v6320_v10 = vpop.permute.xlu0 %6319  ;;  %v33702_v4 = vadd.f32 %v1894_v8, %v1681_v39  ;;  %v2258_v52 = vadd.f32 %v1965_v40, %v33655_v3  ;;  %v33738_v3 = vld [vmem:[%s39383_s2 + $0x60] sm:$0xff] }
 0x1bf   :  { %v6337_v38 = vsel %vm6325_vm11, %v6318_v42, %v6320_v10  ;;  %32075 = vmatmul.mubr.msk.f32.vlgmr.msra.gmra.mxu1 %vm117_vm1, %v33627_v19  ;;  %v33706_v62 = vpop.f32.mrf.mxu0  ;;  %v6338_v13 = vsel %vm6325_vm11, %v6320_v10, %v6322_v9  ;;  %v33729_v53 = vpop.f32.mrf.mxu1 }
 0x1c0   :  { %8617 = vrot.lane.b32.xlu1 %v33245_v44, %s32540_s11  ;;  %8615 = vrot.lane.b32.xlu0 %v33219_v37, %s32540_s11  ;;  %39447 = vst [vmem:[#allocation12_spill] sm:$0xff] %v33706_v62  ;;  %39450 = vst [vmem:[#allocation15_spill] sm:$0xff] %v33729_v53 }
 0x1c1   :  { %6742 = vmatprep.subr.mxu0 %v6337_v38  ;;  %6847 = vmatprep.mubr.f32.mxu1 %v39389_v2  ;;  %v2036_v37 = vpop.f32.mrf.mxu0  ;;  %v2107_v32 = vpop.f32.mrf.mxu1 }
 0x1c2   :  { %6743 = vmatpush1.msra.mxu0 %v6336_v0  ;;  %v6873_v27 = vpop.permute.xlu1 %6872  ;;  %v6324_v29 = vpop.permute.xlu0 %6323  ;;  %v33718_v36 = vadd.f32 %v2036_v37, %v1685_v56 }
 0x1c3   :  { %v6339_v44 = vsel %vm6325_vm11, %v6322_v9, %v6324_v29  ;;  %32076 = vmatmul.mubr.msk.f32.vlgmr.msra.gmra.mxu0 %vm117_vm1, %v33627_v19  ;;  %v33722_v39 = vpop.f32.mrf.mxu0  ;;  %v33750_v10 = vpop.f32.mrf.mxu1  ;;  %vm12679_vm11 = vcmask 367616  }
 0x1c4   :  { %8621 = vrot.lane.b32.xlu1 %v33263_v49, %s32540_s11  ;;  %8619 = vrot.lane.b32.xlu0 %v33238_v43, %s32540_s11  ;;  %39449 = vst [vmem:[#allocation14_spill] sm:$0xff] %v33722_v39  ;;  %39452 = vst [vmem:[#allocation17_spill] sm:$0xff] %v33750_v10 }
 0x1c5   :  { %6813 = vmatprep.subr.mxu1 %v6339_v44  ;;  %6996 = vmatprep.mubr.f32.mxu0 %v39389_v2  ;;  %v2178_v42 = vpop.f32.mrf.mxu0  ;;  %v2249_v38 = vpop.f32.mrf.mxu1 }
 0x1c6   :  { %6814 = vmatpush1.msra.mxu1 %v6338_v13  ;;  %v6871_v6 = vpop.permute.xlu1 %6870  ;;  %v6875_v51 = vpop.permute.xlu0 %6874  ;;  %v33740_v56 = vadd.f32 %v2178_v42, %v1689_v14  ;;  %v2266_v1 = vadd.f32 %v2249_v38, %v33686_v17 }
 0x1c7   :  { %v6901_v49 = vsel %vm6900_vm12, %v6871_v6, %v6873_v27  ;;  %v6902_v43 = vsel %vm6900_vm12, %v6873_v27, %v6875_v51  ;;  %32077 = vmatmul.mubr.msk.f32.vlgmr.msra.gmra.mxu1 %vm117_vm1, %v33627_v19  ;;  %v33743_v19 = vpop.f32.mrf.mxu0  ;;  %v33766_v29 = vpop.f32.mrf.mxu1 }
 0x1c8   :  { %9171 = vrot.lane.b32.xlu1 %v33280_v55, %s32541_s14  ;;  %8623 = vrot.lane.b32.xlu0 %v33256_v48, %s32540_s11  ;;  %39451 = vst [vmem:[#allocation16_spill] sm:$0xff] %v33743_v19  ;;  %v2262_v55 = vadd.f32 %v2107_v32, %v33670_v50  ;;  %39454 = vst [vmem:[#allocation19_spill] sm:$0xff] %v33766_v29  ;;  %s32548_s11 = smov 44  }
 0x1c9   :  { %6962 = vmatprep.subr.mxu0 %v6902_v43  ;;  %7067 = vmatprep.mubr.f32.mxu1 %v39389_v2  ;;  %v2398_v9 = vpop.f32.mrf.mxu0  ;;  %v2469_v44 = vpop.f32.mrf.mxu1 }
 0x1ca   :  { %6963 = vmatpush1.msra.mxu0 %v6901_v49  ;;  %v6879_v57 = vpop.permute.xlu1 %6878  ;;  %v6877_v7 = vpop.permute.xlu0 %6876  ;;  %v33756_v14 = vadd.f32 %v2398_v9, %v2254_v25  ;;  %v2831_v40 = vadd.f32 %v2469_v44, %v33702_v4 }
 0x1cb   :  { %v6904_v48 = vsel %vm6900_vm12, %v6877_v7, %v6879_v57  ;;  %v6903_v21 = vsel %vm6900_vm12, %v6875_v51, %v6877_v7  ;;  %32079 = vmatmul.mubr.msk.f32.vlgmr.msra.gmra.mxu0 %vm117_vm1, %v33738_v3  ;;  %v33759_v50 = vpop.f32.mrf.mxu0  ;;  %v33782_v51 = vpop.f32.mrf.mxu1 }
 0x1cc   :  { %9169 = vrot.lane.b32.xlu1 %v33316_v16, %s32541_s14  ;;  %9173 = vrot.lane.b32.xlu0 %v33273_v54, %s32541_s14  ;;  %39453 = vst [vmem:[#allocation18_spill] sm:$0xff] %v33759_v50  ;;  %39456 = vst [vmem:[#allocation21_spill] sm:$0xff] %v33782_v51 }
 0x1cd   :  { %7033 = vmatprep.subr.mxu1 %v6904_v48  ;;  %7138 = vmatprep.mubr.f32.mxu0 %v39389_v2  ;;  %v2540_v54 = vpop.f32.mrf.mxu0  ;;  %v2611_v43 = vpop.f32.mrf.mxu1 }
 0x1ce   :  { %7034 = vmatpush1.msra.mxu1 %v6903_v21  ;;  %v6883_v8 = vpop.permute.xlu1 %6882  ;;  %v6881_v0 = vpop.permute.xlu0 %6880  ;;  %v33772_v25 = vadd.f32 %v2540_v54, %v2258_v52  ;;  %v33789_v52 = vld [vmem:[%s39382_s0 + $0x28] sm:$0xff]  ;;  %v33808_v21 = vld [vmem:[%s39382_s0 + $0x40] sm:$0xff] }
 0x1cf   :  { %v6906_v27 = vsel %vm6900_vm12, %v6881_v0, %v6883_v8  ;;  %v6905_v16 = vsel %vm6900_vm12, %v6879_v57, %v6881_v0  ;;  %32080 = vmatmul.mubr.msk.f32.vlgmr.msra.gmra.mxu1 %vm117_vm1, %v33738_v3  ;;  %v33775_v17 = vpop.f32.mrf.mxu0  ;;  %v33803_v48 = vpop.f32.mrf.mxu1 }
 0x1d0   :  { %9177 = vrot.lane.b32.xlu1 %v33295_v60, %s32541_s14  ;;  %9175 = vrot.lane.b32.xlu0 %v33302_v61, %s32541_s14  ;;  %39455 = vst [vmem:[#allocation20_spill] sm:$0xff] %v33775_v17  ;;  %39458 = vst [vmem:[#allocation23_spill] sm:$0xff] %v33803_v48 }
 0x1d1   :  { %7104 = vmatprep.subr.mxu0 %v6906_v27  ;;  %7209 = vmatprep.mubr.f32.mxu1 %v39389_v2  ;;  %v2682_v61 = vpop.f32.mrf.mxu0 }
 0x1d2   :  { %7105 = vmatpush1.msra.mxu0 %v6905_v16  ;;  %v6887_v37 = vpop.permute.xlu1 %6886  ;;  %v6885_v13 = vpop.permute.xlu0 %6884  ;;  %v33793_v4 = vadd.f32 %v2682_v61, %v2262_v55 }
 0x1d3   :  { %v6908_v6 = vsel %vm6900_vm12, %v6885_v13, %v6887_v37  ;;  %v6907_v60 = vsel %vm6900_vm12, %v6883_v8, %v6885_v13  ;;  %32081 = vmatmul.mubr.msk.f32.vlgmr.msra.gmra.mxu0 %vm117_vm1, %v33738_v3  ;;  %v33796_v49 = vpop.f32.mrf.mxu0  ;;  %v2753_v8 = vpop.f32.mrf.mxu1  ;;  %v33834_v13 = vld [vmem:[%s39382_s0 + $0x50] sm:$0xff] }
 0x1d4   :  { %9181 = vrot.lane.b32.xlu1 %v33329_v20, %s32541_s14  ;;  %9179 = vrot.lane.b32.xlu0 %v33789_v52, %s32541_s14  ;;  %39457 = vst [vmem:[#allocation22_spill] sm:$0xff] %v33796_v49  ;;  %v2835_v20 = vadd.f32 %v2611_v43, %v33718_v36  ;;  %v33815_v36 = vld [vmem:[%s39382_s0 + $0x38] sm:$0xff]  ;;  %v2839_v16 = vadd.f32 %v2753_v8, %v33740_v56  ;;  %v33841_v56 = vld [vmem:[%s39382_s0 + $0x48] sm:$0xff] }
 0x1d5   :  { %7175 = vmatprep.subr.mxu1 %v6908_v6  ;;  %7280 = vmatprep.mubr.f32.mxu0 %v39389_v2  ;;  %v2824_v55 = vpop.f32.mrf.mxu0  ;;  %v33860_v8 = vld [vmem:[%s39382_s0 + $0x60] sm:$0xff] }
 0x1d6   :  { %7176 = vmatpush1.msra.mxu1 %v6907_v60  ;;  %v6891_v42 = vpop.permute.xlu1 %6890  ;;  %v6889_v32 = vpop.permute.xlu0 %6888  ;;  %v33819_v9 = vadd.f32 %v2824_v55, %v2266_v1 }
 0x1d7   :  { %v6910_v57 = vsel %vm6900_vm12, %v6889_v32, %v6891_v42  ;;  %v6909_v7 = vsel %vm6900_vm12, %v6887_v37, %v6889_v32  ;;  %32082 = vmatmul.mubr.msk.f32.vlgmr.msra.gmra.mxu1 %vm117_vm1, %v33738_v3  ;;  %v33822_v38 = vpop.f32.mrf.mxu0  ;;  %v33829_v37 = vpop.f32.mrf.mxu1 }
 0x1d8   :  { %9185 = vrot.lane.b32.xlu1 %v33808_v21, %s32541_s14  ;;  %9183 = vrot.lane.b32.xlu0 %v33815_v36, %s32541_s14  ;;  %39459 = vst [vmem:[#allocation24_spill] sm:$0xff] %v33822_v38  ;;  %39460 = vst [vmem:[#allocation25_spill] sm:$0xff] %v33829_v37  ;;  %v32507_v38 = vld [vmem:[%s39382_s0 + $0x18] sm:$0xff] }
 0x1d9   :  { %7246 = vmatprep.subr.mxu0 %v6910_v57  ;;  %7351 = vmatprep.mubr.f32.mxu1 %v39389_v2  ;;  %v3044_v1 = vpop.f32.mrf.mxu0  ;;  %v2973_v61 = vpop.f32.mrf.mxu1 }
 0x1da   :  { %7247 = vmatpush1.msra.mxu0 %v6909_v7  ;;  %v6895_v0 = vpop.permute.xlu1 %6894  ;;  %v6893_v27 = vpop.permute.xlu0 %6892  ;;  %v33845_v6 = vadd.f32 %v3044_v1, %v2831_v40  ;;  %v3404_v32 = vadd.f32 %v2973_v61, %v33756_v14  ;;  %v33867_v14 = vld [vmem:[%s39382_s0 + $0x58] sm:$0xff] }
 0x1db   :  { %v6912_v54 = vsel %vm6900_vm12, %v6893_v27, %v6895_v0  ;;  %v6911_v44 = vsel %vm6900_vm12, %v6891_v42, %v6893_v27  ;;  %32083 = vmatmul.mubr.msk.f32.vlgmr.msra.gmra.mxu0 %vm117_vm1, %v33738_v3  ;;  %v33848_v60 = vpop.f32.mrf.mxu0  ;;  %v33855_v55 = vpop.f32.mrf.mxu1 }
 0x1dc   :  { %9189 = vrot.lane.b32.xlu1 %v33834_v13, %s32541_s14  ;;  %9187 = vrot.lane.b32.xlu0 %v33841_v56, %s32541_s14  ;;  %39461 = vst [vmem:[#allocation26_spill] sm:$0xff] %v33848_v60  ;;  %39462 = vst [vmem:[#allocation27_spill] sm:$0xff] %v33855_v55 }
 0x1dd   :  { %7317 = vmatprep.subr.mxu1 %v6912_v54  ;;  %7422 = vmatprep.mubr.f32.mxu0 %v39389_v2  ;;  %v3186_v40 = vpop.f32.mrf.mxu0  ;;  %v3115_v54 = vpop.f32.mrf.mxu1 }
 0x1de   :  { %7318 = vmatpush1.msra.mxu1 %v6911_v44  ;;  %v6899_v43 = vpop.permute.xlu1 %6898  ;;  %v6897_v42 = vpop.permute.xlu0 %6896  ;;  %v3408_v61 = vadd.f32 %v3115_v54, %v33772_v25  ;;  %v33894_v25 = vld [vmem:[%s39382_s0 + $0x68] sm:$0xff] }
 0x1df   :  { %v6914_v57 = vsel %vm6900_vm12, %v6897_v42, %v6899_v43  ;;  %v6913_v7 = vsel %vm6900_vm12, %v6895_v0, %v6897_v42  ;;  %32084 = vmatmul.mubr.msk.f32.vlgmr.msra.gmra.mxu1 %vm117_vm1, %v33738_v3  ;;  %v33871_v0 = vadd.f32 %v3186_v40, %v2835_v20  ;;  %v33874_v27 = vpop.f32.mrf.mxu0  ;;  %v33882_v20 = vpop.f32.mrf.mxu1 }
 0x1e0   :  { %9193 = vrot.lane.b32.xlu1 %v33860_v8, %s32541_s14  ;;  %9191 = vrot.lane.b32.xlu0 %v33867_v14, %s32541_s14  ;;  %39463 = vst [vmem:[#allocation28_spill] sm:$0xff] %v33874_v27  ;;  %39464 = vst [vmem:[#allocation29_spill] sm:$0xff] %v33882_v20 }
 0x1e1   :  { %7388 = vmatprep.subr.mxu0 %v6914_v57  ;;  %7571 = vmatprep.mubr.f32.mxu1 %v39389_v2  ;;  %v3328_v42 = vpop.f32.mrf.mxu0  ;;  %v33887_v57 = vld [vmem:[%s39382_s0 + $0x70] sm:$0xff]  ;;  %v3257_v40 = vpop.f32.mrf.mxu1 }
 0x1e2   :  { %7389 = vmatpush1.msra.mxu0 %v6913_v7  ;;  %v7450_v44 = vpop.permute.xlu1 %7449  ;;  %v7448_v1 = vpop.permute.xlu0 %7447  ;;  %v3412_v27 = vadd.f32 %v3257_v40, %v33793_v4  ;;  %v32505_v4 = vld [vmem:[%s39382_s0 + $0x8] sm:$0xff] }
 0x1e3   :  { %v33878_v43 = vsel %vm7475_vm13, %v7448_v1, %v7450_v44  ;;  %32085 = vmatmul.mubr.msk.f32.vlgmr.msra.gmra.mxu0 %vm117_vm1, %v33738_v3  ;;  %v33898_v3 = vadd.f32 %v3328_v42, %v2839_v16  ;;  %v33902_v7 = vpop.f32.mrf.mxu0  ;;  %v33911_v16 = vpop.f32.mrf.mxu1  ;;  %v32504_v42 = vld [vmem:[%s39382_s0 + $0x10] sm:$0xff] }
 0x1e4   :  { %9197 = vrot.lane.b32.xlu1 %v33887_v57, %s32541_s14  ;;  %9195 = vrot.lane.b32.xlu0 %v33894_v25, %s32541_s14  ;;  %39465 = vst [vmem:[#allocation30_spill] sm:$0xff] %v33902_v7  ;;  %39466 = vst [vmem:[#allocation31_spill] sm:$0xff] %v33911_v16  ;;  %s32543_s14 = smov 56  }
 0x1e5   :  { %7537 = vmatprep.subr.mxu1 %v33878_v43  ;;  %7642 = vmatprep.mubr.f32.mxu0 %v39389_v2  ;;  %v3548_v37 = vpop.f32.mrf.mxu0 }
 0x1e6   :  { %v7454_v54 = vpop.permute.xlu1 %7453  ;;  %v7452_v20 = vpop.permute.xlu0 %7451  ;;  %v33921_v40 = vadd.f32 %v3548_v37, %v3404_v32 }
 0x1e7   :  { %v33906_v55 = vsel %vm7475_vm13, %v7452_v20, %v7454_v54  ;;  %v33909_v60 = vsel %vm7475_vm13, %v7450_v44, %v7452_v20  ;;  %v33924_v44 = vpop.f32.mrf.mxu0  ;;  %v3399_v20 = vpop.f32.mrf.mxu1 }
 0x1e8   :  { %9748 = vrot.lane.b32.xlu1 %v32504_v42, %s32542_s20  ;;  %9746 = vrot.lane.b32.xlu0 %v32505_v4, %s32542_s20  ;;  %39467 = vst [vmem:[#allocation32_spill] sm:$0xff] %v33924_v44  ;;  %v33930_v42 = vld [vmem:[%s39383_s2 + $0x68] sm:$0xff]  ;;  %v3416_v16 = vadd.f32 %v3399_v20, %v33819_v9  ;;  %v32506_v44 = vld [vmem:[%s39382_s0 + $0x20] sm:$0xff] }
 0x1e9   :  { %7608 = vmatprep.subr.mxu0 %v33906_v55  ;;  %v3690_v37 = vpop.f32.mrf.mxu0  ;;  %v33938_v32 = vpop.f32.mrf.mxu1 }
 0x1ea   :  { %7609 = vmatpush1.msra.mxu0 %v33909_v60  ;;  %v7456_v2 = vpop.permute.xlu1 %7455  ;;  %v7446_v7 = vpop.permute.xlu0 %7445  ;;  %39468 = vst [vmem:[#allocation33_spill] sm:$0xff] %v33938_v32  ;;  %v33948_v9 = vadd.f32 %v3690_v37, %v3408_v61  ;;  %v32508_v37 = vld [vmem:[%s39382_s0] sm:$0xff] }
 0x1eb   :  { %v33934_v4 = vsel %vm7475_vm13, %v7446_v7, %v7448_v1  ;;  %32088 = vmatmul.mubr.msk.f32.vlgmr.msra.gmra.mxu0 %vm117_vm1, %v33930_v42  ;;  %v39469_v1 = vmov 0.0   ;;  %v33952_v7 = vpop.f32.mrf.mxu0  ;;  %v3619_v20 = vpop.f32.mrf.mxu1 }
 0x1ec   :  { %9752 = vrot.lane.b32.xlu1 %v32506_v44, %s32542_s20  ;;  %9750 = vrot.lane.b32.xlu0 %v32507_v38, %s32542_s20  ;;  %39470 = vst [vmem:[#allocation34_spill] sm:$0xff] %v33952_v7  ;;  %v3981_v44 = vadd.f32 %v3619_v20, %v33845_v6  ;;  %v33973_v6 = vsel %vm7475_vm13, %v7454_v54, %v7456_v2 }
 0x1ed   :  { %7538 = vmatpush1.msra.mxu1 %v33934_v4  ;;  %7784 = vmatprep.mubr.f32.mxu0 %v39469_v1  ;;  %v3832_v38 = vpop.f32.mrf.mxu0  ;;  %v33961_v61 = vpop.f32.mrf.mxu1 }
 0x1ee   :  { %v7460_v32 = vpop.permute.xlu1 %7459  ;;  %v7458_v48 = vpop.permute.xlu0 %7457  ;;  %32087 = vmatmul.mubr.msk.f32.vlgmr.msra.gmra.mxu1 %vm117_vm1, %v33930_v42  ;;  %39471 = vst [vmem:[#allocation35_spill] sm:$0xff] %v33961_v61  ;;  %v33969_v7 = vadd.f32 %v3832_v38, %v3412_v27 }
 0x1ef   :  { %v33958_v49 = vsel %vm7475_vm13, %v7456_v2, %v7458_v48  ;;  %7713 = vmatprep.mubr.f32.mxu1 %v39469_v1  ;;  %v33975_v20 = vpop.f32.mrf.mxu0  ;;  %v3761_v17 = vpop.f32.mrf.mxu1  ;;  %v32509_v2 = vld [vmem:[%s39382_s0 + $0x30] sm:$0xff] }
 0x1f0   :  { %9754 = vrot.lane.b32.xlu1 %v33789_v52, %s32542_s20  ;;  %9744 = vrot.lane.b32.xlu0 %v32508_v37, %s32542_s20  ;;  %39472 = vst [vmem:[#allocation36_spill] sm:$0xff] %v33975_v20  ;;  %v33979_v51 = vadd.f32 %v3761_v17, %v33871_v0  ;;  %v33998_v0 = vsel %vm7475_vm13, %v7458_v48, %v7460_v32 }
 0x1f1   :  { %7679 = vmatprep.subr.mxu1 %v33958_v49  ;;  %v3974_v27 = vpop.f32.mrf.mxu0  ;;  %v33986_v38 = vpop.f32.mrf.mxu1 }
 0x1f2   :  { %7680 = vmatpush1.msra.mxu1 %v33973_v6  ;;  %v7464_v61 = vpop.permute.xlu1 %7463  ;;  %v7462_v52 = vpop.permute.xlu0 %7461  ;;  %39473 = vst [vmem:[#allocation37_spill] sm:$0xff] %v33986_v38  ;;  %v33994_v17 = vadd.f32 %v3974_v27, %v3416_v16 }
 0x1f3   :  { %v33982_v50 = vsel %vm7475_vm13, %v7460_v32, %v7462_v52  ;;  %32089 = vmatmul.mubr.msk.f32.vlgmr.msra.gmra.mxu1 %vm117_vm1, %v33930_v42  ;;  %v34001_v54 = vpop.f32.mrf.mxu0  ;;  %v3903_v37 = vpop.f32.mrf.mxu1 }
 0x1f4   :  { %9758 = vrot.lane.b32.xlu1 %v33815_v36, %s32542_s20  ;;  %9756 = vrot.lane.b32.xlu0 %v32509_v2, %s32542_s20  ;;  %39474 = vst [vmem:[#allocation38_spill] sm:$0xff] %v34001_v54  ;;  %v34005_v20 = vadd.f32 %v3903_v37, %v33898_v3  ;;  %v34022_v3 = vsel %vm7475_vm13, %v7462_v52, %v7464_v61 }
 0x1f5   :  { %7750 = vmatprep.subr.mxu0 %v33982_v50  ;;  %7855 = vmatprep.mubr.f32.mxu1 %v39469_v1  ;;  %v34012_v32 = vpop.f32.mrf.mxu1 }
 0x1f6   :  { %7751 = vmatpush1.msra.mxu0 %v33998_v0  ;;  %v7468_v36 = vpop.permute.xlu1 %7467  ;;  %v7466_v38 = vpop.permute.xlu0 %7465  ;;  %39475 = vst [vmem:[#allocation39_spill] sm:$0xff] %v34012_v32 }
 0x1f7   :  { %v34008_v16 = vsel %vm7475_vm13, %v7464_v61, %v7466_v38  ;;  %32090 = vmatmul.mubr.msk.f32.vlgmr.msra.gmra.mxu0 %vm117_vm1, %v33930_v42  ;;  %v4194_v48 = vpop.f32.mrf.mxu0 }
 0x1f8   :  { %9762 = vrot.lane.b32.xlu1 %v33841_v56, %s32542_s20  ;;  %9760 = vrot.lane.b32.xlu0 %v33808_v21, %s32542_s20  ;;  %v34018_v27 = vadd.f32 %v4194_v48, %v3981_v44  ;;  %v34040_v44 = vsel %vm7475_vm13, %v7466_v38, %v7468_v36 }
 0x1f9   :  { %7821 = vmatprep.subr.mxu1 %v34008_v16  ;;  %7926 = vmatprep.mubr.f32.mxu0 %v39469_v1 }
 0x1fa   :  { %7822 = vmatpush1.msra.mxu1 %v34022_v3  ;;  %v7472_v2 = vpop.permute.xlu1 %7471  ;;  %v7470_v37 = vpop.permute.xlu0 %7469 }
 0x1fb   :  { %v34027_v32 = vsel %vm7475_vm13, %v7468_v36, %v7470_v37  ;;  %32091 = vmatmul.mubr.msk.f32.vlgmr.msra.gmra.mxu1 %vm117_vm1, %v33930_v42  ;;  %v4123_v21 = vpop.f32.mrf.mxu1  ;;  %v34062_v36 = vsel %vm7475_vm13, %v7470_v37, %v7472_v2 }
 0x1fc   :  { %9766 = vrot.lane.b32.xlu1 %v33867_v14, %s32542_s20  ;;  %9764 = vrot.lane.b32.xlu0 %v33834_v13, %s32542_s20  ;;  %v34036_v56 = vadd.f32 %v4123_v21, %v33921_v40  ;;  %v34051_v13 = vpop.f32.mrf.mxu0  ;;  %v34067_v21 = vld [vmem:[%s39382_s0 + $0x10] sm:$0xff] }
 0x1fd   :  { %7892 = vmatprep.subr.mxu0 %v34027_v32  ;;  %7997 = vmatprep.mubr.f32.mxu1 %v39469_v1  ;;  %v34043_v61 = vpop.f32.mrf.mxu1  ;;  %39477 = vst [vmem:[#allocation41_spill] sm:$0xff] %v34051_v13 }
 0x1fe   :  { %39476 = vst [vmem:[#allocation40_spill] sm:$0xff] %v34043_v61  ;;  %7893 = vmatpush1.msra.mxu0 %v34040_v44  ;;  %v8023_v52 = vpop.permute.xlu1 %8022  ;;  %v7474_v48 = vpop.permute.xlu0 %7473 }
 0x1ff   :  { %v34047_v14 = vsel %vm7475_vm13, %v7472_v2, %v7474_v48  ;;  %32092 = vmatmul.mubr.msk.f32.vlgmr.msra.gmra.mxu0 %vm117_vm1, %v33930_v42  ;;  %v4265_v40 = vpop.f32.mrf.mxu1 }
 0x200   :  { %9770 = vrot.lane.b32.xlu1 %v33894_v25, %s32542_s20  ;;  %9768 = vrot.lane.b32.xlu0 %v33860_v8, %s32542_s20  ;;  %v34058_v38 = vadd.f32 %v4265_v40, %v33948_v9  ;;  %v34084_v40 = vld [vmem:[%s39383_s2 + $0x70] sm:$0xff] }
 0x201   :  { %7963 = vmatprep.subr.mxu1 %v34047_v14  ;;  %8146 = vmatprep.mubr.f32.mxu0 %v39469_v1  ;;  %v34075_v37 = vpop.f32.mrf.mxu1 }
 0x202   :  { %7964 = vmatpush1.msra.mxu1 %v34062_v36  ;;  %v8021_v25 = vpop.permute.xlu1 %8020  ;;  %v8025_v8 = vpop.permute.xlu0 %8024  ;;  %39478 = vst [vmem:[#allocation42_spill] sm:$0xff] %v34075_v37 }
 0x203   :  { %v8051_v48 = vsel %vm8050_vm14, %v8021_v25, %v8023_v52  ;;  %v8052_v9 = vsel %vm8050_vm14, %v8023_v52, %v8025_v8  ;;  %32093 = vmatmul.mubr.msk.f32.vlgmr.msra.gmra.mxu1 %vm117_vm1, %v33930_v42  ;;  %v4336_v2 = vpop.f32.mrf.mxu0  ;;  %v34092_v42 = vld [vmem:[%s39382_s0 + $0x8] sm:$0xff]  ;;  %v34097_v25 = vld [vmem:[%s39382_s0 + $0x18] sm:$0xff] }
 0x204   :  { %10351 = vrot.lane.b32.xlu1 %v34067_v21, %s32543_s14  ;;  %9772 = vrot.lane.b32.xlu0 %v33887_v57, %s32542_s20  ;;  %v34087_v52 = vadd.f32 %v4336_v2, %v33979_v51  ;;  %s32547_s20 = smov 45  }
 0x205   :  { %8112 = vmatprep.subr.mxu0 %v8052_v9  ;;  %8217 = vmatprep.mubr.f32.mxu1 %v39469_v1  ;;  %v34104_v9 = vpop.f32.mrf.mxu0 }
 0x206   :  { %8113 = vmatpush1.msra.mxu0 %v8051_v48  ;;  %v8029_v57 = vpop.permute.xlu1 %8028  ;;  %v8027_v37 = vpop.permute.xlu0 %8026  ;;  %39479 = vst [vmem:[#allocation43_spill] sm:$0xff] %v34104_v9 }
 0x207   :  { %v8054_v61 = vsel %vm8050_vm14, %v8027_v37, %v8029_v57  ;;  %v8053_v51 = vsel %vm8050_vm14, %v8025_v8, %v8027_v37  ;;  %32095 = vmatmul.mubr.msk.f32.vlgmr.msra.gmra.mxu0 %vm117_vm1, %v34084_v40  ;;  %v4407_v2 = vpop.f32.mrf.mxu1  ;;  %v34116_v8 = vld [vmem:[%s39382_s0 + $0x28] sm:$0xff]  ;;  %v34121_v37 = vld [vmem:[%s39382_s0 + $0x20] sm:$0xff] }
 0x208   :  { %10349 = vrot.lane.b32.xlu1 %v34092_v42, %s32543_s14  ;;  %10353 = vrot.lane.b32.xlu0 %v34097_v25, %s32543_s14  ;;  %v34111_v48 = vadd.f32 %v4407_v2, %v33969_v7 }
 0x209   :  { %8183 = vmatprep.subr.mxu1 %v8054_v61  ;;  %8288 = vmatprep.mubr.f32.mxu0 %v39469_v1  ;;  %v34128_v2 = vpop.f32.mrf.mxu1 }
 0x20a   :  { %8184 = vmatpush1.msra.mxu1 %v8053_v51  ;;  %v8033_v9 = vpop.permute.xlu1 %8032  ;;  %v8031_v13 = vpop.permute.xlu0 %8030  ;;  %39480 = vst [vmem:[#allocation44_spill] sm:$0xff] %v34128_v2 }
 0x20b   :  { %v8056_v54 = vsel %vm8050_vm14, %v8031_v13, %v8033_v9  ;;  %v8055_v7 = vsel %vm8050_vm14, %v8029_v57, %v8031_v13  ;;  %32096 = vmatmul.mubr.msk.f32.vlgmr.msra.gmra.mxu1 %vm117_vm1, %v34084_v40  ;;  %v4478_v61 = vpop.f32.mrf.mxu0  ;;  %v34140_v13 = vld [vmem:[%s39382_s0 + $0x38] sm:$0xff]  ;;  %v34145_v57 = vld [vmem:[%s39382_s0 + $0x30] sm:$0xff] }
 0x20c   :  { %10357 = vrot.lane.b32.xlu1 %v34116_v8, %s32543_s14  ;;  %10355 = vrot.lane.b32.xlu0 %v34121_v37, %s32543_s14  ;;  %v34135_v51 = vadd.f32 %v4478_v61, %v34005_v20 }
 0x20d   :  { %8254 = vmatprep.subr.mxu0 %v8056_v54  ;;  %8359 = vmatprep.mubr.f32.mxu1 %v39469_v1  ;;  %v34152_v54 = vpop.f32.mrf.mxu0 }
 0x20e   :  { %8255 = vmatpush1.msra.mxu0 %v8055_v7  ;;  %v8037_v2 = vpop.permute.xlu1 %8036  ;;  %v8035_v29 = vpop.permute.xlu0 %8034  ;;  %39481 = vst [vmem:[#allocation45_spill] sm:$0xff] %v34152_v54 }
 0x20f   :  { %v8058_v19 = vsel %vm8050_vm14, %v8035_v29, %v8037_v2  ;;  %v8057_v20 = vsel %vm8050_vm14, %v8033_v9, %v8035_v29  ;;  %32097 = vmatmul.mubr.msk.f32.vlgmr.msra.gmra.mxu0 %vm117_vm1, %v34084_v40  ;;  %v4549_v61 = vpop.f32.mrf.mxu1  ;;  %v34164_v29 = vld [vmem:[%s39382_s0 + $0x48] sm:$0xff]  ;;  %v34169_v9 = vld [vmem:[%s39382_s0 + $0x40] sm:$0xff] }
 0x210   :  { %10361 = vrot.lane.b32.xlu1 %v34140_v13, %s32543_s14  ;;  %10359 = vrot.lane.b32.xlu0 %v34145_v57, %s32543_s14  ;;  %v34159_v7 = vadd.f32 %v4549_v61, %v33994_v17 }
 0x211   :  { %8325 = vmatprep.subr.mxu1 %v8058_v19  ;;  %8430 = vmatprep.mubr.f32.mxu0 %v39469_v1  ;;  %v34176_v61 = vpop.f32.mrf.mxu1 }
 0x212   :  { %8326 = vmatpush1.msra.mxu1 %v8057_v20  ;;  %v8041_v54 = vpop.permute.xlu1 %8040  ;;  %v8039_v10 = vpop.permute.xlu0 %8038  ;;  %39482 = vst [vmem:[#allocation46_spill] sm:$0xff] %v34176_v61 }
 0x213   :  { %v8060_v53 = vsel %vm8050_vm14, %v8039_v10, %v8041_v54  ;;  %v8059_v17 = vsel %vm8050_vm14, %v8037_v2, %v8039_v10  ;;  %32098 = vmatmul.mubr.msk.f32.vlgmr.msra.gmra.mxu1 %vm117_vm1, %v34084_v40  ;;  %v4698_v19 = vpop.f32.mrf.mxu0  ;;  %v34188_v10 = vld [vmem:[%s39382_s0 + $0x58] sm:$0xff]  ;;  %v34193_v2 = vld [vmem:[%s39382_s0 + $0x50] sm:$0xff] }
 0x214   :  { %10365 = vrot.lane.b32.xlu1 %v34164_v29, %s32543_s14  ;;  %10363 = vrot.lane.b32.xlu0 %v34169_v9, %s32543_s14  ;;  %v34183_v20 = vadd.f32 %v4698_v19, %v34036_v56 }
 0x215   :  { %8396 = vmatprep.subr.mxu0 %v8060_v53  ;;  %8501 = vmatprep.mubr.f32.mxu1 %v39469_v1  ;;  %v34200_v53 = vpop.f32.mrf.mxu0 }
 0x216   :  { %8397 = vmatpush1.msra.mxu0 %v8059_v17  ;;  %v8045_v61 = vpop.permute.xlu1 %8044  ;;  %v8043_v39 = vpop.permute.xlu0 %8042  ;;  %39483 = vst [vmem:[#allocation47_spill] sm:$0xff] %v34200_v53 }
 0x217   :  { %v8062_v35 = vsel %vm8050_vm14, %v8043_v39, %v8045_v61  ;;  %v8061_v56 = vsel %vm8050_vm14, %v8041_v54, %v8043_v39  ;;  %32099 = vmatmul.mubr.msk.f32.vlgmr.msra.gmra.mxu0 %vm117_vm1, %v34084_v40  ;;  %v4769_v19 = vpop.f32.mrf.mxu1  ;;  %v34212_v39 = vld [vmem:[%s39382_s0 + $0x68] sm:$0xff]  ;;  %v34217_v54 = vld [vmem:[%s39382_s0 + $0x60] sm:$0xff] }
 0x218   :  { %10369 = vrot.lane.b32.xlu1 %v34188_v10, %s32543_s14  ;;  %10367 = vrot.lane.b32.xlu0 %v34193_v2, %s32543_s14  ;;  %v34207_v17 = vadd.f32 %v4769_v19, %v34018_v27 }
 0x219   :  { %8467 = vmatprep.subr.mxu1 %v8062_v35  ;;  %8572 = vmatprep.mubr.f32.mxu0 %v39469_v1  ;;  %v34224_v19 = vpop.f32.mrf.mxu1 }
 0x21a   :  { %8468 = vmatpush1.msra.mxu1 %v8061_v56  ;;  %v8049_v53 = vpop.permute.xlu1 %8048  ;;  %v8047_v62 = vpop.permute.xlu0 %8046  ;;  %39484 = vst [vmem:[#allocation48_spill] sm:$0xff] %v34224_v19 }
 0x21b   :  { %v8064_v24 = vsel %vm8050_vm14, %v8047_v62, %v8049_v53  ;;  %v8063_v27 = vsel %vm8050_vm14, %v8045_v61, %v8047_v62  ;;  %32100 = vmatmul.mubr.msk.f32.vlgmr.msra.gmra.mxu1 %vm117_vm1, %v34084_v40  ;;  %v4840_v35 = vpop.f32.mrf.mxu0  ;;  %v34236_v62 = vld [vmem:[%s39382_s0 + $0x78] sm:$0xff]  ;;  %v34241_v61 = vld [vmem:[%s39382_s0 + $0x70] sm:$0xff]  ;;  %vm13254_vm14 = vcmask 359424  }
 0x21c   :  { %10373 = vrot.lane.b32.xlu1 %v34212_v39, %s32543_s14  ;;  %10371 = vrot.lane.b32.xlu0 %v34217_v54, %s32543_s14  ;;  %v34231_v56 = vadd.f32 %v4840_v35, %v34058_v38 }
 0x21d   :  { %8538 = vmatprep.subr.mxu0 %v8064_v24  ;;  %8720 = vmatprep.mubr.f32.mxu1 %v39469_v1  ;;  %v34247_v24 = vpop.f32.mrf.mxu0 }
 0x21e   :  { %8539 = vmatpush1.msra.mxu0 %v8063_v27  ;;  %v8600_v53 = vpop.permute.xlu1 %8599  ;;  %v8598_v19 = vpop.permute.xlu0 %8597  ;;  %39485 = vst [vmem:[#allocation49_spill] sm:$0xff] %v34247_v24 }
 0x21f   :  { %v8626_v46 = vsel %vm117_vm1, %v8598_v19, %v8600_v53  ;;  %32101 = vmatmul.mubr.msk.f32.vlgmr.msra.gmra.mxu0 %vm117_vm1, %v34084_v40  ;;  %v4911_v38 = vpop.f32.mrf.mxu1 }
 0x220   :  { %10377 = vrot.lane.b32.xlu1 %v34236_v62, %s32543_s14  ;;  %10375 = vrot.lane.b32.xlu0 %v34241_v61, %s32543_s14  ;;  %v34254_v35 = vadd.f32 %v4911_v38, %v34087_v52 }
 0x221   :  { %8686 = vmatprep.subr.mxu1 %v8626_v46  ;;  %8791 = vmatprep.mubr.f32.mxu0 %v39469_v1  ;;  %v34259_v34 = vpop.f32.mrf.mxu1  ;;  %v34268_v46 = vld [vmem:[%s39383_s2 + $0x78] sm:$0xff] }
 0x222   :  { %v8604_v27 = vpop.permute.xlu1 %8603  ;;  %v8602_v5 = vpop.permute.xlu0 %8601  ;;  %39486 = vst [vmem:[#allocation50_spill] sm:$0xff] %v34259_v34 }
 0x223   :  { %v8628_v31 = vsel %vm117_vm1, %v8602_v5, %v8604_v27  ;;  %v8627_v40 = vsel %vm117_vm1, %v8600_v53, %v8602_v5  ;;  %v4982_v24 = vpop.f32.mrf.mxu0 }
 0x224   :  { %10928 = vrot.lane.b32.xlu1 %v34097_v25, %s32544_s17  ;;  %10926 = vrot.lane.b32.xlu0 %v34067_v21, %s32544_s17  ;;  %v34271_v52 = vadd.f32 %v4982_v24, %v34111_v48 }
 0x225   :  { %8757 = vmatprep.subr.mxu0 %v8628_v31  ;;  %v34276_v34 = vpop.f32.mrf.mxu0 }
 0x226   :  { %8758 = vmatpush1.msra.mxu0 %v8627_v40  ;;  %v8606_v5 = vpop.permute.xlu1 %8605  ;;  %v8596_v53 = vpop.permute.xlu0 %8595  ;;  %39487 = vst [vmem:[#allocation51_spill] sm:$0xff] %v34276_v34 }
 0x227   :  { %32104 = vmatmul.mubr.msk.f32.vlgmr.msra.gmra.mxu0 %vm117_vm1, %v34268_v46  ;;  %v8625_v38 = vsel %vm117_vm1, %v8596_v53, %v8598_v19  ;;  %v5053_v41 = vpop.f32.mrf.mxu1 }
 0x228   :  { %10932 = vrot.lane.b32.xlu1 %v34116_v8, %s32544_s17  ;;  %10930 = vrot.lane.b32.xlu0 %v34121_v37, %s32544_s17  ;;  %v34283_v48 = vadd.f32 %v5053_v41, %v34135_v51  ;;  %v8629_v51 = vsel %vm117_vm1, %v8604_v27, %v8606_v5 }
 0x229   :  { %8687 = vmatpush1.msra.mxu1 %v8625_v38  ;;  %8933 = vmatprep.mubr.f32.mxu0 %v39469_v1 }
 0x22a   :  { %32103 = vmatmul.mubr.msk.f32.vlgmr.msra.gmra.mxu1 %vm117_vm1, %v34268_v46  ;;  %v8610_v31 = vpop.permute.xlu1 %8609  ;;  %v8608_v19 = vpop.permute.xlu0 %8607 }
 0x22b   :  { %v8630_v24 = vsel %vm117_vm1, %v8606_v5, %v8608_v19  ;;  %8862 = vmatprep.mubr.f32.mxu1 %v39469_v1  ;;  %v5124_v40 = vpop.f32.mrf.mxu0 }
 0x22c   :  { %10934 = vrot.lane.b32.xlu1 %v34145_v57, %s32544_s17  ;;  %10924 = vrot.lane.b32.xlu0 %v34092_v42, %s32544_s17  ;;  %v34295_v41 = vadd.f32 %v5124_v40, %v34159_v7  ;;  %v8631_v7 = vsel %vm117_vm1, %v8608_v19, %v8610_v31 }
 0x22d   :  { %8828 = vmatprep.subr.mxu1 %v8630_v24  ;;  %v34301_v22 = vpop.f32.mrf.mxu0 }
 0x22e   :  { %8829 = vmatpush1.msra.mxu1 %v8629_v51  ;;  %v8614_v53 = vpop.permute.xlu1 %8613  ;;  %v8612_v38 = vpop.permute.xlu0 %8611  ;;  %39488 = vst [vmem:[#allocation52_spill] sm:$0xff] %v34301_v22 }
 0x22f   :  { %32105 = vmatmul.mubr.msk.f32.vlgmr.msra.gmra.mxu1 %vm117_vm1, %v34268_v46  ;;  %v8632_v34 = vsel %vm117_vm1, %v8610_v31, %v8612_v38  ;;  %v34312_v51 = vpop.f32.mrf.mxu1  ;;  %v8633_v31 = vsel %vm117_vm1, %v8612_v38, %v8614_v53 }
 0x230   :  { %10938 = vrot.lane.b32.xlu1 %v34169_v9, %s32544_s17  ;;  %10936 = vrot.lane.b32.xlu0 %v34140_v13, %s32544_s17  ;;  %39489 = vst [vmem:[#allocation53_spill] sm:$0xff] %v34312_v51 }
 0x231   :  { %8899 = vmatprep.subr.mxu0 %v8632_v34  ;;  %9004 = vmatprep.mubr.f32.mxu1 %v39469_v1 }
 0x232   :  { %8900 = vmatpush1.msra.mxu0 %v8631_v7  ;;  %v8618_v27 = vpop.permute.xlu1 %8617  ;;  %v8616_v5 = vpop.permute.xlu0 %8615 }
 0x233   :  { %32106 = vmatmul.mubr.msk.f32.vlgmr.msra.gmra.mxu0 %vm117_vm1, %v34268_v46  ;;  %v8634_v24 = vsel %vm117_vm1, %v8614_v53, %v8616_v5  ;;  %v5344_v40 = vpop.f32.mrf.mxu0  ;;  %v8635_v53 = vsel %vm117_vm1, %v8616_v5, %v8618_v27 }
 0x234   :  { %10942 = vrot.lane.b32.xlu1 %v34193_v2, %s32544_s17  ;;  %10940 = vrot.lane.b32.xlu0 %v34164_v29, %s32544_s17  ;;  %v34319_v34 = vadd.f32 %v5344_v40, %v34207_v17 }
 0x235   :  { %8970 = vmatprep.subr.mxu1 %v8634_v24  ;;  %9075 = vmatprep.mubr.f32.mxu0 %v39469_v1  ;;  %v34340_v28 = vpop.f32.mrf.mxu0 }
 0x236   :  { %8971 = vmatpush1.msra.mxu1 %v8633_v31  ;;  %v8622_v19 = vpop.permute.xlu1 %8621  ;;  %v8620_v7 = vpop.permute.xlu0 %8619  ;;  %39491 = vst [vmem:[#allocation55_spill] sm:$0xff] %v34340_v28 }
 0x237   :  { %32107 = vmatmul.mubr.msk.f32.vlgmr.msra.gmra.mxu1 %vm117_vm1, %v34268_v46  ;;  %v8636_v51 = vsel %vm117_vm1, %v8618_v27, %v8620_v7  ;;  %v5273_v22 = vpop.f32.mrf.mxu1 }
 0x238   :  { %10946 = vrot.lane.b32.xlu1 %v34217_v54, %s32544_s17  ;;  %10944 = vrot.lane.b32.xlu0 %v34188_v10, %s32544_s17  ;;  %v34331_v17 = vadd.f32 %v5273_v22, %v34183_v20  ;;  %v8637_v20 = vsel %vm117_vm1, %v8620_v7, %v8622_v19 }
 0x239   :  { %9041 = vmatprep.subr.mxu0 %v8636_v51  ;;  %9146 = vmatprep.mubr.f32.mxu1 %v39469_v1  ;;  %v34335_v38 = vpop.f32.mrf.mxu1 }
 0x23a   :  { %39490 = vst [vmem:[#allocation54_spill] sm:$0xff] %v34335_v38  ;;  %9042 = vmatpush1.msra.mxu0 %v8635_v53  ;;  %v9172_v24 = vpop.permute.xlu1 %9171  ;;  %v8624_v40 = vpop.permute.xlu0 %8623 }
 0x23b   :  { %32108 = vmatmul.mubr.msk.f32.vlgmr.msra.gmra.mxu0 %vm117_vm1, %v34268_v46  ;;  %v8638_v31 = vsel %vm117_vm1, %v8622_v19, %v8624_v40  ;;  %v5415_v26 = vpop.f32.mrf.mxu1 }
 0x23c   :  { %10950 = vrot.lane.b32.xlu1 %v34241_v61, %s32544_s17  ;;  %10948 = vrot.lane.b32.xlu0 %v34212_v39, %s32544_s17  ;;  %v34347_v22 = vadd.f32 %v5415_v26, %v34231_v56  ;;  %v34364_v26 = vld [vmem:[%s39383_s2 + $0x80] sm:$0xff] }
 0x23d   :  { %9112 = vmatprep.subr.mxu1 %v8638_v31  ;;  %9295 = vmatprep.mubr.f32.mxu0 %v39469_v1  ;;  %v34355_v38 = vpop.f32.mrf.mxu1 }
 0x23e   :  { %9113 = vmatpush1.msra.mxu1 %v8637_v20  ;;  %v9170_v27 = vpop.permute.xlu1 %9169  ;;  %v9174_v5 = vpop.permute.xlu0 %9173  ;;  %39492 = vst [vmem:[#allocation56_spill] sm:$0xff] %v34355_v38 }
 0x23f   :  { %v9200_v51 = vsel %vm9199_vm15, %v9170_v27, %v9172_v24  ;;  %32109 = vmatmul.mubr.msk.f32.vlgmr.msra.gmra.mxu1 %vm117_vm1, %v34268_v46  ;;  %v9201_v53 = vsel %vm9199_vm15, %v9172_v24, %v9174_v5  ;;  %v5486_v40 = vpop.f32.mrf.mxu0 }
 0x240   :  { %11501 = vrot.lane.b32.xlu1 %v34067_v21, %s32545_s19  ;;  %10952 = vrot.lane.b32.xlu0 %v34236_v62, %s32544_s17  ;;  %v34367_v56 = vadd.f32 %v5486_v40, %v34254_v35  ;;  %s32558_s17 = smov 99  }
 0x241   :  { %9261 = vmatprep.subr.mxu0 %v9201_v53  ;;  %9366 = vmatprep.mubr.f32.mxu1 %v39469_v1  ;;  %v34374_v31 = vpop.f32.mrf.mxu0 }
 0x242   :  { %9262 = vmatpush1.msra.mxu0 %v9200_v51  ;;  %v9178_v46 = vpop.permute.xlu1 %9177  ;;  %v9176_v19 = vpop.permute.xlu0 %9175  ;;  %39493 = vst [vmem:[#allocation57_spill] sm:$0xff] %v34374_v31 }
 0x243   :  { %32111 = vmatmul.mubr.msk.f32.vlgmr.msra.gmra.mxu0 %vm117_vm1, %v34364_v26  ;;  %v9203_v7 = vsel %vm9199_vm15, %v9176_v19, %v9178_v46  ;;  %v9202_v24 = vsel %vm9199_vm15, %v9174_v5, %v9176_v19  ;;  %v5557_v20 = vpop.f32.mrf.mxu1 }
 0x244   :  { %11499 = vrot.lane.b32.xlu1 %v34092_v42, %s32545_s19  ;;  %11503 = vrot.lane.b32.xlu0 %v34097_v25, %s32545_s19  ;;  %v34381_v35 = vadd.f32 %v5557_v20, %v34271_v52 }
 0x245   :  { %9332 = vmatprep.subr.mxu1 %v9203_v7  ;;  %9437 = vmatprep.mubr.f32.mxu0 %v39469_v1  ;;  %v34388_v19 = vpop.f32.mrf.mxu1 }
 0x246   :  { %9333 = vmatpush1.msra.mxu1 %v9202_v24  ;;  %v9182_v27 = vpop.permute.xlu1 %9181  ;;  %v9180_v51 = vpop.permute.xlu0 %9179  ;;  %39494 = vst [vmem:[#allocation58_spill] sm:$0xff] %v34388_v19 }
 0x247   :  { %32112 = vmatmul.mubr.msk.f32.vlgmr.msra.gmra.mxu1 %vm117_vm1, %v34364_v26  ;;  %v9205_v5 = vsel %vm9199_vm15, %v9180_v51, %v9182_v27  ;;  %v9204_v53 = vsel %vm9199_vm15, %v9178_v46, %v9180_v51  ;;  %v5628_v40 = vpop.f32.mrf.mxu0 }
 0x248   :  { %11507 = vrot.lane.b32.xlu1 %v34116_v8, %s32545_s19  ;;  %11505 = vrot.lane.b32.xlu0 %v34121_v37, %s32545_s19  ;;  %v34395_v52 = vadd.f32 %v5628_v40, %v34283_v48 }
 0x249   :  { %9403 = vmatprep.subr.mxu0 %v9205_v5  ;;  %9508 = vmatprep.mubr.f32.mxu1 %v39469_v1  ;;  %v34402_v51 = vpop.f32.mrf.mxu0 }
 0x24a   :  { %9404 = vmatpush1.msra.mxu0 %v9204_v53  ;;  %v9186_v7 = vpop.permute.xlu1 %9185  ;;  %v9184_v24 = vpop.permute.xlu0 %9183  ;;  %39495 = vst [vmem:[#allocation59_spill] sm:$0xff] %v34402_v51 }
 0x24b   :  { %32113 = vmatmul.mubr.msk.f32.vlgmr.msra.gmra.mxu0 %vm117_vm1, %v34364_v26  ;;  %v9207_v46 = vsel %vm9199_vm15, %v9184_v24, %v9186_v7  ;;  %v9206_v20 = vsel %vm9199_vm15, %v9182_v27, %v9184_v24  ;;  %v5699_v19 = vpop.f32.mrf.mxu1 }
 0x24c   :  { %11511 = vrot.lane.b32.xlu1 %v34140_v13, %s32545_s19  ;;  %11509 = vrot.lane.b32.xlu0 %v34145_v57, %s32545_s19  ;;  %v34409_v48 = vadd.f32 %v5699_v19, %v34295_v41 }
 0x24d   :  { %9474 = vmatprep.subr.mxu1 %v9207_v46  ;;  %9579 = vmatprep.mubr.f32.mxu0 %v39469_v1  ;;  %v34416_v51 = vpop.f32.mrf.mxu1 }
 0x24e   :  { %9475 = vmatpush1.msra.mxu1 %v9206_v20  ;;  %v9190_v5 = vpop.permute.xlu1 %9189  ;;  %v9188_v53 = vpop.permute.xlu0 %9187  ;;  %39496 = vst [vmem:[#allocation60_spill] sm:$0xff] %v34416_v51 }
 0x24f   :  { %32114 = vmatmul.mubr.msk.f32.vlgmr.msra.gmra.mxu1 %vm117_vm1, %v34364_v26  ;;  %v9209_v27 = vsel %vm9199_vm15, %v9188_v53, %v9190_v5  ;;  %v9208_v40 = vsel %vm9199_vm15, %v9186_v7, %v9188_v53  ;;  %v5848_v24 = vpop.f32.mrf.mxu0 }
 0x250   :  { %11515 = vrot.lane.b32.xlu1 %v34164_v29, %s32545_s19  ;;  %11513 = vrot.lane.b32.xlu0 %v34169_v9, %s32545_s19  ;;  %v34423_v41 = vadd.f32 %v5848_v24, %v34331_v17 }
 0x251   :  { %9545 = vmatprep.subr.mxu0 %v9209_v27  ;;  %9650 = vmatprep.mubr.f32.mxu1 %v39469_v1  ;;  %v34430_v53 = vpop.f32.mrf.mxu0 }
 0x252   :  { %9546 = vmatpush1.msra.mxu0 %v9208_v40  ;;  %v9194_v19 = vpop.permute.xlu1 %9193  ;;  %v9192_v46 = vpop.permute.xlu0 %9191  ;;  %39497 = vst [vmem:[#allocation61_spill] sm:$0xff] %v34430_v53 }
 0x253   :  { %32115 = vmatmul.mubr.msk.f32.vlgmr.msra.gmra.mxu0 %vm117_vm1, %v34364_v26  ;;  %v9211_v7 = vsel %vm9199_vm15, %v9192_v46, %v9194_v19  ;;  %v9210_v20 = vsel %vm9199_vm15, %v9190_v5, %v9192_v46  ;;  %v5919_v51 = vpop.f32.mrf.mxu1 }
 0x254   :  { %11519 = vrot.lane.b32.xlu1 %v34188_v10, %s32545_s19  ;;  %11517 = vrot.lane.b32.xlu0 %v34193_v2, %s32545_s19  ;;  %v34437_v17 = vadd.f32 %v5919_v51, %v34319_v34 }
 0x255   :  { %9616 = vmatprep.subr.mxu1 %v9211_v7  ;;  %9721 = vmatprep.mubr.f32.mxu0 %v39469_v1  ;;  %v34444_v53 = vpop.f32.mrf.mxu1 }
 0x256   :  { %9617 = vmatpush1.msra.mxu1 %v9210_v20  ;;  %v9198_v27 = vpop.permute.xlu1 %9197  ;;  %v9196_v40 = vpop.permute.xlu0 %9195  ;;  %39498 = vst [vmem:[#allocation62_spill] sm:$0xff] %v34444_v53 }
 0x257   :  { %32116 = vmatmul.mubr.msk.f32.vlgmr.msra.gmra.mxu1 %vm117_vm1, %v34364_v26  ;;  %v9213_v5 = vsel %vm9199_vm15, %v9196_v40, %v9198_v27  ;;  %v9212_v24 = vsel %vm9199_vm15, %v9194_v19, %v9196_v40  ;;  %v5990_v46 = vpop.f32.mrf.mxu0  ;;  %vm13829_vm15 = vcmask 293888  }
 0x258   :  { %11523 = vrot.lane.b32.xlu1 %v34212_v39, %s32545_s19  ;;  %11521 = vrot.lane.b32.xlu0 %v34217_v54, %s32545_s19  ;;  %v34451_v34 = vadd.f32 %v5990_v46, %v34347_v22 }
 0x259   :  { %9687 = vmatprep.subr.mxu0 %v9213_v5  ;;  %9870 = vmatprep.mubr.f32.mxu1 %v39469_v1  ;;  %v34457_v20 = vpop.f32.mrf.mxu0 }
 0x25a   :  { %9688 = vmatpush1.msra.mxu0 %v9212_v24  ;;  %v9749_v51 = vpop.permute.xlu1 %9748  ;;  %v9747_v7 = vpop.permute.xlu0 %9746  ;;  %39499 = vst [vmem:[#allocation63_spill] sm:$0xff] %v34457_v20 }
 0x25b   :  { %32117 = vmatmul.mubr.msk.f32.vlgmr.msra.gmra.mxu0 %vm117_vm1, %v34364_v26  ;;  %v9776_v19 = vsel %vm9774_vm2, %v9747_v7, %v9749_v51  ;;  %v6061_v27 = vpop.f32.mrf.mxu1 }
 0x25c   :  { %11527 = vrot.lane.b32.xlu1 %v34236_v62, %s32545_s19  ;;  %11525 = vrot.lane.b32.xlu0 %v34241_v61, %s32545_s19  ;;  %v34464_v22 = vadd.f32 %v6061_v27, %v34367_v56  ;;  %v34478_v56 = vld [vmem:[%s39383_s2 + $0x88] sm:$0xff]  ;;  %s32569_s19 = smov 37  }
 0x25d   :  { %9836 = vmatprep.subr.mxu1 %v9776_v19  ;;  %9941 = vmatprep.mubr.f32.mxu0 %v39469_v1  ;;  %v34469_v20 = vpop.f32.mrf.mxu1 }
 0x25e   :  { %v9753_v40 = vpop.permute.xlu1 %9752  ;;  %v9751_v5 = vpop.permute.xlu0 %9750  ;;  %39500 = vst [vmem:[#allocation64_spill] sm:$0xff] %v34469_v20 }
 0x25f   :  { %v9778_v26 = vsel %vm9774_vm2, %v9751_v5, %v9753_v40  ;;  %v9777_v24 = vsel %vm9774_vm2, %v9749_v51, %v9751_v5  ;;  %v6132_v46 = vpop.f32.mrf.mxu0 }
 0x260   :  { %12078 = vrot.lane.b32.xlu1 %v34097_v25, %s32546_s27  ;;  %12076 = vrot.lane.b32.xlu0 %v34067_v21, %s32546_s27  ;;  %v34481_v19 = vadd.f32 %v6132_v46, %v34381_v35 }
 0x261   :  { %9907 = vmatprep.subr.mxu0 %v9778_v26  ;;  %v34486_v20 = vpop.f32.mrf.mxu0 }
 0x262   :  { %9908 = vmatpush1.msra.mxu0 %v9777_v24  ;;  %v9755_v51 = vpop.permute.xlu1 %9754  ;;  %v9745_v27 = vpop.permute.xlu0 %9744  ;;  %39501 = vst [vmem:[#allocation65_spill] sm:$0xff] %v34486_v20 }
 0x263   :  { %32120 = vmatmul.mubr.msk.f32.vlgmr.msra.gmra.mxu0 %vm117_vm1, %v34478_v56  ;;  %v9775_v5 = vsel %vm9774_vm2, %v9745_v27, %v9747_v7  ;;  %v6203_v53 = vpop.f32.mrf.mxu1 }
 0x264   :  { %12082 = vrot.lane.b32.xlu1 %v34116_v8, %s32546_s27  ;;  %12080 = vrot.lane.b32.xlu0 %v34121_v37, %s32546_s27  ;;  %v34493_v35 = vadd.f32 %v6203_v53, %v34395_v52  ;;  %v9779_v53 = vsel %vm9774_vm2, %v9753_v40, %v9755_v51 }
 0x265   :  { %9837 = vmatpush1.msra.mxu1 %v9775_v5  ;;  %10083 = vmatprep.mubr.f32.mxu0 %v39469_v1 }
 0x266   :  { %32119 = vmatmul.mubr.msk.f32.vlgmr.msra.gmra.mxu1 %vm117_vm1, %v34478_v56  ;;  %v9759_v26 = vpop.permute.xlu1 %9758  ;;  %v9757_v7 = vpop.permute.xlu0 %9756 }
 0x267   :  { %v9780_v24 = vsel %vm9774_vm2, %v9755_v51, %v9757_v7  ;;  %10012 = vmatprep.mubr.f32.mxu1 %v39469_v1  ;;  %v6274_v46 = vpop.f32.mrf.mxu0 }
 0x268   :  { %12084 = vrot.lane.b32.xlu1 %v34145_v57, %s32546_s27  ;;  %12074 = vrot.lane.b32.xlu0 %v34092_v42, %s32546_s27  ;;  %v34505_v52 = vadd.f32 %v6274_v46, %v34409_v48  ;;  %v9781_v48 = vsel %vm9774_vm2, %v9757_v7, %v9759_v26 }
 0x269   :  { %9978 = vmatprep.subr.mxu1 %v9780_v24  ;;  %v34511_v38 = vpop.f32.mrf.mxu0 }
 0x26a   :  { %9979 = vmatpush1.msra.mxu1 %v9779_v53  ;;  %v9763_v27 = vpop.permute.xlu1 %9762  ;;  %v9761_v5 = vpop.permute.xlu0 %9760  ;;  %39502 = vst [vmem:[#allocation66_spill] sm:$0xff] %v34511_v38 }
 0x26b   :  { %32121 = vmatmul.mubr.msk.f32.vlgmr.msra.gmra.mxu1 %vm117_vm1, %v34478_v56  ;;  %v9782_v20 = vsel %vm9774_vm2, %v9759_v26, %v9761_v5  ;;  %v34522_v53 = vpop.f32.mrf.mxu1  ;;  %v9783_v26 = vsel %vm9774_vm2, %v9761_v5, %v9763_v27 }
 0x26c   :  { %12088 = vrot.lane.b32.xlu1 %v34169_v9, %s32546_s27  ;;  %12086 = vrot.lane.b32.xlu0 %v34140_v13, %s32546_s27  ;;  %39503 = vst [vmem:[#allocation67_spill] sm:$0xff] %v34522_v53 }
 0x26d   :  { %10049 = vmatprep.subr.mxu0 %v9782_v20  ;;  %10154 = vmatprep.mubr.f32.mxu1 %v39469_v1 }
 0x26e   :  { %10050 = vmatpush1.msra.mxu0 %v9781_v48  ;;  %v9767_v40 = vpop.permute.xlu1 %9766  ;;  %v9765_v51 = vpop.permute.xlu0 %9764 }
 0x26f   :  { %32122 = vmatmul.mubr.msk.f32.vlgmr.msra.gmra.mxu0 %vm117_vm1, %v34478_v56  ;;  %v9784_v24 = vsel %vm9774_vm2, %v9763_v27, %v9765_v51  ;;  %v6494_v46 = vpop.f32.mrf.mxu0  ;;  %v9785_v27 = vsel %vm9774_vm2, %v9765_v51, %v9767_v40 }
 0x270   :  { %12092 = vrot.lane.b32.xlu1 %v34193_v2, %s32546_s27  ;;  %12090 = vrot.lane.b32.xlu0 %v34164_v29, %s32546_s27  ;;  %v34529_v20 = vadd.f32 %v6494_v46, %v34437_v17 }
 0x271   :  { %10120 = vmatprep.subr.mxu1 %v9784_v24  ;;  %10225 = vmatprep.mubr.f32.mxu0 %v39469_v1  ;;  %v34550_v31 = vpop.f32.mrf.mxu0 }
 0x272   :  { %10121 = vmatpush1.msra.mxu1 %v9783_v26  ;;  %v9771_v7 = vpop.permute.xlu1 %9770  ;;  %v9769_v48 = vpop.permute.xlu0 %9768 }
 0x273   :  { %32123 = vmatmul.mubr.msk.f32.vlgmr.msra.gmra.mxu1 %vm117_vm1, %v34478_v56  ;;  %v9786_v53 = vsel %vm9774_vm2, %v9767_v40, %v9769_v48  ;;  %v6423_v38 = vpop.f32.mrf.mxu1 }
 0x274   :  { %12096 = vrot.lane.b32.xlu1 %v34217_v54, %s32546_s27  ;;  %12094 = vrot.lane.b32.xlu0 %v34188_v10, %s32546_s27  ;;  %v34541_v17 = vadd.f32 %v6423_v38, %v34423_v41  ;;  %v9787_v41 = vsel %vm9774_vm2, %v9769_v48, %v9771_v7 }
 0x275   :  { %10191 = vmatprep.subr.mxu0 %v9786_v53  ;;  %10296 = vmatprep.mubr.f32.mxu1 %v39469_v1  ;;  %v34545_v5 = vpop.f32.mrf.mxu1 }
 0x276   :  { %39504 = vst [vmem:[#allocation68_spill] sm:$0xff] %v34545_v5  ;;  %10192 = vmatpush1.msra.mxu0 %v9785_v27  ;;  %v10352_v24 = vpop.permute.xlu1 %10351  ;;  %v9773_v46 = vpop.permute.xlu0 %9772 }
 0x277   :  { %32124 = vmatmul.mubr.msk.f32.vlgmr.msra.gmra.mxu0 %vm117_vm1, %v34478_v56  ;;  %v9788_v26 = vsel %vm9774_vm2, %v9771_v7, %v9773_v46  ;;  %v6565_v28 = vpop.f32.mrf.mxu1  ;;  %vm14404_vm2 = vcmask 285696  }
 0x278   :  { %12100 = vrot.lane.b32.xlu1 %v34241_v61, %s32546_s27  ;;  %12098 = vrot.lane.b32.xlu0 %v34212_v39, %s32546_s27  ;;  %v34557_v38 = vadd.f32 %v6565_v28, %v34451_v34  ;;  %v34574_v28 = vld [vmem:[%s39383_s2 + $0x90] sm:$0xff] }
 0x279   :  { %10262 = vmatprep.subr.mxu1 %v9788_v26  ;;  %10475 = vmatprep.mubr.f32.mxu0 %v39469_v1  ;;  %v34565_v5 = vpop.f32.mrf.mxu1 }
 0x27a   :  { %10263 = vmatpush1.msra.mxu1 %v9787_v41  ;;  %v10350_v40 = vpop.permute.xlu1 %10349  ;;  %v10354_v51 = vpop.permute.xlu0 %10353  ;;  %39505 = vst [vmem:[#allocation69_spill] sm:$0xff] %v34565_v5 }
 0x27b   :  { %v10380_v53 = vsel %vm10379_vm5, %v10350_v40, %v10352_v24  ;;  %32125 = vmatmul.mubr.msk.f32.vlgmr.msra.gmra.mxu1 %vm117_vm1, %v34478_v56  ;;  %v10381_v27 = vsel %vm10379_vm5, %v10352_v24, %v10354_v51  ;;  %v6636_v46 = vpop.f32.mrf.mxu0 }
 0x27c   :  { %12651 = vrot.lane.b32.xlu1 %v34067_v21, %s32547_s20  ;;  %12102 = vrot.lane.b32.xlu0 %v34236_v62, %s32546_s27  ;;  %v34577_v34 = vadd.f32 %v6636_v46, %v34464_v22  ;;  %s32570_s27 = smov 29  }
 0x27d   :  { %10441 = vmatprep.subr.mxu0 %v10381_v27  ;;  %10546 = vmatprep.mubr.f32.mxu1 %v39469_v1  ;;  %v34584_v24 = vpop.f32.mrf.mxu0 }
 0x27e   :  { %10442 = vmatpush1.msra.mxu0 %v10380_v53  ;;  %v10358_v56 = vpop.permute.xlu1 %10357  ;;  %v10356_v7 = vpop.permute.xlu0 %10355 }
 0x27f   :  { %32127 = vmatmul.mubr.msk.f32.vlgmr.msra.gmra.mxu0 %vm117_vm1, %v34574_v28  ;;  %v10383_v21 = vsel %vm10379_vm5, %v10356_v7, %v10358_v56  ;;  %v10382_v48 = vsel %vm10379_vm5, %v10354_v51, %v10356_v7  ;;  %v6707_v26 = vpop.f32.mrf.mxu1 }
 0x280   :  { %12649 = vrot.lane.b32.xlu1 %v34092_v42, %s32547_s20  ;;  %12653 = vrot.lane.b32.xlu0 %v34097_v25, %s32547_s20  ;;  %v34591_v22 = vadd.f32 %v6707_v26, %v34481_v19 }
 0x281   :  { %10512 = vmatprep.subr.mxu1 %v10383_v21  ;;  %10617 = vmatprep.mubr.f32.mxu0 %v39469_v1  ;;  %v34598_v27 = vpop.f32.mrf.mxu1 }
 0x282   :  { %10513 = vmatpush1.msra.mxu1 %v10382_v48  ;;  %v10362_v41 = vpop.permute.xlu1 %10361  ;;  %v10360_v40 = vpop.permute.xlu0 %10359  ;;  %39506 = vst [vmem:[#allocation70_spill] sm:$0xff] %v34598_v27 }
 0x283   :  { %32128 = vmatmul.mubr.msk.f32.vlgmr.msra.gmra.mxu1 %vm117_vm1, %v34574_v28  ;;  %v10385_v51 = vsel %vm10379_vm5, %v10360_v40, %v10362_v41  ;;  %v10384_v53 = vsel %vm10379_vm5, %v10358_v56, %v10360_v40  ;;  %v6778_v42 = vpop.f32.mrf.mxu0 }
 0x284   :  { %12657 = vrot.lane.b32.xlu1 %v34116_v8, %s32547_s20  ;;  %12655 = vrot.lane.b32.xlu0 %v34121_v37, %s32547_s20  ;;  %v34605_v19 = vadd.f32 %v6778_v42, %v34493_v35 }
 0x285   :  { %10583 = vmatprep.subr.mxu0 %v10385_v51  ;;  %10688 = vmatprep.mubr.f32.mxu1 %v39469_v1  ;;  %v34612_v48 = vpop.f32.mrf.mxu0 }
 0x286   :  { %10584 = vmatpush1.msra.mxu0 %v10384_v53  ;;  %v10366_v46 = vpop.permute.xlu1 %10365  ;;  %v10364_v7 = vpop.permute.xlu0 %10363  ;;  %39507 = vst [vmem:[#allocation71_spill] sm:$0xff] %v34612_v48 }
 0x287   :  { %32129 = vmatmul.mubr.msk.f32.vlgmr.msra.gmra.mxu0 %vm117_vm1, %v34574_v28  ;;  %v10387_v56 = vsel %vm10379_vm5, %v10364_v7, %v10366_v46  ;;  %v10386_v21 = vsel %vm10379_vm5, %v10362_v41, %v10364_v7  ;;  %v6849_v26 = vpop.f32.mrf.mxu1 }
 0x288   :  { %12661 = vrot.lane.b32.xlu1 %v34140_v13, %s32547_s20  ;;  %12659 = vrot.lane.b32.xlu0 %v34145_v57, %s32547_s20  ;;  %v34619_v35 = vadd.f32 %v6849_v26, %v34505_v52 }
 0x289   :  { %10654 = vmatprep.subr.mxu1 %v10387_v56  ;;  %10759 = vmatprep.mubr.f32.mxu0 %v39469_v1  ;;  %v34626_v7 = vpop.f32.mrf.mxu1 }
 0x28a   :  { %10655 = vmatpush1.msra.mxu1 %v10386_v21  ;;  %v10370_v40 = vpop.permute.xlu1 %10369  ;;  %v10368_v51 = vpop.permute.xlu0 %10367  ;;  %39508 = vst [vmem:[#allocation72_spill] sm:$0xff] %v34626_v7 }
 0x28b   :  { %32130 = vmatmul.mubr.msk.f32.vlgmr.msra.gmra.mxu1 %vm117_vm1, %v34574_v28  ;;  %v10389_v41 = vsel %vm10379_vm5, %v10368_v51, %v10370_v40  ;;  %v10388_v53 = vsel %vm10379_vm5, %v10366_v46, %v10368_v51  ;;  %v6998_v42 = vpop.f32.mrf.mxu0 }
 0x28c   :  { %12665 = vrot.lane.b32.xlu1 %v34164_v29, %s32547_s20  ;;  %12663 = vrot.lane.b32.xlu0 %v34169_v9, %s32547_s20  ;;  %v34633_v52 = vadd.f32 %v6998_v42, %v34541_v17 }
 0x28d   :  { %10725 = vmatprep.subr.mxu0 %v10389_v41  ;;  %10830 = vmatprep.mubr.f32.mxu1 %v39469_v1  ;;  %v34640_v51 = vpop.f32.mrf.mxu0 }
 0x28e   :  { %10726 = vmatpush1.msra.mxu0 %v10388_v53  ;;  %v10374_v56 = vpop.permute.xlu1 %10373  ;;  %v10372_v21 = vpop.permute.xlu0 %10371  ;;  %39509 = vst [vmem:[#allocation73_spill] sm:$0xff] %v34640_v51 }
 0x28f   :  { %32131 = vmatmul.mubr.msk.f32.vlgmr.msra.gmra.mxu0 %vm117_vm1, %v34574_v28  ;;  %v10391_v46 = vsel %vm10379_vm5, %v10372_v21, %v10374_v56  ;;  %v10390_v26 = vsel %vm10379_vm5, %v10370_v40, %v10372_v21  ;;  %v7069_v7 = vpop.f32.mrf.mxu1 }
 0x290   :  { %12669 = vrot.lane.b32.xlu1 %v34188_v10, %s32547_s20  ;;  %12667 = vrot.lane.b32.xlu0 %v34193_v2, %s32547_s20  ;;  %v34647_v17 = vadd.f32 %v7069_v7, %v34529_v20 }
 0x291   :  { %10796 = vmatprep.subr.mxu1 %v10391_v46  ;;  %10901 = vmatprep.mubr.f32.mxu0 %v39469_v1  ;;  %v34654_v51 = vpop.f32.mrf.mxu1 }
 0x292   :  { %10797 = vmatpush1.msra.mxu1 %v10390_v26  ;;  %v10378_v41 = vpop.permute.xlu1 %10377  ;;  %v10376_v53 = vpop.permute.xlu0 %10375  ;;  %39510 = vst [vmem:[#allocation74_spill] sm:$0xff] %v34654_v51 }
 0x293   :  { %32132 = vmatmul.mubr.msk.f32.vlgmr.msra.gmra.mxu1 %vm117_vm1, %v34574_v28  ;;  %v10393_v40 = vsel %vm10379_vm5, %v10376_v53, %v10378_v41  ;;  %v10392_v42 = vsel %vm10379_vm5, %v10374_v56, %v10376_v53  ;;  %v7140_v21 = vpop.f32.mrf.mxu0  ;;  %vm14979_vm5 = vcmask 277504  }
 0x294   :  { %12673 = vrot.lane.b32.xlu1 %v34212_v39, %s32547_s20  ;;  %12671 = vrot.lane.b32.xlu0 %v34217_v54, %s32547_s20  ;;  %v34661_v20 = vadd.f32 %v7140_v21, %v34557_v38 }
 0x295   :  { %10867 = vmatprep.subr.mxu0 %v10393_v40  ;;  %11050 = vmatprep.mubr.f32.mxu1 %v39469_v1  ;;  %v34667_v26 = vpop.f32.mrf.mxu0 }
 0x296   :  { %10868 = vmatpush1.msra.mxu0 %v10392_v42  ;;  %v10929_v7 = vpop.permute.xlu1 %10928  ;;  %v10927_v46 = vpop.permute.xlu0 %10926  ;;  %39511 = vst [vmem:[#allocation75_spill] sm:$0xff] %v34667_v26 }
 0x297   :  { %32133 = vmatmul.mubr.msk.f32.vlgmr.msra.gmra.mxu0 %vm117_vm1, %v34574_v28  ;;  %v10956_v56 = vsel %vm10954_vm6, %v10927_v46, %v10929_v7  ;;  %v7211_v41 = vpop.f32.mrf.mxu1 }
 0x298   :  { %12677 = vrot.lane.b32.xlu1 %v34236_v62, %s32547_s20  ;;  %12675 = vrot.lane.b32.xlu0 %v34241_v61, %s32547_s20  ;;  %v34674_v38 = vadd.f32 %v7211_v41, %v34577_v34  ;;  %v34686_v34 = vld [vmem:[%s39382_s0 + $0x10] sm:$0xff] }
 0x299   :  { %11016 = vmatprep.subr.mxu1 %v10956_v56  ;;  %11121 = vmatprep.mubr.f32.mxu0 %v39469_v1  ;;  %v34679_v26 = vpop.f32.mrf.mxu1  ;;  %v34693_v56 = vld [vmem:[%s39383_s2 + $0x98] sm:$0xff] }
 0x29a   :  { %v10933_v53 = vpop.permute.xlu1 %10932  ;;  %v10931_v40 = vpop.permute.xlu0 %10930  ;;  %39512 = vst [vmem:[#allocation76_spill] sm:$0xff] %v34679_v26 }
 0x29b   :  { %v10958_v28 = vsel %vm10954_vm6, %v10931_v40, %v10933_v53  ;;  %v10957_v42 = vsel %vm10954_vm6, %v10929_v7, %v10931_v40  ;;  %v7282_v21 = vpop.f32.mrf.mxu0 }
 0x29c   :  { %13228 = vrot.lane.b32.xlu1 %v34097_v25, %s32548_s11  ;;  %13226 = vrot.lane.b32.xlu0 %v34686_v34, %s32548_s11  ;;  %v34696_v7 = vadd.f32 %v7282_v21, %v34591_v22 }
 0x29d   :  { %11087 = vmatprep.subr.mxu0 %v10958_v28  ;;  %v34701_v26 = vpop.f32.mrf.mxu0 }
 0x29e   :  { %11088 = vmatpush1.msra.mxu0 %v10957_v42  ;;  %v10935_v41 = vpop.permute.xlu1 %10934  ;;  %v10925_v25 = vpop.permute.xlu0 %10924  ;;  %39513 = vst [vmem:[#allocation77_spill] sm:$0xff] %v34701_v26 }
 0x29f   :  { %32136 = vmatmul.mubr.msk.f32.vlgmr.msra.gmra.mxu0 %vm117_vm1, %v34693_v56  ;;  %v10955_v40 = vsel %vm10954_vm6, %v10925_v25, %v10927_v46  ;;  %v7353_v51 = vpop.f32.mrf.mxu1 }
 0x2a0   :  { %13232 = vrot.lane.b32.xlu1 %v34116_v8, %s32548_s11  ;;  %13230 = vrot.lane.b32.xlu0 %v34121_v37, %s32548_s11  ;;  %v34708_v22 = vadd.f32 %v7353_v51, %v34605_v19  ;;  %v34720_v8 = vld [vmem:[%s39382_s0 + $0x8] sm:$0xff]  ;;  %v10959_v19 = vsel %vm10954_vm6, %v10933_v53, %v10935_v41 }
 0x2a1   :  { %11017 = vmatpush1.msra.mxu1 %v10955_v40  ;;  %11263 = vmatprep.mubr.f32.mxu0 %v39469_v1 }
 0x2a2   :  { %32135 = vmatmul.mubr.msk.f32.vlgmr.msra.gmra.mxu1 %vm117_vm1, %v34693_v56  ;;  %v10939_v28 = vpop.permute.xlu1 %10938  ;;  %v10937_v46 = vpop.permute.xlu0 %10936 }
 0x2a3   :  { %v10960_v42 = vsel %vm10954_vm6, %v10935_v41, %v10937_v46  ;;  %11192 = vmatprep.mubr.f32.mxu1 %v39469_v1  ;;  %v7424_v21 = vpop.f32.mrf.mxu0 }
 0x2a4   :  { %13234 = vrot.lane.b32.xlu1 %v34145_v57, %s32548_s11  ;;  %13224 = vrot.lane.b32.xlu0 %v34720_v8, %s32548_s11  ;;  %v34725_v37 = vadd.f32 %v7424_v21, %v34619_v35  ;;  %v10961_v35 = vsel %vm10954_vm6, %v10937_v46, %v10939_v28 }
 0x2a5   :  { %11158 = vmatprep.subr.mxu1 %v10960_v42  ;;  %v34731_v40 = vpop.f32.mrf.mxu0 }
 0x2a6   :  { %11159 = vmatpush1.msra.mxu1 %v10959_v19  ;;  %v10943_v51 = vpop.permute.xlu1 %10942  ;;  %v10941_v25 = vpop.permute.xlu0 %10940  ;;  %39514 = vst [vmem:[#allocation78_spill] sm:$0xff] %v34731_v40  ;;  %v34947_v40 = vld [vmem:[%s39382_s0 + $0x78] sm:$0xff] }
 0x2a7   :  { %32137 = vmatmul.mubr.msk.f32.vlgmr.msra.gmra.mxu1 %vm117_vm1, %v34693_v56  ;;  %v10962_v57 = vsel %vm10954_vm6, %v10939_v28, %v10941_v25  ;;  %v34742_v19 = vpop.f32.mrf.mxu1 }
 0x2a8   :  { %13238 = vrot.lane.b32.xlu1 %v34169_v9, %s32548_s11  ;;  %13236 = vrot.lane.b32.xlu0 %v34140_v13, %s32548_s11  ;;  %39515 = vst [vmem:[#allocation79_spill] sm:$0xff] %v34742_v19  ;;  %v10963_v9 = vsel %vm10954_vm6, %v10941_v25, %v10943_v51 }
 0x2a9   :  { %11229 = vmatprep.subr.mxu0 %v10962_v57  ;;  %11334 = vmatprep.mubr.f32.mxu1 %v39469_v1 }
 0x2aa   :  { %11230 = vmatpush1.msra.mxu0 %v10961_v35  ;;  %v10947_v53 = vpop.permute.xlu1 %10946  ;;  %v10945_v41 = vpop.permute.xlu0 %10944 }
 0x2ab   :  { %32138 = vmatmul.mubr.msk.f32.vlgmr.msra.gmra.mxu0 %vm117_vm1, %v34693_v56  ;;  %v10964_v42 = vsel %vm10954_vm6, %v10943_v51, %v10945_v41  ;;  %v7644_v21 = vpop.f32.mrf.mxu0 }
 0x2ac   :  { %13242 = vrot.lane.b32.xlu1 %v34193_v2, %s32548_s11  ;;  %13240 = vrot.lane.b32.xlu0 %v34164_v29, %s32548_s11  ;;  %v34749_v13 = vadd.f32 %v7644_v21, %v34647_v17  ;;  %v10965_v17 = vsel %vm10954_vm6, %v10945_v41, %v10947_v53 }
 0x2ad   :  { %11300 = vmatprep.subr.mxu1 %v10964_v42  ;;  %11405 = vmatprep.mubr.f32.mxu0 %v39469_v1  ;;  %v34770_v42 = vpop.f32.mrf.mxu0 }
 0x2ae   :  { %11301 = vmatpush1.msra.mxu1 %v10963_v9  ;;  %v10951_v28 = vpop.permute.xlu1 %10950  ;;  %v10949_v46 = vpop.permute.xlu0 %10948  ;;  %39517 = vst [vmem:[#allocation81_spill] sm:$0xff] %v34770_v42 }
 0x2af   :  { %32139 = vmatmul.mubr.msk.f32.vlgmr.msra.gmra.mxu1 %vm117_vm1, %v34693_v56  ;;  %v10966_v57 = vsel %vm10954_vm6, %v10947_v53, %v10949_v46  ;;  %v7573_v2 = vpop.f32.mrf.mxu1  ;;  %v10967_v53 = vsel %vm10954_vm6, %v10949_v46, %v10951_v28 }
 0x2b0   :  { %13246 = vrot.lane.b32.xlu1 %v34217_v54, %s32548_s11  ;;  %13244 = vrot.lane.b32.xlu0 %v34188_v10, %s32548_s11  ;;  %v34761_v29 = vadd.f32 %v7573_v2, %v34633_v52 }
 0x2b1   :  { %11371 = vmatprep.subr.mxu0 %v10966_v57  ;;  %11476 = vmatprep.mubr.f32.mxu1 %v39469_v1  ;;  %v34765_v51 = vpop.f32.mrf.mxu1 }
 0x2b2   :  { %39516 = vst [vmem:[#allocation80_spill] sm:$0xff] %v34765_v51  ;;  %11372 = vmatpush1.msra.mxu0 %v10965_v17  ;;  %v11502_v25 = vpop.permute.xlu1 %11501  ;;  %v10953_v35 = vpop.permute.xlu0 %10952 }
 0x2b3   :  { %32140 = vmatmul.mubr.msk.f32.vlgmr.msra.gmra.mxu0 %vm117_vm1, %v34693_v56  ;;  %v10968_v54 = vsel %vm10954_vm6, %v10951_v28, %v10953_v35  ;;  %v7715_v10 = vpop.f32.mrf.mxu1  ;;  %vm16310_vm6 = vcmask 900096  }
 0x2b4   :  { %13250 = vrot.lane.b32.xlu1 %v34241_v61, %s32548_s11  ;;  %13248 = vrot.lane.b32.xlu0 %v34212_v39, %s32548_s11  ;;  %v34777_v52 = vadd.f32 %v7715_v10, %v34661_v20  ;;  %v34794_v20 = vld [vmem:[%s39383_s2 + $0xa0] sm:$0xff] }
 0x2b5   :  { %11442 = vmatprep.subr.mxu1 %v10968_v54  ;;  %11625 = vmatprep.mubr.f32.mxu0 %v39469_v1  ;;  %v34785_v57 = vpop.f32.mrf.mxu1 }
 0x2b6   :  { %11443 = vmatpush1.msra.mxu1 %v10967_v53  ;;  %v11500_v41 = vpop.permute.xlu1 %11499  ;;  %v11504_v21 = vpop.permute.xlu0 %11503  ;;  %39518 = vst [vmem:[#allocation82_spill] sm:$0xff] %v34785_v57 }
 0x2b7   :  { %v11530_v9 = vsel %vm11529_vm7, %v11500_v41, %v11502_v25  ;;  %32141 = vmatmul.mubr.msk.f32.vlgmr.msra.gmra.mxu1 %vm117_vm1, %v34693_v56  ;;  %v11531_v61 = vsel %vm11529_vm7, %v11502_v25, %v11504_v21  ;;  %v7786_v39 = vpop.f32.mrf.mxu0 }
 0x2b8   :  { %13801 = vrot.lane.b32.xlu1 %v34686_v34, %s32549_s18  ;;  %13252 = vrot.lane.b32.xlu0 %v34236_v62, %s32548_s11  ;;  %v34797_v28 = vadd.f32 %v7786_v39, %v34674_v38  ;;  %v34811_v38 = vld [vmem:[%s39382_s0 + $0x18] sm:$0xff] }
 0x2b9   :  { %11591 = vmatprep.subr.mxu0 %v11531_v61  ;;  %11696 = vmatprep.mubr.f32.mxu1 %v39469_v1  ;;  %v34804_v17 = vpop.f32.mrf.mxu0  ;;  %v34835_v61 = vld [vmem:[%s39382_s0 + $0x20] sm:$0xff] }
 0x2ba   :  { %11592 = vmatpush1.msra.mxu0 %v11530_v9  ;;  %v11508_v56 = vpop.permute.xlu1 %11507  ;;  %v11506_v46 = vpop.permute.xlu0 %11505  ;;  %39519 = vst [vmem:[#allocation83_spill] sm:$0xff] %v34804_v17 }
 0x2bb   :  { %32143 = vmatmul.mubr.msk.f32.vlgmr.msra.gmra.mxu0 %vm117_vm1, %v34794_v20  ;;  %v11533_v2 = vsel %vm11529_vm7, %v11506_v46, %v11508_v56  ;;  %v11532_v62 = vsel %vm11529_vm7, %v11504_v21, %v11506_v46  ;;  %v7857_v25 = vpop.f32.mrf.mxu1 }
 0x2bc   :  { %13799 = vrot.lane.b32.xlu1 %v34720_v8, %s32549_s18  ;;  %13803 = vrot.lane.b32.xlu0 %v34811_v38, %s32549_s18  ;;  %v34816_v35 = vadd.f32 %v7857_v25, %v34696_v7  ;;  %v34828_v7 = vld [vmem:[%s39382_s0 + $0x28] sm:$0xff] }
 0x2bd   :  { %11662 = vmatprep.subr.mxu1 %v11533_v2  ;;  %11767 = vmatprep.mubr.f32.mxu0 %v39469_v1  ;;  %v34823_v9 = vpop.f32.mrf.mxu1 }
 0x2be   :  { %11663 = vmatpush1.msra.mxu1 %v11532_v62  ;;  %v11512_v54 = vpop.permute.xlu1 %11511  ;;  %v11510_v10 = vpop.permute.xlu0 %11509  ;;  %39520 = vst [vmem:[#allocation84_spill] sm:$0xff] %v34823_v9 }
 0x2bf   :  { %32144 = vmatmul.mubr.msk.f32.vlgmr.msra.gmra.mxu1 %vm117_vm1, %v34794_v20  ;;  %v11535_v53 = vsel %vm11529_vm7, %v11510_v10, %v11512_v54  ;;  %v11534_v41 = vsel %vm11529_vm7, %v11508_v56, %v11510_v10  ;;  %v7928_v21 = vpop.f32.mrf.mxu0 }
 0x2c0   :  { %13807 = vrot.lane.b32.xlu1 %v34828_v7, %s32549_s18  ;;  %13805 = vrot.lane.b32.xlu0 %v34835_v61, %s32549_s18  ;;  %v34840_v39 = vadd.f32 %v7928_v21, %v34708_v22  ;;  %v34852_v22 = vld [vmem:[%s39382_s0 + $0x38] sm:$0xff] }
 0x2c1   :  { %11733 = vmatprep.subr.mxu0 %v11535_v53  ;;  %11838 = vmatprep.mubr.f32.mxu1 %v39469_v1  ;;  %v34847_v25 = vpop.f32.mrf.mxu0  ;;  %v34859_v53 = vld [vmem:[%s39382_s0 + $0x30] sm:$0xff] }
 0x2c2   :  { %11734 = vmatpush1.msra.mxu0 %v11534_v41  ;;  %v11516_v56 = vpop.permute.xlu1 %11515  ;;  %v11514_v46 = vpop.permute.xlu0 %11513  ;;  %39521 = vst [vmem:[#allocation85_spill] sm:$0xff] %v34847_v25 }
 0x2c3   :  { %32145 = vmatmul.mubr.msk.f32.vlgmr.msra.gmra.mxu0 %vm117_vm1, %v34794_v20  ;;  %v11537_v2 = vsel %vm11529_vm7, %v11514_v46, %v11516_v56  ;;  %v11536_v62 = vsel %vm11529_vm7, %v11512_v54, %v11514_v46  ;;  %v7999_v10 = vpop.f32.mrf.mxu1 }
 0x2c4   :  { %13811 = vrot.lane.b32.xlu1 %v34852_v22, %s32549_s18  ;;  %13809 = vrot.lane.b32.xlu0 %v34859_v53, %s32549_s18  ;;  %v34864_v54 = vadd.f32 %v7999_v10, %v34725_v37  ;;  %v34876_v37 = vld [vmem:[%s39382_s0 + $0x48] sm:$0xff] }
 0x2c5   :  { %11804 = vmatprep.subr.mxu1 %v11537_v2  ;;  %11909 = vmatprep.mubr.f32.mxu0 %v39469_v1  ;;  %v34871_v57 = vpop.f32.mrf.mxu1  ;;  %v34883_v2 = vld [vmem:[%s39382_s0 + $0x40] sm:$0xff] }
 0x2c6   :  { %11805 = vmatpush1.msra.mxu1 %v11536_v62  ;;  %v11520_v41 = vpop.permute.xlu1 %11519  ;;  %v11518_v21 = vpop.permute.xlu0 %11517  ;;  %39522 = vst [vmem:[#allocation86_spill] sm:$0xff] %v34871_v57 }
 0x2c7   :  { %32146 = vmatmul.mubr.msk.f32.vlgmr.msra.gmra.mxu1 %vm117_vm1, %v34794_v20  ;;  %v11539_v46 = vsel %vm11529_vm7, %v11518_v21, %v11520_v41  ;;  %v11538_v25 = vsel %vm11529_vm7, %v11516_v56, %v11518_v21  ;;  %v8148_v9 = vpop.f32.mrf.mxu0 }
 0x2c8   :  { %13815 = vrot.lane.b32.xlu1 %v34876_v37, %s32549_s18  ;;  %13813 = vrot.lane.b32.xlu0 %v34883_v2, %s32549_s18  ;;  %v34888_v56 = vadd.f32 %v8148_v9, %v34761_v29  ;;  %v34900_v29 = vld [vmem:[%s39382_s0 + $0x58] sm:$0xff]  ;;  %v34907_v9 = vld [vmem:[%s39382_s0 + $0x50] sm:$0xff] }
 0x2c9   :  { %11875 = vmatprep.subr.mxu0 %v11539_v46  ;;  %11980 = vmatprep.mubr.f32.mxu1 %v39469_v1  ;;  %v34895_v17 = vpop.f32.mrf.mxu0 }
 0x2ca   :  { %11876 = vmatpush1.msra.mxu0 %v11538_v25  ;;  %v11524_v62 = vpop.permute.xlu1 %11523  ;;  %v11522_v10 = vpop.permute.xlu0 %11521  ;;  %39523 = vst [vmem:[#allocation87_spill] sm:$0xff] %v34895_v17 }
 0x2cb   :  { %32147 = vmatmul.mubr.msk.f32.vlgmr.msra.gmra.mxu0 %vm117_vm1, %v34794_v20  ;;  %v11541_v21 = vsel %vm11529_vm7, %v11522_v10, %v11524_v62  ;;  %v11540_v57 = vsel %vm11529_vm7, %v11520_v41, %v11522_v10  ;;  %v8219_v51 = vpop.f32.mrf.mxu1 }
 0x2cc   :  { %13819 = vrot.lane.b32.xlu1 %v34900_v29, %s32549_s18  ;;  %13817 = vrot.lane.b32.xlu0 %v34907_v9, %s32549_s18  ;;  %v34912_v25 = vadd.f32 %v8219_v51, %v34749_v13  ;;  %v34924_v13 = vld [vmem:[%s39382_s0 + $0x68] sm:$0xff]  ;;  %v34931_v51 = vld [vmem:[%s39382_s0 + $0x60] sm:$0xff] }
 0x2cd   :  { %11946 = vmatprep.subr.mxu1 %v11541_v21  ;;  %12051 = vmatprep.mubr.f32.mxu0 %v39469_v1  ;;  %v34919_v19 = vpop.f32.mrf.mxu1 }
 0x2ce   :  { %11947 = vmatpush1.msra.mxu1 %v11540_v57  ;;  %v11528_v41 = vpop.permute.xlu1 %11527  ;;  %v11526_v46 = vpop.permute.xlu0 %11525  ;;  %39524 = vst [vmem:[#allocation88_spill] sm:$0xff] %v34919_v19 }
 0x2cf   :  { %32148 = vmatmul.mubr.msk.f32.vlgmr.msra.gmra.mxu1 %vm117_vm1, %v34794_v20  ;;  %v11543_v10 = vsel %vm11529_vm7, %v11526_v46, %v11528_v41  ;;  %v11542_v17 = vsel %vm11529_vm7, %v11524_v62, %v11526_v46  ;;  %v8290_v42 = vpop.f32.mrf.mxu0  ;;  %vm16869_vm7 = vcmask 908288  }
 0x2d0   :  { %13823 = vrot.lane.b32.xlu1 %v34924_v13, %s32549_s18  ;;  %13821 = vrot.lane.b32.xlu0 %v34931_v51, %s32549_s18  ;;  %v34936_v57 = vadd.f32 %v8290_v42, %v34777_v52  ;;  %v34954_v42 = vld [vmem:[%s39382_s0 + $0x70] sm:$0xff]  ;;  %s32550_s0 = smov 35  }
 0x2d1   :  { %12017 = vmatprep.subr.mxu0 %v11543_v10  ;;  %12200 = vmatprep.mubr.f32.mxu1 %v39469_v1  ;;  %v34942_v46 = vpop.f32.mrf.mxu0 }
 0x2d2   :  { %12018 = vmatpush1.msra.mxu0 %v11542_v17  ;;  %v12079_v62 = vpop.permute.xlu1 %12078  ;;  %v12077_v21 = vpop.permute.xlu0 %12076  ;;  %39525 = vst [vmem:[#allocation89_spill] sm:$0xff] %v34942_v46 }
 0x2d3   :  { %32149 = vmatmul.mubr.msk.f32.vlgmr.msra.gmra.mxu0 %vm117_vm1, %v34794_v20  ;;  %v12106_v41 = vsel %vm12104_vm8, %v12077_v21, %v12079_v62  ;;  %v8361_v19 = vpop.f32.mrf.mxu1 }
 0x2d4   :  { %13827 = vrot.lane.b32.xlu1 %v34947_v40, %s32549_s18  ;;  %13825 = vrot.lane.b32.xlu0 %v34954_v42, %s32549_s18  ;;  %v34959_v52 = vadd.f32 %v8361_v19, %v34797_v28  ;;  %v34973_v19 = vld [vmem:[%s39383_s2 + $0xa8] sm:$0xff]  ;;  %s32555_s18 = smov 111  }
 0x2d5   :  { %12166 = vmatprep.subr.mxu1 %v12106_v41  ;;  %12271 = vmatprep.mubr.f32.mxu0 %v39469_v1  ;;  %v34964_v48 = vpop.f32.mrf.mxu1 }
 0x2d6   :  { %v12083_v20 = vpop.permute.xlu1 %12082  ;;  %v12081_v17 = vpop.permute.xlu0 %12080  ;;  %39526 = vst [vmem:[#allocation90_spill] sm:$0xff] %v34964_v48 }
 0x2d7   :  { %v12108_v10 = vsel %vm12104_vm8, %v12081_v17, %v12083_v20  ;;  %v12107_v46 = vsel %vm12104_vm8, %v12079_v62, %v12081_v17  ;;  %v8432_v26 = vpop.f32.mrf.mxu0 }
 0x2d8   :  { %14378 = vrot.lane.b32.xlu1 %v34811_v38, %s32550_s0  ;;  %14376 = vrot.lane.b32.xlu0 %v34686_v34, %s32550_s0  ;;  %v34976_v28 = vadd.f32 %v8432_v26, %v34816_v35 }
 0x2d9   :  { %12237 = vmatprep.subr.mxu0 %v12108_v10  ;;  %v34981_v48 = vpop.f32.mrf.mxu0 }
 0x2da   :  { %12238 = vmatpush1.msra.mxu0 %v12107_v46  ;;  %v12085_v62 = vpop.permute.xlu1 %12084  ;;  %v12075_v41 = vpop.permute.xlu0 %12074  ;;  %39527 = vst [vmem:[#allocation91_spill] sm:$0xff] %v34981_v48 }
 0x2db   :  { %32152 = vmatmul.mubr.msk.f32.vlgmr.msra.gmra.mxu0 %vm117_vm1, %v34973_v19  ;;  %v12105_v17 = vsel %vm12104_vm8, %v12075_v41, %v12077_v21  ;;  %v8503_v27 = vpop.f32.mrf.mxu1 }
 0x2dc   :  { %14382 = vrot.lane.b32.xlu1 %v34828_v7, %s32550_s0  ;;  %14380 = vrot.lane.b32.xlu0 %v34835_v61, %s32550_s0  ;;  %v34988_v26 = vadd.f32 %v8503_v27, %v34840_v39  ;;  %v12109_v39 = vsel %vm12104_vm8, %v12083_v20, %v12085_v62 }
 0x2dd   :  { %12167 = vmatpush1.msra.mxu1 %v12105_v17  ;;  %12413 = vmatprep.mubr.f32.mxu0 %v39469_v1  ;;  %v35013_v20 = vpop.f32.mrf.mxu1 }
 0x2de   :  { %32151 = vmatmul.mubr.msk.f32.vlgmr.msra.gmra.mxu1 %vm117_vm1, %v34973_v19  ;;  %v12089_v35 = vpop.permute.xlu1 %12088  ;;  %v12087_v21 = vpop.permute.xlu0 %12086  ;;  %39529 = vst [vmem:[#allocation93_spill] sm:$0xff] %v35013_v20 }
 0x2df   :  { %v12110_v46 = vsel %vm12104_vm8, %v12085_v62, %v12087_v21  ;;  %12342 = vmatprep.mubr.f32.mxu1 %v39469_v1  ;;  %v8574_v10 = vpop.f32.mrf.mxu0 }
 0x2e0   :  { %14384 = vrot.lane.b32.xlu1 %v34859_v53, %s32550_s0  ;;  %14374 = vrot.lane.b32.xlu0 %v34720_v8, %s32550_s0  ;;  %v35000_v27 = vadd.f32 %v8574_v10, %v34864_v54  ;;  %v12111_v54 = vsel %vm12104_vm8, %v12087_v21, %v12089_v35 }
 0x2e1   :  { %12308 = vmatprep.subr.mxu1 %v12110_v46  ;;  %v35005_v48 = vpop.f32.mrf.mxu0 }
 0x2e2   :  { %12309 = vmatpush1.msra.mxu1 %v12109_v39  ;;  %v12093_v41 = vpop.permute.xlu1 %12092  ;;  %v12091_v17 = vpop.permute.xlu0 %12090  ;;  %39528 = vst [vmem:[#allocation92_spill] sm:$0xff] %v35005_v48 }
 0x2e3   :  { %32153 = vmatmul.mubr.msk.f32.vlgmr.msra.gmra.mxu1 %vm117_vm1, %v34973_v19  ;;  %v12112_v5 = vsel %vm12104_vm8, %v12089_v35, %v12091_v17 }
 0x2e4   :  { %14388 = vrot.lane.b32.xlu1 %v34883_v2, %s32550_s0  ;;  %14386 = vrot.lane.b32.xlu0 %v34852_v22, %s32550_s0 }
 0x2e5   :  { %12379 = vmatprep.subr.mxu0 %v12112_v5  ;;  %12484 = vmatprep.mubr.f32.mxu1 %v39469_v1  ;;  %v12113_v5 = vsel %vm12104_vm8, %v12091_v17, %v12093_v41 }
 0x2e6   :  { %12380 = vmatpush1.msra.mxu0 %v12111_v54  ;;  %v12097_v62 = vpop.permute.xlu1 %12096  ;;  %v12095_v46 = vpop.permute.xlu0 %12094 }
 0x2e7   :  { %v8793_v10 = vpop.f32.mrf.mxu0  ;;  %32154 = vmatmul.mubr.msk.f32.vlgmr.msra.gmra.mxu0 %vm117_vm1, %v34973_v19  ;;  %v12114_v39 = vsel %vm12104_vm8, %v12093_v41, %v12095_v46  ;;  %v12115_v17 = vsel %vm12104_vm8, %v12095_v46, %v12097_v62 }
 0x2e8   :  { %v35020_v48 = vadd.f32 %v8793_v10, %v34912_v25  ;;  %14392 = vrot.lane.b32.xlu1 %v34907_v9, %s32550_s0  ;;  %14390 = vrot.lane.b32.xlu0 %v34876_v37, %s32550_s0 }
 0x2e9   :  { %12450 = vmatprep.subr.mxu1 %v12114_v39  ;;  %12555 = vmatprep.mubr.f32.mxu0 %v39469_v1  ;;  %v35052_v46 = vpop.f32.mrf.mxu0 }
 0x2ea   :  { %v8722_v35 = vpop.f32.mrf.mxu1  ;;  %12451 = vmatpush1.msra.mxu1 %v12113_v5  ;;  %v12101_v21 = vpop.permute.xlu1 %12100 }
 0x2eb   :  { %v35029_v54 = vadd.f32 %v8722_v35, %v34888_v56  ;;  %32155 = vmatmul.mubr.msk.f32.vlgmr.msra.gmra.mxu1 %vm117_vm1, %v34973_v19  ;;  %v12099_v25 = vpop.permute.xlu0 %12098 }
 0x2ec   :  { %v35033_v10 = vpop.f32.mrf.mxu1  ;;  %14396 = vrot.lane.b32.xlu1 %v34931_v51, %s32550_s0  ;;  %14394 = vrot.lane.b32.xlu0 %v34900_v29, %s32550_s0  ;;  %v12116_v41 = vsel %vm12104_vm8, %v12097_v62, %v12099_v25 }
 0x2ed   :  { %39530 = vst [vmem:[#allocation94_spill] sm:$0xff] %v35033_v10  ;;  %12521 = vmatprep.subr.mxu0 %v12116_v41  ;;  %12626 = vmatprep.mubr.f32.mxu1 %v39469_v1  ;;  %v12117_v41 = vsel %vm12104_vm8, %v12099_v25, %v12101_v21  ;;  %v35070_v25 = vld [vmem:[%s39383_s2 + $0xb0] sm:$0xff] }
 0x2ee   :  { %12522 = vmatpush1.msra.mxu0 %v12115_v17  ;;  %v12652_v56 = vpop.permute.xlu1 %12651 }
 0x2ef   :  { %v8864_v39 = vpop.f32.mrf.mxu1  ;;  %32156 = vmatmul.mubr.msk.f32.vlgmr.msra.gmra.mxu0 %vm117_vm1, %v34973_v19  ;;  %v12103_v5 = vpop.permute.xlu0 %12102 }
 0x2f0   :  { %v35045_v35 = vadd.f32 %v8864_v39, %v34936_v57  ;;  %14400 = vrot.lane.b32.xlu1 %v34954_v42, %s32550_s0  ;;  %14398 = vrot.lane.b32.xlu0 %v34924_v13, %s32550_s0  ;;  %v12118_v62 = vsel %vm12104_vm8, %v12101_v21, %v12103_v5  ;;  %vm17430_vm8 = vcmask 891904  }
 0x2f1   :  { %12592 = vmatprep.subr.mxu1 %v12118_v62  ;;  %12775 = vmatprep.mubr.f32.mxu0 %v39469_v1  ;;  %v35072_v5 = vpop.f32.mrf.mxu1 }
 0x2f2   :  { %12593 = vmatpush1.msra.mxu1 %v12117_v41  ;;  %v12650_v17 = vpop.permute.xlu1 %12649 }
 0x2f3   :  { %v12680_v57 = vsel %vm12679_vm11, %v12650_v17, %v12652_v56  ;;  %v8935_v39 = vpop.f32.mrf.mxu0  ;;  %32157 = vmatmul.mubr.msk.f32.vlgmr.msra.gmra.mxu1 %vm117_vm1, %v34973_v19  ;;  %v12654_v10 = vpop.permute.xlu0 %12653 }
 0x2f4   :  { %v35060_v20 = vadd.f32 %v8935_v39, %v34959_v52  ;;  %14951 = vrot.lane.b32.xlu1 %v34686_v34, %s32551_s16  ;;  %14402 = vrot.lane.b32.xlu0 %v34947_v40, %s32550_s0  ;;  %v12681_v21 = vsel %vm12679_vm11, %v12652_v56, %v12654_v10  ;;  %s32554_s0 = smov 109  }
 0x2f5   :  { %12741 = vmatprep.subr.mxu0 %v12681_v21  ;;  %12846 = vmatprep.mubr.f32.mxu1 %v39469_v1  ;;  %v35086_v17 = vpop.f32.mrf.mxu0 }
 0x2f6   :  { %12742 = vmatpush1.msra.mxu0 %v12680_v57  ;;  %v12658_v52 = vpop.permute.xlu1 %12657 }
 0x2f7   :  { %v9006_v19 = vpop.f32.mrf.mxu1  ;;  %32159 = vmatmul.mubr.msk.f32.vlgmr.msra.gmra.mxu0 %vm117_vm1, %v35070_v25  ;;  %v12656_v34 = vpop.permute.xlu0 %12655 }
 0x2f8   :  { %v35078_v62 = vadd.f32 %v9006_v19, %v34976_v28  ;;  %14949 = vrot.lane.b32.xlu1 %v34720_v8, %s32551_s16  ;;  %14953 = vrot.lane.b32.xlu0 %v34811_v38, %s32551_s16  ;;  %v12683_v56 = vsel %vm12679_vm11, %v12656_v34, %v12658_v52  ;;  %v12682_v41 = vsel %vm12679_vm11, %v12654_v10, %v12656_v34 }
 0x2f9   :  { %12812 = vmatprep.subr.mxu1 %v12683_v56  ;;  %12917 = vmatprep.mubr.f32.mxu0 %v39469_v1  ;;  %v35100_v21 = vpop.f32.mrf.mxu1 }
 0x2fa   :  { %12813 = vmatpush1.msra.mxu1 %v12682_v41  ;;  %v12662_v57 = vpop.permute.xlu1 %12661 }
 0x2fb   :  { %v9077_v39 = vpop.f32.mrf.mxu0  ;;  %32160 = vmatmul.mubr.msk.f32.vlgmr.msra.gmra.mxu1 %vm117_vm1, %v35070_v25  ;;  %v12660_v28 = vpop.permute.xlu0 %12659 }
 0x2fc   :  { %v35092_v8 = vadd.f32 %v9077_v39, %v34988_v26  ;;  %14957 = vrot.lane.b32.xlu1 %v34828_v7, %s32551_s16  ;;  %14955 = vrot.lane.b32.xlu0 %v34835_v61, %s32551_s16  ;;  %v12685_v38 = vsel %vm12679_vm11, %v12660_v28, %v12662_v57  ;;  %v12684_v10 = vsel %vm12679_vm11, %v12658_v52, %v12660_v28 }
 0x2fd   :  { %12883 = vmatprep.subr.mxu0 %v12685_v38  ;;  %12988 = vmatprep.mubr.f32.mxu1 %v39469_v1  ;;  %v35114_v56 = vpop.f32.mrf.mxu0 }
 0x2fe   :  { %12884 = vmatpush1.msra.mxu0 %v12684_v10  ;;  %v12666_v19 = vpop.permute.xlu1 %12665 }
 0x2ff   :  { %v9148_v34 = vpop.f32.mrf.mxu1  ;;  %32161 = vmatmul.mubr.msk.f32.vlgmr.msra.gmra.mxu0 %vm117_vm1, %v35070_v25  ;;  %v12664_v26 = vpop.permute.xlu0 %12663 }
 0x300   :  { %v35106_v7 = vadd.f32 %v9148_v34, %v35000_v27  ;;  %14961 = vrot.lane.b32.xlu1 %v34852_v22, %s32551_s16  ;;  %14959 = vrot.lane.b32.xlu0 %v34859_v53, %s32551_s16  ;;  %v12687_v61 = vsel %vm12679_vm11, %v12664_v26, %v12666_v19  ;;  %v12686_v52 = vsel %vm12679_vm11, %v12662_v57, %v12664_v26 }
 0x301   :  { %12954 = vmatprep.subr.mxu1 %v12687_v61  ;;  %13059 = vmatprep.mubr.f32.mxu0 %v39469_v1  ;;  %v35128_v28 = vpop.f32.mrf.mxu1 }
 0x302   :  { %12955 = vmatpush1.msra.mxu1 %v12686_v52  ;;  %v12670_v41 = vpop.permute.xlu1 %12669 }
 0x303   :  { %v9297_v39 = vpop.f32.mrf.mxu0  ;;  %32162 = vmatmul.mubr.msk.f32.vlgmr.msra.gmra.mxu1 %vm117_vm1, %v35070_v25  ;;  %v12668_v27 = vpop.permute.xlu0 %12667 }
 0x304   :  { %v35120_v22 = vadd.f32 %v9297_v39, %v35029_v54  ;;  %14965 = vrot.lane.b32.xlu1 %v34876_v37, %s32551_s16  ;;  %14963 = vrot.lane.b32.xlu0 %v34883_v2, %s32551_s16  ;;  %v12689_v53 = vsel %vm12679_vm11, %v12668_v27, %v12670_v41  ;;  %v12688_v57 = vsel %vm12679_vm11, %v12666_v19, %v12668_v27 }
 0x305   :  { %13025 = vmatprep.subr.mxu0 %v12689_v53  ;;  %13130 = vmatprep.mubr.f32.mxu1 %v39469_v1  ;;  %v35142_v34 = vpop.f32.mrf.mxu0 }
 0x306   :  { %13026 = vmatpush1.msra.mxu0 %v12688_v57  ;;  %v12674_v38 = vpop.permute.xlu1 %12673 }
 0x307   :  { %v9368_v10 = vpop.f32.mrf.mxu1  ;;  %32163 = vmatmul.mubr.msk.f32.vlgmr.msra.gmra.mxu0 %vm117_vm1, %v35070_v25  ;;  %v12672_v54 = vpop.permute.xlu0 %12671 }
 0x308   :  { %v35134_v37 = vadd.f32 %v9368_v10, %v35020_v48  ;;  %14969 = vrot.lane.b32.xlu1 %v34900_v29, %s32551_s16  ;;  %14967 = vrot.lane.b32.xlu0 %v34907_v9, %s32551_s16  ;;  %v12691_v2 = vsel %vm12679_vm11, %v12672_v54, %v12674_v38  ;;  %v12690_v19 = vsel %vm12679_vm11, %v12670_v41, %v12672_v54 }
 0x309   :  { %13096 = vmatprep.subr.mxu1 %v12691_v2  ;;  %13201 = vmatprep.mubr.f32.mxu0 %v39469_v1  ;;  %v35156_v41 = vpop.f32.mrf.mxu1 }
 0x30a   :  { %13097 = vmatpush1.msra.mxu1 %v12690_v19  ;;  %v12678_v26 = vpop.permute.xlu1 %12677 }
 0x30b   :  { %v9439_v61 = vpop.f32.mrf.mxu0  ;;  %32164 = vmatmul.mubr.msk.f32.vlgmr.msra.gmra.mxu1 %vm117_vm1, %v35070_v25  ;;  %v12676_v48 = vpop.permute.xlu0 %12675 }
 0x30c   :  { %v35148_v29 = vadd.f32 %v9439_v61, %v35045_v35  ;;  %14973 = vrot.lane.b32.xlu1 %v34924_v13, %s32551_s16  ;;  %14971 = vrot.lane.b32.xlu0 %v34931_v51, %s32551_s16  ;;  %v12693_v9 = vsel %vm12679_vm11, %v12676_v48, %v12678_v26  ;;  %v12692_v52 = vsel %vm12679_vm11, %v12674_v38, %v12676_v48  ;;  %vm18005_vm11 = vcmask 826368  }
 0x30d   :  { %13167 = vmatprep.subr.mxu0 %v12693_v9  ;;  %13350 = vmatprep.mubr.f32.mxu1 %v39469_v1  ;;  %v35169_v53 = vpop.f32.mrf.mxu0 }
 0x30e   :  { %13168 = vmatpush1.msra.mxu0 %v12692_v52  ;;  %v13229_v39 = vpop.permute.xlu1 %13228 }
 0x30f   :  { %v9510_v35 = vpop.f32.mrf.mxu1  ;;  %32165 = vmatmul.mubr.msk.f32.vlgmr.msra.gmra.mxu0 %vm117_vm1, %v35070_v25  ;;  %v13227_v13 = vpop.permute.xlu0 %13226 }
 0x310   :  { %v35162_v27 = vadd.f32 %v9510_v35, %v35060_v20  ;;  %14977 = vrot.lane.b32.xlu1 %v34947_v40, %s32551_s16  ;;  %14975 = vrot.lane.b32.xlu0 %v34954_v42, %s32551_s16  ;;  %v13256_v51 = vsel %vm13254_vm14, %v13227_v13, %v13229_v39  ;;  %v35180_v42 = vld [vmem:[%s39383_s2 + $0xb8] sm:$0xff]  ;;  %s32557_s16 = smov 101  }
 0x311   :  { %13316 = vmatprep.subr.mxu1 %v13256_v51  ;;  %13421 = vmatprep.mubr.f32.mxu0 %v39469_v1  ;;  %v35182_v54 = vpop.f32.mrf.mxu1 }
 0x312   :  { %v13233_v57 = vpop.permute.xlu1 %13232 }
 0x313   :  { %v9581_v38 = vpop.f32.mrf.mxu0  ;;  %v13231_v25 = vpop.permute.xlu0 %13230 }
 0x314   :  { %v35173_v10 = vadd.f32 %v9581_v38, %v35078_v62  ;;  %v13258_v20 = vsel %vm13254_vm14, %v13231_v25, %v13233_v57  ;;  %v13257_v40 = vsel %vm13254_vm14, %v13229_v39, %v13231_v25 }
 0x315   :  { %13387 = vmatprep.subr.mxu0 %v13258_v20  ;;  %v35191_v48 = vpop.f32.mrf.mxu0 }
 0x316   :  { %13388 = vmatpush1.msra.mxu0 %v13257_v40  ;;  %v13235_v2 = vpop.permute.xlu1 %13234 }
 0x317   :  { %v9652_v19 = vpop.f32.mrf.mxu1  ;;  %32168 = vmatmul.mubr.msk.f32.vlgmr.msra.gmra.mxu0 %vm117_vm1, %v35180_v42  ;;  %v13225_v62 = vpop.permute.xlu0 %13224 }
 0x318   :  { %v35187_v26 = vadd.f32 %v9652_v19, %v35092_v8  ;;  %v13255_v61 = vsel %vm13254_vm14, %v13225_v62, %v13227_v13  ;;  %13563 = vmatprep.mubr.f32.mxu0 %v39469_v1  ;;  %v13259_v13 = vsel %vm13254_vm14, %v13233_v57, %v13235_v2 }
 0x319   :  { %13317 = vmatpush1.msra.mxu1 %v13255_v61 }
 0x31a   :  { %32167 = vmatmul.mubr.msk.f32.vlgmr.msra.gmra.mxu1 %vm117_vm1, %v35180_v42  ;;  %v13239_v9 = vpop.permute.xlu1 %13238 }
 0x31b   :  { %v9723_v52 = vpop.f32.mrf.mxu0  ;;  %v13237_v39 = vpop.permute.xlu0 %13236  ;;  %13492 = vmatprep.mubr.f32.mxu1 %v39469_v1 }
 0x31c   :  { %v35197_v35 = vadd.f32 %v9723_v52, %v35106_v7  ;;  %v13260_v8 = vsel %vm13254_vm14, %v13235_v2, %v13237_v39  ;;  %v13261_v7 = vsel %vm13254_vm14, %v13237_v39, %v13239_v9  ;;  %v35210_v2 = vpop.f32.mrf.mxu1 }
 0x31d   :  { %13458 = vmatprep.subr.mxu1 %v13260_v8  ;;  %v35205_v20 = vpop.f32.mrf.mxu0 }
 0x31e   :  { %13459 = vmatpush1.msra.mxu1 %v13259_v13  ;;  %v13243_v51 = vpop.permute.xlu1 %13242 }
 0x31f   :  { %32169 = vmatmul.mubr.msk.f32.vlgmr.msra.gmra.mxu1 %vm117_vm1, %v35180_v42  ;;  %v13241_v38 = vpop.permute.xlu0 %13240 }
 0x320   :  { %v13262_v25 = vsel %vm13254_vm14, %v13239_v9, %v13241_v38  ;;  %13634 = vmatprep.mubr.f32.mxu1 %v39469_v1  ;;  %v13263_v52 = vsel %vm13254_vm14, %v13241_v38, %v13243_v51 }
 0x321   :  { %13529 = vmatprep.subr.mxu0 %v13262_v25 }
 0x322   :  { %13530 = vmatpush1.msra.mxu0 %v13261_v7  ;;  %v13247_v40 = vpop.permute.xlu1 %13246 }
 0x323   :  { %v9943_v19 = vpop.f32.mrf.mxu0  ;;  %32170 = vmatmul.mubr.msk.f32.vlgmr.msra.gmra.mxu0 %vm117_vm1, %v35180_v42  ;;  %v13245_v57 = vpop.permute.xlu0 %13244 }
 0x324   :  { %v35213_v62 = vadd.f32 %v9943_v19, %v35134_v37  ;;  %v13264_v61 = vsel %vm13254_vm14, %v13243_v51, %v13245_v57  ;;  %13705 = vmatprep.mubr.f32.mxu0 %v39469_v1  ;;  %v13265_v7 = vsel %vm13254_vm14, %v13245_v57, %v13247_v40 }
 0x325   :  { %13600 = vmatprep.subr.mxu1 %v13264_v61 }
 0x326   :  { %v9872_v9 = vpop.f32.mrf.mxu1  ;;  %13601 = vmatpush1.msra.mxu1 %v13263_v52  ;;  %v13251_v39 = vpop.permute.xlu1 %13250 }
 0x327   :  { %v35219_v8 = vadd.f32 %v9872_v9, %v35120_v22  ;;  %32171 = vmatmul.mubr.msk.f32.vlgmr.msra.gmra.mxu1 %vm117_vm1, %v35180_v42  ;;  %v13249_v13 = vpop.permute.xlu0 %13248  ;;  %v35235_v52 = vpop.f32.mrf.mxu0 }
 0x328   :  { %v35223_v25 = vpop.f32.mrf.mxu1  ;;  %v13266_v37 = vsel %vm13254_vm14, %v13247_v40, %v13249_v13  ;;  %13776 = vmatprep.mubr.f32.mxu1 %v39469_v1  ;;  %v13267_v40 = vsel %vm13254_vm14, %v13249_v13, %v13251_v39 }
 0x329   :  { %39531 = vst [vmem:[#allocation95_spill] sm:$0xff] %v35223_v25  ;;  %13671 = vmatprep.subr.mxu0 %v13266_v37 }
 0x32a   :  { %13672 = vmatpush1.msra.mxu0 %v13265_v7  ;;  %v13802_v51 = vpop.permute.xlu1 %13801 }
 0x32b   :  { %v10014_v38 = vpop.f32.mrf.mxu1  ;;  %32172 = vmatmul.mubr.msk.f32.vlgmr.msra.gmra.mxu0 %vm117_vm1, %v35180_v42  ;;  %v13253_v22 = vpop.permute.xlu0 %13252 }
 0x32c   :  { %v35231_v19 = vadd.f32 %v10014_v38, %v35148_v29  ;;  %v13268_v61 = vsel %vm13254_vm14, %v13251_v39, %v13253_v22  ;;  %13925 = vmatprep.mubr.f32.mxu0 %v39469_v1  ;;  %v35248_v22 = vld [vmem:[%s39383_s2 + $0xc0] sm:$0xff]  ;;  %vm18580_vm14 = vcmask 818176  }
 0x32d   :  { %13742 = vmatprep.subr.mxu1 %v13268_v61  ;;  %v35251_v39 = vpop.f32.mrf.mxu1 }
 0x32e   :  { %13743 = vmatpush1.msra.mxu1 %v13267_v40  ;;  %v13800_v57 = vpop.permute.xlu1 %13799  ;;  %39532 = vst [vmem:[#allocation96_spill] sm:$0xff] %v35251_v39 }
 0x32f   :  { %v13830_v9 = vsel %vm13829_vm15, %v13800_v57, %v13802_v51  ;;  %v10085_v37 = vpop.f32.mrf.mxu0  ;;  %32173 = vmatmul.mubr.msk.f32.vlgmr.msra.gmra.mxu1 %vm117_vm1, %v35180_v42  ;;  %v13804_v29 = vpop.permute.xlu0 %13803 }
 0x330   :  { %v35242_v7 = vadd.f32 %v10085_v37, %v35162_v27  ;;  %v13831_v38 = vsel %vm13829_vm15, %v13802_v51, %v13804_v29  ;;  %13996 = vmatprep.mubr.f32.mxu1 %v39469_v1 }
 0x331   :  { %13891 = vmatprep.subr.mxu0 %v13831_v38  ;;  %v35261_v57 = vpop.f32.mrf.mxu0 }
 0x332   :  { %13892 = vmatpush1.msra.mxu0 %v13830_v9  ;;  %v13808_v13 = vpop.permute.xlu1 %13807  ;;  %39533 = vst [vmem:[#allocation97_spill] sm:$0xff] %v35261_v57 }
 0x333   :  { %v10156_v61 = vpop.f32.mrf.mxu1  ;;  %32175 = vmatmul.mubr.msk.f32.vlgmr.msra.gmra.mxu0 %vm117_vm1, %v35248_v22  ;;  %v13806_v27 = vpop.permute.xlu0 %13805 }
 0x334   :  { %v35256_v42 = vadd.f32 %v10156_v61, %v35173_v10  ;;  %v13833_v51 = vsel %vm13829_vm15, %v13806_v27, %v13808_v13  ;;  %v13832_v40 = vsel %vm13829_vm15, %v13804_v29, %v13806_v27  ;;  %14067 = vmatprep.mubr.f32.mxu0 %v39469_v1 }
 0x335   :  { %13962 = vmatprep.subr.mxu1 %v13833_v51  ;;  %v35271_v29 = vpop.f32.mrf.mxu1 }
 0x336   :  { %13963 = vmatpush1.msra.mxu1 %v13832_v40  ;;  %v13812_v9 = vpop.permute.xlu1 %13811  ;;  %39534 = vst [vmem:[#allocation98_spill] sm:$0xff] %v35271_v29 }
 0x337   :  { %v10227_v37 = vpop.f32.mrf.mxu0  ;;  %32176 = vmatmul.mubr.msk.f32.vlgmr.msra.gmra.mxu1 %vm117_vm1, %v35248_v22  ;;  %v13810_v38 = vpop.permute.xlu0 %13809 }
 0x338   :  { %v35266_v39 = vadd.f32 %v10227_v37, %v35187_v26  ;;  %v13835_v10 = vsel %vm13829_vm15, %v13810_v38, %v13812_v9  ;;  %v13834_v61 = vsel %vm13829_vm15, %v13808_v13, %v13810_v38  ;;  %14138 = vmatprep.mubr.f32.mxu1 %v39469_v1 }
 0x339   :  { %14033 = vmatprep.subr.mxu0 %v13835_v10  ;;  %v35281_v13 = vpop.f32.mrf.mxu0 }
 0x33a   :  { %14034 = vmatpush1.msra.mxu0 %v13834_v61  ;;  %v13816_v27 = vpop.permute.xlu1 %13815  ;;  %39535 = vst [vmem:[#allocation99_spill] sm:$0xff] %v35281_v13 }
 0x33b   :  { %v10298_v51 = vpop.f32.mrf.mxu1  ;;  %32177 = vmatmul.mubr.msk.f32.vlgmr.msra.gmra.mxu0 %vm117_vm1, %v35248_v22  ;;  %v13814_v40 = vpop.permute.xlu0 %13813 }
 0x33c   :  { %v35276_v57 = vadd.f32 %v10298_v51, %v35197_v35  ;;  %v13837_v26 = vsel %vm13829_vm15, %v13814_v40, %v13816_v27  ;;  %v13836_v37 = vsel %vm13829_vm15, %v13812_v9, %v13814_v40  ;;  %14209 = vmatprep.mubr.f32.mxu0 %v39469_v1 }
 0x33d   :  { %14104 = vmatprep.subr.mxu1 %v13837_v26  ;;  %v35291_v9 = vpop.f32.mrf.mxu1 }
 0x33e   :  { %14105 = vmatpush1.msra.mxu1 %v13836_v37  ;;  %v13820_v38 = vpop.permute.xlu1 %13819  ;;  %39536 = vst [vmem:[#allocation100_spill] sm:$0xff] %v35291_v9 }
 0x33f   :  { %v10477_v10 = vpop.f32.mrf.mxu0  ;;  %32178 = vmatmul.mubr.msk.f32.vlgmr.msra.gmra.mxu1 %vm117_vm1, %v35248_v22  ;;  %v13818_v61 = vpop.permute.xlu0 %13817 }
 0x340   :  { %v35286_v29 = vadd.f32 %v10477_v10, %v35219_v8  ;;  %v13839_v35 = vsel %vm13829_vm15, %v13818_v61, %v13820_v38  ;;  %v13838_v51 = vsel %vm13829_vm15, %v13816_v27, %v13818_v61  ;;  %14280 = vmatprep.mubr.f32.mxu1 %v39469_v1 }
 0x341   :  { %14175 = vmatprep.subr.mxu0 %v13839_v35  ;;  %v35301_v27 = vpop.f32.mrf.mxu0 }
 0x342   :  { %14176 = vmatpush1.msra.mxu0 %v13838_v51  ;;  %v13824_v40 = vpop.permute.xlu1 %13823  ;;  %39537 = vst [vmem:[#allocation101_spill] sm:$0xff] %v35301_v27 }
 0x343   :  { %v10548_v26 = vpop.f32.mrf.mxu1  ;;  %32179 = vmatmul.mubr.msk.f32.vlgmr.msra.gmra.mxu0 %vm117_vm1, %v35248_v22  ;;  %v13822_v37 = vpop.permute.xlu0 %13821 }
 0x344   :  { %v35296_v13 = vadd.f32 %v10548_v26, %v35213_v62  ;;  %v13841_v8 = vsel %vm13829_vm15, %v13822_v37, %v13824_v40  ;;  %v13840_v10 = vsel %vm13829_vm15, %v13820_v38, %v13822_v37  ;;  %14351 = vmatprep.mubr.f32.mxu0 %v39469_v1 }
 0x345   :  { %14246 = vmatprep.subr.mxu1 %v13841_v8  ;;  %v35311_v38 = vpop.f32.mrf.mxu1 }
 0x346   :  { %14247 = vmatpush1.msra.mxu1 %v13840_v10  ;;  %v13828_v61 = vpop.permute.xlu1 %13827  ;;  %39538 = vst [vmem:[#allocation102_spill] sm:$0xff] %v35311_v38 }
 0x347   :  { %v10619_v35 = vpop.f32.mrf.mxu0  ;;  %32180 = vmatmul.mubr.msk.f32.vlgmr.msra.gmra.mxu1 %vm117_vm1, %v35248_v22  ;;  %v13826_v51 = vpop.permute.xlu0 %13825 }
 0x348   :  { %v35306_v9 = vadd.f32 %v10619_v35, %v35231_v19  ;;  %v13843_v62 = vsel %vm13829_vm15, %v13826_v51, %v13828_v61  ;;  %v13842_v26 = vsel %vm13829_vm15, %v13824_v40, %v13826_v51  ;;  %14500 = vmatprep.mubr.f32.mxu1 %v39469_v1  ;;  %vm19155_vm15 = vcmask 809984  }
 0x349   :  { %14317 = vmatprep.subr.mxu0 %v13843_v62  ;;  %v35320_v40 = vpop.f32.mrf.mxu0 }
 0x34a   :  { %14318 = vmatpush1.msra.mxu0 %v13842_v26  ;;  %v14379_v37 = vpop.permute.xlu1 %14378  ;;  %39539 = vst [vmem:[#allocation103_spill] sm:$0xff] %v35320_v40 }
 0x34b   :  { %v10690_v8 = vpop.f32.mrf.mxu1  ;;  %32181 = vmatmul.mubr.msk.f32.vlgmr.msra.gmra.mxu0 %vm117_vm1, %v35248_v22  ;;  %v14377_v10 = vpop.permute.xlu0 %14376 }
 0x34c   :  { %v35316_v19 = vadd.f32 %v10690_v8, %v35242_v7  ;;  %v14406_v61 = vsel %vm14404_vm2, %v14377_v10, %v14379_v37  ;;  %14571 = vmatprep.mubr.f32.mxu0 %v39469_v1  ;;  %v35330_v7 = vld [vmem:[%s39383_s2 + $0xc8] sm:$0xff] }
 0x34d   :  { %14466 = vmatprep.subr.mxu1 %v14406_v61  ;;  %v35332_v8 = vpop.f32.mrf.mxu1 }
 0x34e   :  { %v14383_v35 = vpop.permute.xlu1 %14382  ;;  %39540 = vst [vmem:[#allocation104_spill] sm:$0xff] %v35332_v8 }
 0x34f   :  { %v10761_v51 = vpop.f32.mrf.mxu0  ;;  %v14381_v62 = vpop.permute.xlu0 %14380 }
 0x350   :  { %v35323_v26 = vadd.f32 %v10761_v51, %v35256_v42  ;;  %v14408_v38 = vsel %vm14404_vm2, %v14381_v62, %v14383_v35  ;;  %v14407_v22 = vsel %vm14404_vm2, %v14379_v37, %v14381_v62 }
 0x351   :  { %14537 = vmatprep.subr.mxu0 %v14408_v38  ;;  %v35341_v62 = vpop.f32.mrf.mxu0 }
 0x352   :  { %14538 = vmatpush1.msra.mxu0 %v14407_v22  ;;  %v14385_v61 = vpop.permute.xlu1 %14384  ;;  %39541 = vst [vmem:[#allocation105_spill] sm:$0xff] %v35341_v62 }
 0x353   :  { %v10832_v40 = vpop.f32.mrf.mxu1  ;;  %32184 = vmatmul.mubr.msk.f32.vlgmr.msra.gmra.mxu0 %vm117_vm1, %v35330_v7  ;;  %v14375_v42 = vpop.permute.xlu0 %14374 }
 0x354   :  { %v35337_v51 = vadd.f32 %v10832_v40, %v35266_v39  ;;  %v14405_v37 = vsel %vm14404_vm2, %v14375_v42, %v14377_v10  ;;  %14713 = vmatprep.mubr.f32.mxu0 %v39469_v1  ;;  %v14409_v10 = vsel %vm14404_vm2, %v14383_v35, %v14385_v61 }
 0x355   :  { %14467 = vmatpush1.msra.mxu1 %v14405_v37 }
 0x356   :  { %32183 = vmatmul.mubr.msk.f32.vlgmr.msra.gmra.mxu1 %vm117_vm1, %v35330_v7  ;;  %v14389_v38 = vpop.permute.xlu1 %14388 }
 0x357   :  { %v10903_v22 = vpop.f32.mrf.mxu0  ;;  %v14387_v8 = vpop.permute.xlu0 %14386  ;;  %14642 = vmatprep.mubr.f32.mxu1 %v39469_v1 }
 0x358   :  { %v35347_v27 = vadd.f32 %v10903_v22, %v35276_v57  ;;  %v14410_v39 = vsel %vm14404_vm2, %v14385_v61, %v14387_v8  ;;  %v14411_v57 = vsel %vm14404_vm2, %v14387_v8, %v14389_v38  ;;  %v35360_v61 = vpop.f32.mrf.mxu1 }
 0x359   :  { %14608 = vmatprep.subr.mxu1 %v14410_v39  ;;  %v35355_v62 = vpop.f32.mrf.mxu0  ;;  %39543 = vst [vmem:[#allocation107_spill] sm:$0xff] %v35360_v61 }
 0x35a   :  { %14609 = vmatpush1.msra.mxu1 %v14409_v10  ;;  %v14393_v40 = vpop.permute.xlu1 %14392  ;;  %39542 = vst [vmem:[#allocation106_spill] sm:$0xff] %v35355_v62 }
 0x35b   :  { %32185 = vmatmul.mubr.msk.f32.vlgmr.msra.gmra.mxu1 %vm117_vm1, %v35330_v7  ;;  %v14391_v42 = vpop.permute.xlu0 %14390 }
 0x35c   :  { %v14412_v37 = vsel %vm14404_vm2, %v14389_v38, %v14391_v42  ;;  %14784 = vmatprep.mubr.f32.mxu1 %v39469_v1 }
 0x35d   :  { %14679 = vmatprep.subr.mxu0 %v14412_v37  ;;  %v14413_v37 = vsel %vm14404_vm2, %v14391_v42, %v14393_v40 }
 0x35e   :  { %14680 = vmatpush1.msra.mxu0 %v14411_v57  ;;  %v14397_v22 = vpop.permute.xlu1 %14396 }
 0x35f   :  { %v11123_v39 = vpop.f32.mrf.mxu0  ;;  %32186 = vmatmul.mubr.msk.f32.vlgmr.msra.gmra.mxu0 %vm117_vm1, %v35330_v7  ;;  %v14395_v35 = vpop.permute.xlu0 %14394 }
 0x360   :  { %v35363_v10 = vadd.f32 %v11123_v39, %v35296_v13  ;;  %v14414_v25 = vsel %vm14404_vm2, %v14393_v40, %v14395_v35  ;;  %14855 = vmatprep.mubr.f32.mxu0 %v39469_v1 }
 0x361   :  { %14750 = vmatprep.subr.mxu1 %v14414_v25  ;;  %v14415_v25 = vsel %vm14404_vm2, %v14395_v35, %v14397_v22 }
 0x362   :  { %v11052_v8 = vpop.f32.mrf.mxu1  ;;  %14751 = vmatpush1.msra.mxu1 %v14413_v37  ;;  %v14401_v38 = vpop.permute.xlu1 %14400 }
 0x363   :  { %v35369_v57 = vadd.f32 %v11052_v8, %v35286_v29  ;;  %32187 = vmatmul.mubr.msk.f32.vlgmr.msra.gmra.mxu1 %vm117_vm1, %v35330_v7  ;;  %v14399_v62 = vpop.permute.xlu0 %14398  ;;  %v35385_v8 = vpop.f32.mrf.mxu0 }
 0x364   :  { %v35373_v61 = vpop.f32.mrf.mxu1  ;;  %v14416_v13 = vsel %vm14404_vm2, %v14397_v22, %v14399_v62  ;;  %14926 = vmatprep.mubr.f32.mxu1 %v39469_v1  ;;  %v14417_v22 = vsel %vm14404_vm2, %v14399_v62, %v14401_v38 }
 0x365   :  { %39544 = vst [vmem:[#allocation108_spill] sm:$0xff] %v35373_v61  ;;  %14821 = vmatprep.subr.mxu0 %v14416_v13 }
 0x366   :  { %14822 = vmatpush1.msra.mxu0 %v14415_v25  ;;  %v14952_v40 = vpop.permute.xlu1 %14951 }
 0x367   :  { %v11194_v42 = vpop.f32.mrf.mxu1  ;;  %32188 = vmatmul.mubr.msk.f32.vlgmr.msra.gmra.mxu0 %vm117_vm1, %v35330_v7  ;;  %v14403_v29 = vpop.permute.xlu0 %14402 }
 0x368   :  { %v35381_v39 = vadd.f32 %v11194_v42, %v35306_v9  ;;  %v14418_v37 = vsel %vm14404_vm2, %v14401_v38, %v14403_v29  ;;  %15075 = vmatprep.mubr.f32.mxu0 %v39469_v1  ;;  %vm19730_vm2 = vcmask 744448  }
 0x369   :  { %14892 = vmatprep.subr.mxu1 %v14418_v37  ;;  %v35398_v37 = vld [vmem:[%s39383_s2 + $0xd0] sm:$0xff]  ;;  %v35401_v62 = vpop.f32.mrf.mxu1 }
 0x36a   :  { %14893 = vmatpush1.msra.mxu1 %v14417_v22  ;;  %v14950_v35 = vpop.permute.xlu1 %14949  ;;  %39545 = vst [vmem:[#allocation109_spill] sm:$0xff] %v35401_v62 }
 0x36b   :  { %v14980_v13 = vsel %vm14979_vm5, %v14950_v35, %v14952_v40  ;;  %v11265_v25 = vpop.f32.mrf.mxu0  ;;  %32189 = vmatmul.mubr.msk.f32.vlgmr.msra.gmra.mxu1 %vm117_vm1, %v35330_v7  ;;  %v14954_v9 = vpop.permute.xlu0 %14953 }
 0x36c   :  { %v35392_v42 = vadd.f32 %v11265_v25, %v35316_v19  ;;  %v14981_v29 = vsel %vm14979_vm5, %v14952_v40, %v14954_v9  ;;  %15146 = vmatprep.mubr.f32.mxu1 %v39469_v1 }
 0x36d   :  { %15041 = vmatprep.subr.mxu0 %v14981_v29  ;;  %v35411_v25 = vpop.f32.mrf.mxu0 }
 0x36e   :  { %15042 = vmatpush1.msra.mxu0 %v14980_v13  ;;  %v14958_v38 = vpop.permute.xlu1 %14957  ;;  %39546 = vst [vmem:[#allocation110_spill] sm:$0xff] %v35411_v25 }
 0x36f   :  { %v11336_v22 = vpop.f32.mrf.mxu1  ;;  %32191 = vmatmul.mubr.msk.f32.vlgmr.msra.gmra.mxu0 %vm117_vm1, %v35398_v37  ;;  %v14956_v19 = vpop.permute.xlu0 %14955 }
 0x370   :  { %v35406_v7 = vadd.f32 %v11336_v22, %v35323_v26  ;;  %v14983_v40 = vsel %vm14979_vm5, %v14956_v19, %v14958_v38  ;;  %v14982_v35 = vsel %vm14979_vm5, %v14954_v9, %v14956_v19  ;;  %15217 = vmatprep.mubr.f32.mxu0 %v39469_v1 }
 0x371   :  { %15112 = vmatprep.subr.mxu1 %v14983_v40  ;;  %v35421_v9 = vpop.f32.mrf.mxu1 }
 0x372   :  { %15113 = vmatpush1.msra.mxu1 %v14982_v35  ;;  %v14962_v13 = vpop.permute.xlu1 %14961  ;;  %39547 = vst [vmem:[#allocation111_spill] sm:$0xff] %v35421_v9 }
 0x373   :  { %v11407_v29 = vpop.f32.mrf.mxu0  ;;  %32192 = vmatmul.mubr.msk.f32.vlgmr.msra.gmra.mxu1 %vm117_vm1, %v35398_v37  ;;  %v14960_v62 = vpop.permute.xlu0 %14959 }
 0x374   :  { %v35416_v61 = vadd.f32 %v11407_v29, %v35337_v51  ;;  %v14985_v26 = vsel %vm14979_vm5, %v14960_v62, %v14962_v13  ;;  %v14984_v22 = vsel %vm14979_vm5, %v14958_v38, %v14960_v62  ;;  %15288 = vmatprep.mubr.f32.mxu1 %v39469_v1 }
 0x375   :  { %15183 = vmatprep.subr.mxu0 %v14985_v26  ;;  %v35431_v62 = vpop.f32.mrf.mxu0 }
 0x376   :  { %15184 = vmatpush1.msra.mxu0 %v14984_v22  ;;  %v14966_v19 = vpop.permute.xlu1 %14965  ;;  %39548 = vst [vmem:[#allocation112_spill] sm:$0xff] %v35431_v62 }
 0x377   :  { %v11478_v40 = vpop.f32.mrf.mxu1  ;;  %32193 = vmatmul.mubr.msk.f32.vlgmr.msra.gmra.mxu0 %vm117_vm1, %v35398_v37  ;;  %v14964_v35 = vpop.permute.xlu0 %14963 }
 0x378   :  { %v35426_v25 = vadd.f32 %v11478_v40, %v35347_v27  ;;  %v14987_v51 = vsel %vm14979_vm5, %v14964_v35, %v14966_v19  ;;  %v14986_v29 = vsel %vm14979_vm5, %v14962_v13, %v14964_v35  ;;  %15359 = vmatprep.mubr.f32.mxu0 %v39469_v1 }
 0x379   :  { %15254 = vmatprep.subr.mxu1 %v14987_v51  ;;  %v35441_v13 = vpop.f32.mrf.mxu1 }
 0x37a   :  { %15255 = vmatpush1.msra.mxu1 %v14986_v29  ;;  %v14970_v38 = vpop.permute.xlu1 %14969 }
 0x37b   :  { %v11627_v26 = vpop.f32.mrf.mxu0  ;;  %32194 = vmatmul.mubr.msk.f32.vlgmr.msra.gmra.mxu1 %vm117_vm1, %v35398_v37  ;;  %v14968_v22 = vpop.permute.xlu0 %14967 }
 0x37c   :  { %v35436_v9 = vadd.f32 %v11627_v26, %v35369_v57  ;;  %v14989_v27 = vsel %vm14979_vm5, %v14968_v22, %v14970_v38  ;;  %v14988_v40 = vsel %vm14979_vm5, %v14966_v19, %v14968_v22  ;;  %15430 = vmatprep.mubr.f32.mxu1 %v39469_v1 }
 0x37d   :  { %15325 = vmatprep.subr.mxu0 %v14989_v27  ;;  %v35451_v19 = vpop.f32.mrf.mxu0 }
 0x37e   :  { %15326 = vmatpush1.msra.mxu0 %v14988_v40  ;;  %v14974_v35 = vpop.permute.xlu1 %14973 }
 0x37f   :  { %v11698_v51 = vpop.f32.mrf.mxu1  ;;  %32195 = vmatmul.mubr.msk.f32.vlgmr.msra.gmra.mxu0 %vm117_vm1, %v35398_v37  ;;  %v14972_v29 = vpop.permute.xlu0 %14971 }
 0x380   :  { %v35446_v62 = vadd.f32 %v11698_v51, %v35363_v10  ;;  %v14991_v57 = vsel %vm14979_vm5, %v14972_v29, %v14974_v35  ;;  %v14990_v26 = vsel %vm14979_vm5, %v14970_v38, %v14972_v29  ;;  %15501 = vmatprep.mubr.f32.mxu0 %v39469_v1  ;;  %v15522_v29 = vld [vmem:[%s39384_s4] sm:$0xff]  ;;  %s32560_s4 = smov 90  }
 0x381   :  { %15396 = vmatprep.subr.mxu1 %v14991_v57  ;;  %v35466_v57 = vpop.f32.mrf.mxu1 }
 0x382   :  { %15397 = vmatpush1.msra.mxu1 %v14990_v26  ;;  %v14978_v22 = vpop.permute.xlu1 %14977 }
 0x383   :  { %v11769_v27 = vpop.f32.mrf.mxu0  ;;  %32196 = vmatmul.mubr.msk.f32.vlgmr.msra.gmra.mxu1 %vm117_vm1, %v35398_v37  ;;  %15556 = vmatprep.subr.mxu1 %v33878_v43  ;;  %v14976_v40 = vpop.permute.xlu0 %14975 }
 0x384   :  { %v35457_v10 = vadd.f32 %v11769_v27, %v35381_v39  ;;  %15557 = vmatpush1.msra.mxu1 %v33934_v4  ;;  %v14993_v38 = vsel %vm14979_vm5, %v14976_v40, %v14978_v22  ;;  %v14992_v51 = vsel %vm14979_vm5, %v14974_v35, %v14976_v40  ;;  %15590 = vmatprep.mubr.f32.mxu1 %v39469_v1  ;;  %vm20305_vm5 = vcmask 736256  }
 0x385   :  { %15467 = vmatprep.subr.mxu0 %v14993_v38  ;;  %15698 = vmatprep.subr.mxu1 %v33958_v49  ;;  %v35475_v39 = vpop.f32.mrf.mxu0 }
 0x386   :  { %15468 = vmatpush1.msra.mxu0 %v14992_v51 }
 0x387   :  { %v11840_v43 = vpop.f32.mrf.mxu1  ;;  %32197 = vmatmul.mubr.msk.f32.vlgmr.msra.gmra.mxu0 %vm117_vm1, %v35398_v37  ;;  %32198 = vmatmul.mubr.msk.f32.vlgmr.msra.gmra.mxu1 %vm117_vm1, %v15522_v29 }
 0x388   :  { %v12064_v4 = vadd.f32 %v11840_v43, %v35392_v42  ;;  %15627 = vmatprep.subr.mxu0 %v33906_v55  ;;  %15699 = vmatpush1.msra.mxu1 %v33973_v6 }
 0x389   :  { %15628 = vmatpush1.msra.mxu0 %v33909_v60  ;;  %15840 = vmatprep.subr.mxu1 %v34008_v16  ;;  %v35486_v55 = vpop.f32.mrf.mxu1 }
 0x38a   :  { %15769 = vmatprep.subr.mxu0 %v33982_v50  ;;  %15661 = vmatprep.mubr.f32.mxu0 %v39469_v1 }
 0x38b   :  { %15732 = vmatprep.mubr.f32.mxu1 %v39469_v1  ;;  %v11911_v49 = vpop.f32.mrf.mxu0  ;;  %32199 = vmatmul.mubr.msk.f32.vlgmr.msra.gmra.mxu0 %vm117_vm1, %v15522_v29 }
 0x38c   :  { %v12066_v42 = vadd.f32 %v11911_v49, %v35406_v7  ;;  %32200 = vmatmul.mubr.msk.f32.vlgmr.msra.gmra.mxu1 %vm117_vm1, %v15522_v29  ;;  %15770 = vmatpush1.msra.mxu0 %v33998_v0 }
 0x38d   :  { %15841 = vmatpush1.msra.mxu1 %v34022_v3  ;;  %15911 = vmatprep.subr.mxu0 %v34027_v32  ;;  %v35497_v6 = vpop.f32.mrf.mxu0 }
 0x38e   :  { %15982 = vmatprep.subr.mxu1 %v34047_v14  ;;  %15803 = vmatprep.mubr.f32.mxu0 %v39469_v1 }
 0x38f   :  { %15874 = vmatprep.mubr.f32.mxu1 %v39469_v1  ;;  %v11982_v50 = vpop.f32.mrf.mxu1  ;;  %32201 = vmatmul.mubr.msk.f32.vlgmr.msra.gmra.mxu0 %vm117_vm1, %v15522_v29 }
 0x390   :  { %v12068_v60 = vadd.f32 %v11982_v50, %v35416_v61  ;;  %32202 = vmatmul.mubr.msk.f32.vlgmr.msra.gmra.mxu1 %vm117_vm1, %v15522_v29  ;;  %15912 = vmatpush1.msra.mxu0 %v34040_v44 }
 0x391   :  { %15983 = vmatpush1.msra.mxu1 %v34062_v36  ;;  %15945 = vmatprep.mubr.f32.mxu0 %v39469_v1  ;;  %v35507_v32 = vpop.f32.mrf.mxu1 }
 0x392   :  { %16016 = vmatprep.mubr.f32.mxu1 %v39469_v1 }
 0x393   :  { %v12053_v0 = vpop.f32.mrf.mxu0  ;;  %32203 = vmatmul.mubr.msk.f32.vlgmr.msra.gmra.mxu0 %vm117_vm1, %v15522_v29 }
 0x394   :  { %v12070_v16 = vadd.f32 %v12053_v0, %v35426_v25  ;;  %32204 = vmatmul.mubr.msk.f32.vlgmr.msra.gmra.mxu1 %vm117_vm1, %v15522_v29  ;;  %16406 = vmatprep.mubr.f32.mxu0 %v39469_v1 }
 0x395   :  { %16477 = vmatprep.mubr.f32.mxu1 %v39469_v1  ;;  %v35511_v44 = vpop.f32.mrf.mxu0  ;;  %v832_v1 = vadd.f32 %v33614_v59, %v33549_v18  ;;  %v39567_v59 = vld [vmem:[#allocation6_spill] sm:$0xff] }
 0x39b   :  { %v35513_v14 = vpop.f32.mrf.mxu0 }
 0x39d   :  { %v35517_v61 = vpop.f32.mrf.mxu0 }
 0x39e   :  { %v35509_v3 = vpop.f32.mrf.mxu1 }
 0x3a0   :  { %v35515_v36 = vpop.f32.mrf.mxu1 }
 0x3a3   :  { %v35519_v37 = vpop.f32.mrf.mxu1 }
 0x3a5   :  { %v35523_v35 = vpop.f32.mrf.mxu1 }
 0x3a7   :  { %v12415_v7 = vpop.f32.mrf.mxu0 }
 0x3a8   :  { %v35521_v25 = vadd.f32 %v12415_v7, %v12064_v4 }
 0x3a9   :  { %v35527_v27 = vpop.f32.mrf.mxu0 }
 0x3aa   :  { %39549 = vst [vmem:[#allocation113_spill] sm:$0xff] %v35521_v25 }
 0x3ab   :  { %v12486_v26 = vpop.f32.mrf.mxu1 }
 0x3ac   :  { %v35525_v22 = vadd.f32 %v12486_v26, %v12066_v42 }
 0x3ad   :  { %v35531_v51 = vpop.f32.mrf.mxu1 }
 0x3ae   :  { %39550 = vst [vmem:[#allocation114_spill] sm:$0xff] %v35525_v22  ;;  %v39559_v22 = vld [vmem:[#allocation3_spill] sm:$0xff] }
 0x3af   :  { %v12557_v40 = vpop.f32.mrf.mxu0 }
 0x3b0   :  { %v35529_v38 = vadd.f32 %v12557_v40, %v12068_v60  ;;  %v690_v40 = vadd.f32 %v33600_v45, %v33536_v58  ;;  %v39563_v58 = vld [vmem:[#allocation4_spill] sm:$0xff]  ;;  %v39564_v45 = vld [vmem:[#allocation7_spill] sm:$0xff] }
 0x3b1   :  { %v35535_v49 = vpop.f32.mrf.mxu0 }
 0x3b2   :  { %39551 = vst [vmem:[#allocation115_spill] sm:$0xff] %v35529_v38  ;;  %v1045_v38 = vadd.f32 %v33622_v63, %v33585_v30  ;;  %v39569_v30 = vld [vmem:[#allocation9_spill] sm:$0xff] }
 0x3b3   :  { %v12628_v29 = vpop.f32.mrf.mxu1 }
 0x3b4   :  { %v35533_v43 = vadd.f32 %v12628_v29, %v12070_v16  ;;  %v761_v16 = vadd.f32 %v33594_v33, %v33557_v23  ;;  %v903_v29 = vadd.f32 %v33609_v47, %v33572_v15  ;;  %v1680_v33 = vadd.f32 %v39563_v58, %v690_v40 }
 0x3b5   :  { %v35537_v50 = vpop.f32.mrf.mxu1 }
 0x3b6   :  { %39552 = vst [vmem:[#allocation116_spill] sm:$0xff] %v35533_v43  ;;  %39553 = vst [vmem:[#allocation117_spill] sm:$0xff] %v35537_v50  ;;  %v974_v43 = vadd.f32 %v33633_v12, %v33564_v11  ;;  %v1682_v15 = vadd.f32 %v39564_v45, %v761_v16  ;;  %v1684_v11 = vadd.f32 %v39567_v59, %v832_v1  ;;  %v39568_v12 = vld [vmem:[#allocation8_spill] sm:$0xff]  ;;  %v39576_v45 = vld [vmem:[#allocation14_spill] sm:$0xff] }
 0x3b7   :  { %v35539_v4 = vpop.f32.mrf.mxu0  ;;  %v1686_v63 = vadd.f32 %v39569_v30, %v903_v29  ;;  %v39572_v50 = vld [vmem:[#allocation12_spill] sm:$0xff]  ;;  %v39578_v59 = vld [vmem:[#allocation17_spill] sm:$0xff]  ;;  %v39580_v30 = vld [vmem:[#allocation19_spill] sm:$0xff] }
 0x3b9   :  { %v35543_v42 = vpop.f32.mrf.mxu0 }
 0x3ba   :  { %39555 = vst [vmem:[#allocation119_spill] sm:$0xff] %v35543_v42  ;;  %v39573_v42 = vld [vmem:[#allocation13_spill] sm:$0xff] }
 0x3bb   :  { %v35541_v0 = vpop.f32.mrf.mxu1  ;;  %v2255_v40 = vadd.f32 %v39573_v42, %v1680_v33  ;;  %v39584_v33 = vld [vmem:[#allocation21_spill] sm:$0xff] }
 0x3bc   :  { %39554 = vst [vmem:[#allocation118_spill] sm:$0xff] %v35541_v0  ;;  %v39570_v0 = vld [vmem:[#allocation10_spill] sm:$0xff] }
 0x3bd   :  { %v35545_v7 = vpop.f32.mrf.mxu1 }
 0x3be   :  { %39556 = vst [vmem:[#allocation120_spill] sm:$0xff] %v35545_v7  ;;  %v1688_v7 = vadd.f32 %v39568_v12, %v974_v43  ;;  %v39579_v12 = vld [vmem:[#allocation16_spill] sm:$0xff] }
 0x3bf   :  { %v35547_v26 = vpop.f32.mrf.mxu0 }
 0x3c0   :  { %39557 = vst [vmem:[#allocation121_spill] sm:$0xff] %v35547_v26  ;;  %v2263_v43 = vadd.f32 %v39578_v59, %v1688_v7  ;;  %v39589_v59 = vld [vmem:[#allocation25_spill] sm:$0xff] }
 0x3c1   :  { %v35565_v26 = vpop.f32.mrf.mxu0 }
 0x3c2   :  { %39561 = vst [vmem:[#allocation3_spill] sm:$0xff] %v35565_v26 }
 0x3c3   :  { %v35549_v60 = vpop.f32.mrf.mxu1 }
 0x3c4   :  { %39558 = vst [vmem:[#allocation122_spill] sm:$0xff] %v35549_v60  ;;  %v39560_v60 = vld [vmem:[#allocation5_spill] sm:$0xff] }
 0x3c5   :  { %v1116_v25 = vadd.f32 %v39560_v60, %v39559_v22  ;;  %v35567_v23 = vpop.f32.mrf.mxu1  ;;  %v39571_v60 = vld [vmem:[#allocation11_spill] sm:$0xff] }
 0x3c6   :  { %39562 = vst [vmem:[#allocation5_spill] sm:$0xff] %v35567_v23  ;;  %v1690_v26 = vadd.f32 %v39571_v60, %v1045_v38  ;;  %v2257_v23 = vadd.f32 %v39572_v50, %v1682_v15  ;;  %v39583_v50 = vld [vmem:[#allocation18_spill] sm:$0xff]  ;;  %v39585_v60 = vld [vmem:[#allocation20_spill] sm:$0xff] }
 0x3c7   :  { %v35571_v47 = vpop.f32.mrf.mxu0  ;;  %v1692_v22 = vadd.f32 %v39570_v0, %v1116_v25  ;;  %v2830_v42 = vadd.f32 %v39583_v50, %v2255_v40 }
 0x3c8   :  { %39565 = vst [vmem:[#allocation4_spill] sm:$0xff] %v35571_v47  ;;  %v39577_v47 = vld [vmem:[#allocation15_spill] sm:$0xff]  ;;  %v2265_v29 = vadd.f32 %v39579_v12, %v1690_v26  ;;  %v2832_v15 = vadd.f32 %v39584_v33, %v2257_v23  ;;  %v39595_v23 = vld [vmem:[#allocation28_spill] sm:$0xff]  ;;  %v39596_v33 = vld [vmem:[#allocation29_spill] sm:$0xff] }
 0x3c9   :  { %v35582_v58 = vpop.f32.mrf.mxu0  ;;  %v2259_v1 = vadd.f32 %v39577_v47, %v1684_v11  ;;  %v2267_v25 = vadd.f32 %v39580_v30, %v1692_v22  ;;  %v39588_v11 = vld [vmem:[#allocation24_spill] sm:$0xff]  ;;  %v39592_v30 = vld [vmem:[#allocation26_spill] sm:$0xff] }
 0x3ca   :  { %39574 = vst [vmem:[#allocation6_spill] sm:$0xff] %v35582_v58  ;;  %v39586_v58 = vld [vmem:[#allocation22_spill] sm:$0xff]  ;;  %v2840_v26 = vadd.f32 %v39589_v59, %v2265_v29  ;;  %v39601_v59 = vld [vmem:[#allocation32_spill] sm:$0xff] }
 0x3cb   :  { %v35573_v18 = vpop.f32.mrf.mxu1  ;;  %v2842_v7 = vadd.f32 %v39588_v11, %v2267_v25 }
 0x3cc   :  { %39566 = vst [vmem:[#allocation7_spill] sm:$0xff] %v35573_v18  ;;  %v2261_v18 = vadd.f32 %v39576_v45, %v1686_v63  ;;  %v2838_v63 = vadd.f32 %v39586_v58, %v2263_v43  ;;  %v39587_v45 = vld [vmem:[#allocation23_spill] sm:$0xff] }
 0x3cd   :  { %v35584_v16 = vpop.f32.mrf.mxu1  ;;  %v39597_v43 = vld [vmem:[#allocation31_spill] sm:$0xff] }
 0x3ce   :  { %39575 = vst [vmem:[#allocation8_spill] sm:$0xff] %v35584_v16  ;;  %v2834_v16 = vadd.f32 %v39585_v60, %v2259_v1  ;;  %v2836_v47 = vadd.f32 %v39587_v45, %v2261_v18  ;;  %v3413_v18 = vadd.f32 %v39597_v43, %v2838_v63  ;;  %v39598_v60 = vld [vmem:[#allocation30_spill] sm:$0xff]  ;;  %v39599_v45 = vld [vmem:[#allocation33_spill] sm:$0xff]  ;;  %v39608_v43 = vld [vmem:[#allocation39_spill] sm:$0xff] }
 0x3cf   :  { %v35591_v0 = vpop.f32.mrf.mxu0  ;;  %v3415_v25 = vadd.f32 %v39598_v60, %v2840_v26  ;;  %v3417_v29 = vadd.f32 %v39599_v45, %v2842_v7  ;;  %v39611_v45 = vld [vmem:[#allocation41_spill] sm:$0xff] }
 0x3d0   :  { %39581 = vst [vmem:[#allocation9_spill] sm:$0xff] %v35591_v0  ;;  %v3407_v0 = vadd.f32 %v39592_v30, %v2832_v15  ;;  %v3411_v1 = vadd.f32 %v39595_v23, %v2836_v47  ;;  %v3409_v58 = vadd.f32 %v39596_v33, %v2834_v16  ;;  %v39606_v23 = vld [vmem:[#allocation37_spill] sm:$0xff]  ;;  %v39607_v33 = vld [vmem:[#allocation38_spill] sm:$0xff] }
 0x3d1   :  { %v35602_v12 = vpop.f32.mrf.mxu0  ;;  %v3992_v63 = vadd.f32 %v39607_v33, %v3417_v29  ;;  %v3990_v26 = vadd.f32 %v39608_v43, %v3415_v25  ;;  %v39618_v33 = vld [vmem:[#allocation46_spill] sm:$0xff] }
 0x3d2   :  { %39590 = vst [vmem:[#allocation11_spill] sm:$0xff] %v35602_v12  ;;  %v3986_v16 = vadd.f32 %v39606_v23, %v3411_v1  ;;  %v39617_v23 = vld [vmem:[#allocation45_spill] sm:$0xff] }
 0x3d3   :  { %v4565_v29 = vadd.f32 %v39617_v23, %v3990_v26  ;;  %v4567_v25 = vadd.f32 %v39618_v33, %v3992_v63  ;;  %v39628_v23 = vld [vmem:[#allocation53_spill] sm:$0xff] }
 0x3d5   :  { %v5140_v63 = vadd.f32 %v39628_v23, %v4565_v29  ;;  %v39639_v23 = vld [vmem:[#allocation61_spill] sm:$0xff] }
 0x3d7   :  { %v35608_v50 = vpop.f32.mrf.mxu0 }
 0x3d8   :  { %39594 = vst [vmem:[#allocation13_spill] sm:$0xff] %v35608_v50  ;;  %v39605_v50 = vld [vmem:[#allocation36_spill] sm:$0xff] }
 0x3d9   :  { %v35619_v30 = vpop.f32.mrf.mxu0  ;;  %v3988_v47 = vadd.f32 %v39605_v50, %v3413_v18  ;;  %v39616_v18 = vld [vmem:[#allocation44_spill] sm:$0xff] }
 0x3da   :  { %v35593_v38 = vpop.f32.mrf.mxu1  ;;  %39603 = vst [vmem:[#allocation15_spill] sm:$0xff] %v35619_v30  ;;  %v39621_v30 = vld [vmem:[#allocation48_spill] sm:$0xff] }
 0x3db   :  { %39582 = vst [vmem:[#allocation10_spill] sm:$0xff] %v35593_v38  ;;  %v39593_v38 = vld [vmem:[#allocation27_spill] sm:$0xff]  ;;  %v4563_v1 = vadd.f32 %v39616_v18, %v3988_v47  ;;  %v39627_v18 = vld [vmem:[#allocation52_spill] sm:$0xff] }
 0x3dc   :  { %v35604_v22 = vpop.f32.mrf.mxu1  ;;  %v3405_v40 = vadd.f32 %v39593_v38, %v2830_v42  ;;  %v39604_v38 = vld [vmem:[#allocation34_spill] sm:$0xff]  ;;  %v5142_v26 = vadd.f32 %v39627_v18, %v4567_v25 }
 0x3dd   :  { %39591 = vst [vmem:[#allocation12_spill] sm:$0xff] %v35604_v22  ;;  %v39602_v22 = vld [vmem:[#allocation35_spill] sm:$0xff]  ;;  %v3984_v42 = vadd.f32 %v39604_v38, %v3409_v58  ;;  %v39615_v38 = vld [vmem:[#allocation42_spill] sm:$0xff] }
 0x3de   :  { %v3980_v12 = vadd.f32 %v39601_v59, %v3405_v40  ;;  %v3982_v15 = vadd.f32 %v39602_v22, %v3407_v0  ;;  %v39612_v59 = vld [vmem:[#allocation40_spill] sm:$0xff] }
 0x3df   :  { %v35615_v11 = vpop.f32.mrf.mxu1  ;;  %v4559_v50 = vadd.f32 %v39615_v38, %v3984_v42  ;;  %v39626_v38 = vld [vmem:[#allocation50_spill] sm:$0xff] }
 0x3e0   :  { %39600 = vst [vmem:[#allocation14_spill] sm:$0xff] %v35615_v11  ;;  %v4557_v40 = vadd.f32 %v39611_v45, %v3982_v15  ;;  %v4555_v0 = vadd.f32 %v39612_v59, %v3980_v12  ;;  %v39614_v11 = vld [vmem:[#allocation43_spill] sm:$0xff]  ;;  %v39624_v59 = vld [vmem:[#allocation49_spill] sm:$0xff] }
 0x3e1   :  { %v35626_v60 = vpop.f32.mrf.mxu1  ;;  %v4561_v58 = vadd.f32 %v39614_v11, %v3986_v16  ;;  %v5134_v11 = vadd.f32 %v39624_v59, %v4559_v50  ;;  %v39625_v16 = vld [vmem:[#allocation51_spill] sm:$0xff]  ;;  %v39635_v59 = vld [vmem:[#allocation58_spill] sm:$0xff] }
 0x3e2   :  { %39609 = vst [vmem:[#allocation17_spill] sm:$0xff] %v35626_v60  ;;  %v39620_v60 = vld [vmem:[#allocation47_spill] sm:$0xff]  ;;  %v5132_v15 = vadd.f32 %v39621_v30, %v4557_v40  ;;  %v5138_v42 = vadd.f32 %v39625_v16, %v4563_v1 }
 0x3e3   :  { %v35628_v7 = vpop.f32.mrf.mxu0  ;;  %v5136_v47 = vadd.f32 %v39626_v38, %v4561_v58  ;;  %v39636_v16 = vld [vmem:[#allocation59_spill] sm:$0xff]  ;;  %v39637_v38 = vld [vmem:[#allocation60_spill] sm:$0xff] }
 0x3e4   :  { %39610 = vst [vmem:[#allocation16_spill] sm:$0xff] %v35628_v7  ;;  %v5130_v7 = vadd.f32 %v39620_v60, %v4555_v0  ;;  %v39631_v0 = vld [vmem:[#allocation54_spill] sm:$0xff]  ;;  %v5713_v1 = vadd.f32 %v39635_v59, %v5138_v42  ;;  %v5715_v58 = vadd.f32 %v39636_v16, %v5140_v63  ;;  %v5717_v25 = vadd.f32 %v39637_v38, %v5142_v26  ;;  %v39646_v16 = vld [vmem:[#allocation67_spill] sm:$0xff] }
 0x3e5   :  { %v35639_v43 = vpop.f32.mrf.mxu0  ;;  %v39645_v59 = vld [vmem:[#allocation66_spill] sm:$0xff] }
 0x3e6   :  { %39619 = vst [vmem:[#allocation18_spill] sm:$0xff] %v35639_v43  ;;  %v5705_v30 = vadd.f32 %v39631_v0, %v5130_v7  ;;  %v39634_v43 = vld [vmem:[#allocation56_spill] sm:$0xff]  ;;  %v6292_v63 = vadd.f32 %v39645_v59, %v5717_v25  ;;  %v6290_v26 = vadd.f32 %v39646_v16, %v5715_v58  ;;  %v39655_v16 = vld [vmem:[#allocation73_spill] sm:$0xff] }
 0x3e7   :  { %v35632_v22 = vpop.f32.mrf.mxu1  ;;  %v5709_v50 = vadd.f32 %v39634_v43, %v5134_v11  ;;  %v39644_v11 = vld [vmem:[#allocation64_spill] sm:$0xff] }
 0x3e8   :  { %39613 = vst [vmem:[#allocation19_spill] sm:$0xff] %v35632_v22  ;;  %v39630_v22 = vld [vmem:[#allocation55_spill] sm:$0xff] }
 0x3e9   :  { %v35643_v45 = vpop.f32.mrf.mxu1  ;;  %v5707_v60 = vadd.f32 %v39630_v22, %v5132_v15  ;;  %v6280_v22 = vadd.f32 %v39639_v23, %v5705_v30  ;;  %v39640_v15 = vld [vmem:[#allocation62_spill] sm:$0xff] }
 0x3ea   :  { %39622 = vst [vmem:[#allocation21_spill] sm:$0xff] %v35643_v45  ;;  %v39633_v45 = vld [vmem:[#allocation57_spill] sm:$0xff] }
 0x3eb   :  { %v35645_v12 = vpop.f32.mrf.mxu0  ;;  %v6282_v7 = vadd.f32 %v39640_v15, %v5707_v60  ;;  %v39651_v15 = vld [vmem:[#allocation70_spill] sm:$0xff] }
 0x3ec   :  { %39623 = vst [vmem:[#allocation20_spill] sm:$0xff] %v35645_v12  ;;  %v5711_v12 = vadd.f32 %v39633_v45, %v5136_v47  ;;  %v39643_v47 = vld [vmem:[#allocation65_spill] sm:$0xff] }
 0x3ed   :  { %v35656_v40 = vpop.f32.mrf.mxu0  ;;  %v6288_v43 = vadd.f32 %v39643_v47, %v5713_v1  ;;  %v39652_v47 = vld [vmem:[#allocation71_spill] sm:$0xff] }
 0x3ee   :  { %39632 = vst [vmem:[#allocation23_spill] sm:$0xff] %v35656_v40  ;;  %v6286_v42 = vadd.f32 %v39644_v11, %v5711_v12  ;;  %v39647_v40 = vld [vmem:[#allocation68_spill] sm:$0xff]  ;;  %v6865_v25 = vadd.f32 %v39652_v47, %v6290_v26 }
 0x3ef   :  { %v35652_v33 = vpop.f32.mrf.mxu1  ;;  %v6855_v30 = vadd.f32 %v39647_v40, %v6280_v22  ;;  %v6863_v12 = vadd.f32 %v39651_v15, %v6288_v43  ;;  %v39653_v11 = vld [vmem:[#allocation72_spill] sm:$0xff]  ;;  %v39662_v15 = vld [vmem:[#allocation79_spill] sm:$0xff] }
 0x3f0   :  { %39629 = vst [vmem:[#allocation22_spill] sm:$0xff] %v35652_v33  ;;  %v39642_v33 = vld [vmem:[#allocation63_spill] sm:$0xff]  ;;  %v6867_v58 = vadd.f32 %v39653_v11, %v6292_v63  ;;  %v7440_v26 = vadd.f32 %v39662_v15, %v6865_v25  ;;  %v39665_v11 = vld [vmem:[#allocation81_spill] sm:$0xff] }
 0x3f1   :  { %v35663_v18 = vpop.f32.mrf.mxu1  ;;  %v6284_v45 = vadd.f32 %v39642_v33, %v5709_v50  ;;  %v6861_v33 = vadd.f32 %v34584_v24, %v6286_v42  ;;  %v39650_v50 = vld [vmem:[#allocation69_spill] sm:$0xff]  ;;  %v39660_v42 = vld [vmem:[#allocation76_spill] sm:$0xff] }
 0x3f2   :  { %39638 = vst [vmem:[#allocation24_spill] sm:$0xff] %v35663_v18  ;;  %v6857_v18 = vadd.f32 %v34550_v31, %v6282_v7  ;;  %v7430_v31 = vadd.f32 %v39655_v16, %v6855_v30  ;;  %v39656_v7 = vld [vmem:[#allocation74_spill] sm:$0xff]  ;;  %v39666_v16 = vld [vmem:[#allocation80_spill] sm:$0xff] }
 0x3f3   :  { %v35665_v29 = vpop.f32.mrf.mxu0  ;;  %v6859_v1 = vadd.f32 %v39650_v50, %v6284_v45  ;;  %v7436_v45 = vadd.f32 %v39660_v42, %v6861_v33  ;;  %v39661_v50 = vld [vmem:[#allocation78_spill] sm:$0xff]  ;;  %v39671_v42 = vld [vmem:[#allocation85_spill] sm:$0xff] }
 0x3f4   :  { %v7432_v40 = vadd.f32 %v39656_v7, %v6857_v18  ;;  %v7442_v43 = vadd.f32 %v39661_v50, %v6867_v58  ;;  %v8005_v18 = vadd.f32 %v39666_v16, %v7430_v31  ;;  %v8015_v58 = vadd.f32 %v39671_v42, %v7440_v26  ;;  %v39672_v50 = vld [vmem:[#allocation86_spill] sm:$0xff]  ;;  %v39675_v16 = vld [vmem:[#allocation89_spill] sm:$0xff] }
 0x3f5   :  { %v35676_v38 = vpop.f32.mrf.mxu0  ;;  %v39679_v42 = vld [vmem:[#allocation93_spill] sm:$0xff] }
 0x3f6   :  { %v8007_v30 = vadd.f32 %v39665_v11, %v7432_v40  ;;  %v8017_v25 = vadd.f32 %v39672_v50, %v7442_v43  ;;  %v8590_v43 = vadd.f32 %v39679_v42, %v8015_v58 }
 0x3f7   :  { %v35669_v0 = vpop.f32.mrf.mxu1 }
 0x3f8   :  { %39641 = vst [vmem:[#allocation25_spill] sm:$0xff] %v35669_v0  ;;  %v39659_v0 = vld [vmem:[#allocation77_spill] sm:$0xff] }
 0x3f9   :  { %v35680_v23 = vpop.f32.mrf.mxu1  ;;  %v7438_v24 = vadd.f32 %v39659_v0, %v6863_v12  ;;  %v39670_v12 = vld [vmem:[#allocation84_spill] sm:$0xff] }
 0x3fa   :  { %39648 = vst [vmem:[#allocation26_spill] sm:$0xff] %v35680_v23  ;;  %v39658_v23 = vld [vmem:[#allocation75_spill] sm:$0xff] }
 0x3fb   :  { %v35682_v60 = vpop.f32.mrf.mxu0  ;;  %v8013_v33 = vadd.f32 %v39670_v12, %v7438_v24  ;;  %v39678_v12 = vld [vmem:[#allocation92_spill] sm:$0xff] }
 0x3fc   :  { %39649 = vst [vmem:[#allocation27_spill] sm:$0xff] %v35682_v60  ;;  %v7434_v60 = vadd.f32 %v39658_v23, %v6859_v1  ;;  %v39669_v1 = vld [vmem:[#allocation82_spill] sm:$0xff]  ;;  %v8592_v26 = vadd.f32 %v39678_v12, %v8017_v25 }
 0x3fd   :  { %v35693_v22 = vpop.f32.mrf.mxu0 }
 0x3fe   :  { %39657 = vst [vmem:[#allocation29_spill] sm:$0xff] %v35693_v22  ;;  %v8009_v0 = vadd.f32 %v39669_v1, %v7434_v60  ;;  %v39674_v22 = vld [vmem:[#allocation88_spill] sm:$0xff]  ;;  %v39677_v1 = vld [vmem:[#allocation90_spill] sm:$0xff] }
 0x3ff   :  { %v35689_v59 = vpop.f32.mrf.mxu1  ;;  %v8582_v40 = vadd.f32 %v39674_v22, %v8007_v30 }
 0x400   :  { %39654 = vst [vmem:[#allocation28_spill] sm:$0xff] %v35689_v59  ;;  %v39668_v59 = vld [vmem:[#allocation83_spill] sm:$0xff] }
 0x401   :  { %v35700_v47 = vpop.f32.mrf.mxu1  ;;  %v8011_v23 = vadd.f32 %v39668_v59, %v7436_v45  ;;  %v8584_v59 = vadd.f32 %v39675_v16, %v8009_v0  ;;  %v39676_v45 = vld [vmem:[#allocation91_spill] sm:$0xff]  ;;  %v9156_v50 = vadd.f32 %v35052_v46, %v8582_v40 }
 0x402   :  { %39663 = vst [vmem:[#allocation31_spill] sm:$0xff] %v35700_v47  ;;  %v39673_v47 = vld [vmem:[#allocation87_spill] sm:$0xff]  ;;  %v8588_v60 = vadd.f32 %v39676_v45, %v8013_v33  ;;  %v9164_v33 = vadd.f32 %v35114_v56, %v8590_v43  ;;  %v39683_v45 = vld [vmem:[#allocation97_spill] sm:$0xff] }
 0x403   :  { %v35702_v63 = vpop.f32.mrf.mxu0  ;;  %v8586_v24 = vadd.f32 %v39677_v1, %v8011_v23  ;;  %v9158_v22 = vadd.f32 %v35072_v5, %v8584_v59  ;;  %v9166_v23 = vadd.f32 %v35128_v28, %v8592_v26  ;;  %v9731_v58 = vadd.f32 %v35156_v41, %v9156_v50  ;;  %v39682_v41 = vld [vmem:[#allocation96_spill] sm:$0xff]  ;;  %v39689_v43 = vld [vmem:[#allocation103_spill] sm:$0xff] }
 0x404   :  { %39664 = vst [vmem:[#allocation30_spill] sm:$0xff] %v35702_v63  ;;  %v8580_v63 = vadd.f32 %v39673_v47, %v8005_v18  ;;  %v9162_v0 = vadd.f32 %v35100_v21, %v8588_v60  ;;  %v39684_v60 = vld [vmem:[#allocation98_spill] sm:$0xff]  ;;  %v16025_v1 = vlaneseq }
 0x405   :  { %v35713_v15 = vpop.f32.mrf.mxu0  ;;  %v9160_v30 = vadd.f32 %v35086_v17, %v8586_v24  ;;  %v9733_v46 = vadd.f32 %v35169_v53, %v9158_v22  ;;  %v9739_v17 = vadd.f32 %v35210_v2, %v9164_v33  ;;  %v9741_v21 = vadd.f32 %v35205_v20, %v9166_v23  ;;  %v39686_v2 = vld [vmem:[#allocation100_spill] sm:$0xff]  ;;  %v39687_v20 = vld [vmem:[#allocation101_spill] sm:$0xff]  ;;  %v39692_v33 = vld [vmem:[#allocation107_spill] sm:$0xff] }
 0x406   :  { %v9737_v5 = vadd.f32 %v35191_v48, %v9162_v0  ;;  %v10306_v56 = vadd.f32 %v35235_v52, %v9731_v58  ;;  %v39685_v48 = vld [vmem:[#allocation99_spill] sm:$0xff]  ;;  %v39688_v52 = vld [vmem:[#allocation102_spill] sm:$0xff] }
 0x407   :  { %v35706_v7 = vpop.f32.mrf.mxu1  ;;  %v10308_v59 = vadd.f32 %v39682_v41, %v9733_v46  ;;  %v10314_v24 = vadd.f32 %v39685_v48, %v9739_v17  ;;  %v10316_v12 = vadd.f32 %v39686_v2, %v9741_v21 }
 0x408   :  { %39667 = vst [vmem:[#allocation33_spill] sm:$0xff] %v35706_v7  ;;  %v39680_v7 = vld [vmem:[#allocation94_spill] sm:$0xff]  ;;  %v10911_v42 = vadd.f32 %v39688_v52, %v10306_v56 }
 0x409   :  { %v35717_v11 = vpop.f32.mrf.mxu1  ;;  %v9154_v47 = vadd.f32 %v39680_v7, %v8580_v63  ;;  %v9735_v63 = vadd.f32 %v35182_v54, %v9160_v30  ;;  %v39681_v7 = vld [vmem:[#allocation95_spill] sm:$0xff]  ;;  %v10312_v54 = vadd.f32 %v39684_v60, %v9737_v5  ;;  %v10913_v50 = vadd.f32 %v39689_v43, %v10308_v59  ;;  %v39691_v30 = vld [vmem:[#allocation105_spill] sm:$0xff]  ;;  %v39698_v60 = vld [vmem:[#allocation112_spill] sm:$0xff] }
 0x40a   :  { %v10919_v23 = vadd.f32 %v39692_v33, %v10314_v24  ;;  %v11486_v46 = vadd.f32 %v35385_v8, %v10911_v42  ;;  %v39697_v59 = vld [vmem:[#allocation111_spill] sm:$0xff]  ;;  %v12635_v42 = vadd.f32 %v35513_v14, %v35446_v62 }
 0x40b   :  { %v35719_v31 = vpop.f32.mrf.mxu0  ;;  %v9729_v25 = vadd.f32 %v35142_v34, %v9154_v47  ;;  %v10310_v53 = vadd.f32 %v39683_v45, %v9735_v63  ;;  %v39690_v47 = vld [vmem:[#allocation104_spill] sm:$0xff]  ;;  %v10917_v0 = vadd.f32 %v39691_v30, %v10312_v54  ;;  %v23_v62 = vld [vmem:[%s39385_s1] sm:$0xff] }
 0x40c   :  { %v39694_v63 = vld [vmem:[#allocation108_spill] sm:$0xff]  ;;  %v11494_v54 = vadd.f32 %v39698_v60, %v10919_v23  ;;  %v12061_v8 = vadd.f32 %v35466_v57, %v11486_v46  ;;  %v39699_v33 = vld [vmem:[#allocation119_spill] sm:$0xff] }
 0x40d   :  { %v35737_v16 = vpop.f32.mrf.mxu0  ;;  %v10304_v28 = vadd.f32 %v39681_v7, %v9729_v25  ;;  %v10915_v22 = vadd.f32 %v39690_v47, %v10310_v53  ;;  %v39693_v25 = vld [vmem:[#allocation106_spill] sm:$0xff]  ;;  %v39695_v7 = vld [vmem:[#allocation109_spill] sm:$0xff]  ;;  %v11492_v45 = vadd.f32 %v39697_v59, %v10917_v0  ;;  %v35771_v53 = vshrl.u32 %v16025_v1, 7  ;;  %v35845_v60 = vld [vmem:[%s39385_s1 + $0x8] sm:$0x3f]  ;;  %s32552_s1 = smov 110  }
 0x40e   :  { %v10921_v58 = vadd.f32 %v39693_v25, %v10316_v12  ;;  %v11488_v56 = vadd.f32 %v39695_v7, %v10913_v50  ;;  %v12069_v52 = vadd.f32 %v35507_v32, %v11494_v54  ;;  %v12637_v32 = vadd.f32 %v35519_v37, %v35457_v10  ;;  %v39700_v25 = vld [vmem:[#allocation10_spill] sm:$0xff]  ;;  %v39710_v54 = vld [vmem:[#allocation120_spill] sm:$0xff] }
 0x40f   :  { %v10909_v26 = vadd.f32 %v39687_v20, %v10304_v28  ;;  %v39696_v28 = vld [vmem:[#allocation110_spill] sm:$0xff]  ;;  %v16035_v14 = vsub.s32 2, %v35771_v53  ;;  %v16047_v37 = vsub.s32 5, %v35771_v53  ;;  %v16051_v30 = vsub.s32 6, %v35771_v53 }
 0x410   :  { %v11490_v41 = vadd.f32 %v39696_v28, %v10915_v22  ;;  %v11496_v48 = vadd.f32 %v35441_v13, %v10921_v58  ;;  %v12063_v12 = vadd.f32 %v35475_v39, %v11488_v56  ;;  %v12636_v13 = vadd.f32 %v35517_v61, %v12061_v8  ;;  %v39707_v7 = vld [vmem:[#allocation118_spill] sm:$0xff]  ;;  %v39708_v28 = vld [vmem:[#allocation12_spill] sm:$0xff]  ;;  %v39711_v8 = vld [vmem:[#allocation121_spill] sm:$0xff] }
 0x411   :  { %v11484_v5 = vadd.f32 %v39694_v63, %v10909_v26  ;;  %v12067_v26 = vadd.f32 %v35497_v6, %v11492_v45  ;;  %v16031_v6 = vsub.s32 1, %v35771_v53  ;;  %v12644_v47 = vadd.f32 %v35535_v49, %v12069_v52  ;;  %v39714_v52 = vld [vmem:[#allocation3_spill] sm:$0xff] }
 0x412   :  { %v12065_v20 = vadd.f32 %v35486_v55, %v11490_v41  ;;  %v12071_v1 = vadd.f32 %v35511_v44, %v11496_v48  ;;  %v16027_v55 = vsub.s32 0, %v35771_v53  ;;  %v16055_v0 = vsub.s32 7, %v35771_v53 }
 0x413   :  { %v35746_v40 = vpop.f32.mrf.mxu0  ;;  %v12059_v2 = vadd.f32 %v35451_v19, %v11484_v5  ;;  %v12633_v19 = vadd.f32 %v35509_v3, %v35436_v9  ;;  %v16039_v9 = vsub.s32 3, %v35771_v53  ;;  %v16043_v3 = vsub.s32 4, %v35771_v53 }
 0x414   :  { %v12640_v61 = vadd.f32 %v35527_v27, %v12065_v20  ;;  %v12642_v50 = vadd.f32 %v35531_v51, %v12067_v26  ;;  %v35818_v58 = vrot.slane %v23_v62, %v16027_v55  ;;  %v35820_v27 = vrot.slane %v23_v62, %v16031_v6 }
 0x415   :  { %v35764_v17 = vpop.f32.mrf.mxu0  ;;  %v12634_v39 = vadd.f32 %v35515_v36, %v12059_v2  ;;  %v12638_v36 = vadd.f32 %v35523_v35, %v12063_v12  ;;  %v13208_v10 = vadd.f32 %v35539_v4, %v12633_v19  ;;  %v39703_v4 = vld [vmem:[#allocation117_spill] sm:$0xff]  ;;  %v35827_v49 = vrot.slane %v23_v62, %v16035_v14 }
 0x416   :  { %v35728_v18 = vpop.f32.mrf.mxu1  ;;  %39701 = vst [vmem:[#allocation32_spill] sm:$0xff] %v35818_v58  ;;  %39702 = vst [vmem:[#allocation35_spill] sm:$0xff] %v35820_v27  ;;  %v35823_v46 = vadd.f32 %v39703_v4, %v12071_v1  ;;  %v35829_v63 = vrot.slane %v23_v62, %v16039_v9  ;;  %v35833_v5 = vrot.slane %v23_v62, %v16043_v3 }
 0x417   :  { %v13209_v23 = vadd.f32 %v39699_v33, %v12634_v39  ;;  %v13783_v35 = vadd.f32 %v39700_v25, %v13208_v10  ;;  %39704 = vst [vmem:[#allocation34_spill] sm:$0xff] %v35827_v49  ;;  %v13210_v56 = vadd.f32 %v39707_v7, %v12635_v42  ;;  %v35840_v45 = vrot.slane %v23_v62, %v16047_v37  ;;  %v39715_v42 = vld [vmem:[#allocation13_spill] sm:$0xff] }
 0x418   :  { %v35748_v34 = vpop.f32.mrf.mxu1  ;;  %39705 = vst [vmem:[#allocation36_spill] sm:$0xff] %v35829_v63  ;;  %39706 = vst [vmem:[#allocation37_spill] sm:$0xff] %v35833_v5  ;;  %v13211_v48 = vadd.f32 %v39710_v54, %v12636_v13  ;;  %v13212_v2 = vadd.f32 %v39711_v8, %v12637_v32  ;;  %v35853_v26 = vrot.slane %v23_v62, %v16051_v30  ;;  %v39716_v33 = vld [vmem:[#allocation113_spill] sm:$0xff]  ;;  %v39717_v13 = vld [vmem:[#allocation122_spill] sm:$0xff] }
 0x419   :  { %v13784_v41 = vadd.f32 %v39708_v28, %v13209_v23  ;;  %v14358_v59 = vadd.f32 %v35665_v29, %v13783_v35  ;;  %39709 = vst [vmem:[#allocation38_spill] sm:$0xff] %v35840_v45  ;;  %v35855_v29 = vrot.slane %v23_v62, %v16055_v0  ;;  %v13213_v1 = vadd.f32 %v39714_v52, %v12638_v36  ;;  %v39718_v32 = vld [vmem:[#allocation5_spill] sm:$0xff]  ;;  %v39721_v30 = vld [vmem:[#allocation15_spill] sm:$0xff]  ;;  %v39724_v28 = vld [vmem:[#allocation4_spill] sm:$0xff] }
 0x41a   :  { %39712 = vst [vmem:[#allocation39_spill] sm:$0xff] %v35853_v26  ;;  %v13785_v19 = vadd.f32 %v39715_v42, %v13210_v56  ;;  %v13214_v23 = vadd.f32 %v39717_v13, %v39716_v33  ;;  %v13215_v25 = vadd.f32 %v39718_v32, %v12640_v61  ;;  %v35865_v4 = vrot.slane %v35845_v60, %v16027_v55  ;;  %v39722_v0 = vld [vmem:[#allocation25_spill] sm:$0xff]  ;;  %v39731_v33 = vld [vmem:[#allocation8_spill] sm:$0xff]  ;;  %v39732_v32 = vld [vmem:[#allocation14_spill] sm:$0xff] }
 0x41b   :  { %v35766_v21 = vpop.f32.mrf.mxu1  ;;  %39713 = vst [vmem:[#allocation41_spill] sm:$0xff] %v35855_v29  ;;  %v14359_v39 = vadd.f32 %v35676_v38, %v13784_v41  ;;  %v14933_v10 = vadd.f32 %v35728_v18, %v14358_v59  ;;  %v35868_v62 = vrot.slane %v35845_v60, %v16031_v6  ;;  %v13786_v36 = vadd.f32 %v39721_v30, %v13211_v48  ;;  %v39723_v18 = vld [vmem:[#allocation114_spill] sm:$0xff] }
 0x41c   :  { %39719 = vst [vmem:[#allocation40_spill] sm:$0xff] %v35865_v4  ;;  %v14360_v7 = vadd.f32 %v39722_v0, %v13785_v19  ;;  %v13216_v41 = vadd.f32 %v39724_v28, %v39723_v18  ;;  %v39725_v59 = vld [vmem:[#allocation6_spill] sm:$0xff]  ;;  %v35881_v8 = vrot.slane %v35845_v60, %v16035_v14  ;;  %v35884_v6 = vrot.slane %v35845_v60, %v16039_v9  ;;  %v39734_v0 = vld [vmem:[#allocation116_spill] sm:$0xff]  ;;  %v39735_v18 = vld [vmem:[#allocation9_spill] sm:$0xff] }
 0x41d   :  { %v35787_v57 = vpop.f32.mrf.mxu1  ;;  %39720 = vst [vmem:[#allocation43_spill] sm:$0xff] %v35868_v62  ;;  %v14934_v38 = vadd.f32 %v35748_v34, %v14359_v39  ;;  %v13217_v61 = vadd.f32 %v39725_v59, %v12642_v50  ;;  %v39728_v48 = vld [vmem:[#allocation26_spill] sm:$0xff]  ;;  %v39729_v39 = vld [vmem:[#allocation115_spill] sm:$0xff]  ;;  %v13219_v13 = vadd.f32 %v39731_v33, %v12644_v47  ;;  %v13787_v14 = vadd.f32 %v39732_v32, %v13212_v2  ;;  %v39736_v28 = vld [vmem:[#allocation16_spill] sm:$0xff] }
 0x41e   :  { %39726 = vst [vmem:[#allocation42_spill] sm:$0xff] %v35881_v8  ;;  %39727 = vst [vmem:[#allocation44_spill] sm:$0xff] %v35884_v6  ;;  %v14361_v52 = vadd.f32 %v39728_v48, %v13786_v36  ;;  %v14935_v34 = vadd.f32 %v35746_v40, %v14360_v7  ;;  %v39730_v50 = vld [vmem:[#allocation7_spill] sm:$0xff]  ;;  %v13220_v36 = vadd.f32 %v39735_v18, %v39734_v0  ;;  %v39738_v47 = vld [vmem:[#allocation29_spill] sm:$0xff] }
 0x41f   :  { %v35776_v24 = vpop.f32.mrf.mxu0  ;;  %v13789_v59 = vadd.f32 %v39736_v28, %v13214_v23  ;;  %v39739_v32 = vld [vmem:[#allocation18_spill] sm:$0xff]  ;;  %v39741_v28 = vld [vmem:[#allocation19_spill] sm:$0xff] }
 0x420   :  { %v14936_v40 = vadd.f32 %v35764_v17, %v14361_v52 }
 0x421   :  { %v35796_v44 = vpop.f32.mrf.mxu0 }
 0x423   :  { %v35798_v43 = vpop.f32.mrf.mxu1 }
 0x425   :  { %v35825_v51 = vpop.f32.mrf.mxu1 }
 0x427   :  { %v35812_v22 = vpop.f32.mrf.mxu0 }
 0x429   :  { %v35849_v12 = vpop.f32.mrf.mxu0 }
 0x42b   :  { %v35851_v20 = vpop.f32.mrf.mxu1 }
 0x42d   :  { %v35878_v54 = vpop.f32.mrf.mxu1 }
 0x42f   :  { %v15077_v35 = vpop.f32.mrf.mxu0 }
 0x430   :  { %v35873_v56 = vadd.f32 %v15077_v35, %v14933_v10  ;;  %v13218_v10 = vadd.f32 %v39730_v50, %v39729_v39  ;;  %v39733_v35 = vld [vmem:[#allocation17_spill] sm:$0xff] }
 0x431   :  { %v15079_v55 = vpop.f32.mrf.mxu0  ;;  %v13788_v30 = vadd.f32 %v39733_v35, %v13213_v1  ;;  %v39740_v35 = vld [vmem:[#allocation28_spill] sm:$0xff] }
 0x432   :  { %v16095_v42 = vmul.f32 %v35818_v58, %v35873_v56  ;;  %v35890_v19 = vadd.f32 %v15079_v55, %v14934_v38  ;;  %v39737_v55 = vld [vmem:[#allocation27_spill] sm:$0xff] }
 0x433   :  { %v15148_v9 = vpop.f32.mrf.mxu1  ;;  %v14362_v48 = vadd.f32 %v39737_v55, %v13787_v14  ;;  %v14363_v39 = vadd.f32 %v39738_v47, %v13788_v30  ;;  %v13791_v55 = vadd.f32 %v39741_v28, %v13216_v41 }
 0x434   :  { %v16096_v7 = vmul.f32 %v35820_v27, %v35890_v19  ;;  %v35902_v38 = vadd.f32 %v15148_v9, %v14935_v34  ;;  %v16125_v2 = vmul.f32 %v16095_v42, %v35873_v56  ;;  %v13790_v34 = vadd.f32 %v39739_v32, %v13215_v25  ;;  %v39745_v32 = vld [vmem:[#allocation30_spill] sm:$0xff] }
 0x435   :  { %v15150_v1 = vpop.f32.mrf.mxu1  ;;  %v14364_v9 = vadd.f32 %v39740_v35, %v13789_v59  ;;  %v14937_v23 = vadd.f32 %v35766_v21, %v14362_v48  ;;  %v14938_v14 = vadd.f32 %v35787_v57, %v14363_v39  ;;  %v14366_v41 = vadd.f32 %v39745_v32, %v13791_v55 }
 0x436   :  { %v16109_v50 = vadd.f32 %v16096_v7, %v16095_v42  ;;  %v16126_v33 = vmul.f32 %v16096_v7, %v35890_v19  ;;  %v16097_v17 = vmul.f32 %v35827_v49, %v35902_v38  ;;  %v35911_v52 = vadd.f32 %v15150_v1, %v14936_v40  ;;  %v39742_v40 = vld [vmem:[#allocation31_spill] sm:$0xff] }
 0x437   :  { %v15219_v30 = vpop.f32.mrf.mxu0  ;;  %v14365_v47 = vadd.f32 %v39742_v40, %v13790_v34  ;;  %v14939_v25 = vadd.f32 %v35776_v24, %v14364_v9  ;;  %v39747_v40 = vld [vmem:[#allocation23_spill] sm:$0xff] }
 0x438   :  { %v16139_v0 = vadd.f32 %v16126_v33, %v16125_v2  ;;  %v16110_v18 = vadd.f32 %v16109_v50, %v16097_v17  ;;  %v16127_v42 = vmul.f32 %v16097_v17, %v35902_v38  ;;  %v16098_v7 = vmul.f32 %v35829_v63, %v35911_v52  ;;  %v39743_v2 = vld [vmem:[#allocation11_spill] sm:$0xff]  ;;  %v39744_v33 = vld [vmem:[#allocation21_spill] sm:$0xff] }
 0x439   :  { %v35923_v1 = vadd.f32 %v15219_v30, %v14937_v23  ;;  %v15221_v59 = vpop.f32.mrf.mxu0  ;;  %v13221_v50 = vadd.f32 %v39743_v2, %v35823_v46  ;;  %v13792_v17 = vadd.f32 %v39744_v33, %v13217_v61  ;;  %v14940_v35 = vadd.f32 %v35796_v44, %v14365_v47  ;;  %v39749_v33 = vld [vmem:[#allocation22_spill] sm:$0xff] }
 0x43a   :  { %v16140_v21 = vadd.f32 %v16139_v0, %v16127_v42  ;;  %v16111_v48 = vadd.f32 %v16110_v18, %v16098_v7  ;;  %v16128_v57 = vmul.f32 %v16098_v7, %v35911_v52  ;;  %v35926_v39 = vadd.f32 %v15221_v59, %v14938_v14  ;;  %v39746_v14 = vld [vmem:[#allocation20_spill] sm:$0xff] }
 0x43b   :  { %v16099_v34 = vmul.f32 %v35833_v5, %v35923_v1  ;;  %v15290_v24 = vpop.f32.mrf.mxu1  ;;  %v13793_v0 = vadd.f32 %v39746_v14, %v13218_v10  ;;  %v14367_v46 = vadd.f32 %v35713_v15, %v13792_v17  ;;  %v14941_v7 = vadd.f32 %v35798_v43, %v14366_v41 }
 0x43c   :  { %v16141_v9 = vadd.f32 %v16140_v21, %v16128_v57  ;;  %v16100_v23 = vmul.f32 %v35840_v45, %v35926_v39  ;;  %v35937_v30 = vadd.f32 %v15290_v24, %v14939_v25  ;;  %v13794_v47 = vadd.f32 %v39747_v40, %v13219_v13  ;;  %v39748_v25 = vld [vmem:[#allocation33_spill] sm:$0xff] }
 0x43d   :  { %v16112_v18 = vadd.f32 %v16111_v48, %v16099_v34  ;;  %v16129_v61 = vmul.f32 %v16099_v34, %v35923_v1  ;;  %v15292_v42 = vpop.f32.mrf.mxu1  ;;  %v14368_v59 = vadd.f32 %v39748_v25, %v13793_v0  ;;  %v14942_v48 = vadd.f32 %v35825_v51, %v14367_v46 }
 0x43e   :  { %v16130_v28 = vmul.f32 %v16100_v23, %v35926_v39  ;;  %v16101_v44 = vmul.f32 %v35853_v26, %v35937_v30  ;;  %v35946_v55 = vadd.f32 %v15292_v42, %v14940_v35  ;;  %v13795_v17 = vadd.f32 %v39749_v33, %v13220_v36 }
 0x43f   :  { %v16142_v10 = vadd.f32 %v16141_v9, %v16129_v61  ;;  %v16113_v21 = vadd.f32 %v16112_v18, %v16100_v23  ;;  %v15361_v15 = vpop.f32.mrf.mxu0  ;;  %v14369_v32 = vadd.f32 %v35717_v11, %v13794_v47  ;;  %v14943_v24 = vadd.f32 %v35812_v22, %v14368_v59  ;;  %v39750_v23 = vld [vmem:[#allocation24_spill] sm:$0xff] }
 0x440   :  { %v16131_v57 = vmul.f32 %v16101_v44, %v35937_v30  ;;  %v16102_v43 = vmul.f32 %v35855_v29, %v35946_v55  ;;  %v35954_v2 = vadd.f32 %v15361_v15, %v14941_v7  ;;  %v13796_v14 = vadd.f32 %v39750_v23, %v13221_v50 }
 0x441   :  { %v16143_v41 = vadd.f32 %v16142_v10, %v16130_v28  ;;  %v16114_v13 = vadd.f32 %v16113_v21, %v16101_v44  ;;  %v15363_v34 = vpop.f32.mrf.mxu0  ;;  %v14370_v0 = vadd.f32 %v35719_v31, %v13795_v17  ;;  %v14944_v11 = vadd.f32 %v35849_v12, %v14369_v32 }
 0x442   :  { %v16132_v35 = vmul.f32 %v16102_v43, %v35946_v55  ;;  %v16103_v51 = vmul.f32 %v35865_v4, %v35954_v2  ;;  %v35962_v9 = vadd.f32 %v15363_v34, %v14942_v48  ;;  %v14371_v7 = vadd.f32 %v35737_v16, %v13796_v14 }
 0x443   :  { %v16144_v46 = vadd.f32 %v16143_v41, %v16131_v57  ;;  %v16115_v36 = vadd.f32 %v16114_v13, %v16102_v43  ;;  %v15432_v18 = vpop.f32.mrf.mxu1  ;;  %v35976_v31 = vrot.slane %v35845_v60, %v16043_v3  ;;  %v14945_v50 = vadd.f32 %v35851_v20, %v14370_v0 }
 0x444   :  { %v16133_v61 = vmul.f32 %v16103_v51, %v35954_v2  ;;  %v16104_v22 = vmul.f32 %v35868_v62, %v35962_v9  ;;  %v35970_v42 = vadd.f32 %v15432_v18, %v14943_v24  ;;  %v35987_v21 = vrot.slane %v35845_v60, %v16047_v37 }
 0x445   :  { %v16145_v28 = vadd.f32 %v16144_v46, %v16132_v35  ;;  %v16116_v44 = vadd.f32 %v16115_v36, %v16103_v51  ;;  %v15434_v40 = vpop.f32.mrf.mxu1  ;;  %39751 = vst [vmem:[#allocation45_spill] sm:$0xff] %v35976_v31  ;;  %v14946_v3 = vadd.f32 %v35878_v54, %v14371_v7  ;;  %v39753_v14 = vmov 0.0  }
 0x446   :  { %v16134_v12 = vmul.f32 %v16104_v22, %v35962_v9  ;;  %v16105_v47 = vmul.f32 %v35881_v8, %v35970_v42  ;;  %v35982_v25 = vadd.f32 %v15434_v40, %v14944_v11  ;;  %39752 = vst [vmem:[#allocation46_spill] sm:$0xff] %v35987_v21  ;;  %v32553_v0 = vmov 0  }
 0x447   :  { %v16146_v59 = vadd.f32 %v16145_v28, %v16133_v61  ;;  %v16117_v10 = vadd.f32 %v16116_v44, %v16104_v22  ;;  %v15503_v16 = vpop.f32.mrf.mxu0  ;;  %32472 = vset.pattern.permute.xlu0 %v32553_v0  ;;  %32473 = vset.pattern.permute.xlu1 %v32553_v0  ;;  %v16157_v28 = vld [vmem:[%s39386_s5] sm:$0xff] }
 0x448   :  { %v16135_v15 = vmul.f32 %v16105_v47, %v35970_v42  ;;  %v16106_v20 = vmul.f32 %v35884_v6, %v35982_v25  ;;  %v35993_v48 = vadd.f32 %v15503_v16, %v14945_v50  ;;  %v32205_v50 = vld [vmem:[%s39386_s5 + $0x8] sm:$0xff] }
 0x449   :  { %v16147_v57 = vadd.f32 %v16146_v59, %v16134_v12  ;;  %v16118_v43 = vadd.f32 %v16117_v10, %v16105_v47  ;;  %v15505_v33 = vpop.f32.mrf.mxu0 }
 0x44a   :  { %v16136_v17 = vmul.f32 %v16106_v20, %v35982_v25  ;;  %v16107_v53 = vmul.f32 %v35976_v31, %v35993_v48  ;;  %v35998_v32 = vadd.f32 %v15505_v33, %v14946_v3 }
 0x44b   :  { %v16148_v37 = vadd.f32 %v16147_v57, %v16135_v15  ;;  %v16119_v60 = vadd.f32 %v16118_v43, %v16106_v20 }
 0x44c   :  { %v16137_v54 = vmul.f32 %v16107_v53, %v35993_v48  ;;  %v16108_v41 = vmul.f32 %v35987_v21, %v35998_v32 }
 0x44d   :  { %v16120_v13 = vadd.f32 %v16119_v60, %v16107_v53  ;;  %v16149_v34 = vadd.f32 %v16148_v37, %v16136_v17 }
 0x44e   :  { %v16138_v24 = vmul.f32 %v16108_v41, %v35998_v32 }
 0x44f   :  { %v16121_v35 = vadd.f32 %v16120_v13, %v16108_v41  ;;  %v16150_v51 = vadd.f32 %v16149_v34, %v16137_v54 }
 0x451   :  { %16122 = vadd.xlane.f32.xlu0 %v16121_v35  ;;  %v16151_v23 = vadd.f32 %v16150_v51, %v16138_v24 }
 0x453   :  { %16152 = vadd.xlane.f32.xlu1 %v16151_v23 }
 0x464   :  { %16280 = vrot.lane.b32.xlu1 %v39753_v14, %s32552_s1 }
 0x467   :  { %17400 = vrot.lane.b32.xlu0 %v39753_v14, %s32554_s0 }
 0x468   :  { %16839 = vrot.lane.b32.xlu1 %v39753_v14, %s32555_s18 }
 0x46b   :  { %18550 = vrot.lane.b32.xlu0 %v39753_v14, %s32556_s15 }
 0x46c   :  { %17975 = vrot.lane.b32.xlu1 %v39753_v14, %s32557_s16 }
 0x470   :  { %19125 = vrot.lane.b32.xlu1 %v39753_v14, %s32558_s17 }
 0x4da   :  { %v16123_v46 = vpop.xlane.xlu0 %16122 }
 0x4db   :  { %v16124_v36 = vmul.f32 0.0009765625, %v16123_v46 }
 0x4dc   :  { %v16153_v18 = vpop.xlane.xlu1 %16152 }
 0x4dd   :  { %v16155_v11 = vmul.f32 %v16124_v36, %v16124_v36  ;;  %v16154_v61 = vmul.f32 0.0009765625, %v16153_v18 }
 0x4de   :  { %v36026_v16 = vpop.permute.xlu0 %17400 }
 0x4df   :  { %v16156_v22 = vsub.f32 %v16154_v61, %v16155_v11 }
 0x4e0   :  { %v36022_v59 = vpop.permute.xlu1 %16280 }
 0x4e1   :  { %v16158_v7 = vadd.f32 1e-05, %v16156_v22 }
 0x4e2   :  { %v36030_v15 = vpop.permute.xlu0 %18550 }
 0x4e3   :  { %32474 = vrsqrt.f32 %v16158_v7 }
 0x4e4   :  { %v36024_v10 = vpop.permute.xlu1 %16839 }
 0x4e8   :  { %v36028_v3 = vpop.permute.xlu1 %17975 }
 0x4ec   :  { %v36032_v20 = vpop.permute.xlu1 %19125 }
 0x4f0   :  { %v32475_v44 = vpop.eup %32474 }
 0x4f1   :  { %v16160_v40 = vmul.f32 %v32475_v44, %v16157_v28 }
 0x4f3   :  { %16167 = vperm.xlu0 %32472, %v16160_v40   ;;  %v16163_v12 = vmul.f32 %v16160_v40, %v16124_v36 }
 0x4f5   :  { %v16164_v47 = vsub.f32 %v32205_v50, %v16163_v12 }
 0x4f7   :  { %16186 = vperm.xlu1 %32473, %v16164_v47  }
 0x56e   :  { %v16168_v57 = vpop.permute.xlu0 %16167 }
 0x56f   :  { %v16170_v43 = vmul.f32 %v16168_v57, %v35873_v56  ;;  %v16175_v33 = vmul.f32 %v16168_v57, %v35926_v39  ;;  %v16171_v37 = vmul.f32 %v16168_v57, %v35890_v19  ;;  %v16177_v54 = vmul.f32 %v16168_v57, %v35946_v55 }
 0x570   :  { %v16172_v35 = vmul.f32 %v16168_v57, %v35902_v38  ;;  %v16179_v51 = vmul.f32 %v16168_v57, %v35962_v9  ;;  %v16173_v55 = vmul.f32 %v16168_v57, %v35911_v52  ;;  %v16181_v36 = vmul.f32 %v16168_v57, %v35982_v25 }
 0x571   :  { %v16174_v52 = vmul.f32 %v16168_v57, %v35923_v1  ;;  %v16183_v25 = vmul.f32 %v16168_v57, %v35998_v32  ;;  %v16176_v1 = vmul.f32 %v16168_v57, %v35937_v30 }
 0x572   :  { %v16187_v17 = vpop.permute.xlu1 %16186 }
 0x573   :  { %v16189_v53 = vadd.f32 %v16187_v17, %v16170_v43  ;;  %v16194_v60 = vadd.f32 %v16187_v17, %v16175_v33  ;;  %v16190_v41 = vadd.f32 %v16187_v17, %v16171_v37  ;;  %v16196_v34 = vadd.f32 %v16187_v17, %v16177_v54 }
 0x574   :  { %v16191_v23 = vadd.f32 %v16187_v17, %v16172_v35  ;;  %v16198_v39 = vadd.f32 %v16187_v17, %v16179_v51  ;;  %v16192_v38 = vadd.f32 %v16187_v17, %v16173_v55  ;;  %v16200_v11 = vadd.f32 %v16187_v17, %v16181_v36 }
 0x575   :  { %v16203_v13 = vmax.f32 %v16189_v53, 0.0  ;;  %v16208_v24 = vmax.f32 %v16194_v60, 0.0  ;;  %v16204_v0 = vmax.f32 %v16190_v41, 0.0  ;;  %v16210_v46 = vmax.f32 %v16196_v34, 0.0 }
 0x576   :  { %v16205_v9 = vmax.f32 %v16191_v23, 0.0  ;;  %v16212_v61 = vmax.f32 %v16198_v39, 0.0  ;;  %v16193_v7 = vadd.f32 %v16187_v17, %v16174_v52  ;;  %v16206_v28 = vmax.f32 %v16192_v38, 0.0  ;;  %v36214_v38 = vld [vmem:[%s39387_s3 + $0x8] sm:$0xff] }
 0x577   :  { %v36041_v56 = vmul.f32 %v16203_v13, %v35818_v58  ;;  %v36044_v19 = vmul.f32 %v16208_v24, %v35840_v45  ;;  %v36053_v18 = vmul.f32 %v16204_v0, %v35820_v27  ;;  %v36056_v22 = vmul.f32 %v16210_v46, %v35855_v29 }
 0x578   :  { %v36065_v44 = vmul.f32 %v16205_v9, %v35827_v49  ;;  %v16202_v40 = vadd.f32 %v16187_v17, %v16183_v25  ;;  %v16214_v50 = vmax.f32 %v16200_v11, 0.0  ;;  %v36068_v12 = vmul.f32 %v16212_v61, %v35868_v62 }
 0x579   :  { %16282 = vrot.lane.b32.xlu1 %v36041_v56, %s32552_s1  ;;  %16292 = vrot.lane.b32.xlu0 %v36044_v19, %s32552_s1  ;;  %v16195_v32 = vadd.f32 %v16187_v17, %v16176_v1  ;;  %v16207_v47 = vmax.f32 %v16193_v7, 0.0  ;;  %v36076_v43 = vmul.f32 %v16206_v28, %v35829_v63  ;;  %v16178_v37 = vmul.f32 %v16168_v57, %v35954_v2 }
 0x57a   :  { %39754 = vst [vmem:[#allocation47_spill] sm:$0xff] %v36068_v12  ;;  %v16216_v33 = vmax.f32 %v16202_v40, 0.0  ;;  %v36079_v53 = vmul.f32 %v16214_v50, %v35884_v6  ;;  %v16180_v13 = vmul.f32 %v16168_v57, %v35970_v42  ;;  %v16182_v35 = vmul.f32 %v16168_v57, %v35993_v48 }
 0x57b   :  { %v16197_v30 = vadd.f32 %v16187_v17, %v16178_v37  ;;  %v16209_v60 = vmax.f32 %v16195_v32, 0.0  ;;  %v36087_v54 = vmul.f32 %v16207_v47, %v35833_v5 }
 0x57c   :  { %v36090_v41 = vmul.f32 %v16216_v33, %v35987_v21  ;;  %v16199_v2 = vadd.f32 %v16187_v17, %v16180_v13  ;;  %v16201_v42 = vadd.f32 %v16187_v17, %v16182_v35 }
 0x57d   :  { %16284 = vrot.lane.b32.xlu1 %v36053_v18, %s32552_s1  ;;  %16296 = vrot.lane.b32.xlu0 %v36056_v22, %s32552_s1  ;;  %v16211_v34 = vmax.f32 %v16197_v30, 0.0  ;;  %v36098_v24 = vmul.f32 %v16209_v60, %v35853_v26 }
 0x57e   :  { %v16213_v51 = vmax.f32 %v16199_v2, 0.0  ;;  %v16215_v0 = vmax.f32 %v16201_v42, 0.0 }
 0x57f   :  { %v36106_v23 = vmul.f32 %v16211_v34, %v35865_v4 }
 0x580   :  { %v36113_v48 = vmul.f32 %v16213_v51, %v35881_v8  ;;  %v36120_v57 = vmul.f32 %v16215_v0, %v35976_v31 }
 0x581   :  { %16286 = vrot.lane.b32.xlu1 %v36065_v44, %s32552_s1  ;;  %16300 = vrot.lane.b32.xlu0 %v36068_v12, %s32552_s1 }
 0x585   :  { %16288 = vrot.lane.b32.xlu1 %v36076_v43, %s32552_s1  ;;  %16304 = vrot.lane.b32.xlu0 %v36079_v53, %s32552_s1 }
 0x589   :  { %16290 = vrot.lane.b32.xlu1 %v36087_v54, %s32552_s1  ;;  %16308 = vrot.lane.b32.xlu0 %v36090_v41, %s32552_s1 }
 0x58d   :  { %16294 = vrot.lane.b32.xlu1 %v36098_v24, %s32552_s1  ;;  %16841 = vrot.lane.b32.xlu0 %v36041_v56, %s32555_s18 }
 0x591   :  { %16298 = vrot.lane.b32.xlu1 %v36106_v23, %s32552_s1  ;;  %16845 = vrot.lane.b32.xlu0 %v36065_v44, %s32555_s18 }
 0x595   :  { %16302 = vrot.lane.b32.xlu1 %v36113_v48, %s32552_s1  ;;  %16849 = vrot.lane.b32.xlu0 %v36087_v54, %s32555_s18 }
 0x599   :  { %16306 = vrot.lane.b32.xlu1 %v36120_v57, %s32552_s1  ;;  %16853 = vrot.lane.b32.xlu0 %v36098_v24, %s32555_s18 }
 0x59d   :  { %16843 = vrot.lane.b32.xlu1 %v36053_v18, %s32555_s18  ;;  %16857 = vrot.lane.b32.xlu0 %v36106_v23, %s32555_s18 }
 0x5a1   :  { %16847 = vrot.lane.b32.xlu1 %v36076_v43, %s32555_s18  ;;  %16861 = vrot.lane.b32.xlu0 %v36113_v48, %s32555_s18 }
 0x5a5   :  { %16851 = vrot.lane.b32.xlu1 %v36044_v19, %s32555_s18  ;;  %16865 = vrot.lane.b32.xlu0 %v36120_v57, %s32555_s18 }
 0x5a9   :  { %16855 = vrot.lane.b32.xlu1 %v36056_v22, %s32555_s18  ;;  %17402 = vrot.lane.b32.xlu0 %v36041_v56, %s32554_s0 }
 0x5ad   :  { %16859 = vrot.lane.b32.xlu1 %v36068_v12, %s32555_s18  ;;  %17408 = vrot.lane.b32.xlu0 %v36076_v43, %s32554_s0 }
 0x5b1   :  { %16863 = vrot.lane.b32.xlu1 %v36079_v53, %s32555_s18  ;;  %17412 = vrot.lane.b32.xlu0 %v36044_v19, %s32554_s0 }
 0x5b5   :  { %16867 = vrot.lane.b32.xlu1 %v36090_v41, %s32555_s18  ;;  %17416 = vrot.lane.b32.xlu0 %v36056_v22, %s32554_s0  ;;  %s32562_s18 = smov 11  }
 0x5b9   :  { %17404 = vrot.lane.b32.xlu1 %v36053_v18, %s32554_s0  ;;  %17420 = vrot.lane.b32.xlu0 %v36068_v12, %s32554_s0 }
 0x5bd   :  { %17406 = vrot.lane.b32.xlu1 %v36065_v44, %s32554_s0  ;;  %17424 = vrot.lane.b32.xlu0 %v36079_v53, %s32554_s0 }
 0x5c1   :  { %17410 = vrot.lane.b32.xlu1 %v36087_v54, %s32554_s0  ;;  %17428 = vrot.lane.b32.xlu0 %v36090_v41, %s32554_s0 }
 0x5c5   :  { %17414 = vrot.lane.b32.xlu1 %v36098_v24, %s32554_s0  ;;  %17979 = vrot.lane.b32.xlu0 %v36053_v18, %s32557_s16 }
 0x5c9   :  { %17418 = vrot.lane.b32.xlu1 %v36106_v23, %s32554_s0  ;;  %17983 = vrot.lane.b32.xlu0 %v36076_v43, %s32557_s16 }
 0x5cd   :  { %17422 = vrot.lane.b32.xlu1 %v36113_v48, %s32554_s0  ;;  %17985 = vrot.lane.b32.xlu0 %v36087_v54, %s32557_s16 }
 0x5d1   :  { %17426 = vrot.lane.b32.xlu1 %v36120_v57, %s32554_s0  ;;  %17989 = vrot.lane.b32.xlu0 %v36098_v24, %s32557_s16 }
 0x5d5   :  { %17977 = vrot.lane.b32.xlu1 %v36041_v56, %s32557_s16  ;;  %17993 = vrot.lane.b32.xlu0 %v36106_v23, %s32557_s16 }
 0x5d9   :  { %17981 = vrot.lane.b32.xlu1 %v36065_v44, %s32557_s16  ;;  %17997 = vrot.lane.b32.xlu0 %v36113_v48, %s32557_s16 }
 0x5dd   :  { %17987 = vrot.lane.b32.xlu1 %v36044_v19, %s32557_s16  ;;  %18001 = vrot.lane.b32.xlu0 %v36120_v57, %s32557_s16 }
 0x5e1   :  { %17991 = vrot.lane.b32.xlu1 %v36056_v22, %s32557_s16  ;;  %18552 = vrot.lane.b32.xlu0 %v36041_v56, %s32556_s15 }
 0x5e5   :  { %17995 = vrot.lane.b32.xlu1 %v36068_v12, %s32557_s16  ;;  %18558 = vrot.lane.b32.xlu0 %v36076_v43, %s32556_s15 }
 0x5e9   :  { %17999 = vrot.lane.b32.xlu1 %v36079_v53, %s32557_s16  ;;  %18562 = vrot.lane.b32.xlu0 %v36044_v19, %s32556_s15 }
 0x5eb   :  { %v16283_v17 = vpop.permute.xlu1 %16282  ;;  %v16293_v39 = vpop.permute.xlu0 %16292 }
 0x5ec   :  { %v16311_v9 = vsel %vm16310_vm6, %v36022_v59, %v16283_v17 }
 0x5ed   :  { %18003 = vrot.lane.b32.xlu1 %v36090_v41, %s32557_s16  ;;  %18566 = vrot.lane.b32.xlu0 %v36056_v22, %s32556_s15  ;;  %s32568_s16 = smov 38  }
 0x5ef   :  { %v16285_v46 = vpop.permute.xlu1 %16284  ;;  %v16297_v55 = vpop.permute.xlu0 %16296 }
 0x5f0   :  { %v16312_v36 = vsel %vm16310_vm6, %v16283_v17, %v16285_v46 }
 0x5f1   :  { %18554 = vrot.lane.b32.xlu1 %v36053_v18, %s32556_s15  ;;  %16372 = vmatprep.subr.mxu0 %v16312_v36 }
 0x5f2   :  { %18570 = vrot.lane.b32.xlu0 %v36068_v12, %s32556_s15  ;;  %16373 = vmatpush1.msra.mxu0 %v16311_v9 }
 0x5f3   :  { %v16287_v11 = vpop.permute.xlu1 %16286  ;;  %32207 = vmatmul.mubr.msk.f32.vlgmr.msra.gmra.mxu0 %vm117_vm1, %v36214_v38  ;;  %v16301_v61 = vpop.permute.xlu0 %16300 }
 0x5f4   :  { %16548 = vmatprep.mubr.f32.mxu0 %v39753_v14  ;;  %v16313_v7 = vsel %vm16310_vm6, %v16285_v46, %v16287_v11 }
 0x5f5   :  { %18556 = vrot.lane.b32.xlu1 %v36065_v44, %s32556_s15 }
 0x5f6   :  { %18574 = vrot.lane.b32.xlu0 %v36079_v53, %s32556_s15 }
 0x5f7   :  { %v16289_v52 = vpop.permute.xlu1 %16288  ;;  %v16305_v25 = vpop.permute.xlu0 %16304 }
 0x5f8   :  { %v16314_v59 = vsel %vm16310_vm6, %v16287_v11, %v16289_v52  ;;  %v36286_v11 = vld [vmem:[%s39387_s3] sm:$0xff] }
 0x5f9   :  { %18560 = vrot.lane.b32.xlu1 %v36087_v54, %s32556_s15  ;;  %16443 = vmatprep.subr.mxu1 %v16314_v59 }
 0x5fa   :  { %18578 = vrot.lane.b32.xlu0 %v36090_v41, %s32556_s15  ;;  %16444 = vmatpush1.msra.mxu1 %v16313_v7 }
 0x5fb   :  { %v16291_v28 = vpop.permute.xlu1 %16290  ;;  %32208 = vmatmul.mubr.msk.f32.vlgmr.msra.gmra.mxu1 %vm117_vm1, %v36214_v38  ;;  %v16309_v40 = vpop.permute.xlu0 %16308 }
 0x5fc   :  { %v16316_v50 = vsel %vm16310_vm6, %v16291_v28, %v16293_v39  ;;  %v16315_v1 = vsel %vm16310_vm6, %v16289_v52, %v16291_v28  ;;  %16619 = vmatprep.mubr.f32.mxu1 %v39753_v14 }
 0x5fd   :  { %18564 = vrot.lane.b32.xlu1 %v36098_v24, %s32556_s15  ;;  %16514 = vmatprep.subr.mxu0 %v16316_v50 }
 0x5fe   :  { %19129 = vrot.lane.b32.xlu0 %v36053_v18, %s32558_s17  ;;  %16515 = vmatpush1.msra.mxu0 %v16315_v1 }
 0x5ff   :  { %v16295_v32 = vpop.permute.xlu1 %16294  ;;  %32209 = vmatmul.mubr.msk.f32.vlgmr.msra.gmra.mxu0 %vm117_vm1, %v36214_v38  ;;  %v16842_v47 = vpop.permute.xlu0 %16841 }
 0x600   :  { %v16318_v33 = vsel %vm16310_vm6, %v16295_v32, %v16297_v55  ;;  %v16317_v37 = vsel %vm16310_vm6, %v16293_v39, %v16295_v32  ;;  %16690 = vmatprep.mubr.f32.mxu0 %v39753_v14 }
 0x601   :  { %18568 = vrot.lane.b32.xlu1 %v36106_v23, %s32556_s15  ;;  %16585 = vmatprep.subr.mxu1 %v16318_v33 }
 0x602   :  { %19133 = vrot.lane.b32.xlu0 %v36076_v43, %s32558_s17  ;;  %16586 = vmatpush1.msra.mxu1 %v16317_v37 }
 0x603   :  { %v16299_v30 = vpop.permute.xlu1 %16298  ;;  %32210 = vmatmul.mubr.msk.f32.vlgmr.msra.gmra.mxu1 %vm117_vm1, %v36214_v38  ;;  %v16846_v60 = vpop.permute.xlu0 %16845 }
 0x604   :  { %v16320_v13 = vsel %vm16310_vm6, %v16299_v30, %v16301_v61  ;;  %v16319_v2 = vsel %vm16310_vm6, %v16297_v55, %v16299_v30  ;;  %16761 = vmatprep.mubr.f32.mxu1 %v39753_v14 }
 0x605   :  { %18572 = vrot.lane.b32.xlu1 %v36113_v48, %s32556_s15  ;;  %16656 = vmatprep.subr.mxu0 %v16320_v13 }
 0x606   :  { %19135 = vrot.lane.b32.xlu0 %v36087_v54, %s32558_s17  ;;  %16657 = vmatpush1.msra.mxu0 %v16319_v2 }
 0x607   :  { %v16303_v34 = vpop.permute.xlu1 %16302  ;;  %32211 = vmatmul.mubr.msk.f32.vlgmr.msra.gmra.mxu0 %vm117_vm1, %v36214_v38  ;;  %v16850_v35 = vpop.permute.xlu0 %16849 }
 0x608   :  { %v16322_v42 = vsel %vm16310_vm6, %v16303_v34, %v16305_v25  ;;  %v16321_v51 = vsel %vm16310_vm6, %v16301_v61, %v16303_v34  ;;  %16832 = vmatprep.mubr.f32.mxu0 %v39753_v14  ;;  %v16870_v61 = vsel %vm16869_vm7, %v36024_v10, %v16842_v47 }
 0x609   :  { %18576 = vrot.lane.b32.xlu1 %v36120_v57, %s32556_s15  ;;  %16727 = vmatprep.subr.mxu1 %v16322_v42 }
 0x60a   :  { %19139 = vrot.lane.b32.xlu0 %v36098_v24, %s32558_s17  ;;  %16728 = vmatpush1.msra.mxu1 %v16321_v51 }
 0x60b   :  { %v16307_v0 = vpop.permute.xlu1 %16306  ;;  %32212 = vmatmul.mubr.msk.f32.vlgmr.msra.gmra.mxu1 %vm117_vm1, %v36214_v38  ;;  %v16854_v17 = vpop.permute.xlu0 %16853 }
 0x60c   :  { %v16324_v39 = vsel %vm16310_vm6, %v16307_v0, %v16309_v40  ;;  %v16323_v46 = vsel %vm16310_vm6, %v16305_v25, %v16307_v0  ;;  %16965 = vmatprep.mubr.f32.mxu1 %v39753_v14  ;;  %vm20880_vm6 = vcmask 728064  }
 0x60d   :  { %19127 = vrot.lane.b32.xlu1 %v36041_v56, %s32558_s17  ;;  %16798 = vmatprep.subr.mxu0 %v16324_v39 }
 0x60e   :  { %19143 = vrot.lane.b32.xlu0 %v36106_v23, %s32558_s17  ;;  %16799 = vmatpush1.msra.mxu0 %v16323_v46 }
 0x60f   :  { %v16844_v55 = vpop.permute.xlu1 %16843  ;;  %32213 = vmatmul.mubr.msk.f32.vlgmr.msra.gmra.mxu0 %vm117_vm1, %v36214_v38  ;;  %v16858_v36 = vpop.permute.xlu0 %16857 }
 0x610   :  { %v16871_v9 = vsel %vm16869_vm7, %v16842_v47, %v16844_v55  ;;  %17036 = vmatprep.mubr.f32.mxu0 %v39753_v14  ;;  %v16872_v59 = vsel %vm16869_vm7, %v16844_v55, %v16846_v60 }
 0x611   :  { %19131 = vrot.lane.b32.xlu1 %v36065_v44, %s32558_s17  ;;  %16931 = vmatprep.subr.mxu1 %v16871_v9 }
 0x612   :  { %19147 = vrot.lane.b32.xlu0 %v36113_v48, %s32558_s17  ;;  %16932 = vmatpush1.msra.mxu1 %v16870_v61 }
 0x613   :  { %v16848_v38 = vpop.permute.xlu1 %16847  ;;  %32214 = vmatmul.mubr.msk.f32.vlgmr.msra.gmra.mxu1 %vm117_vm1, %v36286_v11  ;;  %v16862_v52 = vpop.permute.xlu0 %16861 }
 0x614   :  { %v16873_v25 = vsel %vm16869_vm7, %v16846_v60, %v16848_v38  ;;  %17107 = vmatprep.mubr.f32.mxu1 %v39753_v14  ;;  %v16874_v40 = vsel %vm16869_vm7, %v16848_v38, %v16850_v35 }
 0x615   :  { %19137 = vrot.lane.b32.xlu1 %v36044_v19, %s32558_s17  ;;  %17002 = vmatprep.subr.mxu0 %v16873_v25 }
 0x616   :  { %19151 = vrot.lane.b32.xlu0 %v36120_v57, %s32558_s17  ;;  %17003 = vmatpush1.msra.mxu0 %v16872_v59 }
 0x617   :  { %v16852_v10 = vpop.permute.xlu1 %16851  ;;  %32215 = vmatmul.mubr.msk.f32.vlgmr.msra.gmra.mxu0 %vm117_vm1, %v36286_v11  ;;  %v16866_v7 = vpop.permute.xlu0 %16865 }
 0x618   :  { %v16875_v28 = vsel %vm16869_vm7, %v16850_v35, %v16852_v10  ;;  %17178 = vmatprep.mubr.f32.mxu0 %v39753_v14  ;;  %v16876_v47 = vsel %vm16869_vm7, %v16852_v10, %v16854_v17 }
 0x619   :  { %19141 = vrot.lane.b32.xlu1 %v36056_v22, %s32558_s17  ;;  %17073 = vmatprep.subr.mxu1 %v16875_v28 }
 0x61a   :  { %19702 = vrot.lane.b32.xlu0 %v36041_v56, %s32559_s9  ;;  %17074 = vmatpush1.msra.mxu1 %v16874_v40 }
 0x61b   :  { %v16856_v50 = vpop.permute.xlu1 %16855  ;;  %32216 = vmatmul.mubr.msk.f32.vlgmr.msra.gmra.mxu1 %vm117_vm1, %v36286_v11  ;;  %v17403_v1 = vpop.permute.xlu0 %17402 }
 0x61c   :  { %v16877_v32 = vsel %vm16869_vm7, %v16854_v17, %v16856_v50  ;;  %17249 = vmatprep.mubr.f32.mxu1 %v39753_v14  ;;  %v16878_v60 = vsel %vm16869_vm7, %v16856_v50, %v16858_v36  ;;  %v17431_v9 = vsel %vm17430_vm8, %v36026_v16, %v17403_v1 }
 0x61d   :  { %19145 = vrot.lane.b32.xlu1 %v36068_v12, %s32558_s17  ;;  %17144 = vmatprep.subr.mxu0 %v16877_v32 }
 0x61e   :  { %19700 = vrot.lane.b32.xlu0 %v39753_v14, %s32559_s9  ;;  %17145 = vmatpush1.msra.mxu0 %v16876_v47 }
 0x61f   :  { %v16860_v33 = vpop.permute.xlu1 %16859  ;;  %32217 = vmatmul.mubr.msk.f32.vlgmr.msra.gmra.mxu0 %vm117_vm1, %v36286_v11  ;;  %v17409_v37 = vpop.permute.xlu0 %17408 }
 0x620   :  { %v16879_v30 = vsel %vm16869_vm7, %v16858_v36, %v16860_v33  ;;  %17320 = vmatprep.mubr.f32.mxu0 %v39753_v14  ;;  %v16880_v35 = vsel %vm16869_vm7, %v16860_v33, %v16862_v52  ;;  %v36355_v36 = vld [vmem:[%s39387_s3 + $0x10] sm:$0xff] }
 0x621   :  { %19149 = vrot.lane.b32.xlu1 %v36079_v53, %s32558_s17  ;;  %17215 = vmatprep.subr.mxu1 %v16879_v30 }
 0x622   :  { %19708 = vrot.lane.b32.xlu0 %v36076_v43, %s32559_s9  ;;  %17216 = vmatpush1.msra.mxu1 %v16878_v60 }
 0x623   :  { %v16864_v13 = vpop.permute.xlu1 %16863  ;;  %32218 = vmatmul.mubr.msk.f32.vlgmr.msra.gmra.mxu1 %vm117_vm1, %v36286_v11  ;;  %v17413_v2 = vpop.permute.xlu0 %17412 }
 0x624   :  { %v16881_v34 = vsel %vm16869_vm7, %v16862_v52, %v16864_v13  ;;  %17391 = vmatprep.mubr.f32.mxu1 %v39753_v14  ;;  %v16882_v17 = vsel %vm16869_vm7, %v16864_v13, %v16866_v7 }
 0x625   :  { %19153 = vrot.lane.b32.xlu1 %v36090_v41, %s32558_s17  ;;  %17286 = vmatprep.subr.mxu0 %v16881_v34  ;;  %s32563_s17 = smov 10  }
 0x626   :  { %19712 = vrot.lane.b32.xlu0 %v36044_v19, %s32559_s9  ;;  %17287 = vmatpush1.msra.mxu0 %v16880_v35 }
 0x627   :  { %v16868_v42 = vpop.permute.xlu1 %16867  ;;  %32219 = vmatmul.mubr.msk.f32.vlgmr.msra.gmra.mxu0 %vm117_vm1, %v36286_v11  ;;  %v17417_v51 = vpop.permute.xlu0 %17416 }
 0x628   :  { %v16883_v0 = vsel %vm16869_vm7, %v16866_v7, %v16868_v42  ;;  %17526 = vmatprep.mubr.f32.mxu0 %v39753_v14  ;;  %vm21455_vm7 = vcmask 89088  }
 0x629   :  { %19704 = vrot.lane.b32.xlu1 %v36053_v18, %s32559_s9  ;;  %17357 = vmatprep.subr.mxu1 %v16883_v0 }
 0x62a   :  { %19716 = vrot.lane.b32.xlu0 %v36056_v22, %s32559_s9  ;;  %17358 = vmatpush1.msra.mxu1 %v16882_v17 }
 0x62b   :  { %v17405_v39 = vpop.permute.xlu1 %17404  ;;  %32220 = vmatmul.mubr.msk.f32.vlgmr.msra.gmra.mxu1 %vm117_vm1, %v36286_v11  ;;  %v17421_v46 = vpop.permute.xlu0 %17420 }
 0x62c   :  { %v17432_v55 = vsel %vm17430_vm8, %v17403_v1, %v17405_v39  ;;  %17597 = vmatprep.mubr.f32.mxu1 %v39753_v14 }
 0x62d   :  { %19706 = vrot.lane.b32.xlu1 %v36065_v44, %s32559_s9  ;;  %17492 = vmatprep.subr.mxu0 %v17432_v55 }
 0x62e   :  { %19720 = vrot.lane.b32.xlu0 %v36068_v12, %s32559_s9  ;;  %17493 = vmatpush1.msra.mxu0 %v17431_v9 }
 0x62f   :  { %v17407_v11 = vpop.permute.xlu1 %17406  ;;  %32222 = vmatmul.mubr.msk.f32.vlgmr.msra.gmra.mxu0 %vm117_vm1, %v36355_v36  ;;  %v17425_v61 = vpop.permute.xlu0 %17424 }
 0x630   :  { %v17434_v38 = vsel %vm17430_vm8, %v17407_v11, %v17409_v37  ;;  %v17433_v52 = vsel %vm17430_vm8, %v17405_v39, %v17407_v11  ;;  %17668 = vmatprep.mubr.f32.mxu0 %v39753_v14 }
 0x631   :  { %19710 = vrot.lane.b32.xlu1 %v36087_v54, %s32559_s9  ;;  %17563 = vmatprep.subr.mxu1 %v17434_v38 }
 0x632   :  { %19724 = vrot.lane.b32.xlu0 %v36079_v53, %s32559_s9  ;;  %17564 = vmatpush1.msra.mxu1 %v17433_v52 }
 0x633   :  { %v17411_v16 = vpop.permute.xlu1 %17410  ;;  %32223 = vmatmul.mubr.msk.f32.vlgmr.msra.gmra.mxu1 %vm117_vm1, %v36355_v36  ;;  %v17429_v25 = vpop.permute.xlu0 %17428 }
 0x634   :  { %v17436_v59 = vsel %vm17430_vm8, %v17411_v16, %v17413_v2  ;;  %v17435_v10 = vsel %vm17430_vm8, %v17409_v37, %v17411_v16  ;;  %17739 = vmatprep.mubr.f32.mxu1 %v39753_v14 }
 0x635   :  { %19714 = vrot.lane.b32.xlu1 %v36098_v24, %s32559_s9  ;;  %17634 = vmatprep.subr.mxu0 %v17436_v59 }
 0x636   :  { %19728 = vrot.lane.b32.xlu0 %v36090_v41, %s32559_s9  ;;  %17635 = vmatpush1.msra.mxu0 %v17435_v10 }
 0x637   :  { %v17415_v7 = vpop.permute.xlu1 %17414  ;;  %32224 = vmatmul.mubr.msk.f32.vlgmr.msra.gmra.mxu0 %vm117_vm1, %v36355_v36  ;;  %v17980_v28 = vpop.permute.xlu0 %17979 }
 0x638   :  { %v17438_v40 = vsel %vm17430_vm8, %v17415_v7, %v17417_v51  ;;  %v17437_v50 = vsel %vm17430_vm8, %v17413_v2, %v17415_v7  ;;  %17810 = vmatprep.mubr.f32.mxu0 %v39753_v14 }
 0x639   :  { %19718 = vrot.lane.b32.xlu1 %v36106_v23, %s32559_s9  ;;  %17705 = vmatprep.subr.mxu1 %v17438_v40 }
 0x63a   :  { %20279 = vrot.lane.b32.xlu0 %v36053_v18, %s32560_s4  ;;  %17706 = vmatpush1.msra.mxu1 %v17437_v50 }
 0x63b   :  { %v17419_v1 = vpop.permute.xlu1 %17418  ;;  %32225 = vmatmul.mubr.msk.f32.vlgmr.msra.gmra.mxu1 %vm117_vm1, %v36355_v36  ;;  %v17984_v32 = vpop.permute.xlu0 %17983 }
 0x63c   :  { %v17440_v47 = vsel %vm17430_vm8, %v17419_v1, %v17421_v46  ;;  %v17439_v33 = vsel %vm17430_vm8, %v17417_v51, %v17419_v1  ;;  %17881 = vmatprep.mubr.f32.mxu1 %v39753_v14 }
 0x63d   :  { %19722 = vrot.lane.b32.xlu1 %v36113_v48, %s32559_s9  ;;  %17776 = vmatprep.subr.mxu0 %v17440_v47 }
 0x63e   :  { %20283 = vrot.lane.b32.xlu0 %v36076_v43, %s32560_s4  ;;  %17777 = vmatpush1.msra.mxu0 %v17439_v33 }
 0x63f   :  { %v17423_v37 = vpop.permute.xlu1 %17422  ;;  %32226 = vmatmul.mubr.msk.f32.vlgmr.msra.gmra.mxu0 %vm117_vm1, %v36355_v36  ;;  %v17986_v30 = vpop.permute.xlu0 %17985 }
 0x640   :  { %v17442_v60 = vsel %vm17430_vm8, %v17423_v37, %v17425_v61  ;;  %v17441_v13 = vsel %vm17430_vm8, %v17421_v46, %v17423_v37  ;;  %17952 = vmatprep.mubr.f32.mxu0 %v39753_v14  ;;  %v36426_v46 = vld [vmem:[%s39387_s3 + $0x18] sm:$0xff]  ;;  %v18010_v52 = vsel %vm18005_vm11, %v17984_v32, %v17986_v30 }
 0x641   :  { %19726 = vrot.lane.b32.xlu1 %v36120_v57, %s32559_s9  ;;  %17847 = vmatprep.subr.mxu1 %v17442_v60 }
 0x642   :  { %20285 = vrot.lane.b32.xlu0 %v36087_v54, %s32560_s4  ;;  %17848 = vmatpush1.msra.mxu1 %v17441_v13 }
 0x643   :  { %v17427_v2 = vpop.permute.xlu1 %17426  ;;  %32227 = vmatmul.mubr.msk.f32.vlgmr.msra.gmra.mxu1 %vm117_vm1, %v36355_v36  ;;  %v17990_v34 = vpop.permute.xlu0 %17989 }
 0x644   :  { %v17444_v35 = vsel %vm17430_vm8, %v17427_v2, %v17429_v25  ;;  %v17443_v42 = vsel %vm17430_vm8, %v17425_v61, %v17427_v2  ;;  %18101 = vmatprep.mubr.f32.mxu1 %v39753_v14  ;;  %vm22030_vm8 = vcmask 80896  }
 0x645   :  { %20277 = vrot.lane.b32.xlu1 %v36041_v56, %s32560_s4  ;;  %17918 = vmatprep.subr.mxu0 %v17444_v35 }
 0x646   :  { %20289 = vrot.lane.b32.xlu0 %v36098_v24, %s32560_s4  ;;  %17919 = vmatpush1.msra.mxu0 %v17443_v42  ;;  %v36493_v42 = vld [vmem:[%s39387_s3 + $0x20] sm:$0xff] }
 0x647   :  { %v17978_v51 = vpop.permute.xlu1 %17977  ;;  %32228 = vmatmul.mubr.msk.f32.vlgmr.msra.gmra.mxu0 %vm117_vm1, %v36355_v36  ;;  %v17994_v0 = vpop.permute.xlu0 %17993 }
 0x648   :  { %v18007_v17 = vsel %vm18005_vm11, %v17978_v51, %v17980_v28  ;;  %v18006_v39 = vsel %vm18005_vm11, %v36028_v3, %v17978_v51  ;;  %18172 = vmatprep.mubr.f32.mxu0 %v39753_v14 }
 0x649   :  { %20281 = vrot.lane.b32.xlu1 %v36065_v44, %s32560_s4  ;;  %18067 = vmatprep.subr.mxu1 %v18007_v17 }
 0x64a   :  { %20293 = vrot.lane.b32.xlu0 %v36106_v23, %s32560_s4  ;;  %18068 = vmatpush1.msra.mxu1 %v18006_v39 }
 0x64b   :  { %v17982_v55 = vpop.permute.xlu1 %17981  ;;  %32230 = vmatmul.mubr.msk.f32.vlgmr.msra.gmra.mxu1 %vm117_vm1, %v36426_v46  ;;  %v17998_v3 = vpop.permute.xlu0 %17997 }
 0x64c   :  { %v18009_v36 = vsel %vm18005_vm11, %v17982_v55, %v17984_v32  ;;  %v18008_v9 = vsel %vm18005_vm11, %v17980_v28, %v17982_v55  ;;  %18243 = vmatprep.mubr.f32.mxu1 %v39753_v14 }
 0x64d   :  { %20275 = vrot.lane.b32.xlu1 %v39753_v14, %s32560_s4  ;;  %18138 = vmatprep.subr.mxu0 %v18009_v36 }
 0x64e   :  { %20297 = vrot.lane.b32.xlu0 %v36113_v48, %s32560_s4  ;;  %18139 = vmatpush1.msra.mxu0 %v18008_v9 }
 0x64f   :  { %v17988_v11 = vpop.permute.xlu1 %17987  ;;  %32231 = vmatmul.mubr.msk.f32.vlgmr.msra.gmra.mxu0 %vm117_vm1, %v36426_v46  ;;  %v18002_v61 = vpop.permute.xlu0 %18001 }
 0x650   :  { %v18011_v38 = vsel %vm18005_vm11, %v17986_v30, %v17988_v11  ;;  %18314 = vmatprep.mubr.f32.mxu0 %v39753_v14  ;;  %v18012_v10 = vsel %vm18005_vm11, %v17988_v11, %v17990_v34 }
 0x651   :  { %20287 = vrot.lane.b32.xlu1 %v36044_v19, %s32560_s4  ;;  %18209 = vmatprep.subr.mxu1 %v18011_v38 }
 0x652   :  { %20301 = vrot.lane.b32.xlu0 %v36120_v57, %s32560_s4  ;;  %18210 = vmatpush1.msra.mxu1 %v18010_v52 }
 0x653   :  { %v17992_v16 = vpop.permute.xlu1 %17991  ;;  %32232 = vmatmul.mubr.msk.f32.vlgmr.msra.gmra.mxu1 %vm117_vm1, %v36426_v46  ;;  %v18553_v25 = vpop.permute.xlu0 %18552 }
 0x654   :  { %v18013_v59 = vsel %vm18005_vm11, %v17990_v34, %v17992_v16  ;;  %18385 = vmatprep.mubr.f32.mxu1 %v39753_v14  ;;  %v18014_v50 = vsel %vm18005_vm11, %v17992_v16, %v17994_v0  ;;  %v18581_v51 = vsel %vm18580_vm14, %v36030_v15, %v18553_v25 }
 0x655   :  { %20291 = vrot.lane.b32.xlu1 %v36056_v22, %s32560_s4  ;;  %18280 = vmatprep.subr.mxu0 %v18013_v59 }
 0x656   :  { %20852 = vrot.lane.b32.xlu0 %v36041_v56, %s32561_s13  ;;  %18281 = vmatpush1.msra.mxu0 %v18012_v10 }
 0x657   :  { %v17996_v7 = vpop.permute.xlu1 %17995  ;;  %32233 = vmatmul.mubr.msk.f32.vlgmr.msra.gmra.mxu0 %vm117_vm1, %v36426_v46  ;;  %v18559_v28 = vpop.permute.xlu0 %18558 }
 0x658   :  { %v18015_v40 = vsel %vm18005_vm11, %v17994_v0, %v17996_v7  ;;  %18456 = vmatprep.mubr.f32.mxu0 %v39753_v14  ;;  %v18016_v33 = vsel %vm18005_vm11, %v17996_v7, %v17998_v3 }
 0x659   :  { %20295 = vrot.lane.b32.xlu1 %v36068_v12, %s32560_s4  ;;  %18351 = vmatprep.subr.mxu1 %v18015_v40 }
 0x65a   :  { %20850 = vrot.lane.b32.xlu0 %v39753_v14, %s32561_s13  ;;  %18352 = vmatpush1.msra.mxu1 %v18014_v50 }
 0x65b   :  { %v18000_v1 = vpop.permute.xlu1 %17999  ;;  %32234 = vmatmul.mubr.msk.f32.vlgmr.msra.gmra.mxu1 %vm117_vm1, %v36426_v46  ;;  %v18563_v32 = vpop.permute.xlu0 %18562 }
 0x65c   :  { %v18017_v47 = vsel %vm18005_vm11, %v17998_v3, %v18000_v1  ;;  %18527 = vmatprep.mubr.f32.mxu1 %v39753_v14  ;;  %v18018_v13 = vsel %vm18005_vm11, %v18000_v1, %v18002_v61 }
 0x65d   :  { %20299 = vrot.lane.b32.xlu1 %v36079_v53, %s32560_s4  ;;  %18422 = vmatprep.subr.mxu0 %v18017_v47 }
 0x65e   :  { %20858 = vrot.lane.b32.xlu0 %v36076_v43, %s32561_s13  ;;  %18423 = vmatpush1.msra.mxu0 %v18016_v33 }
 0x65f   :  { %v18004_v37 = vpop.permute.xlu1 %18003  ;;  %32235 = vmatmul.mubr.msk.f32.vlgmr.msra.gmra.mxu0 %vm117_vm1, %v36426_v46  ;;  %v18567_v30 = vpop.permute.xlu0 %18566 }
 0x660   :  { %v18019_v60 = vsel %vm18005_vm11, %v18002_v61, %v18004_v37  ;;  %18676 = vmatprep.mubr.f32.mxu0 %v39753_v14  ;;  %vm22605_vm11 = vcmask 72704  }
 0x661   :  { %20303 = vrot.lane.b32.xlu1 %v36090_v41, %s32560_s4  ;;  %18493 = vmatprep.subr.mxu1 %v18019_v60 }
 0x662   :  { %20862 = vrot.lane.b32.xlu0 %v36044_v19, %s32561_s13  ;;  %18494 = vmatpush1.msra.mxu1 %v18018_v13  ;;  %v36564_v13 = vld [vmem:[%s39387_s3 + $0x28] sm:$0xff] }
 0x663   :  { %v18555_v2 = vpop.permute.xlu1 %18554  ;;  %32236 = vmatmul.mubr.msk.f32.vlgmr.msra.gmra.mxu1 %vm117_vm1, %v36426_v46 }
 0x664   :  { %v18571_v34 = vpop.permute.xlu0 %18570  ;;  %v18582_v35 = vsel %vm18580_vm14, %v18553_v25, %v18555_v2  ;;  %18747 = vmatprep.mubr.f32.mxu1 %v39753_v14 }
 0x665   :  { %20854 = vrot.lane.b32.xlu1 %v36053_v18, %s32561_s13  ;;  %18642 = vmatprep.subr.mxu0 %v18582_v35 }
 0x666   :  { %20866 = vrot.lane.b32.xlu0 %v36056_v22, %s32561_s13  ;;  %18643 = vmatpush1.msra.mxu0 %v18581_v51 }
 0x667   :  { %v18557_v0 = vpop.permute.xlu1 %18556  ;;  %32238 = vmatmul.mubr.msk.f32.vlgmr.msra.gmra.mxu0 %vm117_vm1, %v36493_v42 }
 0x668   :  { %v18575_v17 = vpop.permute.xlu0 %18574  ;;  %v18584_v39 = vsel %vm18580_vm14, %v18557_v0, %v18559_v28  ;;  %v18583_v46 = vsel %vm18580_vm14, %v18555_v2, %v18557_v0  ;;  %18818 = vmatprep.mubr.f32.mxu0 %v39753_v14 }
 0x669   :  { %20856 = vrot.lane.b32.xlu1 %v36065_v44, %s32561_s13  ;;  %18713 = vmatprep.subr.mxu1 %v18584_v39 }
 0x66a   :  { %20870 = vrot.lane.b32.xlu0 %v36068_v12, %s32561_s13  ;;  %18714 = vmatpush1.msra.mxu1 %v18583_v46 }
 0x66b   :  { %v18561_v15 = vpop.permute.xlu1 %18560  ;;  %32239 = vmatmul.mubr.msk.f32.vlgmr.msra.gmra.mxu1 %vm117_vm1, %v36493_v42 }
 0x66c   :  { %v18579_v55 = vpop.permute.xlu0 %18578  ;;  %v18586_v3 = vsel %vm18580_vm14, %v18561_v15, %v18563_v32  ;;  %v18585_v36 = vsel %vm18580_vm14, %v18559_v28, %v18561_v15  ;;  %18889 = vmatprep.mubr.f32.mxu1 %v39753_v14 }
 0x66d   :  { %20860 = vrot.lane.b32.xlu1 %v36087_v54, %s32561_s13  ;;  %18784 = vmatprep.subr.mxu0 %v18586_v3 }
 0x66e   :  { %20874 = vrot.lane.b32.xlu0 %v36079_v53, %s32561_s13  ;;  %18785 = vmatpush1.msra.mxu0 %v18585_v36 }
 0x66f   :  { %v18565_v9 = vpop.permute.xlu1 %18564  ;;  %32240 = vmatmul.mubr.msk.f32.vlgmr.msra.gmra.mxu0 %vm117_vm1, %v36493_v42 }
 0x670   :  { %v19130_v11 = vpop.permute.xlu0 %19129  ;;  %v18588_v61 = vsel %vm18580_vm14, %v18565_v9, %v18567_v30  ;;  %v18587_v38 = vsel %vm18580_vm14, %v18563_v32, %v18565_v9  ;;  %18960 = vmatprep.mubr.f32.mxu0 %v39753_v14 }
 0x671   :  { %20864 = vrot.lane.b32.xlu1 %v36098_v24, %s32561_s13  ;;  %18855 = vmatprep.subr.mxu1 %v18588_v61 }
 0x672   :  { %20878 = vrot.lane.b32.xlu0 %v36090_v41, %s32561_s13  ;;  %18856 = vmatpush1.msra.mxu1 %v18587_v38 }
 0x673   :  { %v18569_v52 = vpop.permute.xlu1 %18568  ;;  %32241 = vmatmul.mubr.msk.f32.vlgmr.msra.gmra.mxu1 %vm117_vm1, %v36493_v42 }
 0x674   :  { %v19134_v16 = vpop.permute.xlu0 %19133  ;;  %v18590_v25 = vsel %vm18580_vm14, %v18569_v52, %v18571_v34  ;;  %v18589_v59 = vsel %vm18580_vm14, %v18567_v30, %v18569_v52  ;;  %19031 = vmatprep.mubr.f32.mxu1 %v39753_v14 }
 0x675   :  { %20868 = vrot.lane.b32.xlu1 %v36106_v23, %s32561_s13  ;;  %18926 = vmatprep.subr.mxu0 %v18590_v25 }
 0x676   :  { %21429 = vrot.lane.b32.xlu0 %v36053_v18, %s32562_s18  ;;  %18927 = vmatpush1.msra.mxu0 %v18589_v59 }
 0x677   :  { %v18573_v10 = vpop.permute.xlu1 %18572  ;;  %32242 = vmatmul.mubr.msk.f32.vlgmr.msra.gmra.mxu0 %vm117_vm1, %v36493_v42 }
 0x678   :  { %v19136_v7 = vpop.permute.xlu0 %19135  ;;  %v18592_v28 = vsel %vm18580_vm14, %v18573_v10, %v18575_v17  ;;  %v18591_v40 = vsel %vm18580_vm14, %v18571_v34, %v18573_v10  ;;  %19102 = vmatprep.mubr.f32.mxu0 %v39753_v14 }
 0x679   :  { %20872 = vrot.lane.b32.xlu1 %v36113_v48, %s32561_s13  ;;  %18997 = vmatprep.subr.mxu1 %v18592_v28 }
 0x67a   :  { %21433 = vrot.lane.b32.xlu0 %v36076_v43, %s32562_s18  ;;  %18998 = vmatpush1.msra.mxu1 %v18591_v40 }
 0x67b   :  { %v18577_v50 = vpop.permute.xlu1 %18576  ;;  %32243 = vmatmul.mubr.msk.f32.vlgmr.msra.gmra.mxu1 %vm117_vm1, %v36493_v42 }
 0x67c   :  { %v19140_v1 = vpop.permute.xlu0 %19139  ;;  %v18594_v32 = vsel %vm18580_vm14, %v18577_v50, %v18579_v55  ;;  %v18593_v47 = vsel %vm18580_vm14, %v18575_v17, %v18577_v50  ;;  %19251 = vmatprep.mubr.f32.mxu1 %v39753_v14  ;;  %v19160_v17 = vsel %vm19155_vm15, %v19134_v16, %v19136_v7  ;;  %vm23180_vm14 = vcmask 7168  }
 0x67d   :  { %20876 = vrot.lane.b32.xlu1 %v36120_v57, %s32561_s13  ;;  %19068 = vmatprep.subr.mxu0 %v18594_v32 }
 0x67e   :  { %21435 = vrot.lane.b32.xlu0 %v36087_v54, %s32562_s18  ;;  %19069 = vmatpush1.msra.mxu0 %v18593_v47 }
 0x67f   :  { %v19128_v33 = vpop.permute.xlu1 %19127  ;;  %32244 = vmatmul.mubr.msk.f32.vlgmr.msra.gmra.mxu0 %vm117_vm1, %v36493_v42 }
 0x680   :  { %v19144_v37 = vpop.permute.xlu0 %19143  ;;  %v19157_v30 = vsel %vm19155_vm15, %v19128_v33, %v19130_v11  ;;  %v19156_v60 = vsel %vm19155_vm15, %v36032_v20, %v19128_v33  ;;  %19322 = vmatprep.mubr.f32.mxu0 %v39753_v14 }
 0x681   :  { %21427 = vrot.lane.b32.xlu1 %v36041_v56, %s32562_s18  ;;  %19217 = vmatprep.subr.mxu1 %v19157_v30 }
 0x682   :  { %21439 = vrot.lane.b32.xlu0 %v36098_v24, %s32562_s18  ;;  %19218 = vmatpush1.msra.mxu1 %v19156_v60 }
 0x683   :  { %v19132_v2 = vpop.permute.xlu1 %19131  ;;  %32246 = vmatmul.mubr.msk.f32.vlgmr.msra.gmra.mxu1 %vm117_vm1, %v36564_v13 }
 0x684   :  { %v19148_v20 = vpop.permute.xlu0 %19147  ;;  %v19159_v34 = vsel %vm19155_vm15, %v19132_v2, %v19134_v16  ;;  %v19158_v35 = vsel %vm19155_vm15, %v19130_v11, %v19132_v2  ;;  %19393 = vmatprep.mubr.f32.mxu1 %v39753_v14 }
 0x685   :  { %21431 = vrot.lane.b32.xlu1 %v36065_v44, %s32562_s18  ;;  %19288 = vmatprep.subr.mxu0 %v19159_v34 }
 0x686   :  { %21443 = vrot.lane.b32.xlu0 %v36106_v23, %s32562_s18  ;;  %19289 = vmatpush1.msra.mxu0 %v19158_v35 }
 0x687   :  { %v19138_v42 = vpop.permute.xlu1 %19137  ;;  %32247 = vmatmul.mubr.msk.f32.vlgmr.msra.gmra.mxu0 %vm117_vm1, %v36564_v13 }
 0x688   :  { %v19152_v51 = vpop.permute.xlu0 %19151  ;;  %v19161_v0 = vsel %vm19155_vm15, %v19136_v7, %v19138_v42  ;;  %19464 = vmatprep.mubr.f32.mxu0 %v39753_v14  ;;  %v19162_v55 = vsel %vm19155_vm15, %v19138_v42, %v19140_v1 }
 0x689   :  { %21425 = vrot.lane.b32.xlu1 %v39753_v14, %s32562_s18  ;;  %19359 = vmatprep.subr.mxu1 %v19161_v0 }
 0x68a   :  { %21447 = vrot.lane.b32.xlu0 %v36113_v48, %s32562_s18  ;;  %19360 = vmatpush1.msra.mxu1 %v19160_v17 }
 0x68b   :  { %v19142_v39 = vpop.permute.xlu1 %19141  ;;  %32248 = vmatmul.mubr.msk.f32.vlgmr.msra.gmra.mxu1 %vm117_vm1, %v36564_v13 }
 0x68c   :  { %v19703_v46 = vpop.permute.xlu0 %19702  ;;  %v19163_v15 = vsel %vm19155_vm15, %v19140_v1, %v19142_v39  ;;  %19535 = vmatprep.mubr.f32.mxu1 %v39753_v14  ;;  %v19164_v11 = vsel %vm19155_vm15, %v19142_v39, %v19144_v37  ;;  %v36631_v1 = vld [vmem:[%s39387_s3 + $0x30] sm:$0xff] }
 0x68d   :  { %21437 = vrot.lane.b32.xlu1 %v36044_v19, %s32562_s18  ;;  %19430 = vmatprep.subr.mxu0 %v19163_v15 }
 0x68e   :  { %21451 = vrot.lane.b32.xlu0 %v36120_v57, %s32562_s18  ;;  %19431 = vmatpush1.msra.mxu0 %v19162_v55 }
 0x68f   :  { %v19146_v3 = vpop.permute.xlu1 %19145  ;;  %32249 = vmatmul.mubr.msk.f32.vlgmr.msra.gmra.mxu0 %vm117_vm1, %v36564_v13 }
 0x690   :  { %v19701_v36 = vpop.permute.xlu0 %19700  ;;  %v19165_v9 = vsel %vm19155_vm15, %v19144_v37, %v19146_v3  ;;  %19606 = vmatprep.mubr.f32.mxu0 %v39753_v14  ;;  %v19166_v16 = vsel %vm19155_vm15, %v19146_v3, %v19148_v20 }
 0x691   :  { %21441 = vrot.lane.b32.xlu1 %v36056_v22, %s32562_s18  ;;  %19501 = vmatprep.subr.mxu1 %v19165_v9  ;;  %v19731_v32 = vsel %vm19730_vm2, %v19701_v36, %v19703_v46 }
 0x692   :  { %22002 = vrot.lane.b32.xlu0 %v36041_v56, %s32563_s17  ;;  %19502 = vmatpush1.msra.mxu1 %v19164_v11 }
 0x693   :  { %v19150_v61 = vpop.permute.xlu1 %19149  ;;  %32250 = vmatmul.mubr.msk.f32.vlgmr.msra.gmra.mxu1 %vm117_vm1, %v36564_v13 }
 0x694   :  { %v19709_v38 = vpop.permute.xlu0 %19708  ;;  %v19167_v52 = vsel %vm19155_vm15, %v19148_v20, %v19150_v61  ;;  %19677 = vmatprep.mubr.f32.mxu1 %v39753_v14  ;;  %v19168_v7 = vsel %vm19155_vm15, %v19150_v61, %v19152_v51 }
 0x695   :  { %21445 = vrot.lane.b32.xlu1 %v36068_v12, %s32562_s18  ;;  %19572 = vmatprep.subr.mxu0 %v19167_v52 }
 0x696   :  { %22000 = vrot.lane.b32.xlu0 %v39753_v14, %s32563_s17  ;;  %19573 = vmatpush1.msra.mxu0 %v19166_v16 }
 0x697   :  { %v19154_v25 = vpop.permute.xlu1 %19153  ;;  %32251 = vmatmul.mubr.msk.f32.vlgmr.msra.gmra.mxu0 %vm117_vm1, %v36564_v13 }
 0x698   :  { %v19713_v59 = vpop.permute.xlu0 %19712  ;;  %v19169_v10 = vsel %vm19155_vm15, %v19152_v51, %v19154_v25  ;;  %19826 = vmatprep.mubr.f32.mxu0 %v39753_v14  ;;  %vm24875_vm15 = vcmask 973824  }
 0x699   :  { %21449 = vrot.lane.b32.xlu1 %v36079_v53, %s32562_s18  ;;  %19643 = vmatprep.subr.mxu1 %v19169_v10 }
 0x69a   :  { %22008 = vrot.lane.b32.xlu0 %v36076_v43, %s32563_s17  ;;  %19644 = vmatpush1.msra.mxu1 %v19168_v7 }
 0x69b   :  { %v19705_v28 = vpop.permute.xlu1 %19704  ;;  %32252 = vmatmul.mubr.msk.f32.vlgmr.msra.gmra.mxu1 %vm117_vm1, %v36564_v13 }
 0x69c   :  { %v19717_v40 = vpop.permute.xlu0 %19716  ;;  %v19732_v50 = vsel %vm19730_vm2, %v19703_v46, %v19705_v28  ;;  %19897 = vmatprep.mubr.f32.mxu1 %v39753_v14 }
 0x69d   :  { %21453 = vrot.lane.b32.xlu1 %v36090_v41, %s32562_s18  ;;  %19792 = vmatprep.subr.mxu0 %v19732_v50 }
 0x69e   :  { %22012 = vrot.lane.b32.xlu0 %v36044_v19, %s32563_s17  ;;  %19793 = vmatpush1.msra.mxu0 %v19731_v32 }
 0x69f   :  { %v19707_v47 = vpop.permute.xlu1 %19706  ;;  %32254 = vmatmul.mubr.msk.f32.vlgmr.msra.gmra.mxu0 %vm117_vm1, %v36631_v1 }
 0x6a0   :  { %v19721_v33 = vpop.permute.xlu0 %19720  ;;  %v19734_v37 = vsel %vm19730_vm2, %v19707_v47, %v19709_v38  ;;  %v19733_v30 = vsel %vm19730_vm2, %v19705_v28, %v19707_v47  ;;  %19968 = vmatprep.mubr.f32.mxu0 %v39753_v14 }
 0x6a1   :  { %22004 = vrot.lane.b32.xlu1 %v36053_v18, %s32563_s17  ;;  %19863 = vmatprep.subr.mxu1 %v19734_v37 }
 0x6a2   :  { %22016 = vrot.lane.b32.xlu0 %v36056_v22, %s32563_s17  ;;  %19864 = vmatpush1.msra.mxu1 %v19733_v30 }
 0x6a3   :  { %v19711_v60 = vpop.permute.xlu1 %19710  ;;  %32255 = vmatmul.mubr.msk.f32.vlgmr.msra.gmra.mxu1 %vm117_vm1, %v36631_v1 }
 0x6a4   :  { %v19725_v13 = vpop.permute.xlu0 %19724  ;;  %v19736_v2 = vsel %vm19730_vm2, %v19711_v60, %v19713_v59  ;;  %v19735_v20 = vsel %vm19730_vm2, %v19709_v38, %v19711_v60  ;;  %20039 = vmatprep.mubr.f32.mxu1 %v39753_v14 }
 0x6a5   :  { %22006 = vrot.lane.b32.xlu1 %v36065_v44, %s32563_s17  ;;  %19934 = vmatprep.subr.mxu0 %v19736_v2 }
 0x6a6   :  { %22020 = vrot.lane.b32.xlu0 %v36068_v12, %s32563_s17  ;;  %19935 = vmatpush1.msra.mxu0 %v19735_v20 }
 0x6a7   :  { %v19715_v34 = vpop.permute.xlu1 %19714  ;;  %32256 = vmatmul.mubr.msk.f32.vlgmr.msra.gmra.mxu0 %vm117_vm1, %v36631_v1 }
 0x6a8   :  { %v19729_v35 = vpop.permute.xlu0 %19728  ;;  %v19738_v42 = vsel %vm19730_vm2, %v19715_v34, %v19717_v40  ;;  %v19737_v51 = vsel %vm19730_vm2, %v19713_v59, %v19715_v34  ;;  %20110 = vmatprep.mubr.f32.mxu0 %v39753_v14 }
 0x6a9   :  { %22010 = vrot.lane.b32.xlu1 %v36087_v54, %s32563_s17  ;;  %20005 = vmatprep.subr.mxu1 %v19738_v42 }
 0x6aa   :  { %22024 = vrot.lane.b32.xlu0 %v36079_v53, %s32563_s17  ;;  %20006 = vmatpush1.msra.mxu1 %v19737_v51 }
 0x6ab   :  { %v19719_v0 = vpop.permute.xlu1 %19718  ;;  %32257 = vmatmul.mubr.msk.f32.vlgmr.msra.gmra.mxu1 %vm117_vm1, %v36631_v1 }
 0x6ac   :  { %v20280_v17 = vpop.permute.xlu0 %20279  ;;  %v19740_v39 = vsel %vm19730_vm2, %v19719_v0, %v19721_v33  ;;  %v19739_v46 = vsel %vm19730_vm2, %v19717_v40, %v19719_v0  ;;  %20181 = vmatprep.mubr.f32.mxu1 %v39753_v14  ;;  %v32261_v40 = vld [vmem:[%s39387_s3 + $0x38] sm:$0xff] }
 0x6ad   :  { %22014 = vrot.lane.b32.xlu1 %v36098_v24, %s32563_s17  ;;  %20076 = vmatprep.subr.mxu0 %v19740_v39 }
 0x6ae   :  { %22028 = vrot.lane.b32.xlu0 %v36090_v41, %s32563_s17  ;;  %20077 = vmatpush1.msra.mxu0 %v19739_v46 }
 0x6af   :  { %v19723_v15 = vpop.permute.xlu1 %19722  ;;  %32258 = vmatmul.mubr.msk.f32.vlgmr.msra.gmra.mxu0 %vm117_vm1, %v36631_v1 }
 0x6b0   :  { %v20284_v55 = vpop.permute.xlu0 %20283  ;;  %v19742_v3 = vsel %vm19730_vm2, %v19723_v15, %v19725_v13  ;;  %v19741_v36 = vsel %vm19730_vm2, %v19721_v33, %v19723_v15  ;;  %20252 = vmatprep.mubr.f32.mxu0 %v39753_v14 }
 0x6b1   :  { %22018 = vrot.lane.b32.xlu1 %v36106_v23, %s32563_s17  ;;  %20147 = vmatprep.subr.mxu1 %v19742_v3 }
 0x6b2   :  { %22579 = vrot.lane.b32.xlu0 %v36053_v18, %s32564_s22  ;;  %20148 = vmatpush1.msra.mxu1 %v19741_v36 }
 0x6b3   :  { %v19727_v9 = vpop.permute.xlu1 %19726  ;;  %32259 = vmatmul.mubr.msk.f32.vlgmr.msra.gmra.mxu1 %vm117_vm1, %v36631_v1 }
 0x6b4   :  { %v20286_v11 = vpop.permute.xlu0 %20285  ;;  %v19744_v61 = vsel %vm19730_vm2, %v19727_v9, %v19729_v35  ;;  %v19743_v38 = vsel %vm19730_vm2, %v19725_v13, %v19727_v9  ;;  %20401 = vmatprep.mubr.f32.mxu1 %v39753_v14  ;;  %vm28323_vm2 = vcmask 236544  }
 0x6b5   :  { %22022 = vrot.lane.b32.xlu1 %v36113_v48, %s32563_s17  ;;  %20218 = vmatprep.subr.mxu0 %v19744_v61  ;;  %v20310_v30 = vsel %vm20305_vm5, %v20284_v55, %v20286_v11 }
 0x6b6   :  { %22583 = vrot.lane.b32.xlu0 %v36076_v43, %s32564_s22  ;;  %20219 = vmatpush1.msra.mxu0 %v19743_v38  ;;  %v36762_v38 = vld [vmem:[%s39387_s3 + $0x40] sm:$0xff] }
 0x6b7   :  { %v20278_v52 = vpop.permute.xlu1 %20277  ;;  %32260 = vmatmul.mubr.msk.f32.vlgmr.msra.gmra.mxu0 %vm117_vm1, %v36631_v1 }
 0x6b8   :  { %v20290_v16 = vpop.permute.xlu0 %20289  ;;  %v20307_v25 = vsel %vm20305_vm5, %v20278_v52, %v20280_v17  ;;  %20472 = vmatprep.mubr.f32.mxu0 %v39753_v14 }
 0x6b9   :  { %22026 = vrot.lane.b32.xlu1 %v36120_v57, %s32563_s17  ;;  %20367 = vmatprep.subr.mxu1 %v20307_v25 }
 0x6ba   :  { %22585 = vrot.lane.b32.xlu0 %v36087_v54, %s32564_s22 }
 0x6bb   :  { %v20282_v59 = vpop.permute.xlu1 %20281 }
 0x6bc   :  { %v20294_v10 = vpop.permute.xlu0 %20293  ;;  %v20309_v7 = vsel %vm20305_vm5, %v20282_v59, %v20284_v55  ;;  %v20308_v28 = vsel %vm20305_vm5, %v20280_v17, %v20282_v59 }
 0x6bd   :  { %22577 = vrot.lane.b32.xlu1 %v36041_v56, %s32564_s22  ;;  %20438 = vmatprep.subr.mxu0 %v20309_v7 }
 0x6be   :  { %22589 = vrot.lane.b32.xlu0 %v36098_v24, %s32564_s22  ;;  %20439 = vmatpush1.msra.mxu0 %v20308_v28 }
 0x6bf   :  { %v20276_v50 = vpop.permute.xlu1 %20275  ;;  %32263 = vmatmul.mubr.msk.f32.vlgmr.msra.gmra.mxu0 %vm117_vm1, %v32261_v40 }
 0x6c0   :  { %v20298_v1 = vpop.permute.xlu0 %20297  ;;  %v20306_v32 = vsel %vm20305_vm5, %v20276_v50, %v20278_v52  ;;  %20614 = vmatprep.mubr.f32.mxu0 %v39753_v14 }
 0x6c1   :  { %22581 = vrot.lane.b32.xlu1 %v36065_v44, %s32564_s22  ;;  %20368 = vmatpush1.msra.mxu1 %v20306_v32 }
 0x6c2   :  { %22593 = vrot.lane.b32.xlu0 %v36106_v23, %s32564_s22  ;;  %32262 = vmatmul.mubr.msk.f32.vlgmr.msra.gmra.mxu1 %vm117_vm1, %v32261_v40 }
 0x6c3   :  { %v20288_v47 = vpop.permute.xlu1 %20287  ;;  %20543 = vmatprep.mubr.f32.mxu1 %v39753_v14 }
 0x6c4   :  { %v20302_v33 = vpop.permute.xlu0 %20301  ;;  %v20311_v37 = vsel %vm20305_vm5, %v20286_v11, %v20288_v47  ;;  %v20312_v20 = vsel %vm20305_vm5, %v20288_v47, %v20290_v16 }
 0x6c5   :  { %22575 = vrot.lane.b32.xlu1 %v39753_v14, %s32564_s22  ;;  %20509 = vmatprep.subr.mxu1 %v20311_v37 }
 0x6c6   :  { %22597 = vrot.lane.b32.xlu0 %v36113_v48, %s32564_s22  ;;  %20510 = vmatpush1.msra.mxu1 %v20310_v30 }
 0x6c7   :  { %v20292_v60 = vpop.permute.xlu1 %20291  ;;  %32264 = vmatmul.mubr.msk.f32.vlgmr.msra.gmra.mxu1 %vm117_vm1, %v32261_v40 }
 0x6c8   :  { %v20853_v13 = vpop.permute.xlu0 %20852  ;;  %v20313_v2 = vsel %vm20305_vm5, %v20290_v16, %v20292_v60  ;;  %20685 = vmatprep.mubr.f32.mxu1 %v39753_v14  ;;  %v20314_v51 = vsel %vm20305_vm5, %v20292_v60, %v20294_v10 }
 0x6c9   :  { %22587 = vrot.lane.b32.xlu1 %v36044_v19, %s32564_s22  ;;  %20580 = vmatprep.subr.mxu0 %v20313_v2 }
 0x6ca   :  { %22601 = vrot.lane.b32.xlu0 %v36120_v57, %s32564_s22  ;;  %20581 = vmatpush1.msra.mxu0 %v20312_v20 }
 0x6cb   :  { %v20296_v34 = vpop.permute.xlu1 %20295  ;;  %32265 = vmatmul.mubr.msk.f32.vlgmr.msra.gmra.mxu0 %vm117_vm1, %v32261_v40 }
 0x6cc   :  { %v20851_v35 = vpop.permute.xlu0 %20850  ;;  %v20315_v42 = vsel %vm20305_vm5, %v20294_v10, %v20296_v34  ;;  %20756 = vmatprep.mubr.f32.mxu0 %v39753_v14  ;;  %v20316_v46 = vsel %vm20305_vm5, %v20296_v34, %v20298_v1 }
 0x6cd   :  { %22591 = vrot.lane.b32.xlu1 %v36056_v22, %s32564_s22  ;;  %20651 = vmatprep.subr.mxu1 %v20315_v42  ;;  %v20881_v52 = vsel %vm20880_vm6, %v20851_v35, %v20853_v13 }
 0x6ce   :  { %23152 = vrot.lane.b32.xlu0 %v36041_v56, %s32565_s29  ;;  %20652 = vmatpush1.msra.mxu1 %v20314_v51 }
 0x6cf   :  { %v20300_v0 = vpop.permute.xlu1 %20299  ;;  %32266 = vmatmul.mubr.msk.f32.vlgmr.msra.gmra.mxu1 %vm117_vm1, %v32261_v40 }
 0x6d0   :  { %v20859_v17 = vpop.permute.xlu0 %20858  ;;  %v20317_v39 = vsel %vm20305_vm5, %v20298_v1, %v20300_v0  ;;  %20827 = vmatprep.mubr.f32.mxu1 %v39753_v14  ;;  %v20318_v36 = vsel %vm20305_vm5, %v20300_v0, %v20302_v33 }
 0x6d1   :  { %22595 = vrot.lane.b32.xlu1 %v36068_v12, %s32564_s22  ;;  %20722 = vmatprep.subr.mxu0 %v20317_v39  ;;  %v36824_v39 = vpop.f32.mrf.mxu1 }
 0x6d2   :  { %23150 = vrot.lane.b32.xlu0 %v39753_v14, %s32565_s29  ;;  %20723 = vmatpush1.msra.mxu0 %v20316_v46  ;;  %39755 = vst [vmem:[#allocation48_spill] sm:$0xff] %v36824_v39  ;;  %v36830_v46 = vmul.f32 %v35818_v58, %v36824_v39 }
 0x6d3   :  { %v20304_v15 = vpop.permute.xlu1 %20303  ;;  %32267 = vmatmul.mubr.msk.f32.vlgmr.msra.gmra.mxu0 %vm117_vm1, %v32261_v40 }
 0x6d4   :  { %v20863_v55 = vpop.permute.xlu0 %20862  ;;  %v20319_v3 = vsel %vm20305_vm5, %v20302_v33, %v20304_v15  ;;  %20976 = vmatprep.mubr.f32.mxu0 %v39753_v14  ;;  %39756 = vst [vmem:[#allocation49_spill] sm:$0xff] %v36830_v46 }
 0x6d5   :  { %22599 = vrot.lane.b32.xlu1 %v36079_v53, %s32564_s22  ;;  %20793 = vmatprep.subr.mxu1 %v20319_v3 }
 0x6d6   :  { %23158 = vrot.lane.b32.xlu0 %v36076_v43, %s32565_s29  ;;  %20794 = vmatpush1.msra.mxu1 %v20318_v36 }
 0x6d7   :  { %v20855_v9 = vpop.permute.xlu1 %20854  ;;  %32268 = vmatmul.mubr.msk.f32.vlgmr.msra.gmra.mxu1 %vm117_vm1, %v32261_v40 }
 0x6d8   :  { %v20867_v11 = vpop.permute.xlu0 %20866  ;;  %v20882_v61 = vsel %vm20880_vm6, %v20853_v13, %v20855_v9  ;;  %21047 = vmatprep.mubr.f32.mxu1 %v39753_v14 }
 0x6d9   :  { %22603 = vrot.lane.b32.xlu1 %v36090_v41, %s32564_s22  ;;  %20942 = vmatprep.subr.mxu0 %v20882_v61  ;;  %v36850_v61 = vpop.f32.mrf.mxu0 }
 0x6da   :  { %23162 = vrot.lane.b32.xlu0 %v36044_v19, %s32565_s29  ;;  %20943 = vmatpush1.msra.mxu0 %v20881_v52  ;;  %39759 = vst [vmem:[#allocation52_spill] sm:$0xff] %v36850_v61 }
 0x6db   :  { %v20857_v16 = vpop.permute.xlu1 %20856  ;;  %32270 = vmatmul.mubr.msk.f32.vlgmr.msra.gmra.mxu0 %vm117_vm1, %v36762_v38 }
 0x6dc   :  { %v20871_v25 = vpop.permute.xlu0 %20870  ;;  %v20884_v59 = vsel %vm20880_vm6, %v20857_v16, %v20859_v17  ;;  %v20883_v10 = vsel %vm20880_vm6, %v20855_v9, %v20857_v16  ;;  %21118 = vmatprep.mubr.f32.mxu0 %v39753_v14  ;;  %v36860_v16 = vmul.f32 %v35827_v49, %v36850_v61 }
 0x6dd   :  { %23154 = vrot.lane.b32.xlu1 %v36053_v18, %s32565_s29  ;;  %21013 = vmatprep.subr.mxu1 %v20884_v59 }
 0x6de   :  { %23166 = vrot.lane.b32.xlu0 %v36056_v22, %s32565_s29  ;;  %21014 = vmatpush1.msra.mxu1 %v20883_v10  ;;  %39761 = vst [vmem:[#allocation55_spill] sm:$0xff] %v36860_v16 }
 0x6df   :  { %v20861_v7 = vpop.permute.xlu1 %20860  ;;  %32271 = vmatmul.mubr.msk.f32.vlgmr.msra.gmra.mxu1 %vm117_vm1, %v36762_v38 }
 0x6e0   :  { %v20875_v28 = vpop.permute.xlu0 %20874  ;;  %v20886_v40 = vsel %vm20880_vm6, %v20861_v7, %v20863_v55  ;;  %v20885_v50 = vsel %vm20880_vm6, %v20859_v17, %v20861_v7  ;;  %21189 = vmatprep.mubr.f32.mxu1 %v39753_v14 }
 0x6e1   :  { %23156 = vrot.lane.b32.xlu1 %v36065_v44, %s32565_s29  ;;  %21084 = vmatprep.subr.mxu0 %v20886_v40  ;;  %v31840_v40 = vmul.f32 %v36860_v16, %v36850_v61 }
 0x6e2   :  { %23170 = vrot.lane.b32.xlu0 %v36068_v12, %s32565_s29  ;;  %21085 = vmatpush1.msra.mxu0 %v20885_v50  ;;  %v36873_v50 = vpop.f32.mrf.mxu0 }
 0x6e3   :  { %v20865_v1 = vpop.permute.xlu1 %20864  ;;  %32272 = vmatmul.mubr.msk.f32.vlgmr.msra.gmra.mxu0 %vm117_vm1, %v36762_v38  ;;  %39763 = vst [vmem:[#allocation57_spill] sm:$0xff] %v36873_v50 }
 0x6e4   :  { %v20879_v32 = vpop.permute.xlu0 %20878  ;;  %v20888_v47 = vsel %vm20880_vm6, %v20865_v1, %v20867_v11  ;;  %v20887_v33 = vsel %vm20880_vm6, %v20863_v55, %v20865_v1  ;;  %21260 = vmatprep.mubr.f32.mxu0 %v39753_v14  ;;  %v36836_v55 = vpop.f32.mrf.mxu1 }
 0x6e5   :  { %23160 = vrot.lane.b32.xlu1 %v36087_v54, %s32565_s29  ;;  %21155 = vmatprep.subr.mxu1 %v20888_v47  ;;  %39757 = vst [vmem:[#allocation51_spill] sm:$0xff] %v36836_v55  ;;  %v36844_v9 = vmul.f32 %v35820_v27, %v36836_v55 }
 0x6e6   :  { %23174 = vrot.lane.b32.xlu0 %v36079_v53, %s32565_s29  ;;  %21156 = vmatpush1.msra.mxu1 %v20887_v33  ;;  %v36888_v33 = vld [vmem:[%s39387_s3 + $0x48] sm:$0xff] }
 0x6e7   :  { %v20869_v37 = vpop.permute.xlu1 %20868  ;;  %32273 = vmatmul.mubr.msk.f32.vlgmr.msra.gmra.mxu1 %vm117_vm1, %v36762_v38  ;;  %39758 = vst [vmem:[#allocation50_spill] sm:$0xff] %v36844_v9  ;;  %v31839_v52 = vmul.f32 %v36844_v9, %v36836_v55 }
 0x6e8   :  { %v21430_v30 = vpop.permute.xlu0 %21429  ;;  %v20890_v60 = vsel %vm20880_vm6, %v20869_v37, %v20871_v25  ;;  %v20889_v13 = vsel %vm20880_vm6, %v20867_v11, %v20869_v37  ;;  %21331 = vmatprep.mubr.f32.mxu1 %v39753_v14  ;;  %v31838_v11 = vmul.f32 %v36830_v46, %v36824_v39 }
 0x6e9   :  { %23164 = vrot.lane.b32.xlu1 %v36098_v24, %s32565_s29  ;;  %21226 = vmatprep.subr.mxu0 %v20890_v60 }
 0x6ea   :  { %23178 = vrot.lane.b32.xlu0 %v36090_v41, %s32565_s29  ;;  %21227 = vmatpush1.msra.mxu0 %v20889_v13  ;;  %v31852_v1 = vadd.f32 %v31839_v52, %v31838_v11 }
 0x6eb   :  { %v20873_v2 = vpop.permute.xlu1 %20872  ;;  %32274 = vmatmul.mubr.msk.f32.vlgmr.msra.gmra.mxu0 %vm117_vm1, %v36762_v38 }
 0x6ec   :  { %v36808_v20 = vpop.permute.xlu0 %21433  ;;  %v20892_v34 = vsel %vm20880_vm6, %v20873_v2, %v20875_v28  ;;  %v20891_v35 = vsel %vm20880_vm6, %v20871_v25, %v20873_v2  ;;  %21402 = vmatprep.mubr.f32.mxu0 %v39753_v14  ;;  %v31853_v13 = vadd.f32 %v31852_v1, %v31840_v40 }
 0x6ed   :  { %23168 = vrot.lane.b32.xlu1 %v36106_v23, %s32565_s29  ;;  %21297 = vmatprep.subr.mxu1 %v20892_v34 }
 0x6ee   :  { %24275 = vrot.lane.b32.xlu0 %v36065_v44, %s32526_s25  ;;  %21298 = vmatpush1.msra.mxu1 %v20891_v35 }
 0x6ef   :  { %v20877_v42 = vpop.permute.xlu1 %20876  ;;  %32275 = vmatmul.mubr.msk.f32.vlgmr.msra.gmra.mxu1 %vm117_vm1, %v36762_v38 }
 0x6f0   :  { %v36819_v51 = vpop.permute.xlu0 %21435  ;;  %v20894_v0 = vsel %vm20880_vm6, %v20877_v42, %v20879_v32  ;;  %v20893_v17 = vsel %vm20880_vm6, %v20875_v28, %v20877_v42  ;;  %21551 = vmatprep.mubr.f32.mxu1 %v39753_v14  ;;  %v36879_v32 = vmul.f32 %v35829_v63, %v36873_v50 }
 0x6f1   :  { %23172 = vrot.lane.b32.xlu1 %v36113_v48, %s32565_s29  ;;  %21368 = vmatprep.subr.mxu0 %v20894_v0 }
 0x6f2   :  { %24277 = vrot.lane.b32.xlu0 %v36076_v43, %s32526_s25  ;;  %21369 = vmatpush1.msra.mxu0 %v20893_v17  ;;  %39764 = vst [vmem:[#allocation56_spill] sm:$0xff] %v36879_v32  ;;  %v31841_v34 = vmul.f32 %v36879_v32, %v36873_v50  ;;  %v37203_v32 = vld [vmem:[%s39387_s3 + $0x58] sm:$0xff] }
 0x6f3   :  { %v21428_v15 = vpop.permute.xlu1 %21427  ;;  %32276 = vmatmul.mubr.msk.f32.vlgmr.msra.gmra.mxu0 %vm117_vm1, %v36762_v38  ;;  %v36852_v38 = vpop.f32.mrf.mxu1 }
 0x6f4   :  { %v36838_v3 = vpop.permute.xlu0 %21439  ;;  %v21457_v36 = vsel %vm21455_vm7, %v21428_v15, %v21430_v30  ;;  %21622 = vmatprep.mubr.f32.mxu0 %v39753_v14  ;;  %39760 = vst [vmem:[#allocation53_spill] sm:$0xff] %v36852_v38  ;;  %v36864_v59 = vmul.f32 %v35833_v5, %v36852_v38  ;;  %v31854_v11 = vadd.f32 %v31853_v13, %v31841_v34 }
 0x6f5   :  { %23176 = vrot.lane.b32.xlu1 %v36120_v57, %s32565_s29  ;;  %21517 = vmatprep.subr.mxu1 %v21457_v36  ;;  %v36881_v47 = vpop.f32.mrf.mxu1 }
 0x6f6   :  { %24281 = vrot.lane.b32.xlu0 %v36044_v19, %s32526_s25  ;;  %39762 = vst [vmem:[#allocation54_spill] sm:$0xff] %v36864_v59  ;;  %39765 = vst [vmem:[#allocation58_spill] sm:$0xff] %v36881_v47  ;;  %v36892_v37 = vmul.f32 %v35840_v45, %v36881_v47  ;;  %v31842_v2 = vmul.f32 %v36864_v59, %v36852_v38 }
 0x6f7   :  { %v21432_v25 = vpop.permute.xlu1 %21431  ;;  %v36906_v42 = vpop.f32.mrf.mxu1 }
 0x6f8   :  { %v36866_v10 = vpop.permute.xlu0 %21443  ;;  %v21459_v7 = vsel %vm21455_vm7, %v21432_v25, %v36808_v20  ;;  %v21458_v28 = vsel %vm21455_vm7, %v21430_v30, %v21432_v25  ;;  %39766 = vst [vmem:[#allocation59_spill] sm:$0xff] %v36892_v37  ;;  %v36894_v30 = vpop.f32.mrf.mxu0  ;;  %39769 = vst [vmem:[#allocation62_spill] sm:$0xff] %v36906_v42  ;;  %v31843_v52 = vmul.f32 %v36892_v37, %v36881_v47 }
 0x6f9   :  { %24273 = vrot.lane.b32.xlu1 %v36053_v18, %s32526_s25  ;;  %21588 = vmatprep.subr.mxu0 %v21459_v7  ;;  %39767 = vst [vmem:[#allocation60_spill] sm:$0xff] %v36894_v30  ;;  %v36904_v35 = vmul.f32 %v35853_v26, %v36894_v30  ;;  %v36918_v25 = vpop.f32.mrf.mxu1  ;;  %v31855_v1 = vadd.f32 %v31854_v11, %v31842_v2 }
 0x6fa   :  { %24285 = vrot.lane.b32.xlu0 %v36056_v22, %s32526_s25  ;;  %21589 = vmatpush1.msra.mxu0 %v21458_v28  ;;  %v36912_v36 = vpop.f32.mrf.mxu0  ;;  %39771 = vst [vmem:[#allocation65_spill] sm:$0xff] %v36918_v25  ;;  %v21460_v47 = vsel %vm21455_vm7, %v36808_v20, %v36819_v51 }
 0x6fb   :  { %v21426_v60 = vpop.permute.xlu1 %21425  ;;  %32279 = vmatmul.mubr.msk.f32.vlgmr.msra.gmra.mxu0 %vm117_vm1, %v36888_v33  ;;  %39768 = vst [vmem:[#allocation61_spill] sm:$0xff] %v36904_v35  ;;  %39770 = vst [vmem:[#allocation63_spill] sm:$0xff] %v36912_v36  ;;  %v31844_v40 = vmul.f32 %v36904_v35, %v36894_v30  ;;  %v36937_v13 = vpop.f32.mrf.mxu1  ;;  %v31856_v2 = vadd.f32 %v31855_v1, %v31843_v52  ;;  %v36954_v30 = vmul.f32 %v35868_v62, %v36918_v25 }
 0x6fc   :  { %v36908_v0 = vpop.permute.xlu0 %21447  ;;  %v21456_v17 = vsel %vm21455_vm7, %v21426_v60, %v21428_v15  ;;  %21764 = vmatprep.mubr.f32.mxu0 %v39753_v14  ;;  %v36926_v15 = vmul.f32 %v35855_v29, %v36912_v36  ;;  %v36928_v7 = vpop.f32.mrf.mxu0  ;;  %v36935_v60 = vmul.f32 %v35865_v4, %v36906_v42  ;;  %39775 = vst [vmem:[#allocation68_spill] sm:$0xff] %v36937_v13 }
 0x6fd   :  { %24271 = vrot.lane.b32.xlu1 %v36041_v56, %s32526_s25  ;;  %21518 = vmatpush1.msra.mxu1 %v21456_v17  ;;  %39773 = vst [vmem:[#allocation66_spill] sm:$0xff] %v36928_v7  ;;  %39777 = vst [vmem:[#allocation70_spill] sm:$0xff] %v36954_v30  ;;  %v36956_v50 = vpop.f32.mrf.mxu1  ;;  %v36966_v1 = vmul.f32 %v35881_v8, %v36928_v7 }
 0x6fe   :  { %24289 = vrot.lane.b32.xlu0 %v36068_v12, %s32526_s25  ;;  %32278 = vmatmul.mubr.msk.f32.vlgmr.msra.gmra.mxu1 %vm117_vm1, %v36888_v33  ;;  %39772 = vst [vmem:[#allocation64_spill] sm:$0xff] %v36926_v15  ;;  %39774 = vst [vmem:[#allocation67_spill] sm:$0xff] %v36935_v60  ;;  %v36946_v38 = vpop.f32.mrf.mxu0  ;;  %v31845_v11 = vmul.f32 %v36926_v15, %v36912_v36  ;;  %v31846_v52 = vmul.f32 %v36935_v60, %v36906_v42 }
 0x6ff   :  { %v21438_v28 = vpop.permute.xlu1 %21437  ;;  %21693 = vmatprep.mubr.f32.mxu1 %v39753_v14  ;;  %39776 = vst [vmem:[#allocation69_spill] sm:$0xff] %v36946_v38  ;;  %39778 = vst [vmem:[#allocation71_spill] sm:$0xff] %v36956_v50  ;;  %v36975_v55 = vpop.f32.mrf.mxu1  ;;  %v36983_v42 = vmul.f32 %v35884_v6, %v36946_v38 }
 0x700   :  { %v36939_v34 = vpop.permute.xlu0 %21451  ;;  %v21461_v17 = vsel %vm21455_vm7, %v36819_v51, %v21438_v28  ;;  %v31857_v51 = vadd.f32 %v31856_v2, %v31844_v40  ;;  %39779 = vst [vmem:[#allocation72_spill] sm:$0xff] %v36966_v1  ;;  %v31847_v2 = vmul.f32 %v36954_v30, %v36918_v25 }
 0x701   :  { %24279 = vrot.lane.b32.xlu1 %v36087_v54, %s32526_s25  ;;  %21659 = vmatprep.subr.mxu1 %v21461_v17  ;;  %v16408_v17 = vpop.f32.mrf.mxu0  ;;  %39780 = vst [vmem:[#allocation73_spill] sm:$0xff] %v36983_v42 }
 0x702   :  { %24293 = vrot.lane.b32.xlu0 %v36079_v53, %s32526_s25  ;;  %21660 = vmatpush1.msra.mxu1 %v21460_v47  ;;  %v21462_v47 = vsel %vm21455_vm7, %v21438_v28, %v36838_v3  ;;  %v31858_v40 = vadd.f32 %v31857_v51, %v31845_v11 }
 0x703   :  { %v21442_v20 = vpop.permute.xlu1 %21441  ;;  %32280 = vmatmul.mubr.msk.f32.vlgmr.msra.gmra.mxu1 %vm117_vm1, %v36888_v33  ;;  %v36985_v39 = vpop.f32.mrf.mxu0 }
 0x704   :  { %v36968_v36 = vpop.permute.xlu0 %22002  ;;  %v21463_v61 = vsel %vm21455_vm7, %v36838_v3, %v21442_v20  ;;  %21835 = vmatprep.mubr.f32.mxu1 %v39753_v14  ;;  %v36989_v3 = vpop.f32.mrf.mxu1  ;;  %v31859_v11 = vadd.f32 %v31858_v40, %v31846_v52  ;;  %v31849_v52 = vmul.f32 %v36983_v42, %v36946_v38 }
 0x705   :  { %24283 = vrot.lane.b32.xlu1 %v36098_v24, %s32526_s25  ;;  %21730 = vmatprep.subr.mxu0 %v21463_v61  ;;  %v31848_v61 = vmul.f32 %v36966_v1, %v36928_v7  ;;  %v16550_v51 = vpop.f32.mrf.mxu0 }
 0x706   :  { %24297 = vrot.lane.b32.xlu0 %v36090_v41, %s32526_s25  ;;  %21731 = vmatpush1.msra.mxu0 %v21462_v47  ;;  %v36998_v8 = vpop.f32.mrf.mxu1  ;;  %v21464_v47 = vsel %vm21455_vm7, %v21442_v20, %v36866_v10  ;;  %v31860_v62 = vadd.f32 %v31859_v11, %v31847_v2 }
 0x707   :  { %v21446_v28 = vpop.permute.xlu1 %21445  ;;  %32281 = vmatmul.mubr.msk.f32.vlgmr.msra.gmra.mxu0 %vm117_vm1, %v36888_v33  ;;  %v37006_v40 = vpop.f32.mrf.mxu0 }
 0x708   :  { %v22001_v25 = vpop.permute.xlu0 %22000  ;;  %v21465_v6 = vsel %vm21455_vm7, %v36866_v10, %v21446_v28  ;;  %21906 = vmatprep.mubr.f32.mxu0 %v39753_v14  ;;  %v37010_v7 = vpop.f32.mrf.mxu1  ;;  %v21466_v11 = vsel %vm21455_vm7, %v21446_v28, %v36908_v0 }
 0x709   :  { %24287 = vrot.lane.b32.xlu1 %v36106_v23, %s32526_s25  ;;  %21801 = vmatprep.subr.mxu1 %v21465_v6  ;;  %v31861_v6 = vadd.f32 %v31860_v62, %v31848_v61  ;;  %v16692_v29 = vpop.f32.mrf.mxu0 }
 0x70a   :  { %24847 = vrot.lane.b32.xlu0 %v36053_v18, %s32566_s10  ;;  %21802 = vmatpush1.msra.mxu1 %v21464_v47  ;;  %v37019_v2 = vpop.f32.mrf.mxu1 }
 0x70b   :  { %v21450_v4 = vpop.permute.xlu1 %21449  ;;  %32282 = vmatmul.mubr.msk.f32.vlgmr.msra.gmra.mxu1 %vm117_vm1, %v36888_v33  ;;  %v37025_v47 = vadd.f32 %v31861_v6, %v31849_v52  ;;  %v37027_v62 = vpop.f32.mrf.mxu0 }
 0x70c   :  { %v37014_v10 = vpop.permute.xlu0 %22008  ;;  %v21467_v20 = vsel %vm21455_vm7, %v36908_v0, %v21450_v4  ;;  %21977 = vmatprep.mubr.f32.mxu1 %v39753_v14  ;;  %v37031_v61 = vpop.f32.mrf.mxu1  ;;  %v21468_v52 = vsel %vm21455_vm7, %v21450_v4, %v36939_v34 }
 0x70d   :  { %24291 = vrot.lane.b32.xlu1 %v36113_v48, %s32526_s25  ;;  %21872 = vmatprep.subr.mxu0 %v21467_v20  ;;  %39781 = vst [vmem:[#allocation74_spill] sm:$0xff] %v37025_v47  ;;  %v16834_v26 = vpop.f32.mrf.mxu0 }
 0x70e   :  { %24851 = vrot.lane.b32.xlu0 %v36076_v43, %s32566_s10  ;;  %21873 = vmatpush1.msra.mxu0 %v21466_v11  ;;  %v16967_v28 = vpop.f32.mrf.mxu1 }
 0x70f   :  { %v21454_v38 = vpop.permute.xlu1 %21453  ;;  %32283 = vmatmul.mubr.msk.f32.vlgmr.msra.gmra.mxu0 %vm117_vm1, %v36888_v33  ;;  %v16968_v6 = vadd.f32 %v16967_v28, %v16408_v17  ;;  %v37044_v20 = vpop.f32.mrf.mxu0  ;;  %v22031_v28 = vsel %vm22030_vm8, %v22001_v25, %v36968_v36 }
 0x710   :  { %v37035_v45 = vpop.permute.xlu0 %22012  ;;  %v21469_v0 = vsel %vm21455_vm7, %v36939_v34, %v21454_v38  ;;  %22126 = vmatprep.mubr.f32.mxu0 %v39753_v14  ;;  %39782 = vst [vmem:[#allocation75_spill] sm:$0xff] %v37044_v20  ;;  %v37048_v11 = vpop.f32.mrf.mxu1  ;;  %v37059_v34 = vld [vmem:[%s39387_s3 + $0x50] sm:$0xff] }
 0x711   :  { %24295 = vrot.lane.b32.xlu1 %v36120_v57, %s32526_s25  ;;  %21943 = vmatprep.subr.mxu1 %v21469_v0  ;;  %v17038_v47 = vpop.f32.mrf.mxu0 }
 0x712   :  { %24845 = vrot.lane.b32.xlu0 %v36041_v56, %s32566_s10  ;;  %21944 = vmatpush1.msra.mxu1 %v21468_v52  ;;  %v17039_v17 = vadd.f32 %v17038_v47, %v36975_v55  ;;  %v17109_v0 = vpop.f32.mrf.mxu1 }
 0x713   :  { %v22005_v38 = vpop.permute.xlu1 %22004  ;;  %32284 = vmatmul.mubr.msk.f32.vlgmr.msra.gmra.mxu1 %vm117_vm1, %v36888_v33  ;;  %v17110_v33 = vadd.f32 %v17109_v0, %v16550_v51  ;;  %v37067_v52 = vpop.f32.mrf.mxu0 }
 0x714   :  { %v37052_v5 = vpop.permute.xlu0 %22016  ;;  %v22032_v4 = vsel %vm22030_vm8, %v36968_v36, %v22005_v38  ;;  %22197 = vmatprep.mubr.f32.mxu1 %v39753_v14  ;;  %v37071_v63 = vpop.f32.mrf.mxu1 }
 0x715   :  { %24299 = vrot.lane.b32.xlu1 %v39753_v14, %s32526_s25  ;;  %22092 = vmatprep.subr.mxu0 %v22032_v4  ;;  %v17180_v55 = vpop.f32.mrf.mxu0 }
 0x716   :  { %24857 = vrot.lane.b32.xlu0 %v36098_v24, %s32566_s10  ;;  %22093 = vmatpush1.msra.mxu0 %v22031_v28  ;;  %v17181_v51 = vadd.f32 %v17180_v55, %v36998_v8  ;;  %v17251_v4 = vpop.f32.mrf.mxu1 }
 0x717   :  { %v22007_v49 = vpop.permute.xlu1 %22006  ;;  %32286 = vmatmul.mubr.msk.f32.vlgmr.msra.gmra.mxu0 %vm117_vm1, %v37059_v34  ;;  %v17252_v0 = vadd.f32 %v17251_v4, %v16692_v29  ;;  %v37084_v28 = vpop.f32.mrf.mxu0 }
 0x718   :  { %v37075_v47 = vpop.permute.xlu0 %22020  ;;  %v22034_v36 = vsel %vm22030_vm8, %v22007_v49, %v37014_v10  ;;  %v22033_v25 = vsel %vm22030_vm8, %v22005_v38, %v22007_v49  ;;  %22268 = vmatprep.mubr.f32.mxu0 %v39753_v14  ;;  %v37088_v27 = vpop.f32.mrf.mxu1 }
 0x719   :  { %24849 = vrot.lane.b32.xlu1 %v36065_v44, %s32566_s10  ;;  %22163 = vmatprep.subr.mxu1 %v22034_v36  ;;  %v17322_v49 = vpop.f32.mrf.mxu0 }
 0x71a   :  { %24861 = vrot.lane.b32.xlu0 %v36106_v23, %s32566_s10  ;;  %22164 = vmatpush1.msra.mxu1 %v22033_v25  ;;  %v17323_v55 = vadd.f32 %v17322_v49, %v37019_v2  ;;  %v17393_v36 = vpop.f32.mrf.mxu1 }
 0x71b   :  { %v22011_v58 = vpop.permute.xlu1 %22010  ;;  %32287 = vmatmul.mubr.msk.f32.vlgmr.msra.gmra.mxu1 %vm117_vm1, %v37059_v34  ;;  %v17394_v25 = vadd.f32 %v17393_v36, %v16834_v26  ;;  %v37102_v4 = vpop.f32.mrf.mxu0 }
 0x71c   :  { %v37092_v8 = vpop.permute.xlu0 %22024  ;;  %v22036_v38 = vsel %vm22030_vm8, %v22011_v58, %v37035_v45  ;;  %v22035_v29 = vsel %vm22030_vm8, %v37014_v10, %v22011_v58  ;;  %22339 = vmatprep.mubr.f32.mxu1 %v39753_v14  ;;  %v37106_v21 = vpop.f32.mrf.mxu1 }
 0x71d   :  { %24853 = vrot.lane.b32.xlu1 %v36087_v54, %s32566_s10  ;;  %22234 = vmatprep.subr.mxu0 %v22036_v38  ;;  %39783 = vst [vmem:[#allocation77_spill] sm:$0xff] %v37106_v21  ;;  %v17528_v58 = vpop.f32.mrf.mxu0 }
 0x71e   :  { %24865 = vrot.lane.b32.xlu0 %v36113_v48, %s32566_s10  ;;  %22235 = vmatpush1.msra.mxu0 %v22035_v29  ;;  %v17959_v49 = vadd.f32 %v17528_v58, %v16968_v6  ;;  %v17599_v38 = vpop.f32.mrf.mxu1 }
 0x71f   :  { %v22015_v50 = vpop.permute.xlu1 %22014  ;;  %32288 = vmatmul.mubr.msk.f32.vlgmr.msra.gmra.mxu0 %vm117_vm1, %v37059_v34  ;;  %v17961_v29 = vadd.f32 %v17599_v38, %v17039_v17  ;;  %v37117_v36 = vpop.f32.mrf.mxu0 }
 0x720   :  { %v22029_v10 = vpop.permute.xlu0 %22028  ;;  %v22038_v2 = vsel %vm22030_vm8, %v22015_v50, %v37052_v5  ;;  %v22037_v26 = vsel %vm22030_vm8, %v37035_v45, %v22015_v50  ;;  %22410 = vmatprep.mubr.f32.mxu0 %v39753_v14  ;;  %v37121_v31 = vpop.f32.mrf.mxu1 }
 0x721   :  { %24855 = vrot.lane.b32.xlu1 %v36044_v19, %s32566_s10  ;;  %22305 = vmatprep.subr.mxu1 %v22038_v2  ;;  %v17670_v45 = vpop.f32.mrf.mxu0 }
 0x722   :  { %24869 = vrot.lane.b32.xlu0 %v36120_v57, %s32566_s10  ;;  %22306 = vmatpush1.msra.mxu1 %v22037_v26  ;;  %v17963_v58 = vadd.f32 %v17670_v45, %v17110_v33  ;;  %v17741_v2 = vpop.f32.mrf.mxu1 }
 0x723   :  { %v22019_v13 = vpop.permute.xlu1 %22018  ;;  %32289 = vmatmul.mubr.msk.f32.vlgmr.msra.gmra.mxu1 %vm117_vm1, %v37059_v34  ;;  %v17965_v26 = vadd.f32 %v17741_v2, %v17181_v51  ;;  %v37134_v38 = vpop.f32.mrf.mxu0 }
 0x724   :  { %v37125_v50 = vpop.permute.xlu0 %22579  ;;  %v22040_v6 = vsel %vm22030_vm8, %v22019_v13, %v37075_v47  ;;  %v22039_v17 = vsel %vm22030_vm8, %v37052_v5, %v22019_v13  ;;  %22481 = vmatprep.mubr.f32.mxu1 %v39753_v14  ;;  %v37138_v42 = vpop.f32.mrf.mxu1 }
 0x725   :  { %24859 = vrot.lane.b32.xlu1 %v36056_v22, %s32566_s10  ;;  %22376 = vmatprep.subr.mxu0 %v22040_v6  ;;  %v17812_v5 = vpop.f32.mrf.mxu0 }
 0x726   :  { %24873 = vrot.lane.b32.xlu0 %v39753_v14, %s32566_s10  ;;  %22377 = vmatpush1.msra.mxu0 %v22039_v17  ;;  %v17967_v45 = vadd.f32 %v17812_v5, %v17252_v0  ;;  %v17883_v6 = vpop.f32.mrf.mxu1 }
 0x727   :  { %v22023_v1 = vpop.permute.xlu1 %22022  ;;  %32290 = vmatmul.mubr.msk.f32.vlgmr.msra.gmra.mxu0 %vm117_vm1, %v37059_v34  ;;  %v17969_v17 = vadd.f32 %v17883_v6, %v17323_v55  ;;  %v37151_v2 = vpop.f32.mrf.mxu0 }
 0x728   :  { %v37142_v13 = vpop.permute.xlu0 %22583  ;;  %v22042_v33 = vsel %vm22030_vm8, %v22023_v1, %v37092_v8  ;;  %v22041_v51 = vsel %vm22030_vm8, %v37075_v47, %v22023_v1  ;;  %22552 = vmatprep.mubr.f32.mxu0 %v39753_v14  ;;  %v37155_v30 = vpop.f32.mrf.mxu1 }
 0x729   :  { %24863 = vrot.lane.b32.xlu1 %v36068_v12, %s32566_s10  ;;  %22447 = vmatprep.subr.mxu1 %v22042_v33  ;;  %39784 = vst [vmem:[#allocation76_spill] sm:$0xff] %v37155_v30  ;;  %v17954_v1 = vpop.f32.mrf.mxu0 }
 0x72a   :  { %25424 = vrot.lane.b32.xlu0 %v36065_v44, %s32528_s30  ;;  %22448 = vmatpush1.msra.mxu1 %v22041_v51  ;;  %v17971_v5 = vadd.f32 %v17954_v1, %v17394_v25  ;;  %v18103_v33 = vpop.f32.mrf.mxu1 }
 0x72b   :  { %v22027_v60 = vpop.permute.xlu1 %22026  ;;  %32291 = vmatmul.mubr.msk.f32.vlgmr.msra.gmra.mxu1 %vm117_vm1, %v37059_v34  ;;  %v18534_v51 = vadd.f32 %v18103_v33, %v17959_v49  ;;  %v37167_v6 = vpop.f32.mrf.mxu0 }
 0x72c   :  { %v37159_v47 = vpop.permute.xlu0 %22585  ;;  %v22044_v0 = vsel %vm22030_vm8, %v22027_v60, %v22029_v10  ;;  %v22043_v55 = vsel %vm22030_vm8, %v37092_v8, %v22027_v60  ;;  %22701 = vmatprep.mubr.f32.mxu1 %v39753_v14  ;;  %39785 = vst [vmem:[#allocation78_spill] sm:$0xff] %v37167_v6  ;;  %v37171_v15 = vpop.f32.mrf.mxu1 }
 0x72d   :  { %24867 = vrot.lane.b32.xlu1 %v36079_v53, %s32566_s10  ;;  %22518 = vmatprep.subr.mxu0 %v22044_v0  ;;  %v18174_v60 = vpop.f32.mrf.mxu0 }
 0x72e   :  { %25426 = vrot.lane.b32.xlu0 %v36076_v43, %s32528_s30  ;;  %22519 = vmatpush1.msra.mxu0 %v22043_v55  ;;  %v18536_v49 = vadd.f32 %v18174_v60, %v17961_v29  ;;  %v18245_v1 = vpop.f32.mrf.mxu1 }
 0x72f   :  { %v22578_v10 = vpop.permute.xlu1 %22577  ;;  %32292 = vmatmul.mubr.msk.f32.vlgmr.msra.gmra.mxu0 %vm117_vm1, %v37059_v34  ;;  %v18538_v0 = vadd.f32 %v18245_v1, %v17963_v58  ;;  %v37182_v55 = vpop.f32.mrf.mxu0 }
 0x730   :  { %v37175_v8 = vpop.permute.xlu0 %22589  ;;  %v22607_v25 = vsel %vm22605_vm11, %v22578_v10, %v37125_v50  ;;  %22772 = vmatprep.mubr.f32.mxu0 %v39753_v14  ;;  %v37186_v34 = vpop.f32.mrf.mxu1 }
 0x731   :  { %24871 = vrot.lane.b32.xlu1 %v36090_v41, %s32566_s10  ;;  %22667 = vmatprep.subr.mxu1 %v22607_v25  ;;  %v18316_v35 = vpop.f32.mrf.mxu0 }
 0x732   :  { %25430 = vrot.lane.b32.xlu0 %v36044_v19, %s32528_s30  ;;  %v18540_v59 = vadd.f32 %v18316_v35, %v17965_v26  ;;  %v18387_v25 = vpop.f32.mrf.mxu1 }
 0x733   :  { %v22582_v33 = vpop.permute.xlu1 %22581  ;;  %v18542_v58 = vadd.f32 %v18387_v25, %v17967_v45  ;;  %v37196_v1 = vpop.f32.mrf.mxu0 }
 0x734   :  { %v37188_v37 = vpop.permute.xlu0 %22593  ;;  %v22609_v29 = vsel %vm22605_vm11, %v22582_v33, %v37142_v13  ;;  %v22608_v60 = vsel %vm22605_vm11, %v37125_v50, %v22582_v33  ;;  %v37205_v16 = vpop.f32.mrf.mxu1 }
 0x735   :  { %25422 = vrot.lane.b32.xlu1 %v36053_v18, %s32528_s30  ;;  %22738 = vmatprep.subr.mxu0 %v22609_v29  ;;  %39786 = vst [vmem:[#allocation79_spill] sm:$0xff] %v37205_v16  ;;  %v18458_v50 = vpop.f32.mrf.mxu0 }
 0x736   :  { %25434 = vrot.lane.b32.xlu0 %v36056_v22, %s32528_s30  ;;  %22739 = vmatpush1.msra.mxu0 %v22608_v60  ;;  %v18544_v33 = vadd.f32 %v18458_v50, %v17969_v17  ;;  %v18529_v29 = vpop.f32.mrf.mxu1 }
 0x737   :  { %v22576_v35 = vpop.permute.xlu1 %22575  ;;  %32295 = vmatmul.mubr.msk.f32.vlgmr.msra.gmra.mxu0 %vm117_vm1, %v37203_v32  ;;  %v18546_v60 = vadd.f32 %v18529_v29, %v17971_v5  ;;  %v37215_v25 = vpop.f32.mrf.mxu0  ;;  %v22610_v29 = vsel %vm22605_vm11, %v37142_v13, %v37159_v47 }
 0x738   :  { %v37209_v26 = vpop.permute.xlu0 %22597  ;;  %v22606_v45 = vsel %vm22605_vm11, %v22576_v35, %v22578_v10  ;;  %22914 = vmatprep.mubr.f32.mxu0 %v39753_v14  ;;  %39787 = vst [vmem:[#allocation81_spill] sm:$0xff] %v37215_v25  ;;  %v37221_v9 = vpop.f32.mrf.mxu1 }
 0x739   :  { %25420 = vrot.lane.b32.xlu1 %v36041_v56, %s32528_s30  ;;  %22668 = vmatpush1.msra.mxu1 %v22606_v45  ;;  %39788 = vst [vmem:[#allocation80_spill] sm:$0xff] %v37221_v9  ;;  %v18678_v17 = vpop.f32.mrf.mxu0 }
 0x73a   :  { %25438 = vrot.lane.b32.xlu0 %v36068_v12, %s32528_s30  ;;  %32294 = vmatmul.mubr.msk.f32.vlgmr.msra.gmra.mxu1 %vm117_vm1, %v37203_v32  ;;  %v19109_v5 = vadd.f32 %v18678_v17, %v18534_v51  ;;  %v18749_v45 = vpop.f32.mrf.mxu1 }
 0x73b   :  { %v22588_v10 = vpop.permute.xlu1 %22587  ;;  %22843 = vmatprep.mubr.f32.mxu1 %v39753_v14  ;;  %v19111_v46 = vadd.f32 %v18749_v45, %v18536_v49  ;;  %v37233_v9 = vpop.f32.mrf.mxu0 }
 0x73c   :  { %v37224_v35 = vpop.permute.xlu0 %22601  ;;  %v22611_v50 = vsel %vm22605_vm11, %v37159_v47, %v22588_v10  ;;  %v37237_v25 = vpop.f32.mrf.mxu1  ;;  %v22612_v49 = vsel %vm22605_vm11, %v22588_v10, %v37175_v8 }
 0x73d   :  { %25428 = vrot.lane.b32.xlu1 %v36087_v54, %s32528_s30  ;;  %22809 = vmatprep.subr.mxu1 %v22611_v50  ;;  %v18820_v51 = vpop.f32.mrf.mxu0 }
 0x73e   :  { %25442 = vrot.lane.b32.xlu0 %v36079_v53, %s32528_s30  ;;  %22810 = vmatpush1.msra.mxu1 %v22610_v29  ;;  %v19113_v13 = vadd.f32 %v18820_v51, %v18538_v0  ;;  %v18891_v47 = vpop.f32.mrf.mxu1 }
 0x73f   :  { %v22592_v6 = vpop.permute.xlu1 %22591  ;;  %32296 = vmatmul.mubr.msk.f32.vlgmr.msra.gmra.mxu1 %vm117_vm1, %v37203_v32  ;;  %v19115_v45 = vadd.f32 %v18891_v47, %v18540_v59  ;;  %v37250_v29 = vpop.f32.mrf.mxu0 }
 0x740   :  { %v37241_v17 = vpop.permute.xlu0 %23152  ;;  %v22613_v50 = vsel %vm22605_vm11, %v37175_v8, %v22592_v6  ;;  %22985 = vmatprep.mubr.f32.mxu1 %v39753_v14  ;;  %39789 = vst [vmem:[#allocation83_spill] sm:$0xff] %v37250_v29  ;;  %v37254_v16 = vpop.f32.mrf.mxu1  ;;  %v22614_v10 = vsel %vm22605_vm11, %v22592_v6, %v37188_v37 }
 0x741   :  { %25432 = vrot.lane.b32.xlu1 %v36098_v24, %s32528_s30  ;;  %22880 = vmatprep.subr.mxu0 %v22613_v50  ;;  %39790 = vst [vmem:[#allocation82_spill] sm:$0xff] %v37254_v16  ;;  %v18962_v0 = vpop.f32.mrf.mxu0 }
 0x742   :  { %25446 = vrot.lane.b32.xlu0 %v36090_v41, %s32528_s30  ;;  %22881 = vmatpush1.msra.mxu0 %v22612_v49  ;;  %v37261_v59 = vadd.f32 %v18962_v0, %v18542_v58  ;;  %v19033_v8 = vpop.f32.mrf.mxu1 }
 0x743   :  { %v22596_v30 = vpop.permute.xlu1 %22595  ;;  %32297 = vmatmul.mubr.msk.f32.vlgmr.msra.gmra.mxu0 %vm117_vm1, %v37203_v32  ;;  %v37267_v47 = vadd.f32 %v19033_v8, %v18544_v33  ;;  %v37269_v49 = vpop.f32.mrf.mxu0 }
 0x744   :  { %v23151_v51 = vpop.permute.xlu0 %23150  ;;  %v22615_v50 = vsel %vm22605_vm11, %v37188_v37, %v22596_v30  ;;  %23056 = vmatprep.mubr.f32.mxu0 %v39753_v14  ;;  %39791 = vst [vmem:[#allocation84_spill] sm:$0xff] %v37269_v49  ;;  %v37273_v16 = vpop.f32.mrf.mxu1 }
 0x745   :  { %25436 = vrot.lane.b32.xlu1 %v36106_v23, %s32528_s30  ;;  %22951 = vmatprep.subr.mxu1 %v22615_v50  ;;  %39792 = vst [vmem:[#allocation85_spill] sm:$0xff] %v37273_v16  ;;  %v19104_v0 = vpop.f32.mrf.mxu0  ;;  %v22616_v50 = vsel %vm22605_vm11, %v22596_v30, %v37209_v26 }
 0x746   :  { %25996 = vrot.lane.b32.xlu0 %v36053_v18, %s32529_s7  ;;  %22952 = vmatpush1.msra.mxu1 %v22614_v10  ;;  %v37282_v6 = vadd.f32 %v19104_v0, %v18546_v60  ;;  %v19253_v33 = vpop.f32.mrf.mxu1 }
 0x747   :  { %v22600_v58 = vpop.permute.xlu1 %22599  ;;  %32298 = vmatmul.mubr.msk.f32.vlgmr.msra.gmra.mxu1 %vm117_vm1, %v37203_v32  ;;  %v37288_v8 = vadd.f32 %v19253_v33, %v19109_v5  ;;  %v37290_v10 = vpop.f32.mrf.mxu0 }
 0x748   :  { %v37277_v21 = vpop.permute.xlu0 %23158  ;;  %v22617_v37 = vsel %vm22605_vm11, %v37209_v26, %v22600_v58  ;;  %23127 = vmatprep.mubr.f32.mxu1 %v39753_v14  ;;  %39793 = vst [vmem:[#allocation86_spill] sm:$0xff] %v37290_v10  ;;  %v37294_v16 = vpop.f32.mrf.mxu1  ;;  %v22618_v5 = vsel %vm22605_vm11, %v22600_v58, %v37224_v35 }
 0x749   :  { %25440 = vrot.lane.b32.xlu1 %v36113_v48, %s32528_s30  ;;  %23022 = vmatprep.subr.mxu0 %v22617_v37  ;;  %v19324_v0 = vpop.f32.mrf.mxu0 }
 0x74a   :  { %26000 = vrot.lane.b32.xlu0 %v36076_v43, %s32529_s7  ;;  %23023 = vmatpush1.msra.mxu0 %v22616_v50  ;;  %v37301_v30 = vadd.f32 %v19324_v0, %v19111_v46 }
 0x74b   :  { %v22604_v60 = vpop.permute.xlu1 %22603  ;;  %32299 = vmatmul.mubr.msk.f32.vlgmr.msra.gmra.mxu0 %vm117_vm1, %v37203_v32  ;;  %v19395_v26 = vpop.f32.mrf.mxu1 }
 0x74c   :  { %v23163_v49 = vpop.permute.xlu0 %23162  ;;  %v22619_v37 = vsel %vm22605_vm11, %v37224_v35, %v22604_v60  ;;  %23276 = vmatprep.mubr.f32.mxu0 %v39753_v14  ;;  %v37307_v33 = vadd.f32 %v19395_v26, %v19113_v13  ;;  %v37309_v50 = vpop.f32.mrf.mxu0  ;;  %v37322_v13 = vld [vmem:[%s39387_s3 + $0x60] sm:$0xff]  ;;  %v23181_v26 = vsel %vm23180_vm14, %v23151_v51, %v37241_v17 }
 0x74d   :  { %25444 = vrot.lane.b32.xlu1 %v36120_v57, %s32528_s30  ;;  %23093 = vmatprep.subr.mxu1 %v22619_v37  ;;  %39794 = vst [vmem:[#allocation87_spill] sm:$0xff] %v37309_v50  ;;  %v37313_v60 = vpop.f32.mrf.mxu1 }
 0x74e   :  { %25994 = vrot.lane.b32.xlu0 %v36041_v56, %s32529_s7  ;;  %23094 = vmatpush1.msra.mxu1 %v22618_v5  ;;  %39795 = vst [vmem:[#allocation88_spill] sm:$0xff] %v37313_v60 }
 0x74f   :  { %v23155_v46 = vpop.permute.xlu1 %23154  ;;  %32300 = vmatmul.mubr.msk.f32.vlgmr.msra.gmra.mxu1 %vm117_vm1, %v37203_v32  ;;  %v19466_v0 = vpop.f32.mrf.mxu0 }
 0x750   :  { %v23167_v37 = vpop.permute.xlu0 %23166  ;;  %v23182_v35 = vsel %vm23180_vm14, %v37241_v17, %v23155_v46  ;;  %23347 = vmatprep.mubr.f32.mxu1 %v39753_v14  ;;  %v37325_v58 = vadd.f32 %v19466_v0, %v19115_v45 }
 0x751   :  { %25448 = vrot.lane.b32.xlu1 %v39753_v14, %s32528_s30  ;;  %23242 = vmatprep.subr.mxu0 %v23182_v35  ;;  %v37333_v32 = vpop.f32.mrf.mxu0  ;;  %s32567_s30 = smov 39  }
 0x752   :  { %26006 = vrot.lane.b32.xlu0 %v36098_v24, %s32529_s7  ;;  %23243 = vmatpush1.msra.mxu0 %v23181_v26  ;;  %39796 = vst [vmem:[#allocation89_spill] sm:$0xff] %v37333_v32 }
 0x753   :  { %v23157_v5 = vpop.permute.xlu1 %23156  ;;  %32302 = vmatmul.mubr.msk.f32.vlgmr.msra.gmra.mxu0 %vm117_vm1, %v37322_v13  ;;  %v19537_v10 = vpop.f32.mrf.mxu1 }
 0x754   :  { %v23171_v45 = vpop.permute.xlu0 %23170  ;;  %v23184_v0 = vsel %vm23180_vm14, %v23157_v5, %v37277_v21  ;;  %v23183_v17 = vsel %vm23180_vm14, %v23155_v46, %v23157_v5  ;;  %23418 = vmatprep.mubr.f32.mxu0 %v39753_v14  ;;  %v37342_v51 = vadd.f32 %v19537_v10, %v37261_v59 }
 0x755   :  { %25998 = vrot.lane.b32.xlu1 %v36065_v44, %s32529_s7  ;;  %23313 = vmatprep.subr.mxu1 %v23184_v0  ;;  %v37348_v35 = vpop.f32.mrf.mxu1 }
 0x756   :  { %26010 = vrot.lane.b32.xlu0 %v36106_v23, %s32529_s7  ;;  %23314 = vmatpush1.msra.mxu1 %v23183_v17  ;;  %39797 = vst [vmem:[#allocation91_spill] sm:$0xff] %v37348_v35 }
 0x757   :  { %v23161_v26 = vpop.permute.xlu1 %23160  ;;  %32303 = vmatmul.mubr.msk.f32.vlgmr.msra.gmra.mxu1 %vm117_vm1, %v37322_v13  ;;  %v19608_v46 = vpop.f32.mrf.mxu0 }
 0x758   :  { %v23175_v5 = vpop.permute.xlu0 %23174  ;;  %v23186_v32 = vsel %vm23180_vm14, %v23161_v26, %v23163_v49  ;;  %v23185_v59 = vsel %vm23180_vm14, %v37277_v21, %v23161_v26  ;;  %23489 = vmatprep.mubr.f32.mxu1 %v39753_v14  ;;  %v37357_v10 = vadd.f32 %v19608_v46, %v37267_v47 }
 0x759   :  { %26002 = vrot.lane.b32.xlu1 %v36087_v54, %s32529_s7  ;;  %23384 = vmatprep.subr.mxu0 %v23186_v32  ;;  %v37363_v0 = vpop.f32.mrf.mxu0 }
 0x75a   :  { %26014 = vrot.lane.b32.xlu0 %v36113_v48, %s32529_s7  ;;  %23385 = vmatpush1.msra.mxu0 %v23185_v59  ;;  %39798 = vst [vmem:[#allocation90_spill] sm:$0xff] %v37363_v0 }
 0x75b   :  { %v23165_v17 = vpop.permute.xlu1 %23164  ;;  %32304 = vmatmul.mubr.msk.f32.vlgmr.msra.gmra.mxu0 %vm117_vm1, %v37322_v13  ;;  %v19679_v21 = vpop.f32.mrf.mxu1 }
 0x75c   :  { %v23179_v26 = vpop.permute.xlu0 %23178  ;;  %v23188_v35 = vsel %vm23180_vm14, %v23165_v17, %v23167_v37  ;;  %v23187_v47 = vsel %vm23180_vm14, %v23163_v49, %v23165_v17  ;;  %23560 = vmatprep.mubr.f32.mxu0 %v39753_v14  ;;  %v37371_v32 = vadd.f32 %v19679_v21, %v37282_v6 }
 0x75d   :  { %26004 = vrot.lane.b32.xlu1 %v36044_v19, %s32529_s7  ;;  %23455 = vmatprep.subr.mxu1 %v23188_v35  ;;  %v37377_v46 = vpop.f32.mrf.mxu1 }
 0x75e   :  { %26018 = vrot.lane.b32.xlu0 %v36120_v57, %s32529_s7  ;;  %23456 = vmatpush1.msra.mxu1 %v23187_v47  ;;  %39799 = vst [vmem:[#allocation92_spill] sm:$0xff] %v37377_v46 }
 0x75f   :  { %v23169_v59 = vpop.permute.xlu1 %23168  ;;  %32305 = vmatmul.mubr.msk.f32.vlgmr.msra.gmra.mxu1 %vm117_vm1, %v37322_v13  ;;  %v19828_v49 = vpop.f32.mrf.mxu0 }
 0x760   :  { %v37381_v17 = vpop.permute.xlu0 %24275  ;;  %v23190_v6 = vsel %vm23180_vm14, %v23169_v59, %v23171_v45  ;;  %v23189_v21 = vsel %vm23180_vm14, %v23167_v37, %v23169_v59  ;;  %23631 = vmatprep.mubr.f32.mxu1 %v39753_v14  ;;  %v37387_v35 = vadd.f32 %v19828_v49, %v37288_v8 }
 0x761   :  { %26008 = vrot.lane.b32.xlu1 %v36056_v22, %s32529_s7  ;;  %23526 = vmatprep.subr.mxu0 %v23190_v6  ;;  %v37393_v47 = vpop.f32.mrf.mxu0 }
 0x762   :  { %26022 = vrot.lane.b32.xlu0 %v39753_v14, %s32529_s7  ;;  %23527 = vmatpush1.msra.mxu0 %v23189_v21  ;;  %39800 = vst [vmem:[#allocation93_spill] sm:$0xff] %v37393_v47 }
 0x763   :  { %v23173_v46 = vpop.permute.xlu1 %23172  ;;  %32306 = vmatmul.mubr.msk.f32.vlgmr.msra.gmra.mxu0 %vm117_vm1, %v37322_v13  ;;  %v19899_v37 = vpop.f32.mrf.mxu1 }
 0x764   :  { %v37397_v59 = vpop.permute.xlu0 %24277  ;;  %v23192_v8 = vsel %vm23180_vm14, %v23173_v46, %v23175_v5  ;;  %v23191_v49 = vsel %vm23180_vm14, %v23171_v45, %v23173_v46  ;;  %23702 = vmatprep.mubr.f32.mxu0 %v39753_v14  ;;  %v37403_v6 = vadd.f32 %v19899_v37, %v37301_v30 }
 0x765   :  { %26012 = vrot.lane.b32.xlu1 %v36068_v12, %s32529_s7  ;;  %23597 = vmatprep.subr.mxu1 %v23192_v8  ;;  %v37409_v21 = vpop.f32.mrf.mxu1 }
 0x766   :  { %26572 = vrot.lane.b32.xlu0 %v36065_v44, %s32567_s30  ;;  %23598 = vmatpush1.msra.mxu1 %v23191_v49  ;;  %39801 = vst [vmem:[#allocation94_spill] sm:$0xff] %v37409_v21  ;;  %v32309_v49 = vld [vmem:[%s39387_s3 + $0x68] sm:$0xff] }
 0x767   :  { %32307 = vmatmul.mubr.msk.f32.vlgmr.msra.gmra.mxu1 %vm117_vm1, %v37322_v13  ;;  %23758 = vmatprep.subr.mxu1 %v36053_v18  ;;  %v23177_v45 = vpop.permute.xlu1 %23176  ;;  %v19970_v46 = vpop.f32.mrf.mxu0 }
 0x768   :  { %v37414_v30 = vpop.permute.xlu0 %24281  ;;  %23759 = vmatpush1.msra.mxu1 %v36041_v56  ;;  %v23194_v37 = vsel %vm23180_vm14, %v23177_v45, %v23179_v26  ;;  %v23193_v8 = vsel %vm23180_vm14, %v23175_v5, %v23177_v45  ;;  %23792 = vmatprep.mubr.f32.mxu1 %v39753_v14  ;;  %v37424_v0 = vadd.f32 %v19970_v46, %v37307_v33 }
 0x769   :  { %26016 = vrot.lane.b32.xlu1 %v36079_v53, %s32529_s7  ;;  %23668 = vmatprep.subr.mxu0 %v23194_v37  ;;  %v37431_v26 = vpop.f32.mrf.mxu0 }
 0x76a   :  { %26574 = vrot.lane.b32.xlu0 %v36076_v43, %s32567_s30  ;;  %23900 = vmatprep.subr.mxu1 %v36044_v19  ;;  %39802 = vst [vmem:[#allocation95_spill] sm:$0xff] %v37431_v26 }
 0x76b   :  { %23669 = vmatpush1.msra.mxu0 %v23193_v8  ;;  %32310 = vmatmul.mubr.msk.f32.vlgmr.msra.gmra.mxu1 %vm117_vm1, %v32309_v49  ;;  %v24274_v5 = vpop.permute.xlu1 %24273  ;;  %v20041_v45 = vpop.f32.mrf.mxu1 }
 0x76c   :  { %v37434_v21 = vpop.permute.xlu0 %24285  ;;  %32308 = vmatmul.mubr.msk.f32.vlgmr.msra.gmra.mxu0 %vm117_vm1, %v37322_v13  ;;  %23829 = vmatprep.subr.mxu0 %v36076_v43  ;;  %v37440_v33 = vadd.f32 %v20041_v45, %v37325_v58  ;;  %v24302_v60 = vsel %vm88_vm0, %v24274_v5, %v37381_v17 }
 0x76d   :  { %23901 = vmatpush1.msra.mxu1 %v36087_v54  ;;  %23830 = vmatpush1.msra.mxu0 %v36065_v44  ;;  %v37447_v46 = vpop.f32.mrf.mxu1 }
 0x76e   :  { %24042 = vmatprep.subr.mxu1 %v36068_v12  ;;  %26578 = vrot.lane.b32.xlu0 %v36044_v19, %s32567_s30  ;;  %39803 = vst [vmem:[#allocation96_spill] sm:$0xff] %v37447_v46 }
 0x76f   :  { %26020 = vrot.lane.b32.xlu1 %v36090_v41, %s32529_s7  ;;  %23971 = vmatprep.subr.mxu0 %v36056_v22  ;;  %v24272_v13 = vpop.permute.xlu1 %24271  ;;  %v20112_v37 = vpop.f32.mrf.mxu0 }
 0x770   :  { %23863 = vmatprep.mubr.f32.mxu0 %v39753_v14  ;;  %23934 = vmatprep.mubr.f32.mxu1 %v39753_v14  ;;  %v37454_v58 = vpop.permute.xlu0 %24289  ;;  %v37457_v8 = vadd.f32 %v20112_v37, %v37342_v51  ;;  %v24301_v50 = vsel %vm88_vm0, %v24272_v13, %v24274_v5  ;;  %v37512_v5 = vld [vmem:[%s39387_s3 + $0x70] sm:$0xff] }
 0x771   :  { %32311 = vmatmul.mubr.msk.f32.vlgmr.msra.gmra.mxu0 %vm117_vm1, %v32309_v49  ;;  %32312 = vmatmul.mubr.msk.f32.vlgmr.msra.gmra.mxu1 %vm117_vm1, %v32309_v49  ;;  %v37463_v45 = vpop.f32.mrf.mxu0 }
 0x772   :  { %23972 = vmatpush1.msra.mxu0 %v36098_v24  ;;  %24043 = vmatpush1.msra.mxu1 %v36106_v23  ;;  %39804 = vst [vmem:[#allocation97_spill] sm:$0xff] %v37463_v45 }
 0x773   :  { %24113 = vmatprep.subr.mxu0 %v36079_v53  ;;  %24184 = vmatprep.subr.mxu1 %v36090_v41  ;;  %v24280_v46 = vpop.permute.xlu1 %24279  ;;  %v20183_v26 = vpop.f32.mrf.mxu1 }
 0x774   :  { %26582 = vrot.lane.b32.xlu0 %v36056_v22, %s32567_s30  ;;  %26570 = vrot.lane.b32.xlu1 %v36053_v18, %s32567_s30  ;;  %v37471_v51 = vpop.permute.xlu0 %24293  ;;  %v37474_v37 = vadd.f32 %v20183_v26, %v37357_v10  ;;  %v24304_v45 = vsel %vm88_vm0, %v37397_v59, %v24280_v46 }
 0x775   :  { %24005 = vmatprep.mubr.f32.mxu0 %v39753_v14  ;;  %24076 = vmatprep.mubr.f32.mxu1 %v39753_v14 }
 0x776   :  { %32313 = vmatmul.mubr.msk.f32.vlgmr.msra.gmra.mxu0 %vm117_vm1, %v32309_v49  ;;  %32314 = vmatmul.mubr.msk.f32.vlgmr.msra.gmra.mxu1 %vm117_vm1, %v32309_v49 }
 0x777   :  { %24114 = vmatpush1.msra.mxu0 %v36113_v48  ;;  %24185 = vmatpush1.msra.mxu1 %v36120_v57  ;;  %v24284_v10 = vpop.permute.xlu1 %24283  ;;  %v20254_v26 = vpop.f32.mrf.mxu0 }
 0x778   :  { %24362 = vmatprep.subr.mxu0 %v24302_v60  ;;  %26586 = vrot.lane.b32.xlu0 %v36068_v12, %s32567_s30  ;;  %v37488_v20 = vpop.permute.xlu0 %24297  ;;  %v37491_v47 = vadd.f32 %v20254_v26, %v37371_v32  ;;  %v24303_v60 = vsel %vm88_vm0, %v37381_v17, %v37397_v59  ;;  %v24306_v32 = vsel %vm88_vm0, %v37414_v30, %v24284_v10 }
 0x779   :  { %26568 = vrot.lane.b32.xlu1 %v36041_v56, %s32567_s30  ;;  %24433 = vmatprep.subr.mxu1 %v24304_v45  ;;  %v37505_v29 = vpop.f32.mrf.mxu0  ;;  %v24305_v59 = vsel %vm88_vm0, %v24280_v46, %v37414_v30  ;;  %v24307_v30 = vsel %vm88_vm0, %v24284_v10, %v37434_v21 }
 0x77a   :  { %24147 = vmatprep.mubr.f32.mxu0 %v39753_v14  ;;  %24218 = vmatprep.mubr.f32.mxu1 %v39753_v14  ;;  %39805 = vst [vmem:[#allocation98_spill] sm:$0xff] %v37505_v29 }
 0x77b   :  { %32315 = vmatmul.mubr.msk.f32.vlgmr.msra.gmra.mxu0 %vm117_vm1, %v32309_v49  ;;  %32316 = vmatmul.mubr.msk.f32.vlgmr.msra.gmra.mxu1 %vm117_vm1, %v32309_v49  ;;  %v24288_v26 = vpop.permute.xlu1 %24287 }
 0x77c   :  { %24363 = vmatpush1.msra.mxu0 %v24301_v50  ;;  %24434 = vmatpush1.msra.mxu1 %v24303_v60  ;;  %v37507_v45 = vpop.permute.xlu0 %24847  ;;  %v24308_v17 = vsel %vm88_vm0, %v37434_v21, %v24288_v26  ;;  %v37521_v50 = vpop.f32.mrf.mxu1 }
 0x77d   :  { %26590 = vrot.lane.b32.xlu0 %v36079_v53, %s32567_s30  ;;  %26576 = vrot.lane.b32.xlu1 %v36087_v54, %s32567_s30  ;;  %39806 = vst [vmem:[#allocation99_spill] sm:$0xff] %v37521_v50 }
 0x77e   :  { %24504 = vmatprep.subr.mxu0 %v24306_v32  ;;  %24396 = vmatprep.mubr.f32.mxu0 %v39753_v14 }
 0x77f   :  { %32318 = vmatmul.mubr.msk.f32.vlgmr.msra.gmra.mxu0 %vm117_vm1, %v37512_v5  ;;  %24467 = vmatprep.mubr.f32.mxu1 %v39753_v14  ;;  %v24292_v49 = vpop.permute.xlu1 %24291  ;;  %v20474_v13 = vpop.f32.mrf.mxu0 }
 0x780   :  { %24505 = vmatpush1.msra.mxu0 %v24305_v59  ;;  %24575 = vmatprep.subr.mxu1 %v24308_v17  ;;  %v37528_v60 = vpop.permute.xlu0 %24851  ;;  %v24310_v32 = vsel %vm88_vm0, %v37454_v58, %v24292_v49  ;;  %v37533_v29 = vadd.f32 %v20474_v13, %v37403_v6  ;;  %v24311_v10 = vsel %vm88_vm0, %v24292_v49, %v37471_v51 }
 0x781   :  { %26594 = vrot.lane.b32.xlu0 %v36090_v41, %s32567_s30  ;;  %26580 = vrot.lane.b32.xlu1 %v36098_v24, %s32567_s30  ;;  %v37560_v21 = vpop.f32.mrf.mxu0 }
 0x782   :  { %32319 = vmatmul.mubr.msk.f32.vlgmr.msra.gmra.mxu1 %vm117_vm1, %v37512_v5  ;;  %24538 = vmatprep.mubr.f32.mxu0 %v39753_v14  ;;  %v20403_v46 = vpop.f32.mrf.mxu1 }
 0x783   :  { %24576 = vmatpush1.msra.mxu1 %v24307_v30  ;;  %24646 = vmatprep.subr.mxu0 %v24310_v32  ;;  %v24296_v17 = vpop.permute.xlu1 %24295  ;;  %v37545_v6 = vadd.f32 %v20403_v46, %v37387_v35  ;;  %v24309_v35 = vsel %vm88_vm0, %v24288_v26, %v37454_v58 }
 0x784   :  { %32320 = vmatmul.mubr.msk.f32.vlgmr.msra.gmra.mxu0 %vm117_vm1, %v37512_v5  ;;  %v24846_v59 = vpop.permute.xlu0 %24845  ;;  %24609 = vmatprep.mubr.f32.mxu1 %v39753_v14  ;;  %v24312_v13 = vsel %vm88_vm0, %v37471_v51, %v24296_v17  ;;  %v37552_v50 = vpop.f32.mrf.mxu1  ;;  %v24313_v51 = vsel %vm88_vm0, %v24296_v17, %v37488_v20 }
 0x785   :  { %39807 = vst [vmem:[#allocation100_spill] sm:$0xff] %v37552_v50  ;;  %27145 = vrot.lane.b32.xlu0 %v36053_v18, %s32568_s16  ;;  %26584 = vrot.lane.b32.xlu1 %v36106_v23, %s32567_s30  ;;  %v24876_v17 = vsel %vm24875_vm15, %v24846_v59, %v37507_v45 }
 0x786   :  { %24647 = vmatpush1.msra.mxu0 %v24309_v35  ;;  %24717 = vmatprep.subr.mxu1 %v24312_v13 }
 0x787   :  { %32321 = vmatmul.mubr.msk.f32.vlgmr.msra.gmra.mxu1 %vm117_vm1, %v37512_v5  ;;  %v24300_v32 = vpop.permute.xlu1 %24299  ;;  %24680 = vmatprep.mubr.f32.mxu0 %v39753_v14  ;;  %v20545_v30 = vpop.f32.mrf.mxu1 }
 0x788   :  { %24718 = vmatpush1.msra.mxu1 %v24311_v10  ;;  %v24858_v46 = vpop.permute.xlu0 %24857  ;;  %v24314_v50 = vsel %vm88_vm0, %v37488_v20, %v24300_v32  ;;  %32322 = vmatmul.mubr.msk.f32.vlgmr.msra.gmra.mxu0 %vm117_vm1, %v37512_v5  ;;  %v37572_v58 = vadd.f32 %v20545_v30, %v37424_v0  ;;  %v37599_v20 = vld [vmem:[%s39387_s3 + $0x78] sm:$0xff]  ;;  %vm26598_vm0 = vcmask 318464  }
 0x789   :  { %27149 = vrot.lane.b32.xlu0 %v36076_v43, %s32568_s16  ;;  %26588 = vrot.lane.b32.xlu1 %v36113_v48, %s32567_s30  ;;  %v37581_v26 = vpop.f32.mrf.mxu1 }
 0x78a   :  { %24788 = vmatprep.subr.mxu0 %v24314_v50  ;;  %24751 = vmatprep.mubr.f32.mxu1 %v39753_v14  ;;  %39808 = vst [vmem:[#allocation101_spill] sm:$0xff] %v37581_v26 }
 0x78b   :  { %24789 = vmatpush1.msra.mxu0 %v24313_v51  ;;  %32323 = vmatmul.mubr.msk.f32.vlgmr.msra.gmra.mxu1 %vm117_vm1, %v37512_v5  ;;  %v24850_v0 = vpop.permute.xlu1 %24849  ;;  %v20616_v49 = vpop.f32.mrf.mxu0 }
 0x78c   :  { %v24862_v13 = vpop.permute.xlu0 %24861  ;;  %v24877_v35 = vsel %vm24875_vm15, %v37507_v45, %v24850_v0  ;;  %24822 = vmatprep.mubr.f32.mxu0 %v39753_v14  ;;  %24971 = vmatprep.mubr.f32.mxu1 %v39753_v14  ;;  %v37590_v50 = vadd.f32 %v20616_v49, %v37440_v33 }
 0x78d   :  { %27143 = vrot.lane.b32.xlu0 %v36041_v56, %s32568_s16  ;;  %26592 = vrot.lane.b32.xlu1 %v36120_v57, %s32567_s30  ;;  %v37605_v33 = vpop.f32.mrf.mxu0 }
 0x78e   :  { %24937 = vmatprep.subr.mxu1 %v24877_v35  ;;  %32324 = vmatmul.mubr.msk.f32.vlgmr.msra.gmra.mxu0 %vm117_vm1, %v37512_v5  ;;  %39809 = vst [vmem:[#allocation102_spill] sm:$0xff] %v37605_v33  ;;  %v24878_v5 = vsel %vm24875_vm15, %v24850_v0, %v37528_v60 }
 0x78f   :  { %24938 = vmatpush1.msra.mxu1 %v24876_v17  ;;  %v24854_v10 = vpop.permute.xlu1 %24853  ;;  %25042 = vmatprep.mubr.f32.mxu0 %v39753_v14  ;;  %v20687_v32 = vpop.f32.mrf.mxu1 }
 0x790   :  { %v24866_v30 = vpop.permute.xlu0 %24865  ;;  %32326 = vmatmul.mubr.msk.f32.vlgmr.msra.gmra.mxu1 %vm117_vm1, %v37599_v20  ;;  %v24879_v51 = vsel %vm24875_vm15, %v37528_v60, %v24854_v10  ;;  %v37613_v45 = vadd.f32 %v20687_v32, %v37457_v8 }
 0x791   :  { %27155 = vrot.lane.b32.xlu0 %v36098_v24, %s32568_s16  ;;  %26596 = vrot.lane.b32.xlu1 %v39753_v14, %s32567_s30  ;;  %v37622_v59 = vpop.f32.mrf.mxu1 }
 0x792   :  { %25008 = vmatprep.subr.mxu0 %v24879_v51  ;;  %25113 = vmatprep.mubr.f32.mxu1 %v39753_v14  ;;  %39810 = vst [vmem:[#allocation103_spill] sm:$0xff] %v37622_v59 }
 0x793   :  { %25009 = vmatpush1.msra.mxu0 %v24878_v5  ;;  %v24856_v49 = vpop.permute.xlu1 %24855  ;;  %v20758_v35 = vpop.f32.mrf.mxu0 }
 0x794   :  { %v24870_v17 = vpop.permute.xlu0 %24869  ;;  %32327 = vmatmul.mubr.msk.f32.vlgmr.msra.gmra.mxu0 %vm117_vm1, %v37599_v20  ;;  %v24881_v8 = vsel %vm24875_vm15, %v24856_v49, %v24858_v46  ;;  %v24880_v32 = vsel %vm24875_vm15, %v24854_v10, %v24856_v49  ;;  %v37629_v51 = vadd.f32 %v20758_v35, %v37474_v37 }
 0x795   :  { %27159 = vrot.lane.b32.xlu0 %v36106_v23, %s32568_s16  ;;  %27147 = vrot.lane.b32.xlu1 %v36065_v44, %s32568_s16  ;;  %v37636_v60 = vpop.f32.mrf.mxu0 }
 0x796   :  { %25079 = vmatprep.subr.mxu1 %v24881_v8  ;;  %25184 = vmatprep.mubr.f32.mxu0 %v39753_v14  ;;  %39811 = vst [vmem:[#allocation104_spill] sm:$0xff] %v37636_v60 }
 0x797   :  { %25080 = vmatpush1.msra.mxu1 %v24880_v32  ;;  %v24860_v0 = vpop.permute.xlu1 %24859  ;;  %v20829_v5 = vpop.f32.mrf.mxu1 }
 0x798   :  { %v24874_v59 = vpop.permute.xlu0 %24873  ;;  %32328 = vmatmul.mubr.msk.f32.vlgmr.msra.gmra.mxu1 %vm117_vm1, %v37599_v20  ;;  %v24883_v37 = vsel %vm24875_vm15, %v24860_v0, %v24862_v13  ;;  %v24882_v10 = vsel %vm24875_vm15, %v24858_v46, %v24860_v0  ;;  %v37643_v49 = vadd.f32 %v20829_v5, %v37491_v47 }
 0x799   :  { %27163 = vrot.lane.b32.xlu0 %v36113_v48, %s32568_s16  ;;  %27151 = vrot.lane.b32.xlu1 %v36087_v54, %s32568_s16  ;;  %v37650_v35 = vpop.f32.mrf.mxu1 }
 0x79a   :  { %25150 = vmatprep.subr.mxu0 %v24883_v37  ;;  %25255 = vmatprep.mubr.f32.mxu1 %v39753_v14  ;;  %39812 = vst [vmem:[#allocation105_spill] sm:$0xff] %v37650_v35 }
 0x79b   :  { %25151 = vmatpush1.msra.mxu0 %v24882_v10  ;;  %v24864_v8 = vpop.permute.xlu1 %24863  ;;  %v20978_v32 = vpop.f32.mrf.mxu0 }
 0x79c   :  { %v37652_v60 = vpop.permute.xlu0 %25424  ;;  %32329 = vmatmul.mubr.msk.f32.vlgmr.msra.gmra.mxu0 %vm117_vm1, %v37599_v20  ;;  %v24885_v47 = vsel %vm24875_vm15, %v24864_v8, %v24866_v30  ;;  %v24884_v46 = vsel %vm24875_vm15, %v24862_v13, %v24864_v8  ;;  %v37659_v0 = vadd.f32 %v20978_v32, %v37545_v6 }
 0x79d   :  { %27167 = vrot.lane.b32.xlu0 %v36120_v57, %s32568_s16  ;;  %27153 = vrot.lane.b32.xlu1 %v36044_v19, %s32568_s16  ;;  %v37666_v5 = vpop.f32.mrf.mxu0 }
 0x79e   :  { %25221 = vmatprep.subr.mxu1 %v24885_v47  ;;  %25326 = vmatprep.mubr.f32.mxu0 %v39753_v14 }
 0x79f   :  { %25222 = vmatpush1.msra.mxu1 %v24884_v46  ;;  %v24868_v37 = vpop.permute.xlu1 %24867  ;;  %v21049_v10 = vpop.f32.mrf.mxu1 }
 0x7a0   :  { %v25427_v35 = vpop.permute.xlu0 %25426  ;;  %32330 = vmatmul.mubr.msk.f32.vlgmr.msra.gmra.mxu1 %vm117_vm1, %v37599_v20  ;;  %v24887_v6 = vsel %vm24875_vm15, %v24868_v37, %v24870_v17  ;;  %v24886_v13 = vsel %vm24875_vm15, %v24866_v30, %v24868_v37  ;;  %v37673_v8 = vadd.f32 %v21049_v10, %v37533_v29 }
 0x7a1   :  { %27171 = vrot.lane.b32.xlu0 %v39753_v14, %s32568_s16  ;;  %27157 = vrot.lane.b32.xlu1 %v36056_v22, %s32568_s16  ;;  %v37680_v32 = vpop.f32.mrf.mxu1 }
 0x7a2   :  { %25292 = vmatprep.subr.mxu0 %v24887_v6  ;;  %25397 = vmatprep.mubr.f32.mxu1 %v39753_v14  ;;  %39813 = vst [vmem:[#allocation107_spill] sm:$0xff] %v37680_v32 }
 0x7a3   :  { %25293 = vmatpush1.msra.mxu0 %v24886_v13  ;;  %v24872_v47 = vpop.permute.xlu1 %24871  ;;  %v21120_v46 = vpop.f32.mrf.mxu0 }
 0x7a4   :  { %v25431_v33 = vpop.permute.xlu0 %25430  ;;  %32331 = vmatmul.mubr.msk.f32.vlgmr.msra.gmra.mxu0 %vm117_vm1, %v37599_v20  ;;  %v24889_v29 = vsel %vm24875_vm15, %v24872_v47, %v24874_v59  ;;  %v24888_v30 = vsel %vm24875_vm15, %v24870_v17, %v24872_v47  ;;  %v37687_v37 = vadd.f32 %v21120_v46, %v37572_v58 }
 0x7a5   :  { %27722 = vrot.lane.b32.xlu0 %v36065_v44, %s32569_s19  ;;  %27161 = vrot.lane.b32.xlu1 %v36068_v12, %s32568_s16  ;;  %v37694_v10 = vpop.f32.mrf.mxu0 }
 0x7a6   :  { %25363 = vmatprep.subr.mxu1 %v24889_v29  ;;  %25545 = vmatprep.mubr.f32.mxu0 %v39753_v14  ;;  %39814 = vst [vmem:[#allocation106_spill] sm:$0xff] %v37694_v10 }
 0x7a7   :  { %25364 = vmatpush1.msra.mxu1 %v24888_v30  ;;  %v25423_v6 = vpop.permute.xlu1 %25422  ;;  %v21191_v59 = vpop.f32.mrf.mxu1 }
 0x7a8   :  { %v25435_v13 = vpop.permute.xlu0 %25434  ;;  %32332 = vmatmul.mubr.msk.f32.vlgmr.msra.gmra.mxu1 %vm117_vm1, %v37599_v20  ;;  %v25451_v58 = vsel %vm1725_vm3, %v25423_v6, %v37652_v60  ;;  %v37701_v17 = vadd.f32 %v21191_v59, %v37590_v50  ;;  %v37714_v50 = vld [vmem:[%s39387_s3 + $0x80] sm:$0xff] }
 0x7a9   :  { %27724 = vrot.lane.b32.xlu0 %v36076_v43, %s32569_s19  ;;  %27165 = vrot.lane.b32.xlu1 %v36079_v53, %s32568_s16  ;;  %v37708_v47 = vpop.f32.mrf.mxu1 }
 0x7aa   :  { %25511 = vmatprep.subr.mxu0 %v25451_v58  ;;  %25616 = vmatprep.mubr.f32.mxu1 %v39753_v14  ;;  %39815 = vst [vmem:[#allocation108_spill] sm:$0xff] %v37708_v47 }
 0x7ab   :  { %v25421_v46 = vpop.permute.xlu1 %25420  ;;  %v21262_v29 = vpop.f32.mrf.mxu0 }
 0x7ac   :  { %v25439_v20 = vpop.permute.xlu0 %25438  ;;  %v25450_v30 = vsel %vm1725_vm3, %v25421_v46, %v25423_v6  ;;  %v37717_v59 = vadd.f32 %v21262_v29, %v37613_v45  ;;  %v25452_v29 = vsel %vm1725_vm3, %v37652_v60, %v25427_v35 }
 0x7ad   :  { %27728 = vrot.lane.b32.xlu0 %v36044_v19, %s32569_s19  ;;  %27169 = vrot.lane.b32.xlu1 %v36090_v41, %s32568_s16  ;;  %v37723_v58 = vpop.f32.mrf.mxu0 }
 0x7ae   :  { %25512 = vmatpush1.msra.mxu0 %v25450_v30  ;;  %39816 = vst [vmem:[#allocation109_spill] sm:$0xff] %v37723_v58 }
 0x7af   :  { %32334 = vmatmul.mubr.msk.f32.vlgmr.msra.gmra.mxu0 %vm117_vm1, %v37714_v50  ;;  %v25429_v6 = vpop.permute.xlu1 %25428  ;;  %v21333_v46 = vpop.f32.mrf.mxu1 }
 0x7b0   :  { %v25443_v47 = vpop.permute.xlu0 %25442  ;;  %v25453_v10 = vsel %vm1725_vm3, %v25427_v35, %v25429_v6  ;;  %25687 = vmatprep.mubr.f32.mxu0 %v39753_v14  ;;  %v37730_v45 = vadd.f32 %v21333_v46, %v37629_v51  ;;  %v25454_v60 = vsel %vm1725_vm3, %v25429_v6, %v25431_v33 }
 0x7b1   :  { %27732 = vrot.lane.b32.xlu0 %v36056_v22, %s32569_s19  ;;  %27720 = vrot.lane.b32.xlu1 %v36053_v18, %s32569_s19 }
 0x7b2   :  { %25582 = vmatprep.subr.mxu1 %v25453_v10 }
 0x7b3   :  { %25583 = vmatpush1.msra.mxu1 %v25452_v29  ;;  %v25433_v30 = vpop.permute.xlu1 %25432  ;;  %v21404_v58 = vpop.f32.mrf.mxu0 }
 0x7b4   :  { %v25447_v32 = vpop.permute.xlu0 %25446  ;;  %32335 = vmatmul.mubr.msk.f32.vlgmr.msra.gmra.mxu1 %vm117_vm1, %v37714_v50  ;;  %v25455_v51 = vsel %vm1725_vm3, %v25431_v33, %v25433_v30  ;;  %v37742_v46 = vadd.f32 %v21404_v58, %v37643_v49  ;;  %v25456_v33 = vsel %vm1725_vm3, %v25433_v30, %v25435_v13  ;;  %v37761_v58 = vpop.f32.mrf.mxu1 }
 0x7b5   :  { %27736 = vrot.lane.b32.xlu0 %v36068_v12, %s32569_s19  ;;  %27718 = vrot.lane.b32.xlu1 %v36041_v56, %s32569_s19  ;;  %v37750_v10 = vpop.f32.mrf.mxu0  ;;  %39818 = vst [vmem:[#allocation111_spill] sm:$0xff] %v37761_v58 }
 0x7b6   :  { %25653 = vmatprep.subr.mxu0 %v25455_v51  ;;  %25758 = vmatprep.mubr.f32.mxu1 %v39753_v14  ;;  %39817 = vst [vmem:[#allocation110_spill] sm:$0xff] %v37750_v10 }
 0x7b7   :  { %25654 = vmatpush1.msra.mxu0 %v25454_v60  ;;  %v25437_v35 = vpop.permute.xlu1 %25436 }
 0x7b8   :  { %v25997_v29 = vpop.permute.xlu0 %25996  ;;  %32336 = vmatmul.mubr.msk.f32.vlgmr.msra.gmra.mxu0 %vm117_vm1, %v37714_v50  ;;  %v25457_v49 = vsel %vm1725_vm3, %v25435_v13, %v25437_v35  ;;  %v25458_v13 = vsel %vm1725_vm3, %v25437_v35, %v25439_v20 }
 0x7b9   :  { %27740 = vrot.lane.b32.xlu0 %v36079_v53, %s32569_s19  ;;  %27726 = vrot.lane.b32.xlu1 %v36087_v54, %s32569_s19 }
 0x7ba   :  { %25724 = vmatprep.subr.mxu1 %v25457_v49  ;;  %25829 = vmatprep.mubr.f32.mxu0 %v39753_v14 }
 0x7bb   :  { %25725 = vmatpush1.msra.mxu1 %v25456_v33  ;;  %v25441_v6 = vpop.permute.xlu1 %25440  ;;  %v21624_v51 = vpop.f32.mrf.mxu0 }
 0x7bc   :  { %v26001_v60 = vpop.permute.xlu0 %26000  ;;  %32337 = vmatmul.mubr.msk.f32.vlgmr.msra.gmra.mxu1 %vm117_vm1, %v37714_v50  ;;  %v25459_v10 = vsel %vm1725_vm3, %v25439_v20, %v25441_v6  ;;  %v37767_v26 = vadd.f32 %v21624_v51, %v37673_v8  ;;  %v25460_v20 = vsel %vm1725_vm3, %v25441_v6, %v25443_v47 }
 0x7bd   :  { %27744 = vrot.lane.b32.xlu0 %v36090_v41, %s32569_s19  ;;  %27730 = vrot.lane.b32.xlu1 %v36098_v24, %s32569_s19 }
 0x7be   :  { %25795 = vmatprep.subr.mxu0 %v25459_v10  ;;  %25900 = vmatprep.mubr.f32.mxu1 %v39753_v14  ;;  %v21553_v30 = vpop.f32.mrf.mxu1 }
 0x7bf   :  { %25796 = vmatpush1.msra.mxu0 %v25458_v13  ;;  %v25445_v49 = vpop.permute.xlu1 %25444  ;;  %v37776_v33 = vadd.f32 %v21553_v30, %v37659_v0  ;;  %v37789_v0 = vpop.f32.mrf.mxu0 }
 0x7c0   :  { %v25995_v58 = vpop.permute.xlu0 %25994  ;;  %32338 = vmatmul.mubr.msk.f32.vlgmr.msra.gmra.mxu0 %vm117_vm1, %v37714_v50  ;;  %v25461_v8 = vsel %vm1725_vm3, %v25443_v47, %v25445_v49  ;;  %v37781_v51 = vpop.f32.mrf.mxu1  ;;  %39820 = vst [vmem:[#allocation119_spill] sm:$0xff] %v37789_v0  ;;  %v25462_v47 = vsel %vm1725_vm3, %v25445_v49, %v25447_v32 }
 0x7c1   :  { %39819 = vst [vmem:[#allocation112_spill] sm:$0xff] %v37781_v51  ;;  %28295 = vrot.lane.b32.xlu0 %v36053_v18, %s32570_s27  ;;  %27734 = vrot.lane.b32.xlu1 %v36106_v23, %s32569_s19  ;;  %v26024_v49 = vsel %vm2300_vm4, %v25995_v58, %v25997_v29 }
 0x7c2   :  { %25866 = vmatprep.subr.mxu1 %v25461_v8  ;;  %25971 = vmatprep.mubr.f32.mxu0 %v39753_v14 }
 0x7c3   :  { %25867 = vmatpush1.msra.mxu1 %v25460_v20  ;;  %v25449_v35 = vpop.permute.xlu1 %25448  ;;  %v21695_v10 = vpop.f32.mrf.mxu1 }
 0x7c4   :  { %v26007_v13 = vpop.permute.xlu0 %26006  ;;  %32339 = vmatmul.mubr.msk.f32.vlgmr.msra.gmra.mxu1 %vm117_vm1, %v37714_v50  ;;  %v25463_v30 = vsel %vm1725_vm3, %v25447_v32, %v25449_v35  ;;  %v37795_v51 = vadd.f32 %v21695_v10, %v37687_v37  ;;  %v37818_v32 = vld [vmem:[%s39387_s3 + $0x88] sm:$0xff]  ;;  %vm27173_vm3 = vcmask 310272  }
 0x7c5   :  { %28299 = vrot.lane.b32.xlu0 %v36076_v43, %s32570_s27  ;;  %27738 = vrot.lane.b32.xlu1 %v36113_v48, %s32569_s19  ;;  %v37803_v6 = vpop.f32.mrf.mxu1 }
 0x7c6   :  { %25937 = vmatprep.subr.mxu0 %v25463_v30  ;;  %26119 = vmatprep.mubr.f32.mxu1 %v39753_v14  ;;  %39821 = vst [vmem:[#allocation10_spill] sm:$0xff] %v37803_v6 }
 0x7c7   :  { %25938 = vmatpush1.msra.mxu0 %v25462_v47  ;;  %v25999_v8 = vpop.permute.xlu1 %25998  ;;  %v21766_v20 = vpop.f32.mrf.mxu0 }
 0x7c8   :  { %v26011_v35 = vpop.permute.xlu0 %26010  ;;  %32340 = vmatmul.mubr.msk.f32.vlgmr.msra.gmra.mxu0 %vm117_vm1, %v37714_v50  ;;  %v26025_v37 = vsel %vm2300_vm4, %v25997_v29, %v25999_v8  ;;  %v37809_v10 = vadd.f32 %v21766_v20, %v37701_v17  ;;  %v26026_v29 = vsel %vm2300_vm4, %v25999_v8, %v26001_v60 }
 0x7c9   :  { %28293 = vrot.lane.b32.xlu0 %v36041_v56, %s32570_s27  ;;  %27742 = vrot.lane.b32.xlu1 %v36120_v57, %s32569_s19  ;;  %v37822_v50 = vpop.f32.mrf.mxu0 }
 0x7ca   :  { %26085 = vmatprep.subr.mxu1 %v26025_v37  ;;  %26190 = vmatprep.mubr.f32.mxu0 %v39753_v14  ;;  %39822 = vst [vmem:[#allocation117_spill] sm:$0xff] %v37822_v50 }
 0x7cb   :  { %26086 = vmatpush1.msra.mxu1 %v26024_v49  ;;  %v26003_v17 = vpop.permute.xlu1 %26002  ;;  %v21837_v30 = vpop.f32.mrf.mxu1 }
 0x7cc   :  { %v26015_v47 = vpop.permute.xlu0 %26014  ;;  %32342 = vmatmul.mubr.msk.f32.vlgmr.msra.gmra.mxu1 %vm117_vm1, %v37818_v32  ;;  %v26027_v20 = vsel %vm2300_vm4, %v26001_v60, %v26003_v17  ;;  %v37828_v6 = vadd.f32 %v21837_v30, %v37717_v59 }
 0x7cd   :  { %28305 = vrot.lane.b32.xlu0 %v36098_v24, %s32570_s27  ;;  %27746 = vrot.lane.b32.xlu1 %v39753_v14, %s32569_s19  ;;  %v37836_v58 = vpop.f32.mrf.mxu1 }
 0x7ce   :  { %26156 = vmatprep.subr.mxu0 %v26027_v20  ;;  %26261 = vmatprep.mubr.f32.mxu1 %v39753_v14  ;;  %39823 = vst [vmem:[#allocation118_spill] sm:$0xff] %v37836_v58 }
 0x7cf   :  { %26157 = vmatpush1.msra.mxu0 %v26026_v29  ;;  %v26005_v37 = vpop.permute.xlu1 %26004  ;;  %v21908_v49 = vpop.f32.mrf.mxu0 }
 0x7d0   :  { %v26019_v50 = vpop.permute.xlu0 %26018  ;;  %32343 = vmatmul.mubr.msk.f32.vlgmr.msra.gmra.mxu0 %vm117_vm1, %v37818_v32  ;;  %v26029_v59 = vsel %vm2300_vm4, %v26005_v37, %v26007_v13  ;;  %v26028_v30 = vsel %vm2300_vm4, %v26003_v17, %v26005_v37  ;;  %v37843_v0 = vadd.f32 %v21908_v49, %v37730_v45 }
 0x7d1   :  { %28309 = vrot.lane.b32.xlu0 %v36106_v23, %s32570_s27  ;;  %28297 = vrot.lane.b32.xlu1 %v36065_v44, %s32570_s27  ;;  %v37850_v60 = vpop.f32.mrf.mxu0 }
 0x7d2   :  { %26227 = vmatprep.subr.mxu1 %v26029_v59  ;;  %26332 = vmatprep.mubr.f32.mxu0 %v39753_v14  ;;  %39824 = vst [vmem:[#allocation12_spill] sm:$0xff] %v37850_v60 }
 0x7d3   :  { %26228 = vmatpush1.msra.mxu1 %v26028_v30  ;;  %v26009_v8 = vpop.permute.xlu1 %26008  ;;  %v21979_v20 = vpop.f32.mrf.mxu1 }
 0x7d4   :  { %v26023_v29 = vpop.permute.xlu0 %26022  ;;  %32344 = vmatmul.mubr.msk.f32.vlgmr.msra.gmra.mxu1 %vm117_vm1, %v37818_v32  ;;  %v26031_v45 = vsel %vm2300_vm4, %v26009_v8, %v26011_v35  ;;  %v26030_v17 = vsel %vm2300_vm4, %v26007_v13, %v26009_v8  ;;  %v37857_v37 = vadd.f32 %v21979_v20, %v37742_v46 }
 0x7d5   :  { %28313 = vrot.lane.b32.xlu0 %v36113_v48, %s32570_s27  ;;  %28301 = vrot.lane.b32.xlu1 %v36087_v54, %s32570_s27  ;;  %v37864_v49 = vpop.f32.mrf.mxu1 }
 0x7d6   :  { %26298 = vmatprep.subr.mxu0 %v26031_v45  ;;  %26403 = vmatprep.mubr.f32.mxu1 %v39753_v14  ;;  %39825 = vst [vmem:[#allocation120_spill] sm:$0xff] %v37864_v49 }
 0x7d7   :  { %26299 = vmatpush1.msra.mxu0 %v26030_v17  ;;  %v26013_v59 = vpop.permute.xlu1 %26012  ;;  %v22128_v30 = vpop.f32.mrf.mxu0 }
 0x7d8   :  { %v37866_v60 = vpop.permute.xlu0 %26572  ;;  %32345 = vmatmul.mubr.msk.f32.vlgmr.msra.gmra.mxu0 %vm117_vm1, %v37818_v32  ;;  %v26033_v46 = vsel %vm2300_vm4, %v26013_v59, %v26015_v47  ;;  %v26032_v13 = vsel %vm2300_vm4, %v26011_v35, %v26013_v59  ;;  %v37873_v8 = vadd.f32 %v22128_v30, %v37776_v33 }
 0x7d9   :  { %28317 = vrot.lane.b32.xlu0 %v36120_v57, %s32570_s27  ;;  %28303 = vrot.lane.b32.xlu1 %v36044_v19, %s32570_s27  ;;  %v37880_v20 = vpop.f32.mrf.mxu0 }
 0x7da   :  { %26369 = vmatprep.subr.mxu1 %v26033_v46  ;;  %26474 = vmatprep.mubr.f32.mxu0 %v39753_v14 }
 0x7db   :  { %26370 = vmatpush1.msra.mxu1 %v26032_v13  ;;  %v26017_v45 = vpop.permute.xlu1 %26016  ;;  %v22199_v17 = vpop.f32.mrf.mxu1 }
 0x7dc   :  { %v37882_v49 = vpop.permute.xlu0 %26574  ;;  %32346 = vmatmul.mubr.msk.f32.vlgmr.msra.gmra.mxu1 %vm117_vm1, %v37818_v32  ;;  %v26035_v33 = vsel %vm2300_vm4, %v26017_v45, %v26019_v50  ;;  %v26034_v35 = vsel %vm2300_vm4, %v26015_v47, %v26017_v45  ;;  %v37889_v59 = vadd.f32 %v22199_v17, %v37767_v26 }
 0x7dd   :  { %28321 = vrot.lane.b32.xlu0 %v39753_v14, %s32570_s27  ;;  %28307 = vrot.lane.b32.xlu1 %v36056_v22, %s32570_s27  ;;  %v37896_v30 = vpop.f32.mrf.mxu1 }
 0x7de   :  { %26440 = vmatprep.subr.mxu0 %v26035_v33  ;;  %26545 = vmatprep.mubr.f32.mxu1 %v39753_v14 }
 0x7df   :  { %26441 = vmatpush1.msra.mxu0 %v26034_v35  ;;  %v22270_v46 = vpop.f32.mrf.mxu0 }
 0x7e0   :  { %v37898_v13 = vpop.permute.xlu0 %26578  ;;  %32347 = vmatmul.mubr.msk.f32.vlgmr.msra.gmra.mxu0 %vm117_vm1, %v37818_v32  ;;  %v37903_v26 = vadd.f32 %v22270_v46, %v37795_v51 }
 0x7e1   :  { %28872 = vrot.lane.b32.xlu0 %v36065_v44, %s32534_s24  ;;  %28311 = vrot.lane.b32.xlu1 %v36068_v12, %s32570_s27  ;;  %v26021_v47 = vpop.permute.xlu1 %26020  ;;  %v37912_v35 = vpop.f32.mrf.mxu0 }
 0x7e2   :  { %v26037_v45 = vsel %vm2300_vm4, %v26021_v47, %v26023_v29  ;;  %v26036_v17 = vsel %vm2300_vm4, %v26019_v50, %v26021_v47  ;;  %26694 = vmatprep.mubr.f32.mxu0 %v39753_v14  ;;  %vm27748_vm4 = vcmask 302080  }
 0x7e3   :  { %26511 = vmatprep.subr.mxu1 %v26037_v45  ;;  %v22341_v33 = vpop.f32.mrf.mxu1 }
 0x7e4   :  { %26512 = vmatpush1.msra.mxu1 %v26036_v17  ;;  %v37915_v51 = vadd.f32 %v22341_v33, %v37809_v10  ;;  %v16970_v17 = vadd.f32 %v37048_v11, %v36985_v39  ;;  %v17041_v39 = vadd.f32 %v37067_v52, %v36989_v3  ;;  %v26601_v52 = vsel %vm26598_vm0, %v37866_v60, %v37882_v49 }
 0x7e5   :  { %28874 = vrot.lane.b32.xlu0 %v36076_v43, %s32534_s24  ;;  %28315 = vrot.lane.b32.xlu1 %v36079_v53, %s32570_s27  ;;  %v37928_v10 = vpop.f32.mrf.mxu1 }
 0x7e6   :  { %v37921_v46 = vpop.permute.xlu0 %26582  ;;  %32348 = vmatmul.mubr.msk.f32.vlgmr.msra.gmra.mxu1 %vm117_vm1, %v37818_v32  ;;  %v26571_v50 = vpop.permute.xlu1 %26570  ;;  %39826 = vst [vmem:[#allocation121_spill] sm:$0xff] %v37928_v10  ;;  %v17960_v11 = vadd.f32 %v37117_v36, %v16970_v17  ;;  %v17112_v36 = vadd.f32 %v37071_v63, %v37006_v40  ;;  %v17183_v63 = vadd.f32 %v37084_v28, %v37010_v7 }
 0x7e7   :  { %v26600_v29 = vsel %vm26598_vm0, %v26571_v50, %v37866_v60  ;;  %26765 = vmatprep.mubr.f32.mxu1 %v39753_v14  ;;  %v22412_v47 = vpop.f32.mrf.mxu0 }
 0x7e8   :  { %26660 = vmatprep.subr.mxu0 %v26600_v29  ;;  %v37931_v45 = vadd.f32 %v22412_v47, %v37828_v6  ;;  %v37945_v6 = vld [vmem:[%s39387_s3 + $0x90] sm:$0xff]  ;;  %v18535_v17 = vadd.f32 %v37171_v15, %v17960_v11  ;;  %v17964_v40 = vadd.f32 %v37134_v38, %v17112_v36 }
 0x7e9   :  { %28878 = vrot.lane.b32.xlu0 %v36044_v19, %s32534_s24  ;;  %28319 = vrot.lane.b32.xlu1 %v36090_v41, %s32570_s27  ;;  %v37950_v47 = vpop.f32.mrf.mxu0 }
 0x7ea   :  { %v37937_v32 = vpop.permute.xlu0 %26586  ;;  %39827 = vst [vmem:[#allocation3_spill] sm:$0xff] %v37950_v47 }
 0x7eb   :  { %v26569_v33 = vpop.permute.xlu1 %26568  ;;  %v22483_v58 = vpop.f32.mrf.mxu1 }
 0x7ec   :  { %v26599_v10 = vsel %vm26598_vm0, %v26569_v33, %v26571_v50  ;;  %v37948_v29 = vadd.f32 %v22483_v58, %v37843_v0 }
 0x7ed   :  { %28882 = vrot.lane.b32.xlu0 %v36056_v22, %s32534_s24  ;;  %28870 = vrot.lane.b32.xlu1 %v36053_v18, %s32534_s24  ;;  %v37997_v15 = vpop.f32.mrf.mxu1 }
 0x7ee   :  { %26661 = vmatpush1.msra.mxu0 %v26599_v10  ;;  %v17962_v10 = vadd.f32 %v37121_v31, %v17041_v39 }
 0x7ef   :  { %32350 = vmatmul.mubr.msk.f32.vlgmr.msra.gmra.mxu0 %vm117_vm1, %v37945_v6  ;;  %v37961_v50 = vpop.permute.xlu0 %26590  ;;  %v26577_v0 = vpop.permute.xlu1 %26576 }
 0x7f0   :  { %v26602_v58 = vsel %vm26598_vm0, %v37882_v49, %v26577_v0  ;;  %26836 = vmatprep.mubr.f32.mxu0 %v39753_v14  ;;  %v22554_v33 = vpop.f32.mrf.mxu0  ;;  %v26603_v31 = vsel %vm26598_vm0, %v26577_v0, %v37898_v13  ;;  %v18537_v60 = vadd.f32 %v37182_v55, %v17962_v10  ;;  %v19110_v49 = vadd.f32 %v37233_v9, %v18535_v17  ;;  %v39829_v17 = vld [vmem:[#allocation87_spill] sm:$0xff] }
 0x7f1   :  { %28886 = vrot.lane.b32.xlu0 %v36068_v12, %s32534_s24  ;;  %28868 = vrot.lane.b32.xlu1 %v36041_v56, %s32534_s24  ;;  %v37971_v3 = vadd.f32 %v22554_v33, %v37857_v37  ;;  %v17254_v9 = vadd.f32 %v37088_v27, %v37027_v62  ;;  %v17966_v55 = vadd.f32 %v37138_v42, %v17183_v63 }
 0x7f2   :  { %26731 = vmatprep.subr.mxu1 %v26602_v58  ;;  %v37986_v58 = vpop.f32.mrf.mxu0  ;;  %v18539_v33 = vadd.f32 %v37186_v34, %v17964_v40  ;;  %v19685_v36 = vadd.f32 %v37294_v16, %v19110_v49  ;;  %v17325_v62 = vadd.f32 %v37102_v4, %v37031_v61  ;;  %v39830_v4 = vld [vmem:[#allocation93_spill] sm:$0xff] }
 0x7f3   :  { %26732 = vmatpush1.msra.mxu1 %v26601_v52  ;;  %v37980_v47 = vpop.permute.xlu0 %26594  ;;  %v26581_v12 = vpop.permute.xlu1 %26580  ;;  %v19112_v52 = vadd.f32 %v37237_v25, %v18537_v60  ;;  %v17968_v16 = vadd.f32 %v37151_v2, %v17254_v9  ;;  %v18541_v34 = vadd.f32 %v37196_v1, %v17966_v55  ;;  %v39832_v60 = vld [vmem:[#allocation77_spill] sm:$0xff]  ;;  %v39834_v9 = vld [vmem:[#allocation79_spill] sm:$0xff] }
 0x7f4   :  { %32351 = vmatmul.mubr.msk.f32.vlgmr.msra.gmra.mxu1 %vm117_vm1, %v37945_v6  ;;  %v26604_v37 = vsel %vm26598_vm0, %v37898_v13, %v26581_v12  ;;  %v26605_v13 = vsel %vm26598_vm0, %v26581_v12, %v37921_v46 }
 0x7f5   :  { %28890 = vrot.lane.b32.xlu0 %v36079_v53, %s32534_s24  ;;  %28876 = vrot.lane.b32.xlu1 %v36087_v54, %s32534_s24  ;;  %v19687_v61 = vadd.f32 %v39829_v17, %v19112_v52  ;;  %v18543_v55 = vadd.f32 %v39834_v9, %v17968_v16  ;;  %v39836_v52 = vld [vmem:[#allocation88_spill] sm:$0xff] }
 0x7f6   :  { %26802 = vmatprep.subr.mxu0 %v26604_v37  ;;  %26907 = vmatprep.mubr.f32.mxu1 %v39753_v14  ;;  %v20260_v37 = vadd.f32 %v39830_v4, %v19685_v36 }
 0x7f7   :  { %26803 = vmatpush1.msra.mxu0 %v26603_v31  ;;  %v38002_v39 = vpop.permute.xlu0 %27145  ;;  %v26585_v11 = vpop.permute.xlu1 %26584 }
 0x7f8   :  { %32352 = vmatmul.mubr.msk.f32.vlgmr.msra.gmra.mxu0 %vm117_vm1, %v37945_v6  ;;  %v26606_v7 = vsel %vm26598_vm0, %v37921_v46, %v26585_v11  ;;  %v22774_v28 = vpop.f32.mrf.mxu0  ;;  %v26607_v25 = vsel %vm26598_vm0, %v26585_v11, %v37937_v32  ;;  %v39833_v11 = vld [vmem:[#allocation76_spill] sm:$0xff] }
 0x7f9   :  { %28894 = vrot.lane.b32.xlu0 %v36090_v41, %s32534_s24  ;;  %28880 = vrot.lane.b32.xlu1 %v36098_v24, %s32534_s24  ;;  %v38013_v38 = vadd.f32 %v22774_v28, %v37889_v59 }
 0x7fa   :  { %26873 = vmatprep.subr.mxu1 %v26606_v7  ;;  %26978 = vmatprep.mubr.f32.mxu0 %v39753_v14  ;;  %v22703_v0 = vpop.f32.mrf.mxu1  ;;  %v38053_v40 = vpop.f32.mrf.mxu0  ;;  %v17970_v7 = vadd.f32 %v39833_v11, %v17325_v62 }
 0x7fb   :  { %26874 = vmatpush1.msra.mxu1 %v26605_v13  ;;  %v38024_v59 = vpop.permute.xlu0 %27149  ;;  %v26589_v10 = vpop.permute.xlu1 %26588  ;;  %v38027_v27 = vadd.f32 %v22703_v0, %v37873_v8  ;;  %v39828_v8 = vld [vmem:[#allocation83_spill] sm:$0xff]  ;;  %v39835_v13 = vld [vmem:[#allocation82_spill] sm:$0xff] }
 0x7fc   :  { %32353 = vmatmul.mubr.msk.f32.vlgmr.msra.gmra.mxu1 %vm117_vm1, %v37945_v6  ;;  %v26608_v12 = vsel %vm26598_vm0, %v37937_v32, %v26589_v10  ;;  %v38033_v42 = vpop.f32.mrf.mxu1  ;;  %v19114_v46 = vadd.f32 %v39828_v8, %v18539_v33  ;;  %v39831_v32 = vld [vmem:[#allocation75_spill] sm:$0xff]  ;;  %v19116_v0 = vadd.f32 %v39835_v13, %v18541_v34  ;;  %v26609_v33 = vsel %vm26598_vm0, %v26589_v10, %v37961_v50  ;;  %v39839_v10 = vld [vmem:[#allocation78_spill] sm:$0xff] }
 0x7fd   :  { %29444 = vrot.lane.b32.xlu0 %v36053_v18, %s32535_s28  ;;  %28884 = vrot.lane.b32.xlu1 %v36106_v23, %s32534_s24  ;;  %v17396_v49 = vadd.f32 %v39832_v60, %v39831_v32  ;;  %v39842_v32 = vld [vmem:[#allocation89_spill] sm:$0xff] }
 0x7fe   :  { %26944 = vmatprep.subr.mxu0 %v26608_v12  ;;  %27049 = vmatprep.mubr.f32.mxu1 %v39753_v14  ;;  %v19689_v36 = vadd.f32 %v39836_v52, %v19114_v46  ;;  %v39837_v12 = vld [vmem:[#allocation94_spill] sm:$0xff]  ;;  %v39840_v46 = vld [vmem:[#allocation81_spill] sm:$0xff]  ;;  %v19691_v60 = vadd.f32 %v39842_v32, %v19116_v0  ;;  %v39844_v0 = vld [vmem:[#allocation80_spill] sm:$0xff] }
 0x7ff   :  { %26945 = vmatpush1.msra.mxu0 %v26607_v25  ;;  %v27144_v63 = vpop.permute.xlu0 %27143  ;;  %v26593_v31 = vpop.permute.xlu1 %26592  ;;  %v20262_v62 = vadd.f32 %v39837_v12, %v19687_v61  ;;  %v39838_v25 = vld [vmem:[#allocation100_spill] sm:$0xff]  ;;  %v17972_v4 = vadd.f32 %v39839_v10, %v17396_v49  ;;  %v39843_v49 = vld [vmem:[#allocation95_spill] sm:$0xff]  ;;  %v39851_v32 = vld [vmem:[#allocation86_spill] sm:$0xff] }
 0x800   :  { %32354 = vmatmul.mubr.msk.f32.vlgmr.msra.gmra.mxu0 %vm117_vm1, %v37945_v6  ;;  %v26610_v2 = vsel %vm26598_vm0, %v37961_v50, %v26593_v31  ;;  %v22845_v1 = vpop.f32.mrf.mxu1  ;;  %v20835_v8 = vadd.f32 %v39838_v25, %v20260_v37  ;;  %v39841_v37 = vld [vmem:[#allocation84_spill] sm:$0xff]  ;;  %v26611_v11 = vsel %vm26598_vm0, %v26593_v31, %v37980_v47  ;;  %v39846_v12 = vld [vmem:[#allocation91_spill] sm:$0xff]  ;;  %v27174_v25 = vsel %vm27173_vm3, %v27144_v63, %v38002_v39 }
 0x801   :  { %29448 = vrot.lane.b32.xlu0 %v36076_v43, %s32535_s28  ;;  %28888 = vrot.lane.b32.xlu1 %v36113_v48, %s32534_s24  ;;  %v38063_v28 = vadd.f32 %v22845_v1, %v37903_v26  ;;  %v19118_v1 = vadd.f32 %v39841_v37, %v18543_v55  ;;  %v20837_v9 = vadd.f32 %v37560_v21, %v20262_v62  ;;  %v38114_v21 = vld [vmem:[%s39387_s3 + $0x98] sm:$0xff]  ;;  %v39849_v10 = vld [vmem:[#allocation107_spill] sm:$0xff] }
 0x802   :  { %27015 = vmatprep.subr.mxu1 %v26610_v2  ;;  %27120 = vmatprep.mubr.f32.mxu0 %v39753_v14  ;;  %v38079_v34 = vpop.f32.mrf.mxu1  ;;  %v18545_v2 = vadd.f32 %v39840_v46, %v17970_v7  ;;  %v20264_v7 = vadd.f32 %v39843_v49, %v19689_v36  ;;  %v21410_v13 = vadd.f32 %v37666_v5, %v20835_v8  ;;  %v39847_v8 = vld [vmem:[#allocation96_spill] sm:$0xff]  ;;  %v39852_v49 = vld [vmem:[#allocation90_spill] sm:$0xff] }
 0x803   :  { %27016 = vmatpush1.msra.mxu1 %v26609_v33  ;;  %v38073_v17 = vpop.permute.xlu0 %27155  ;;  %v26597_v26 = vpop.permute.xlu1 %26596  ;;  %v18547_v52 = vadd.f32 %v39844_v0, %v17972_v4  ;;  %v19693_v62 = vadd.f32 %v39846_v12, %v19118_v1  ;;  %v21412_v4 = vadd.f32 %v39849_v10, %v20837_v9  ;;  %v39850_v46 = vld [vmem:[#allocation112_spill] sm:$0xff]  ;;  %v39853_v9 = vld [vmem:[#allocation97_spill] sm:$0xff]  ;;  %v39856_v12 = vld [vmem:[#allocation119_spill] sm:$0xff] }
 0x804   :  { %32355 = vmatmul.mubr.msk.f32.vlgmr.msra.gmra.mxu1 %vm117_vm1, %v37945_v6  ;;  %v26612_v16 = vsel %vm26598_vm0, %v37980_v47, %v26597_v26  ;;  %v22916_v50 = vpop.f32.mrf.mxu0  ;;  %v20266_v26 = vadd.f32 %v39847_v8, %v19691_v60  ;;  %v21985_v37 = vadd.f32 %v39850_v46, %v21410_v13  ;;  %v39858_v10 = vld [vmem:[#allocation99_spill] sm:$0xff] }
 0x805   :  { %29442 = vrot.lane.b32.xlu0 %v36041_v56, %s32535_s28  ;;  %28892 = vrot.lane.b32.xlu1 %v36120_v57, %s32534_s24  ;;  %v38088_v61 = vadd.f32 %v22916_v50, %v37915_v51  ;;  %v19122_v60 = vadd.f32 %v39851_v32, %v18547_v52  ;;  %v20268_v13 = vadd.f32 %v39853_v9, %v19693_v62  ;;  %v39855_v52 = vld [vmem:[#allocation106_spill] sm:$0xff]  ;;  %v39859_v46 = vld [vmem:[#allocation103_spill] sm:$0xff] }
 0x806   :  { %27086 = vmatprep.subr.mxu0 %v26612_v16  ;;  %27269 = vmatprep.mubr.f32.mxu1 %v39753_v14  ;;  %v38104_v31 = vpop.f32.mrf.mxu0  ;;  %v39848_v16 = vld [vmem:[#allocation101_spill] sm:$0xff] }
 0x807   :  { %27087 = vmatpush1.msra.mxu0 %v26611_v11  ;;  %v38098_v51 = vpop.permute.xlu0 %27159  ;;  %v27148_v33 = vpop.permute.xlu1 %27147  ;;  %v20839_v50 = vadd.f32 %v39848_v16, %v20264_v7 }
 0x808   :  { %32356 = vmatmul.mubr.msk.f32.vlgmr.msra.gmra.mxu0 %vm117_vm1, %v37945_v6  ;;  %v27175_v55 = vsel %vm27173_vm3, %v38002_v39, %v27148_v33  ;;  %v22987_v47 = vpop.f32.mrf.mxu1  ;;  %v39845_v6 = vld [vmem:[#allocation85_spill] sm:$0xff] }
 0x809   :  { %29454 = vrot.lane.b32.xlu0 %v36098_v24, %s32535_s28  ;;  %28896 = vrot.lane.b32.xlu1 %v39753_v14, %s32534_s24  ;;  %v38117_v5 = vadd.f32 %v22987_v47, %v37931_v45  ;;  %v19120_v36 = vadd.f32 %v39845_v6, %v18545_v2  ;;  %v39854_v47 = vld [vmem:[#allocation102_spill] sm:$0xff]  ;;  %v21414_v6 = vadd.f32 %v39855_v52, %v20839_v50  ;;  %v39863_v52 = vld [vmem:[#allocation104_spill] sm:$0xff]  ;;  %s32571_s24 = smov 19  }
 0x80a   :  { %27235 = vmatprep.subr.mxu1 %v27175_v55  ;;  %27340 = vmatprep.mubr.f32.mxu0 %v39753_v14  ;;  %v38134_v63 = vpop.f32.mrf.mxu1  ;;  %v27176_v55 = vsel %vm27173_vm3, %v27148_v33, %v38024_v59  ;;  %v20841_v0 = vadd.f32 %v39854_v47, %v20266_v26 }
 0x80b   :  { %27236 = vmatpush1.msra.mxu1 %v27174_v25  ;;  %v38128_v45 = vpop.permute.xlu0 %27163  ;;  %v27152_v2 = vpop.permute.xlu1 %27151  ;;  %v19695_v7 = vadd.f32 %v39852_v49, %v19120_v36  ;;  %v21987_v25 = vadd.f32 %v39856_v12, %v21412_v4  ;;  %v22560_v36 = vadd.f32 %v37880_v20, %v21985_v37  ;;  %v39857_v20 = vld [vmem:[#allocation92_spill] sm:$0xff]  ;;  %v20843_v37 = vadd.f32 %v39859_v46, %v20268_v13  ;;  %v39864_v12 = vld [vmem:[#allocation109_spill] sm:$0xff] }
 0x80c   :  { %32358 = vmatmul.mubr.msk.f32.vlgmr.msra.gmra.mxu1 %vm117_vm1, %v38114_v21  ;;  %v27177_v39 = vsel %vm27173_vm3, %v38024_v59, %v27152_v2  ;;  %v23058_v1 = vpop.f32.mrf.mxu0  ;;  %v19697_v50 = vadd.f32 %v39857_v20, %v19122_v60 }
 0x80d   :  { %29458 = vrot.lane.b32.xlu0 %v36106_v23, %s32535_s28  ;;  %29446 = vrot.lane.b32.xlu1 %v36065_v44, %s32535_s28  ;;  %v38142_v11 = vadd.f32 %v23058_v1, %v37948_v29  ;;  %v20270_v4 = vadd.f32 %v39858_v10, %v19695_v7  ;;  %v39861_v1 = vld [vmem:[#allocation10_spill] sm:$0xff]  ;;  %v22562_v49 = vadd.f32 %v37896_v30, %v21987_v25 }
 0x80e   :  { %27306 = vmatprep.subr.mxu0 %v27177_v39  ;;  %27411 = vmatprep.mubr.f32.mxu1 %v39753_v14  ;;  %v38160_v26 = vpop.f32.mrf.mxu0  ;;  %v21989_v32 = vadd.f32 %v39861_v1, %v21414_v6  ;;  %v21418_v25 = vadd.f32 %v39864_v12, %v20843_v37  ;;  %v39867_v37 = vld [vmem:[#allocation111_spill] sm:$0xff]  ;;  %v39868_v1 = vld [vmem:[#allocation118_spill] sm:$0xff] }
 0x80f   :  { %27307 = vmatpush1.msra.mxu0 %v27176_v55  ;;  %v38152_v8 = vpop.permute.xlu0 %27167  ;;  %v27154_v29 = vpop.permute.xlu1 %27153  ;;  %v23135_v55 = vadd.f32 %v38033_v42, %v22560_v36  ;;  %v39862_v42 = vld [vmem:[#allocation98_spill] sm:$0xff]  ;;  %v20845_v6 = vadd.f32 %v39863_v52, %v20270_v4 }
 0x810   :  { %32359 = vmatmul.mubr.msk.f32.vlgmr.msra.gmra.mxu0 %vm117_vm1, %v38114_v21  ;;  %v27179_v59 = vsel %vm27173_vm3, %v27154_v29, %v38073_v17  ;;  %v27178_v33 = vsel %vm27173_vm3, %v27152_v2, %v27154_v29  ;;  %v23129_v62 = vpop.f32.mrf.mxu1  ;;  %v39860_v2 = vld [vmem:[#allocation108_spill] sm:$0xff]  ;;  %v39865_v29 = vld [vmem:[#allocation117_spill] sm:$0xff]  ;;  %v39871_v52 = vld [vmem:[#allocation110_spill] sm:$0xff] }
 0x811   :  { %29462 = vrot.lane.b32.xlu0 %v36113_v48, %s32535_s28  ;;  %29450 = vrot.lane.b32.xlu1 %v36087_v54, %s32535_s28  ;;  %v38167_v16 = vadd.f32 %v23129_v62, %v37971_v3  ;;  %v21416_v39 = vadd.f32 %v39860_v2, %v20841_v0  ;;  %v20272_v0 = vadd.f32 %v39862_v42, %v19697_v50 }
 0x812   :  { %27377 = vmatprep.subr.mxu1 %v27179_v59  ;;  %27482 = vmatprep.mubr.f32.mxu0 %v39753_v14  ;;  %v38185_v13 = vpop.f32.mrf.mxu1  ;;  %v22564_v59 = vadd.f32 %v37912_v35, %v21989_v32  ;;  %v21420_v2 = vadd.f32 %v39867_v37, %v20845_v6  ;;  %v39869_v32 = vld [vmem:[#allocation121_spill] sm:$0xff] }
 0x813   :  { %27378 = vmatpush1.msra.mxu1 %v27178_v33  ;;  %v38176_v9 = vpop.permute.xlu0 %27171  ;;  %v27158_v3 = vpop.permute.xlu1 %27157  ;;  %v21991_v36 = vadd.f32 %v39865_v29, %v21416_v39 }
 0x814   :  { %32360 = vmatmul.mubr.msk.f32.vlgmr.msra.gmra.mxu1 %vm117_vm1, %v38114_v21  ;;  %v27181_v60 = vsel %vm27173_vm3, %v27158_v3, %v38098_v51  ;;  %v27180_v7 = vsel %vm27173_vm3, %v38073_v17, %v27158_v3  ;;  %v23278_v47 = vpop.f32.mrf.mxu0 }
 0x815   :  { %29466 = vrot.lane.b32.xlu0 %v36120_v57, %s32535_s28  ;;  %29452 = vrot.lane.b32.xlu1 %v36044_v19, %s32535_s28  ;;  %v38192_v30 = vadd.f32 %v23278_v47, %v38027_v27  ;;  %v23137_v27 = vadd.f32 %v38053_v40, %v22562_v49  ;;  %v39866_v40 = vld [vmem:[#allocation105_spill] sm:$0xff]  ;;  %v22566_v49 = vadd.f32 %v39869_v32, %v21991_v36 }
 0x816   :  { %27448 = vmatprep.subr.mxu0 %v27181_v60  ;;  %27553 = vmatprep.mubr.f32.mxu1 %v39753_v14  ;;  %v23280_v17 = vpop.f32.mrf.mxu0  ;;  %v20847_v46 = vadd.f32 %v39866_v40, %v20272_v0  ;;  %v23139_v60 = vadd.f32 %v38079_v34, %v22564_v59  ;;  %v39870_v0 = vld [vmem:[#allocation47_spill] sm:$0xff]  ;;  %v39874_v40 = vld [vmem:[#allocation120_spill] sm:$0xff] }
 0x817   :  { %27449 = vmatpush1.msra.mxu0 %v27180_v7  ;;  %v38200_v33 = vpop.permute.xlu0 %27722  ;;  %v27162_v62 = vpop.permute.xlu1 %27161  ;;  %v38203_v20 = vadd.f32 %v23280_v17, %v23135_v55 }
 0x818   :  { %32361 = vmatmul.mubr.msk.f32.vlgmr.msra.gmra.mxu0 %vm117_vm1, %v38114_v21  ;;  %v27183_v50 = vsel %vm27173_vm3, %v27162_v62, %v38128_v45  ;;  %v27182_v10 = vsel %vm27173_vm3, %v38098_v51, %v27162_v62  ;;  %v23349_v4 = vpop.f32.mrf.mxu1  ;;  %v21993_v51 = vadd.f32 %v39868_v1, %v21418_v25  ;;  %v21422_v6 = vadd.f32 %v39871_v52, %v20847_v46  ;;  %v39872_v25 = vld [vmem:[#allocation12_spill] sm:$0xff] }
 0x819   :  { %29470 = vrot.lane.b32.xlu0 %v39753_v14, %s32535_s28  ;;  %29456 = vrot.lane.b32.xlu1 %v36056_v22, %s32535_s28  ;;  %v38216_v35 = vadd.f32 %v23349_v4, %v38013_v38  ;;  %v21995_v17 = vadd.f32 %v39872_v25, %v21420_v2  ;;  %v23141_v62 = vadd.f32 %v38104_v31, %v22566_v49 }
 0x81a   :  { %27519 = vmatprep.subr.mxu1 %v27183_v50  ;;  %27624 = vmatprep.mubr.f32.mxu0 %v39753_v14  ;;  %v23351_v39 = vpop.f32.mrf.mxu1 }
 0x81b   :  { %27520 = vmatpush1.msra.mxu1 %v27182_v10  ;;  %v38223_v3 = vpop.permute.xlu0 %27724  ;;  %v27166_v55 = vpop.permute.xlu1 %27165  ;;  %v38226_v38 = vadd.f32 %v23351_v39, %v23137_v27  ;;  %v22570_v46 = vadd.f32 %v37997_v15, %v21995_v17 }
 0x81c   :  { %32362 = vmatmul.mubr.msk.f32.vlgmr.msra.gmra.mxu1 %vm117_vm1, %v38114_v21  ;;  %v27185_v7 = vsel %vm27173_vm3, %v27166_v55, %v38152_v8  ;;  %v27184_v47 = vsel %vm27173_vm3, %v38128_v45, %v27166_v55  ;;  %v23420_v42 = vpop.f32.mrf.mxu0  ;;  %v39873_v45 = vld [vmem:[#allocation3_spill] sm:$0xff] }
 0x81d   :  { %30020 = vrot.lane.b32.xlu0 %v36065_v44, %s32571_s24  ;;  %29460 = vrot.lane.b32.xlu1 %v39870_v0, %s32535_s28  ;;  %v38239_v34 = vadd.f32 %v23420_v42, %v38063_v28  ;;  %v22568_v29 = vadd.f32 %v39873_v45, %v21993_v51  ;;  %v23145_v49 = vadd.f32 %v38160_v26, %v22570_v46 }
 0x81e   :  { %27590 = vmatprep.subr.mxu0 %v27185_v7  ;;  %27695 = vmatprep.mubr.f32.mxu1 %v39753_v14  ;;  %v23422_v12 = vpop.f32.mrf.mxu0  ;;  %v27751_v45 = vsel %vm27748_vm4, %v38200_v33, %v38223_v3 }
 0x81f   :  { %27591 = vmatpush1.msra.mxu0 %v27184_v47  ;;  %v38245_v36 = vpop.permute.xlu0 %27728  ;;  %v27170_v59 = vpop.permute.xlu1 %27169  ;;  %v38248_v27 = vadd.f32 %v23422_v12, %v23139_v60  ;;  %v23143_v2 = vadd.f32 %v38134_v63, %v22568_v29 }
 0x820   :  { %32363 = vmatmul.mubr.msk.f32.vlgmr.msra.gmra.mxu0 %vm117_vm1, %v38114_v21  ;;  %v27187_v28 = vsel %vm27173_vm3, %v27170_v59, %v38176_v9  ;;  %v27186_v50 = vsel %vm27173_vm3, %v38152_v8, %v27170_v59  ;;  %v23491_v10 = vpop.f32.mrf.mxu1  ;;  %v21997_v9 = vadd.f32 %v39874_v40, %v21422_v6 }
 0x821   :  { %30022 = vrot.lane.b32.xlu0 %v36076_v43, %s32571_s24  ;;  %29464 = vrot.lane.b32.xlu1 %v36079_v53, %s32535_s28  ;;  %v38261_v31 = vadd.f32 %v23491_v10, %v38088_v61 }
 0x822   :  { %27661 = vmatprep.subr.mxu1 %v27187_v28  ;;  %27844 = vmatprep.mubr.f32.mxu0 %v39753_v14  ;;  %v23493_v4 = vpop.f32.mrf.mxu1  ;;  %v22572_v51 = vadd.f32 %v37986_v58, %v21997_v9 }
 0x823   :  { %27662 = vmatpush1.msra.mxu1 %v27186_v50  ;;  %v38266_v8 = vpop.permute.xlu0 %27732  ;;  %v27721_v37 = vpop.permute.xlu1 %27720  ;;  %v38269_v39 = vadd.f32 %v23493_v4, %v23141_v62 }
 0x824   :  { %32364 = vmatmul.mubr.msk.f32.vlgmr.msra.gmra.mxu1 %vm117_vm1, %v38114_v21  ;;  %v27750_v61 = vsel %vm27748_vm4, %v27721_v37, %v38200_v33  ;;  %v23562_v1 = vpop.f32.mrf.mxu0  ;;  %v23147_v47 = vadd.f32 %v38185_v13, %v22572_v51 }
 0x825   :  { %30026 = vrot.lane.b32.xlu0 %v36044_v19, %s32571_s24  ;;  %29468 = vrot.lane.b32.xlu1 %v36090_v41, %s32535_s28  ;;  %v38280_v15 = vadd.f32 %v23562_v1, %v38117_v5  ;;  %v38293_v5 = vld [vmem:[%s39387_s3 + $0xa0] sm:$0xff] }
 0x826   :  { %27810 = vmatprep.subr.mxu0 %v27750_v61  ;;  %27915 = vmatprep.mubr.f32.mxu1 %v39753_v14  ;;  %v23564_v63 = vpop.f32.mrf.mxu0 }
 0x827   :  { %v38284_v21 = vpop.permute.xlu0 %27736  ;;  %v27719_v32 = vpop.permute.xlu1 %27718  ;;  %v38287_v55 = vadd.f32 %v23564_v63, %v23143_v2 }
 0x828   :  { %v27749_v60 = vsel %vm27748_vm4, %v27719_v32, %v27721_v37  ;;  %v23633_v7 = vpop.f32.mrf.mxu1 }
 0x829   :  { %30030 = vrot.lane.b32.xlu0 %v36056_v22, %s32571_s24  ;;  %30018 = vrot.lane.b32.xlu1 %v36053_v18, %s32571_s24  ;;  %v38300_v58 = vadd.f32 %v23633_v7, %v38142_v11 }
 0x82a   :  { %27811 = vmatpush1.msra.mxu0 %v27749_v60  ;;  %v23635_v26 = vpop.f32.mrf.mxu1 }
 0x82b   :  { %32366 = vmatmul.mubr.msk.f32.vlgmr.msra.gmra.mxu0 %vm117_vm1, %v38293_v5  ;;  %v38305_v42 = vpop.permute.xlu0 %27740  ;;  %v27727_v52 = vpop.permute.xlu1 %27726  ;;  %v38307_v6 = vadd.f32 %v23635_v26, %v23145_v49 }
 0x82c   :  { %v27752_v12 = vsel %vm27748_vm4, %v38223_v3, %v27727_v52  ;;  %27986 = vmatprep.mubr.f32.mxu0 %v39753_v14  ;;  %v23704_v25 = vpop.f32.mrf.mxu0  ;;  %v23794_v11 = vpop.f32.mrf.mxu1  ;;  %v27753_v3 = vsel %vm27748_vm4, %v27727_v52, %v38245_v36 }
 0x82d   :  { %30034 = vrot.lane.b32.xlu0 %v39870_v0, %s32571_s24  ;;  %30016 = vrot.lane.b32.xlu1 %v36041_v56, %s32571_s24  ;;  %v38317_v13 = vadd.f32 %v23704_v25, %v38167_v16  ;;  %v38320_v17 = vadd.f32 %v23794_v11, %v38192_v30 }
 0x82e   :  { %27881 = vmatprep.subr.mxu1 %v27752_v12  ;;  %v23706_v29 = vpop.f32.mrf.mxu0  ;;  %v23796_v59 = vpop.f32.mrf.mxu1 }
 0x82f   :  { %27882 = vmatpush1.msra.mxu1 %v27751_v45  ;;  %v38325_v62 = vpop.permute.xlu0 %27744  ;;  %v27731_v28 = vpop.permute.xlu1 %27730  ;;  %v38327_v50 = vadd.f32 %v23706_v29, %v23147_v47  ;;  %v38330_v10 = vadd.f32 %v23796_v59, %v38203_v20 }
 0x830   :  { %32367 = vmatmul.mubr.msk.f32.vlgmr.msra.gmra.mxu1 %vm117_vm1, %v38293_v5  ;;  %v27754_v16 = vsel %vm27748_vm4, %v38245_v36, %v27731_v28  ;;  %v27755_v2 = vsel %vm27748_vm4, %v27731_v28, %v38266_v8 }
 0x831   :  { %30038 = vrot.lane.b32.xlu0 %v36079_v53, %s32571_s24  ;;  %30024 = vrot.lane.b32.xlu1 %v36087_v54, %s32571_s24  ;;  %v23865_v30 = vpop.f32.mrf.mxu0  ;;  %v23936_v33 = vpop.f32.mrf.mxu1 }
 0x832   :  { %27952 = vmatprep.subr.mxu0 %v27754_v16  ;;  %28057 = vmatprep.mubr.f32.mxu1 %v39753_v14  ;;  %v38344_v20 = vadd.f32 %v23865_v30, %v38216_v35  ;;  %v38347_v4 = vadd.f32 %v23936_v33, %v38239_v34 }
 0x833   :  { %27953 = vmatpush1.msra.mxu0 %v27753_v3  ;;  %v38349_v40 = vpop.permute.xlu0 %28295  ;;  %v27735_v9 = vpop.permute.xlu1 %27734 }
 0x834   :  { %32368 = vmatmul.mubr.msk.f32.vlgmr.msra.gmra.mxu0 %vm117_vm1, %v38293_v5  ;;  %v27756_v46 = vsel %vm27748_vm4, %v38266_v8, %v27735_v9  ;;  %v23867_v37 = vpop.f32.mrf.mxu0  ;;  %v23938_v36 = vpop.f32.mrf.mxu1  ;;  %v27757_v60 = vsel %vm27748_vm4, %v27735_v9, %v38284_v21 }
 0x835   :  { %30042 = vrot.lane.b32.xlu0 %v36090_v41, %s32571_s24  ;;  %30028 = vrot.lane.b32.xlu1 %v36098_v24, %s32571_s24  ;;  %v38360_v35 = vadd.f32 %v23867_v37, %v38226_v38  ;;  %v38363_v34 = vadd.f32 %v23938_v36, %v38248_v27 }
 0x836   :  { %28023 = vmatprep.subr.mxu1 %v27756_v46  ;;  %28128 = vmatprep.mubr.f32.mxu0 %v39753_v14  ;;  %v24007_v61 = vpop.f32.mrf.mxu0  ;;  %v24078_v1 = vpop.f32.mrf.mxu1 }
 0x837   :  { %28024 = vmatpush1.msra.mxu1 %v27755_v2  ;;  %v38368_v63 = vpop.permute.xlu0 %28299  ;;  %v27739_v51 = vpop.permute.xlu1 %27738  ;;  %v38371_v32 = vadd.f32 %v24007_v61, %v38261_v31  ;;  %v38374_v38 = vadd.f32 %v24078_v1, %v38280_v15 }
 0x838   :  { %32369 = vmatmul.mubr.msk.f32.vlgmr.msra.gmra.mxu1 %vm117_vm1, %v38293_v5  ;;  %v27758_v27 = vsel %vm27748_vm4, %v38284_v21, %v27739_v51  ;;  %v24009_v8 = vpop.f32.mrf.mxu0  ;;  %v24080_v49 = vpop.f32.mrf.mxu1  ;;  %v27759_v12 = vsel %vm27748_vm4, %v27739_v51, %v38305_v42 }
 0x839   :  { %30593 = vrot.lane.b32.xlu0 %v36053_v18, %s32537_s21  ;;  %30032 = vrot.lane.b32.xlu1 %v36106_v23, %s32571_s24  ;;  %v38385_v31 = vadd.f32 %v24009_v8, %v38269_v39  ;;  %v38388_v15 = vadd.f32 %v24080_v49, %v38287_v55 }
 0x83a   :  { %28094 = vmatprep.subr.mxu0 %v27758_v27  ;;  %28199 = vmatprep.mubr.f32.mxu1 %v39753_v14 }
 0x83b   :  { %28095 = vmatpush1.msra.mxu0 %v27757_v60  ;;  %v28294_v7 = vpop.permute.xlu0 %28293  ;;  %v27743_v26 = vpop.permute.xlu1 %27742 }
 0x83c   :  { %32370 = vmatmul.mubr.msk.f32.vlgmr.msra.gmra.mxu0 %vm117_vm1, %v38293_v5  ;;  %v27760_v47 = vsel %vm27748_vm4, %v38305_v42, %v27743_v26  ;;  %v24149_v39 = vpop.f32.mrf.mxu0  ;;  %v24220_v52 = vpop.f32.mrf.mxu1  ;;  %v28324_v37 = vsel %vm28323_vm2, %v28294_v7, %v38349_v40 }
 0x83d   :  { %30597 = vrot.lane.b32.xlu0 %v36076_v43, %s32537_s21  ;;  %30036 = vrot.lane.b32.xlu1 %v36113_v48, %s32571_s24  ;;  %v38402_v21 = vadd.f32 %v24149_v39, %v38300_v58  ;;  %v38405_v55 = vadd.f32 %v24220_v52, %v38317_v13 }
 0x83e   :  { %28165 = vmatprep.subr.mxu1 %v27760_v47  ;;  %28270 = vmatprep.mubr.f32.mxu0 %v39753_v14  ;;  %v24151_v25 = vpop.f32.mrf.mxu0  ;;  %v24222_v11 = vpop.f32.mrf.mxu1 }
 0x83f   :  { %28166 = vmatpush1.msra.mxu1 %v27759_v12  ;;  %v38410_v45 = vpop.permute.xlu0 %28305  ;;  %v27747_v29 = vpop.permute.xlu1 %27746  ;;  %v38413_v59 = vadd.f32 %v24151_v25, %v38307_v6  ;;  %v38416_v58 = vadd.f32 %v24222_v11, %v38327_v50  ;;  %v27761_v6 = vsel %vm27748_vm4, %v27743_v26, %v38325_v62 }
 0x840   :  { %32371 = vmatmul.mubr.msk.f32.vlgmr.msra.gmra.mxu1 %vm117_vm1, %v38293_v5  ;;  %v27762_v42 = vsel %vm27748_vm4, %v38325_v62, %v27747_v29  ;;  %v24398_v13 = vpop.f32.mrf.mxu0 }
 0x841   :  { %30591 = vrot.lane.b32.xlu0 %v36041_v56, %s32537_s21  ;;  %30040 = vrot.lane.b32.xlu1 %v36120_v57, %s32571_s24  ;;  %v38427_v28 = vadd.f32 %v24398_v13, %v38320_v17 }
 0x842   :  { %28236 = vmatprep.subr.mxu0 %v27762_v42  ;;  %28419 = vmatprep.mubr.f32.mxu1 %v39753_v14  ;;  %v24469_v50 = vpop.f32.mrf.mxu1  ;;  %v24400_v16 = vpop.f32.mrf.mxu0 }
 0x843   :  { %28237 = vmatpush1.msra.mxu0 %v27761_v6  ;;  %v38432_v30 = vpop.permute.xlu0 %28309  ;;  %v28298_v33 = vpop.permute.xlu1 %28297  ;;  %v38435_v3 = vadd.f32 %v24469_v50, %v38344_v20  ;;  %v38438_v9 = vadd.f32 %v24400_v16, %v38330_v10  ;;  %v38451_v20 = vld [vmem:[%s39387_s3 + $0xa8] sm:$0xff] }
 0x844   :  { %32372 = vmatmul.mubr.msk.f32.vlgmr.msra.gmra.mxu0 %vm117_vm1, %v38293_v5  ;;  %v28325_v17 = vsel %vm28323_vm2, %v38349_v40, %v28298_v33  ;;  %v24471_v62 = vpop.f32.mrf.mxu1  ;;  %v24540_v46 = vpop.f32.mrf.mxu0  ;;  %v28326_v27 = vsel %vm28323_vm2, %v28298_v33, %v38368_v63 }
 0x845   :  { %30603 = vrot.lane.b32.xlu0 %v36098_v24, %s32537_s21  ;;  %30044 = vrot.lane.b32.xlu1 %v39753_v14, %s32571_s24  ;;  %v38454_v10 = vadd.f32 %v24471_v62, %v38360_v35  ;;  %v38457_v5 = vadd.f32 %v24540_v46, %v38347_v4 }
 0x846   :  { %28385 = vmatprep.subr.mxu1 %v28325_v17  ;;  %28490 = vmatprep.mubr.f32.mxu0 %v39753_v14  ;;  %v24542_v36 = vpop.f32.mrf.mxu0 }
 0x847   :  { %28386 = vmatpush1.msra.mxu1 %v28324_v37  ;;  %v38462_v2 = vpop.permute.xlu0 %28313  ;;  %v28302_v61 = vpop.permute.xlu1 %28301  ;;  %v38465_v1 = vadd.f32 %v24542_v36, %v38363_v34 }
 0x848   :  { %32374 = vmatmul.mubr.msk.f32.vlgmr.msra.gmra.mxu1 %vm117_vm1, %v38451_v20  ;;  %v28327_v4 = vsel %vm28323_vm2, %v38368_v63, %v28302_v61  ;;  %v24611_v35 = vpop.f32.mrf.mxu1  ;;  %v24682_v51 = vpop.f32.mrf.mxu0 }
 0x849   :  { %30607 = vrot.lane.b32.xlu0 %v36106_v23, %s32537_s21  ;;  %30595 = vrot.lane.b32.xlu1 %v36065_v44, %s32537_s21  ;;  %v38476_v40 = vadd.f32 %v24611_v35, %v38371_v32  ;;  %v38479_v34 = vadd.f32 %v24682_v51, %v38374_v38 }
 0x84a   :  { %28456 = vmatprep.subr.mxu0 %v28327_v4  ;;  %v24613_v8 = vpop.f32.mrf.mxu1  ;;  %28561 = vmatprep.mubr.f32.mxu1 %v39753_v14  ;;  %v24684_v49 = vpop.f32.mrf.mxu0 }
 0x84b   :  { %28457 = vmatpush1.msra.mxu0 %v28326_v27  ;;  %v38484_v60 = vpop.permute.xlu0 %28317  ;;  %v28304_v7 = vpop.permute.xlu1 %28303  ;;  %v38487_v26 = vadd.f32 %v24613_v8, %v38385_v31  ;;  %v38490_v32 = vadd.f32 %v24684_v49, %v38388_v15 }
 0x84c   :  { %32375 = vmatmul.mubr.msk.f32.vlgmr.msra.gmra.mxu0 %vm117_vm1, %v38451_v20  ;;  %v28328_v63 = vsel %vm28323_vm2, %v28302_v61, %v28304_v7  ;;  %v28329_v38 = vsel %vm28323_vm2, %v28304_v7, %v38410_v45  ;;  %v24753_v47 = vpop.f32.mrf.mxu1 }
 0x84d   :  { %30611 = vrot.lane.b32.xlu0 %v36113_v48, %s32537_s21  ;;  %30599 = vrot.lane.b32.xlu1 %v36087_v54, %s32537_s21  ;;  %v38502_v31 = vadd.f32 %v24753_v47, %v38402_v21 }
 0x84e   :  { %28527 = vmatprep.subr.mxu1 %v28329_v38  ;;  %v24755_v15 = vpop.f32.mrf.mxu1  ;;  %28632 = vmatprep.mubr.f32.mxu0 %v39753_v14  ;;  %v24824_v39 = vpop.f32.mrf.mxu0 }
 0x84f   :  { %28528 = vmatpush1.msra.mxu1 %v28328_v63  ;;  %v28322_v52 = vpop.permute.xlu0 %28321  ;;  %v28308_v12 = vpop.permute.xlu1 %28307  ;;  %v38506_v25 = vadd.f32 %v24755_v15, %v38413_v59  ;;  %v38509_v11 = vadd.f32 %v24824_v39, %v38405_v55 }
 0x850   :  { %32376 = vmatmul.mubr.msk.f32.vlgmr.msra.gmra.mxu1 %vm117_vm1, %v38451_v20  ;;  %v28330_v21 = vsel %vm28323_vm2, %v38410_v45, %v28308_v12  ;;  %v28331_v29 = vsel %vm28323_vm2, %v28308_v12, %v38432_v30  ;;  %v24973_v42 = vpop.f32.mrf.mxu1  ;;  %v24826_v13 = vpop.f32.mrf.mxu0 }
 0x851   :  { %30615 = vrot.lane.b32.xlu0 %v36120_v57, %s32537_s21  ;;  %30601 = vrot.lane.b32.xlu1 %v36044_v19, %s32537_s21  ;;  %v38522_v55 = vadd.f32 %v24973_v42, %v38427_v28  ;;  %v38525_v59 = vadd.f32 %v24826_v13, %v38416_v58 }
 0x852   :  { %28598 = vmatprep.subr.mxu0 %v28331_v29  ;;  %v24975_v6 = vpop.f32.mrf.mxu1  ;;  %28703 = vmatprep.mubr.f32.mxu1 %v39753_v14 }
 0x853   :  { %28599 = vmatpush1.msra.mxu0 %v28330_v21  ;;  %v38528_v45 = vpop.permute.xlu0 %28872  ;;  %v28312_v50 = vpop.permute.xlu1 %28311  ;;  %v38531_v16 = vadd.f32 %v24975_v6, %v38438_v9 }
 0x854   :  { %32377 = vmatmul.mubr.msk.f32.vlgmr.msra.gmra.mxu0 %vm117_vm1, %v38451_v20  ;;  %v28332_v28 = vsel %vm28323_vm2, %v38432_v30, %v28312_v50  ;;  %v28333_v58 = vsel %vm28323_vm2, %v28312_v50, %v38462_v2  ;;  %v25044_v33 = vpop.f32.mrf.mxu0 }
 0x855   :  { %30619 = vrot.lane.b32.xlu0 %v39753_v14, %s32537_s21  ;;  %30605 = vrot.lane.b32.xlu1 %v36056_v22, %s32537_s21  ;;  %v38544_v17 = vadd.f32 %v25044_v33, %v38435_v3 }
 0x856   :  { %28669 = vmatprep.subr.mxu1 %v28333_v58  ;;  %v25046_v9 = vpop.f32.mrf.mxu0  ;;  %28774 = vmatprep.mubr.f32.mxu0 %v39753_v14  ;;  %v39876_v58 = vld [vmem:[#allocation50_spill] sm:$0xff] }
 0x857   :  { %28670 = vmatpush1.msra.mxu1 %v28332_v28  ;;  %v28875_v62 = vpop.permute.xlu0 %28874  ;;  %v28316_v30 = vpop.permute.xlu1 %28315  ;;  %v38548_v46 = vadd.f32 %v25046_v9, %v38454_v10  ;;  %v39875_v28 = vld [vmem:[#allocation49_spill] sm:$0xff] }
 0x858   :  { %32378 = vmatmul.mubr.msk.f32.vlgmr.msra.gmra.mxu1 %vm117_vm1, %v38451_v20  ;;  %v28334_v37 = vsel %vm28323_vm2, %v38462_v2, %v28316_v30  ;;  %v28335_v3 = vsel %vm28323_vm2, %v28316_v30, %v38484_v60  ;;  %v25115_v36 = vpop.f32.mrf.mxu1  ;;  %v31822_v33 = vadd.f32 %v39876_v58, %v39875_v28 }
 0x859   :  { %31169 = vrot.lane.b32.xlu0 %v36065_v44, %s32538_s26  ;;  %30609 = vrot.lane.b32.xlu1 %v39870_v0, %s32537_s21  ;;  %v38561_v61 = vadd.f32 %v25115_v36, %v38457_v5 }
 0x85a   :  { %28740 = vmatprep.subr.mxu0 %v28335_v3  ;;  %v25117_v10 = vpop.f32.mrf.mxu1  ;;  %28845 = vmatprep.mubr.f32.mxu1 %v39753_v14 }
 0x85b   :  { %28741 = vmatpush1.msra.mxu0 %v28334_v37  ;;  %v28879_v4 = vpop.permute.xlu0 %28878  ;;  %v28320_v2 = vpop.permute.xlu1 %28319  ;;  %v38565_v35 = vadd.f32 %v25117_v10, %v38465_v1 }
 0x85c   :  { %32379 = vmatmul.mubr.msk.f32.vlgmr.msra.gmra.mxu0 %vm117_vm1, %v38451_v20  ;;  %v28336_v44 = vsel %vm28323_vm2, %v38484_v60, %v28320_v2  ;;  %v28337_v51 = vsel %vm28323_vm2, %v28320_v2, %v28322_v52  ;;  %v25186_v5 = vpop.f32.mrf.mxu0 }
 0x85d   :  { %31171 = vrot.lane.b32.xlu0 %v36076_v43, %s32538_s26  ;;  %30613 = vrot.lane.b32.xlu1 %v36079_v53, %s32537_s21  ;;  %v38577_v27 = vadd.f32 %v25186_v5, %v38476_v40 }
 0x85e   :  { %28811 = vmatprep.subr.mxu1 %v28337_v51  ;;  %v25188_v1 = vpop.f32.mrf.mxu0  ;;  %28993 = vmatprep.mubr.f32.mxu0 %v39753_v14 }
 0x85f   :  { %28812 = vmatpush1.msra.mxu1 %v28336_v44  ;;  %v28883_v8 = vpop.permute.xlu0 %28882  ;;  %v28871_v49 = vpop.permute.xlu1 %28870  ;;  %v38581_v60 = vadd.f32 %v25188_v1, %v38487_v26  ;;  %v39878_v1 = vld [vmem:[#allocation56_spill] sm:$0xff] }
 0x860   :  { %32380 = vmatmul.mubr.msk.f32.vlgmr.msra.gmra.mxu1 %vm117_vm1, %v38451_v20  ;;  %v28899_v43 = vsel %vm5175_vm9, %v28871_v49, %v38528_v45  ;;  %v25257_v7 = vpop.f32.mrf.mxu1 }
 0x861   :  { %31175 = vrot.lane.b32.xlu0 %v36044_v19, %s32538_s26  ;;  %30617 = vrot.lane.b32.xlu1 %v36090_v41, %s32537_s21  ;;  %v38592_v40 = vadd.f32 %v25257_v7, %v38479_v34  ;;  %v38602_v19 = vld [vmem:[%s39387_s3 + $0xb0] sm:$0xff] }
 0x862   :  { %28959 = vmatprep.subr.mxu0 %v28899_v43  ;;  %v25259_v63 = vpop.f32.mrf.mxu1  ;;  %29064 = vmatprep.mubr.f32.mxu1 %v39753_v14 }
 0x863   :  { %v28887_v26 = vpop.permute.xlu0 %28886  ;;  %v28869_v38 = vpop.permute.xlu1 %28868  ;;  %v38596_v20 = vadd.f32 %v25259_v63, %v38490_v32 }
 0x864   :  { %v28898_v47 = vsel %vm5175_vm9, %v28869_v38, %v28871_v49  ;;  %v25328_v15 = vpop.f32.mrf.mxu0  ;;  %v39879_v38 = vld [vmem:[#allocation54_spill] sm:$0xff] }
 0x865   :  { %31179 = vrot.lane.b32.xlu0 %v36056_v22, %s32538_s26  ;;  %31167 = vrot.lane.b32.xlu1 %v36053_v18, %s32538_s26  ;;  %v38609_v34 = vadd.f32 %v25328_v15, %v38502_v31  ;;  %v28900_v22 = vsel %vm5175_vm9, %v38528_v45, %v28875_v62 }
 0x866   :  { %28960 = vmatpush1.msra.mxu0 %v28898_v47  ;;  %v25330_v32 = vpop.f32.mrf.mxu0 }
 0x867   :  { %32382 = vmatmul.mubr.msk.f32.vlgmr.msra.gmra.mxu0 %vm117_vm1, %v38602_v19  ;;  %v28891_v39 = vpop.permute.xlu0 %28890  ;;  %v28877_v52 = vpop.permute.xlu1 %28876  ;;  %v38614_v12 = vadd.f32 %v25330_v32, %v38506_v25 }
 0x868   :  { %v28901_v21 = vsel %vm5175_vm9, %v28875_v62, %v28877_v52  ;;  %v25399_v29 = vpop.f32.mrf.mxu1  ;;  %29135 = vmatprep.mubr.f32.mxu0 %v39753_v14 }
 0x869   :  { %31183 = vrot.lane.b32.xlu0 %v39870_v0, %s32538_s26  ;;  %31165 = vrot.lane.b32.xlu1 %v36041_v56, %s32538_s26  ;;  %v38623_v18 = vadd.f32 %v25399_v29, %v38509_v11  ;;  %v28902_v56 = vsel %vm5175_vm9, %v28877_v52, %v28879_v4 }
 0x86a   :  { %29030 = vmatprep.subr.mxu1 %v28901_v21  ;;  %v25401_v31 = vpop.f32.mrf.mxu1  ;;  %v39880_v21 = vld [vmem:[#allocation59_spill] sm:$0xff] }
 0x86b   :  { %29031 = vmatpush1.msra.mxu1 %v28900_v22  ;;  %v28895_v25 = vpop.permute.xlu0 %28894  ;;  %v28881_v42 = vpop.permute.xlu1 %28880  ;;  %v38628_v13 = vadd.f32 %v25401_v31, %v38525_v59 }
 0x86c   :  { %32383 = vmatmul.mubr.msk.f32.vlgmr.msra.gmra.mxu1 %vm117_vm1, %v38602_v19  ;;  %v28903_v0 = vsel %vm5175_vm9, %v28879_v4, %v28881_v42 }
 0x86d   :  { %31187 = vrot.lane.b32.xlu0 %v36079_v53, %s32538_s26  ;;  %31173 = vrot.lane.b32.xlu1 %v36087_v54, %s32538_s26  ;;  %v28904_v54 = vsel %vm5175_vm9, %v28881_v42, %v28883_v8 }
 0x86e   :  { %29101 = vmatprep.subr.mxu0 %v28903_v0  ;;  %29206 = vmatprep.mubr.f32.mxu1 %v39753_v14 }
 0x86f   :  { %29102 = vmatpush1.msra.mxu0 %v28902_v56  ;;  %v38639_v11 = vpop.permute.xlu0 %29444  ;;  %v28885_v59 = vpop.permute.xlu1 %28884 }
 0x870   :  { %32384 = vmatmul.mubr.msk.f32.vlgmr.msra.gmra.mxu0 %vm117_vm1, %v38602_v19  ;;  %v28905_v6 = vsel %vm5175_vm9, %v28883_v8, %v28885_v59  ;;  %v25547_v45 = vpop.f32.mrf.mxu0  ;;  %v28906_v30 = vsel %vm5175_vm9, %v28885_v59, %v28887_v26  ;;  %v39881_v59 = vld [vmem:[#allocation61_spill] sm:$0xff] }
 0x871   :  { %31191 = vrot.lane.b32.xlu0 %v36090_v41, %s32538_s26  ;;  %31177 = vrot.lane.b32.xlu1 %v36098_v24, %s32538_s26  ;;  %v38649_v53 = vadd.f32 %v25547_v45, %v38522_v55 }
 0x872   :  { %29172 = vmatprep.subr.mxu1 %v28905_v6  ;;  %v25549_v50 = vpop.f32.mrf.mxu0  ;;  %29277 = vmatprep.mubr.f32.mxu0 %v39753_v14 }
 0x873   :  { %29173 = vmatpush1.msra.mxu1 %v28904_v54  ;;  %v38655_v9 = vpop.permute.xlu0 %29448  ;;  %v28889_v62 = vpop.permute.xlu1 %28888  ;;  %v38658_v41 = vadd.f32 %v25549_v50, %v38531_v16  ;;  %v39877_v16 = vld [vmem:[#allocation55_spill] sm:$0xff] }
 0x874   :  { %32385 = vmatmul.mubr.msk.f32.vlgmr.msra.gmra.mxu1 %vm117_vm1, %v38602_v19  ;;  %v28907_v24 = vsel %vm5175_vm9, %v28887_v26, %v28889_v62  ;;  %v25618_v55 = vpop.f32.mrf.mxu1  ;;  %v31823_v36 = vadd.f32 %v31822_v33, %v39877_v16 }
 0x875   :  { %31181 = vrot.lane.b32.xlu1 %v36106_v23, %s32538_s26  ;;  %29243 = vmatprep.subr.mxu0 %v28907_v24  ;;  %v38667_v37 = vadd.f32 %v25618_v55, %v38544_v17  ;;  %v28908_v17 = vsel %vm5175_vm9, %v28889_v62, %v28891_v39 }
 0x876   :  { %29244 = vmatpush1.msra.mxu0 %v28906_v30  ;;  %v25620_v3 = vpop.f32.mrf.mxu1  ;;  %29348 = vmatprep.mubr.f32.mxu1 %v39753_v14  ;;  %v31824_v8 = vadd.f32 %v31823_v36, %v39878_v1 }
 0x877   :  { %v29443_v10 = vpop.permute.xlu0 %29442  ;;  %32386 = vmatmul.mubr.msk.f32.vlgmr.msra.gmra.mxu0 %vm117_vm1, %v38602_v19  ;;  %v28893_v4 = vpop.permute.xlu1 %28892  ;;  %v38674_v2 = vadd.f32 %v25620_v3, %v38548_v46 }
 0x878   :  { %v28909_v23 = vsel %vm5175_vm9, %v28891_v39, %v28893_v4  ;;  %v25689_v44 = vpop.f32.mrf.mxu0  ;;  %29419 = vmatprep.mubr.f32.mxu0 %v39753_v14  ;;  %v31825_v47 = vadd.f32 %v31824_v8, %v39879_v38  ;;  %v29472_v52 = vsel %vm5750_vm10, %v29443_v10, %v38639_v11  ;;  %v39883_v10 = vld [vmem:[#allocation67_spill] sm:$0xff] }
 0x879   :  { %31185 = vrot.lane.b32.xlu1 %v36113_v48, %s32538_s26  ;;  %29314 = vmatprep.subr.mxu1 %v28909_v23  ;;  %v38682_v51 = vadd.f32 %v25689_v44, %v38561_v61  ;;  %v28910_v48 = vsel %vm5175_vm9, %v28893_v4, %v28895_v25 }
 0x87a   :  { %29315 = vmatpush1.msra.mxu1 %v28908_v17  ;;  %v25691_v5 = vpop.f32.mrf.mxu0  ;;  %v31826_v29 = vadd.f32 %v31825_v47, %v39880_v21 }
 0x87b   :  { %v29455_v46 = vpop.permute.xlu0 %29454  ;;  %32387 = vmatmul.mubr.msk.f32.vlgmr.msra.gmra.mxu1 %vm117_vm1, %v38602_v19  ;;  %v28897_v49 = vpop.permute.xlu1 %28896  ;;  %v38688_v43 = vadd.f32 %v25691_v5, %v38565_v35 }
 0x87c   :  { %v28911_v7 = vsel %vm5175_vm9, %v28895_v25, %v28897_v49  ;;  %v25760_v63 = vpop.f32.mrf.mxu1  ;;  %29567 = vmatprep.mubr.f32.mxu1 %v39753_v14  ;;  %v31827_v6 = vadd.f32 %v31826_v29, %v39881_v59  ;;  %vm30046_vm9 = vcmask 154624   ;;  %v39888_v59 = vld [vmem:[#allocation45_spill] sm:$0xff] }
 0x87d   :  { %31189 = vrot.lane.b32.xlu1 %v36120_v57, %s32538_s26  ;;  %29385 = vmatprep.subr.mxu0 %v28911_v7  ;;  %v38696_v61 = vadd.f32 %v25760_v63, %v38577_v27  ;;  %v38709_v27 = vld [vmem:[%s39387_s3 + $0xb8] sm:$0xff] }
 0x87e   :  { %29386 = vmatpush1.msra.mxu0 %v28910_v48  ;;  %v25762_v26 = vpop.f32.mrf.mxu1 }
 0x87f   :  { %v29459_v35 = vpop.permute.xlu0 %29458  ;;  %32388 = vmatmul.mubr.msk.f32.vlgmr.msra.gmra.mxu0 %vm117_vm1, %v38602_v19  ;;  %v29447_v15 = vpop.permute.xlu1 %29446  ;;  %v38702_v32 = vadd.f32 %v25762_v26, %v38581_v60 }
 0x880   :  { %v29473_v39 = vsel %vm5750_vm10, %v38639_v11, %v29447_v15  ;;  %v25831_v57 = vpop.f32.mrf.mxu0  ;;  %29638 = vmatprep.mubr.f32.mxu0 %v39753_v14 }
 0x881   :  { %31193 = vrot.lane.b32.xlu1 %v39753_v14, %s32538_s26  ;;  %29533 = vmatprep.subr.mxu1 %v29473_v39  ;;  %v38717_v60 = vadd.f32 %v25831_v57, %v38592_v40  ;;  %v29474_v40 = vsel %vm5750_vm10, %v29447_v15, %v38655_v9 }
 0x882   :  { %29534 = vmatpush1.msra.mxu1 %v29472_v52  ;;  %v25833_v19 = vpop.f32.mrf.mxu0 }
 0x883   :  { %v29463_v22 = vpop.permute.xlu0 %29462  ;;  %32390 = vmatmul.mubr.msk.f32.vlgmr.msra.gmra.mxu1 %vm117_vm1, %v38709_v27  ;;  %v29451_v31 = vpop.permute.xlu1 %29450  ;;  %v38723_v25 = vadd.f32 %v25833_v19, %v38596_v20 }
 0x884   :  { %v29475_v42 = vsel %vm5750_vm10, %v38655_v9, %v29451_v31  ;;  %v25902_v0 = vpop.f32.mrf.mxu1  ;;  %29709 = vmatprep.mubr.f32.mxu1 %v39753_v14  ;;  %v39882_v9 = vld [vmem:[#allocation64_spill] sm:$0xff] }
 0x885   :  { %29604 = vmatprep.subr.mxu0 %v29475_v42  ;;  %v38731_v56 = vadd.f32 %v25902_v0, %v38609_v34  ;;  %v31828_v62 = vadd.f32 %v31827_v6, %v39882_v9 }
 0x886   :  { %29605 = vmatpush1.msra.mxu0 %v29474_v40  ;;  %v25904_v11 = vpop.f32.mrf.mxu1 }
 0x887   :  { %v29467_v45 = vpop.permute.xlu0 %29466  ;;  %32391 = vmatmul.mubr.msk.f32.vlgmr.msra.gmra.mxu0 %vm117_vm1, %v38709_v27  ;;  %v29453_v20 = vpop.permute.xlu1 %29452  ;;  %v38737_v54 = vadd.f32 %v25904_v11, %v38614_v12  ;;  %v31829_v4 = vadd.f32 %v31828_v62, %v39883_v10  ;;  %v39890_v62 = vld [vmem:[#allocation71_spill] sm:$0xff] }
 0x888   :  { %v29476_v50 = vsel %vm5750_vm10, %v29451_v31, %v29453_v20  ;;  %v29477_v28 = vsel %vm5750_vm10, %v29453_v20, %v29455_v46  ;;  %v25973_v58 = vpop.f32.mrf.mxu0  ;;  %29780 = vmatprep.mubr.f32.mxu0 %v39753_v14 }
 0x889   :  { %29675 = vmatprep.subr.mxu1 %v29477_v28  ;;  %v38743_v34 = vadd.f32 %v25973_v58, %v38623_v18  ;;  %v38817_v28 = vld [vmem:[%s39387_s3 + $0xc0] sm:$0xff] }
 0x88a   :  { %29676 = vmatpush1.msra.mxu1 %v29476_v50  ;;  %v25975_v33 = vpop.f32.mrf.mxu0 }
 0x88b   :  { %v29471_v24 = vpop.permute.xlu0 %29470  ;;  %32392 = vmatmul.mubr.msk.f32.vlgmr.msra.gmra.mxu1 %vm117_vm1, %v38709_v27  ;;  %v29457_v12 = vpop.permute.xlu1 %29456  ;;  %v38749_v55 = vadd.f32 %v25975_v33, %v38628_v13 }
 0x88c   :  { %v29478_v30 = vsel %vm5750_vm10, %v29455_v46, %v29457_v12  ;;  %v29479_v3 = vsel %vm5750_vm10, %v29457_v12, %v29459_v35  ;;  %v26121_v16 = vpop.f32.mrf.mxu1  ;;  %29851 = vmatprep.mubr.f32.mxu1 %v39753_v14  ;;  %v39884_v46 = vld [vmem:[#allocation70_spill] sm:$0xff] }
 0x88d   :  { %29746 = vmatprep.subr.mxu0 %v29479_v3  ;;  %v38755_v18 = vadd.f32 %v26121_v16, %v38649_v53  ;;  %v31830_v49 = vadd.f32 %v31829_v4, %v39884_v46 }
 0x88e   :  { %29747 = vmatpush1.msra.mxu0 %v29478_v30  ;;  %v26123_v36 = vpop.f32.mrf.mxu1 }
 0x88f   :  { %v38758_v23 = vpop.permute.xlu0 %30020  ;;  %32393 = vmatmul.mubr.msk.f32.vlgmr.msra.gmra.mxu0 %vm117_vm1, %v38709_v27  ;;  %v29461_v13 = vpop.permute.xlu1 %29460  ;;  %v38763_v44 = vadd.f32 %v26123_v36, %v38658_v41 }
 0x890   :  { %v29480_v17 = vsel %vm5750_vm10, %v29459_v35, %v29461_v13  ;;  %v29481_v5 = vsel %vm5750_vm10, %v29461_v13, %v29463_v22  ;;  %v26192_v1 = vpop.f32.mrf.mxu0  ;;  %29922 = vmatprep.mubr.f32.mxu0 %v39753_v14  ;;  %v39885_v35 = vld [vmem:[#allocation72_spill] sm:$0xff] }
 0x891   :  { %29817 = vmatprep.subr.mxu1 %v29481_v5  ;;  %v38769_v53 = vadd.f32 %v26192_v1, %v38667_v37  ;;  %v31831_v15 = vadd.f32 %v31830_v49, %v39885_v35 }
 0x892   :  { %29818 = vmatpush1.msra.mxu1 %v29480_v17  ;;  %v26194_v8 = vpop.f32.mrf.mxu0 }
 0x893   :  { %v30023_v7 = vpop.permute.xlu0 %30022  ;;  %32394 = vmatmul.mubr.msk.f32.vlgmr.msra.gmra.mxu1 %vm117_vm1, %v38709_v27  ;;  %v29465_v41 = vpop.permute.xlu1 %29464  ;;  %v38775_v63 = vadd.f32 %v26194_v8, %v38674_v2 }
 0x894   :  { %v29482_v48 = vsel %vm5750_vm10, %v29463_v22, %v29465_v41  ;;  %v29483_v26 = vsel %vm5750_vm10, %v29465_v41, %v29467_v45  ;;  %v26263_v38 = vpop.f32.mrf.mxu1  ;;  %29993 = vmatprep.mubr.f32.mxu1 %v39753_v14  ;;  %v39886_v22 = vld [vmem:[#allocation73_spill] sm:$0xff]  ;;  %v30049_v4 = vsel %vm30046_vm9, %v38758_v23, %v30023_v7 }
 0x895   :  { %29888 = vmatprep.subr.mxu0 %v29483_v26  ;;  %v38781_v37 = vadd.f32 %v26263_v38, %v38682_v51  ;;  %v31832_v31 = vadd.f32 %v31831_v15, %v39886_v22 }
 0x896   :  { %29889 = vmatpush1.msra.mxu0 %v29482_v48  ;;  %v26265_v47 = vpop.f32.mrf.mxu1 }
 0x897   :  { %v30027_v39 = vpop.permute.xlu0 %30026  ;;  %32395 = vmatmul.mubr.msk.f32.vlgmr.msra.gmra.mxu0 %vm117_vm1, %v38709_v27  ;;  %v29469_v2 = vpop.permute.xlu1 %29468  ;;  %v38787_v57 = vadd.f32 %v26265_v47, %v38688_v43 }
 0x898   :  { %v29484_v52 = vsel %vm5750_vm10, %v29467_v45, %v29469_v2  ;;  %v29485_v19 = vsel %vm5750_vm10, %v29469_v2, %v29471_v24  ;;  %v26334_v21 = vpop.f32.mrf.mxu0  ;;  %30142 = vmatprep.mubr.f32.mxu0 %v39753_v14  ;;  %v39891_v24 = vld [vmem:[#allocation46_spill] sm:$0xff] }
 0x899   :  { %29959 = vmatprep.subr.mxu1 %v29485_v19  ;;  %v38793_v51 = vadd.f32 %v26334_v21, %v38696_v61  ;;  %v39887_v61 = vld [vmem:[#allocation68_spill] sm:$0xff] }
 0x89a   :  { %29960 = vmatpush1.msra.mxu1 %v29484_v52  ;;  %v26336_v29 = vpop.f32.mrf.mxu0  ;;  %v38806_v6 = vmul.f32 %v39888_v59, %v39887_v61 }
 0x89b   :  { %v30031_v42 = vpop.permute.xlu0 %30030  ;;  %32396 = vmatmul.mubr.msk.f32.vlgmr.msra.gmra.mxu1 %vm117_vm1, %v38709_v27  ;;  %v30019_v43 = vpop.permute.xlu1 %30018  ;;  %v38799_v0 = vadd.f32 %v26336_v29, %v38702_v32 }
 0x89c   :  { %v30048_v40 = vsel %vm30046_vm9, %v30019_v43, %v38758_v23  ;;  %v26405_v11 = vpop.f32.mrf.mxu1  ;;  %30213 = vmatprep.mubr.f32.mxu1 %v39753_v14  ;;  %39889 = vst [vmem:[#allocation13_spill] sm:$0xff] %v38806_v6  ;;  %v31833_v58 = vadd.f32 %v31832_v31, %v38806_v6 }
 0x89d   :  { %30108 = vmatprep.subr.mxu0 %v30048_v40  ;;  %v38809_v45 = vadd.f32 %v26405_v11, %v38717_v60  ;;  %v38823_v60 = vmul.f32 %v39891_v24, %v39890_v62 }
 0x89e   :  { %v26407_v20 = vpop.f32.mrf.mxu1 }
 0x89f   :  { %v30035_v27 = vpop.permute.xlu0 %30034  ;;  %v30017_v50 = vpop.permute.xlu1 %30016  ;;  %v38812_v32 = vadd.f32 %v26407_v20, %v38723_v25  ;;  %39892 = vst [vmem:[#allocation113_spill] sm:$0xff] %v38823_v60  ;;  %v31834_v36 = vadd.f32 %v31833_v58, %v38823_v60 }
 0x8a0   :  { %v30047_v33 = vsel %vm30046_vm9, %v30017_v50, %v30019_v43  ;;  %v26476_v9 = vpop.f32.mrf.mxu0 }
 0x8a1   :  { %30109 = vmatpush1.msra.mxu0 %v30047_v33  ;;  %v38826_v12 = vadd.f32 %v26476_v9, %v38731_v56  ;;  %v38896_v33 = vld [vmem:[%s39387_s3 + $0xc8] sm:$0xff] }
 0x8a2   :  { %32398 = vmatmul.mubr.msk.f32.vlgmr.msra.gmra.mxu0 %vm117_vm1, %v38817_v28  ;;  %v26478_v25 = vpop.f32.mrf.mxu0 }
 0x8a3   :  { %v30039_v30 = vpop.permute.xlu0 %30038  ;;  %v30025_v3 = vpop.permute.xlu1 %30024  ;;  %v38831_v16 = vadd.f32 %v26478_v25, %v38737_v54  ;;  %30284 = vmatprep.mubr.f32.mxu0 %v39753_v14 }
 0x8a4   :  { %v30050_v10 = vsel %vm30046_vm9, %v30023_v7, %v30025_v3  ;;  %v30051_v8 = vsel %vm30046_vm9, %v30025_v3, %v30027_v39 }
 0x8a5   :  { %31835 = vadd.xlane.f32.xlu1 %v31834_v36  ;;  %30179 = vmatprep.subr.mxu1 %v30050_v10 }
 0x8a6   :  { %30180 = vmatpush1.msra.mxu1 %v30049_v4  ;;  %v26547_v56 = vpop.f32.mrf.mxu1 }
 0x8a7   :  { %v30043_v13 = vpop.permute.xlu0 %30042  ;;  %v38839_v17 = vadd.f32 %v26547_v56, %v38743_v34  ;;  %32399 = vmatmul.mubr.msk.f32.vlgmr.msra.gmra.mxu1 %vm117_vm1, %v38817_v28  ;;  %v30029_v54 = vpop.permute.xlu1 %30028 }
 0x8a8   :  { %v26549_v5 = vpop.f32.mrf.mxu1  ;;  %v30052_v1 = vsel %vm30046_vm9, %v30027_v39, %v30029_v54  ;;  %30355 = vmatprep.mubr.f32.mxu1 %v39753_v14  ;;  %v30053_v7 = vsel %vm30046_vm9, %v30029_v54, %v30031_v42 }
 0x8a9   :  { %v38847_v23 = vadd.f32 %v26549_v5, %v38749_v55  ;;  %30250 = vmatprep.subr.mxu0 %v30052_v1 }
 0x8aa   :  { %30251 = vmatpush1.msra.mxu0 %v30051_v8 }
 0x8ab   :  { %v30594_v46 = vpop.permute.xlu0 %30593  ;;  %32400 = vmatmul.mubr.msk.f32.vlgmr.msra.gmra.mxu0 %vm117_vm1, %v38817_v28  ;;  %v30033_v34 = vpop.permute.xlu1 %30032 }
 0x8ac   :  { %v30054_v49 = vsel %vm30046_vm9, %v30031_v42, %v30033_v34  ;;  %30426 = vmatprep.mubr.f32.mxu0 %v39753_v14  ;;  %v30055_v35 = vsel %vm30046_vm9, %v30033_v34, %v30035_v27 }
 0x8ad   :  { %30321 = vmatprep.subr.mxu1 %v30054_v49 }
 0x8ae   :  { %30322 = vmatpush1.msra.mxu1 %v30053_v7 }
 0x8af   :  { %v26696_v41 = vpop.f32.mrf.mxu0  ;;  %v30598_v48 = vpop.permute.xlu0 %30597  ;;  %32401 = vmatmul.mubr.msk.f32.vlgmr.msra.gmra.mxu1 %vm117_vm1, %v38817_v28 }
 0x8b0   :  { %v38857_v55 = vadd.f32 %v26696_v41, %v38755_v18  ;;  %v30037_v26 = vpop.permute.xlu1 %30036  ;;  %30497 = vmatprep.mubr.f32.mxu1 %v39753_v14 }
 0x8b1   :  { %v26698_v38 = vpop.f32.mrf.mxu0  ;;  %v30056_v47 = vsel %vm30046_vm9, %v30035_v27, %v30037_v26  ;;  %v30057_v21 = vsel %vm30046_vm9, %v30037_v26, %v30039_v30 }
 0x8b2   :  { %v38863_v15 = vadd.f32 %v26698_v38, %v38763_v44  ;;  %30392 = vmatprep.subr.mxu0 %v30056_v47 }
 0x8b3   :  { %30393 = vmatpush1.msra.mxu0 %v30055_v35  ;;  %v30592_v39 = vpop.permute.xlu0 %30591 }
 0x8b4   :  { %v26767_v2 = vpop.f32.mrf.mxu1  ;;  %32402 = vmatmul.mubr.msk.f32.vlgmr.msra.gmra.mxu0 %vm117_vm1, %v38817_v28  ;;  %v30041_v18 = vpop.permute.xlu1 %30040 }
 0x8b5   :  { %v38868_v52 = vadd.f32 %v26767_v2, %v38769_v53  ;;  %v30058_v19 = vsel %vm30046_vm9, %v30039_v30, %v30041_v18  ;;  %30568 = vmatprep.mubr.f32.mxu0 %v39753_v14  ;;  %v30059_v40 = vsel %vm30046_vm9, %v30041_v18, %v30043_v13 }
 0x8b6   :  { %v26769_v29 = vpop.f32.mrf.mxu1  ;;  %30463 = vmatprep.subr.mxu1 %v30058_v19 }
 0x8b7   :  { %v38874_v44 = vadd.f32 %v26769_v29, %v38775_v63  ;;  %30464 = vmatpush1.msra.mxu1 %v30057_v21  ;;  %v30604_v22 = vpop.permute.xlu0 %30603 }
 0x8b8   :  { %v26838_v31 = vpop.f32.mrf.mxu0  ;;  %32403 = vmatmul.mubr.msk.f32.vlgmr.msra.gmra.mxu1 %vm117_vm1, %v38817_v28  ;;  %v30045_v42 = vpop.permute.xlu1 %30044 }
 0x8b9   :  { %v38879_v53 = vadd.f32 %v26838_v31, %v38781_v37  ;;  %v30060_v43 = vsel %vm30046_vm9, %v30043_v13, %v30045_v42  ;;  %30716 = vmatprep.mubr.f32.mxu1 %v39753_v14 }
 0x8ba   :  { %v26840_v11 = vpop.f32.mrf.mxu0  ;;  %30534 = vmatprep.subr.mxu0 %v30060_v43 }
 0x8bb   :  { %v38885_v63 = vadd.f32 %v26840_v11, %v38787_v57  ;;  %30535 = vmatpush1.msra.mxu0 %v30059_v40  ;;  %v30608_v20 = vpop.permute.xlu0 %30607  ;;  %v30621_v57 = vsel %vm6900_vm12, %v30592_v39, %v30594_v46 }
 0x8bc   :  { %v26909_v27 = vpop.f32.mrf.mxu1  ;;  %32404 = vmatmul.mubr.msk.f32.vlgmr.msra.gmra.mxu0 %vm117_vm1, %v38817_v28  ;;  %v30596_v50 = vpop.permute.xlu1 %30595 }
 0x8bd   :  { %v38890_v37 = vadd.f32 %v26909_v27, %v38793_v51  ;;  %v30622_v58 = vsel %vm6900_vm12, %v30594_v46, %v30596_v50  ;;  %30787 = vmatprep.mubr.f32.mxu0 %v39753_v14  ;;  %v30623_v10 = vsel %vm6900_vm12, %v30596_v50, %v30598_v48 }
 0x8be   :  { %v26911_v9 = vpop.f32.mrf.mxu1  ;;  %30682 = vmatprep.subr.mxu1 %v30622_v58 }
 0x8bf   :  { %v38901_v25 = vadd.f32 %v26911_v9, %v38799_v0  ;;  %30683 = vmatpush1.msra.mxu1 %v30621_v57  ;;  %v30612_v28 = vpop.permute.xlu0 %30611 }
 0x8c0   :  { %v26980_v51 = vpop.f32.mrf.mxu0  ;;  %32406 = vmatmul.mubr.msk.f32.vlgmr.msra.gmra.mxu1 %vm117_vm1, %v38896_v33  ;;  %v30600_v30 = vpop.permute.xlu1 %30599 }
 0x8c1   :  { %v38906_v3 = vadd.f32 %v26980_v51, %v38809_v45  ;;  %v30624_v36 = vsel %vm6900_vm12, %v30598_v48, %v30600_v30  ;;  %30858 = vmatprep.mubr.f32.mxu1 %v39753_v14 }
 0x8c2   :  { %v26982_v4 = vpop.f32.mrf.mxu0  ;;  %30753 = vmatprep.subr.mxu0 %v30624_v36 }
 0x8c3   :  { %v38912_v0 = vadd.f32 %v26982_v4, %v38812_v32  ;;  %30754 = vmatpush1.msra.mxu0 %v30623_v10  ;;  %v30616_v56 = vpop.permute.xlu0 %30615 }
 0x8c4   :  { %v27051_v13 = vpop.f32.mrf.mxu1  ;;  %32407 = vmatmul.mubr.msk.f32.vlgmr.msra.gmra.mxu0 %vm117_vm1, %v38896_v33  ;;  %v30602_v54 = vpop.permute.xlu1 %30601 }
 0x8c5   :  { %v38917_v45 = vadd.f32 %v27051_v13, %v38826_v12  ;;  %v30625_v5 = vsel %vm6900_vm12, %v30600_v30, %v30602_v54  ;;  %v30626_v1 = vsel %vm6900_vm12, %v30602_v54, %v30604_v22  ;;  %30929 = vmatprep.mubr.f32.mxu0 %v39753_v14 }
 0x8c6   :  { %v27053_v8 = vpop.f32.mrf.mxu1  ;;  %30824 = vmatprep.subr.mxu1 %v30626_v1 }
 0x8c7   :  { %v38923_v32 = vadd.f32 %v27053_v8, %v38831_v16  ;;  %30825 = vmatpush1.msra.mxu1 %v30625_v5  ;;  %v30620_v49 = vpop.permute.xlu0 %30619 }
 0x8c8   :  { %v27122_v46 = vpop.f32.mrf.mxu0  ;;  %32408 = vmatmul.mubr.msk.f32.vlgmr.msra.gmra.mxu1 %vm117_vm1, %v38896_v33  ;;  %v30606_v34 = vpop.permute.xlu1 %30605 }
 0x8c9   :  { %v38928_v12 = vadd.f32 %v27122_v46, %v38839_v17  ;;  %v30627_v7 = vsel %vm6900_vm12, %v30604_v22, %v30606_v34  ;;  %v30628_v41 = vsel %vm6900_vm12, %v30606_v34, %v30608_v20  ;;  %31000 = vmatprep.mubr.f32.mxu1 %v39753_v14 }
 0x8ca   :  { %v27124_v48 = vpop.f32.mrf.mxu0  ;;  %30895 = vmatprep.subr.mxu0 %v30628_v41 }
 0x8cb   :  { %v38934_v16 = vadd.f32 %v27124_v48, %v38847_v23  ;;  %30896 = vmatpush1.msra.mxu0 %v30627_v7  ;;  %v31170_v2 = vpop.permute.xlu0 %31169 }
 0x8cc   :  { %v27271_v26 = vpop.f32.mrf.mxu1  ;;  %32409 = vmatmul.mubr.msk.f32.vlgmr.msra.gmra.mxu0 %vm117_vm1, %v38896_v33  ;;  %v30610_v38 = vpop.permute.xlu1 %30609 }
 0x8cd   :  { %v38939_v17 = vadd.f32 %v27271_v26, %v38857_v55  ;;  %v30629_v47 = vsel %vm6900_vm12, %v30608_v20, %v30610_v38  ;;  %v30630_v35 = vsel %vm6900_vm12, %v30610_v38, %v30612_v28  ;;  %31071 = vmatprep.mubr.f32.mxu0 %v39753_v14 }
 0x8ce   :  { %v27273_v39 = vpop.f32.mrf.mxu1  ;;  %30966 = vmatprep.subr.mxu1 %v30630_v35 }
 0x8cf   :  { %v38945_v23 = vadd.f32 %v27273_v39, %v38863_v15  ;;  %30967 = vmatpush1.msra.mxu1 %v30629_v47  ;;  %v31172_v43 = vpop.permute.xlu0 %31171 }
 0x8d0   :  { %v27342_v18 = vpop.f32.mrf.mxu0  ;;  %32410 = vmatmul.mubr.msk.f32.vlgmr.msra.gmra.mxu1 %vm117_vm1, %v38896_v33  ;;  %v30614_v19 = vpop.permute.xlu1 %30613  ;;  %v31197_v54 = vsel %vm7475_vm13, %v31170_v2, %v31172_v43 }
 0x8d1   :  { %v38950_v55 = vadd.f32 %v27342_v18, %v38868_v52  ;;  %v30631_v21 = vsel %vm6900_vm12, %v30612_v28, %v30614_v19  ;;  %v30632_v29 = vsel %vm6900_vm12, %v30614_v19, %v30616_v56  ;;  %31142 = vmatprep.mubr.f32.mxu1 %v39753_v14 }
 0x8d2   :  { %v27344_v22 = vpop.f32.mrf.mxu0  ;;  %31037 = vmatprep.subr.mxu0 %v30632_v29 }
 0x8d3   :  { %v38956_v15 = vadd.f32 %v27344_v22, %v38874_v44  ;;  %31038 = vmatpush1.msra.mxu0 %v30631_v21  ;;  %v31176_v9 = vpop.permute.xlu0 %31175 }
 0x8d4   :  { %v27413_v31 = vpop.f32.mrf.mxu1  ;;  %32411 = vmatmul.mubr.msk.f32.vlgmr.msra.gmra.mxu0 %vm117_vm1, %v38896_v33  ;;  %v30618_v42 = vpop.permute.xlu1 %30617 }
 0x8d5   :  { %v38961_v52 = vadd.f32 %v27413_v31, %v38879_v53  ;;  %v30633_v40 = vsel %vm6900_vm12, %v30616_v56, %v30618_v42  ;;  %v30634_v11 = vsel %vm6900_vm12, %v30618_v42, %v30620_v49  ;;  %31290 = vmatprep.mubr.f32.mxu0 %v39753_v14 }
 0x8d6   :  { %v27415_v20 = vpop.f32.mrf.mxu1  ;;  %31108 = vmatprep.subr.mxu1 %v30634_v11 }
 0x8d7   :  { %v38967_v44 = vadd.f32 %v27415_v20, %v38885_v63  ;;  %31109 = vmatpush1.msra.mxu1 %v30633_v40  ;;  %v31180_v56 = vpop.permute.xlu0 %31179 }
 0x8d8   :  { %v27484_v27 = vpop.f32.mrf.mxu0  ;;  %32412 = vmatmul.mubr.msk.f32.vlgmr.msra.gmra.mxu1 %vm117_vm1, %v38896_v33  ;;  %v31168_v50 = vpop.permute.xlu1 %31167  ;;  %v38982_v33 = vld [vmem:[%s39387_s3 + $0xd0] sm:$0xff] }
 0x8d9   :  { %v38972_v53 = vadd.f32 %v27484_v27, %v38890_v37  ;;  %v31196_v58 = vsel %vm7475_vm13, %v31168_v50, %v31170_v2  ;;  %31361 = vmatprep.mubr.f32.mxu1 %v39753_v14 }
 0x8da   :  { %v27486_v57 = vpop.f32.mrf.mxu0  ;;  %31256 = vmatprep.subr.mxu0 %v31196_v58 }
 0x8db   :  { %v38977_v28 = vadd.f32 %v27486_v57, %v38901_v25  ;;  %v31184_v7 = vpop.permute.xlu0 %31183 }
 0x8dc   :  { %v27555_v63 = vpop.f32.mrf.mxu1  ;;  %v31166_v51 = vpop.permute.xlu1 %31165 }
 0x8dd   :  { %v38985_v37 = vadd.f32 %v27555_v63, %v38906_v3  ;;  %v31195_v30 = vsel %vm7475_vm13, %v31166_v51, %v31168_v50 }
 0x8de   :  { %v27557_v36 = vpop.f32.mrf.mxu1  ;;  %31257 = vmatpush1.msra.mxu0 %v31195_v30 }
 0x8df   :  { %v38989_v10 = vadd.f32 %v27557_v36, %v38912_v0  ;;  %32414 = vmatmul.mubr.msk.f32.vlgmr.msra.gmra.mxu0 %vm117_vm1, %v38982_v33  ;;  %v31188_v47 = vpop.permute.xlu0 %31187 }
 0x8e0   :  { %v27626_v25 = vpop.f32.mrf.mxu0  ;;  %v31174_v4 = vpop.permute.xlu1 %31173  ;;  %31432 = vmatprep.mubr.f32.mxu0 %v39753_v14 }
 0x8e1   :  { %v38995_v13 = vadd.f32 %v27626_v25, %v38917_v45  ;;  %v31198_v3 = vsel %vm7475_vm13, %v31172_v43, %v31174_v4  ;;  %v31199_v34 = vsel %vm7475_vm13, %v31174_v4, %v31176_v9 }
 0x8e2   :  { %v27628_v5 = vpop.f32.mrf.mxu0  ;;  %31327 = vmatprep.subr.mxu1 %v31198_v3 }
 0x8e3   :  { %v39000_v0 = vadd.f32 %v27628_v5, %v38923_v32  ;;  %31328 = vmatpush1.msra.mxu1 %v31197_v54 }
 0x8e4   :  { %v27697_v1 = vpop.f32.mrf.mxu1  ;;  %32415 = vmatmul.mubr.msk.f32.vlgmr.msra.gmra.mxu1 %vm117_vm1, %v38982_v33  ;;  %v31178_v8 = vpop.permute.xlu1 %31177 }
 0x8e5   :  { %v39005_v46 = vadd.f32 %v27697_v1, %v38928_v12  ;;  %v31200_v45 = vsel %vm7475_vm13, %v31176_v9, %v31178_v8  ;;  %31503 = vmatprep.mubr.f32.mxu1 %v39753_v14  ;;  %v31201_v12 = vsel %vm7475_vm13, %v31178_v8, %v31180_v56 }
 0x8e6   :  { %v27699_v49 = vpop.f32.mrf.mxu1  ;;  %31398 = vmatprep.subr.mxu0 %v31200_v45 }
 0x8e7   :  { %v27715_v32 = vadd.f32 %v27699_v49, %v38934_v16  ;;  %31399 = vmatpush1.msra.mxu0 %v31199_v34 }
 0x8e8   :  { %32416 = vmatmul.mubr.msk.f32.vlgmr.msra.gmra.mxu0 %vm117_vm1, %v38982_v33  ;;  %v31182_v41 = vpop.permute.xlu1 %31181 }
 0x8e9   :  { %v31202_v48 = vsel %vm7475_vm13, %v31180_v56, %v31182_v41  ;;  %31574 = vmatprep.mubr.f32.mxu0 %v39753_v14  ;;  %v31203_v2 = vsel %vm7475_vm13, %v31182_v41, %v31184_v7 }
 0x8ea   :  { %31469 = vmatprep.subr.mxu1 %v31202_v48 }
 0x8eb   :  { %v27846_v26 = vpop.f32.mrf.mxu0  ;;  %31470 = vmatpush1.msra.mxu1 %v31201_v12 }
 0x8ec   :  { %v39017_v38 = vadd.f32 %v27846_v26, %v38939_v17  ;;  %32417 = vmatmul.mubr.msk.f32.vlgmr.msra.gmra.mxu1 %vm117_vm1, %v38982_v33  ;;  %v31186_v16 = vpop.permute.xlu1 %31185 }
 0x8ed   :  { %v27848_v35 = vpop.f32.mrf.mxu0  ;;  %v31204_v39 = vsel %vm7475_vm13, %v31184_v7, %v31186_v16  ;;  %31645 = vmatprep.mubr.f32.mxu1 %v39753_v14  ;;  %v31205_v22 = vsel %vm7475_vm13, %v31186_v16, %v31188_v47 }
 0x8ee   :  { %v39025_v18 = vadd.f32 %v27848_v35, %v38945_v23  ;;  %31540 = vmatprep.subr.mxu0 %v31204_v39  ;;  %v31192_v23 = vpop.permute.xlu0 %31191 }
 0x8ef   :  { %31541 = vmatpush1.msra.mxu0 %v31203_v2 }
 0x8f0   :  { %v27917_v19 = vpop.f32.mrf.mxu1  ;;  %32418 = vmatmul.mubr.msk.f32.vlgmr.msra.gmra.mxu0 %vm117_vm1, %v38982_v33  ;;  %v31190_v17 = vpop.permute.xlu1 %31189 }
 0x8f1   :  { %v39030_v21 = vadd.f32 %v27917_v19, %v38950_v55  ;;  %v31206_v29 = vsel %vm7475_vm13, %v31188_v47, %v31190_v17  ;;  %31716 = vmatprep.mubr.f32.mxu0 %v39753_v14  ;;  %v31207_v14 = vsel %vm7475_vm13, %v31190_v17, %v31192_v23 }
 0x8f2   :  { %v27919_v31 = vpop.f32.mrf.mxu1  ;;  %31611 = vmatprep.subr.mxu1 %v31206_v29 }
 0x8f3   :  { %v39036_v42 = vadd.f32 %v27919_v31, %v38956_v15  ;;  %31612 = vmatpush1.msra.mxu1 %v31205_v22 }
 0x8f4   :  { %v27988_v43 = vpop.f32.mrf.mxu0  ;;  %32419 = vmatmul.mubr.msk.f32.vlgmr.msra.gmra.mxu1 %vm117_vm1, %v38982_v33  ;;  %v31194_v40 = vpop.permute.xlu1 %31193 }
 0x8f5   :  { %v39041_v55 = vadd.f32 %v27988_v43, %v38961_v52  ;;  %v31208_v11 = vsel %vm7475_vm13, %v31192_v23, %v31194_v40 }
 0x8f6   :  { %v27990_v20 = vpop.f32.mrf.mxu0  ;;  %31682 = vmatprep.subr.mxu0 %v31208_v11 }
 0x8f7   :  { %v39046_v27 = vadd.f32 %v27990_v20, %v38967_v44  ;;  %31683 = vmatpush1.msra.mxu0 %v31207_v14 }
 0x8f8   :  { %v28059_v15 = vpop.f32.mrf.mxu1  ;;  %32420 = vmatmul.mubr.msk.f32.vlgmr.msra.gmra.mxu0 %vm117_vm1, %v38982_v33 }
 0x8f9   :  { %v28283_v50 = vadd.f32 %v28059_v15, %v38972_v53 }
 0x8fa   :  { %v28061_v58 = vpop.f32.mrf.mxu1 }
 0x8fb   :  { %v28284_v52 = vadd.f32 %v28061_v58, %v38977_v28 }
 0x8fc   :  { %v28130_v57 = vpop.f32.mrf.mxu0 }
 0x8fd   :  { %v28285_v9 = vadd.f32 %v28130_v57, %v38985_v37 }
 0x8fe   :  { %v28132_v63 = vpop.f32.mrf.mxu0 }
 0x8ff   :  { %v28286_v51 = vadd.f32 %v28132_v63, %v38989_v10 }
 0x900   :  { %v28201_v30 = vpop.f32.mrf.mxu1 }
 0x901   :  { %v28287_v44 = vadd.f32 %v28201_v30, %v38995_v13 }
 0x902   :  { %v28203_v36 = vpop.f32.mrf.mxu1 }
 0x903   :  { %v28288_v25 = vadd.f32 %v28203_v36, %v39000_v0 }
 0x904   :  { %v28272_v4 = vpop.f32.mrf.mxu0 }
 0x905   :  { %v28289_v33 = vadd.f32 %v28272_v4, %v39005_v46 }
 0x906   :  { %v28274_v56 = vpop.f32.mrf.mxu0 }
 0x907   :  { %v28290_v53 = vadd.f32 %v28274_v56, %v27715_v32 }
 0x908   :  { %v39057_v3 = vpop.f32.mrf.mxu1 }
 0x90a   :  { %v39061_v54 = vpop.f32.mrf.mxu1 }
 0x90c   :  { %v39059_v28 = vpop.f32.mrf.mxu0 }
 0x90e   :  { %v39063_v37 = vpop.f32.mrf.mxu0 }
 0x910   :  { %v39065_v10 = vpop.f32.mrf.mxu1 }
 0x912   :  { %v39069_v1 = vpop.f32.mrf.mxu1 }
 0x914   :  { %v28634_v5 = vpop.f32.mrf.mxu0 }
 0x915   :  { %v39067_v13 = vadd.f32 %v28634_v5, %v28283_v50 }
 0x916   :  { %v28636_v0 = vpop.f32.mrf.mxu0 }
 0x917   :  { %v39071_v8 = vadd.f32 %v28636_v0, %v28284_v52 }
 0x918   :  { %v28705_v46 = vpop.f32.mrf.mxu1 }
 0x919   :  { %v39073_v45 = vadd.f32 %v28705_v46, %v28285_v9 }
 0x91a   :  { %v28707_v34 = vpop.f32.mrf.mxu1 }
 0x91b   :  { %v39075_v49 = vadd.f32 %v28707_v34, %v28286_v51 }
 0x91c   :  { %v28776_v7 = vpop.f32.mrf.mxu0 }
 0x91d   :  { %v39077_v32 = vadd.f32 %v28776_v7, %v28287_v44 }
 0x91e   :  { %v28778_v41 = vpop.f32.mrf.mxu0 }
 0x91f   :  { %v39079_v48 = vadd.f32 %v28778_v41, %v28288_v25 }
 0x920   :  { %v28847_v12 = vpop.f32.mrf.mxu1 }
 0x921   :  { %v39081_v26 = vadd.f32 %v28847_v12, %v28289_v33 }
 0x922   :  { %v28849_v16 = vpop.f32.mrf.mxu1 }
 0x923   :  { %v39083_v47 = vadd.f32 %v28849_v16, %v28290_v53 }
 0x925   :  { %39893 = vst [vmem:[#allocation122_spill] sm:$0xff] %v39083_v47 }
 0x927   :  { %v28995_v35 = vpop.f32.mrf.mxu0 }
 0x929   :  { %v28997_v39 = vpop.f32.mrf.mxu0 }
 0x92c   :  { %v29066_v2 = vpop.f32.mrf.mxu1 }
 0x92e   :  { %v39087_v17 = vpop.f32.mrf.mxu1 }
 0x930   :  { %v39085_v19 = vpop.f32.mrf.mxu0 }
 0x932   :  { %v39089_v29 = vpop.f32.mrf.mxu0 }
 0x934   :  { %v39091_v22 = vpop.f32.mrf.mxu1 }
 0x936   :  { %v39095_v23 = vpop.f32.mrf.mxu1 }
 0x937   :  { %v39093_v31 = vpop.f32.mrf.mxu0 }
 0x939   :  { %v39097_v43 = vpop.f32.mrf.mxu0 }
 0x93b   :  { %v39099_v40 = vpop.f32.mrf.mxu1 }
 0x93d   :  { %v39103_v14 = vpop.f32.mrf.mxu1 }
 0x93f   :  { %v39101_v11 = vpop.f32.mrf.mxu0 }
 0x941   :  { %v39105_v20 = vpop.f32.mrf.mxu0 }
 0x942   :  { %39894 = vst [vmem:[#allocation5_spill] sm:$0xff] %v39105_v20  ;;  %v28852_v20 = vadd.f32 %v39057_v3, %v39017_v38  ;;  %v28855_v3 = vadd.f32 %v39063_v37, %v39036_v42 }
 0x943   :  { %v29569_v15 = vpop.f32.mrf.mxu1 }
 0x945   :  { %v29571_v58 = vpop.f32.mrf.mxu1 }
 0x947   :  { %v29640_v50 = vpop.f32.mrf.mxu0 }
 0x949   :  { %v29642_v52 = vpop.f32.mrf.mxu0 }
 0x94b   :  { %v39107_v57 = vpop.f32.mrf.mxu1 }
 0x94d   :  { %v39111_v63 = vpop.f32.mrf.mxu1 }
 0x94f   :  { %v39109_v9 = vpop.f32.mrf.mxu0 }
 0x951   :  { %v39113_v51 = vpop.f32.mrf.mxu0 }
 0x953   :  { %v39115_v30 = vpop.f32.mrf.mxu1 }
 0x954   :  { %39895 = vst [vmem:[#allocation15_spill] sm:$0xff] %v39115_v30 }
 0x955   :  { %v39119_v36 = vpop.f32.mrf.mxu1 }
 0x956   :  { %39897 = vst [vmem:[#allocation114_spill] sm:$0xff] %v39119_v36 }
 0x957   :  { %v39117_v44 = vpop.f32.mrf.mxu0 }
 0x958   :  { %39896 = vst [vmem:[#allocation25_spill] sm:$0xff] %v39117_v44 }
 0x959   :  { %v39121_v25 = vpop.f32.mrf.mxu0 }
 0x95a   :  { %39898 = vst [vmem:[#allocation4_spill] sm:$0xff] %v39121_v25 }
 0x95b   :  { %v39123_v4 = vpop.f32.mrf.mxu1 }
 0x95c   :  { %39899 = vst [vmem:[#allocation6_spill] sm:$0xff] %v39123_v4 }
 0x95d   :  { %v39125_v56 = vpop.f32.mrf.mxu1 }
 0x95e   :  { %39900 = vst [vmem:[#allocation26_spill] sm:$0xff] %v39125_v56 }
 0x962   :  { %v30144_v33 = vpop.f32.mrf.mxu0 }
 0x964   :  { %v30146_v53 = vpop.f32.mrf.mxu0 }
 0x967   :  { %v30215_v5 = vpop.f32.mrf.mxu1 }
 0x969   :  { %v30217_v46 = vpop.f32.mrf.mxu1 }
 0x96b   :  { %v39127_v0 = vpop.f32.mrf.mxu0 }
 0x96d   :  { %v39129_v34 = vpop.f32.mrf.mxu0 }
 0x96f   :  { %v39131_v7 = vpop.f32.mrf.mxu1 }
 0x971   :  { %v39135_v12 = vpop.f32.mrf.mxu1 }
 0x972   :  { %39902 = vst [vmem:[#allocation7_spill] sm:$0xff] %v39135_v12 }
 0x974   :  { %v39133_v41 = vpop.f32.mrf.mxu0 }
 0x975   :  { %39901 = vst [vmem:[#allocation115_spill] sm:$0xff] %v39133_v41 }
 0x976   :  { %v39137_v16 = vpop.f32.mrf.mxu0 }
 0x977   :  { %39903 = vst [vmem:[#allocation8_spill] sm:$0xff] %v39137_v16 }
 0x978   :  { %v39139_v60 = vpop.f32.mrf.mxu1 }
 0x979   :  { %39904 = vst [vmem:[#allocation14_spill] sm:$0xff] %v39139_v60 }
 0x97a   :  { %v39143_v6 = vpop.f32.mrf.mxu1 }
 0x97b   :  { %39906 = vst [vmem:[#allocation116_spill] sm:$0xff] %v39143_v6  ;;  %v29426_v6 = vadd.f32 %v28995_v35, %v28852_v20 }
 0x97c   :  { %v39141_v62 = vpop.f32.mrf.mxu0 }
 0x97d   :  { %39905 = vst [vmem:[#allocation17_spill] sm:$0xff] %v39141_v62  ;;  %v28853_v62 = vadd.f32 %v39061_v54, %v39025_v18  ;;  %v30000_v36 = vadd.f32 %v29569_v15, %v29426_v6  ;;  %v28856_v6 = vadd.f32 %v39065_v10, %v39041_v55  ;;  %v29432_v55 = vadd.f32 %v39091_v22, %v39067_v13 }
 0x97e   :  { %v39145_v61 = vpop.f32.mrf.mxu0  ;;  %v29435_v13 = vadd.f32 %v39097_v43, %v39075_v49  ;;  %v29437_v22 = vadd.f32 %v39103_v14, %v39079_v48  ;;  %v29438_v48 = vadd.f32 %v39101_v11, %v39081_v26 }
 0x97f   :  { %39907 = vst [vmem:[#allocation9_spill] sm:$0xff] %v39145_v61  ;;  %v29427_v41 = vadd.f32 %v28997_v39, %v28853_v62  ;;  %v30575_v30 = vadd.f32 %v30144_v33, %v30000_v36  ;;  %v28857_v62 = vadd.f32 %v39069_v1, %v39046_v27  ;;  %v29430_v42 = vadd.f32 %v39085_v19, %v28856_v6  ;;  %v39911_v1 = vld [vmem:[#allocation32_spill] sm:$0xff] }
 0x980   :  { %v30718_v24 = vpop.f32.mrf.mxu1  ;;  %v29433_v27 = vadd.f32 %v39095_v23, %v39071_v8  ;;  %v29434_v19 = vadd.f32 %v39093_v31, %v39073_v45  ;;  %v29436_v8 = vadd.f32 %v39099_v40, %v39077_v32  ;;  %v39912_v23 = vld [vmem:[#allocation35_spill] sm:$0xff] }
 0x981   :  { %v30001_v12 = vadd.f32 %v29571_v58, %v29427_v41  ;;  %v31149_v54 = vadd.f32 %v30718_v24, %v30575_v30  ;;  %v29431_v37 = vadd.f32 %v39089_v29, %v28857_v62  ;;  %v30004_v29 = vadd.f32 %v39107_v57, %v29430_v42 }
 0x982   :  { %v30720_v56 = vpop.f32.mrf.mxu1 }
 0x983   :  { %v30576_v18 = vadd.f32 %v30146_v53, %v30001_v12  ;;  %v30005_v33 = vadd.f32 %v39111_v63, %v29431_v37  ;;  %v30579_v45 = vadd.f32 %v39127_v0, %v30004_v29  ;;  %v39920_v37 = vld [vmem:[#allocation114_spill] sm:$0xff] }
 0x984   :  { %v30789_v59 = vpop.f32.mrf.mxu0 }
 0x985   :  { %v31150_v20 = vadd.f32 %v30720_v56, %v30576_v18  ;;  %v39913_v56 = vld [vmem:[#allocation34_spill] sm:$0xff]  ;;  %v39916_v18 = vld [vmem:[#allocation7_spill] sm:$0xff] }
 0x986   :  { %v30791_v4 = vpop.f32.mrf.mxu0 }
 0x988   :  { %v30860_v25 = vpop.f32.mrf.mxu1 }
 0x989   :  { %v31153_v14 = vadd.f32 %v30860_v25, %v30579_v45  ;;  %v39915_v25 = vld [vmem:[#allocation15_spill] sm:$0xff] }
 0x98a   :  { %v39151_v47 = vpop.f32.mrf.mxu1 }
 0x98b   :  { %39909 = vst [vmem:[#allocation27_spill] sm:$0xff] %v39151_v47 }
 0x98c   :  { %v39147_v44 = vpop.f32.mrf.mxu0 }
 0x98d   :  { %39908 = vst [vmem:[#allocation16_spill] sm:$0xff] %v39147_v44  ;;  %v28854_v44 = vadd.f32 %v39059_v28, %v39030_v21  ;;  %v29429_v21 = vadd.f32 %v39087_v17, %v28855_v3  ;;  %v30008_v3 = vadd.f32 %v39915_v25, %v29434_v19 }
 0x98e   :  { %v39153_v16 = vpop.f32.mrf.mxu0 }
 0x98f   :  { %39910 = vst [vmem:[#allocation29_spill] sm:$0xff] %v39153_v16  ;;  %v29428_v16 = vadd.f32 %v29066_v2, %v28854_v44  ;;  %v30003_v24 = vadd.f32 %v29642_v52, %v29429_v21 }
 0x990   :  { %v39157_v60 = vpop.f32.mrf.mxu1 }
 0x991   :  { %v30002_v28 = vadd.f32 %v29640_v50, %v29428_v16  ;;  %v30578_v52 = vadd.f32 %v30217_v46, %v30003_v24  ;;  %v39914_v16 = vld [vmem:[#allocation36_spill] sm:$0xff]  ;;  %v30009_v24 = vadd.f32 %v39920_v37, %v29435_v13 }
 0x992   :  { %v39163_v38 = vpop.f32.mrf.mxu1  ;;  %v39917_v6 = vld [vmem:[#allocation27_spill] sm:$0xff] }
 0x993   :  { %v30577_v2 = vadd.f32 %v30215_v5, %v30002_v28  ;;  %v31152_v31 = vadd.f32 %v30791_v4, %v30578_v52  ;;  %v30007_v4 = vadd.f32 %v39113_v51, %v29433_v27  ;;  %v30580_v5 = vadd.f32 %v39129_v34, %v30005_v33  ;;  %v39925_v33 = vld [vmem:[#allocation25_spill] sm:$0xff] }
 0x994   :  { %v39159_v61 = vpop.f32.mrf.mxu0  ;;  %v39918_v62 = vld [vmem:[#allocation16_spill] sm:$0xff]  ;;  %v30010_v45 = vadd.f32 %v39925_v33, %v29436_v8 }
 0x995   :  { %v31151_v30 = vadd.f32 %v30789_v59, %v30577_v2  ;;  %v30006_v59 = vadd.f32 %v39109_v9, %v29432_v55  ;;  %v31154_v51 = vadd.f32 %v39917_v6, %v30580_v5  ;;  %v39921_v2 = vld [vmem:[#allocation115_spill] sm:$0xff] }
 0x996   :  { %v39167_v47 = vpop.f32.mrf.mxu0  ;;  %v39922_v55 = vld [vmem:[#allocation29_spill] sm:$0xff] }
 0x997   :  { %v30581_v9 = vadd.f32 %v39131_v7, %v30006_v59  ;;  %v39927_v59 = vld [vmem:[#allocation38_spill] sm:$0xff] }
 0x998   :  { %v39169_v35 = vpop.f32.mrf.mxu1 }
 0x999   :  { %v31155_v34 = vadd.f32 %v39918_v62, %v30581_v9  ;;  %v39930_v9 = vld [vmem:[#allocation14_spill] sm:$0xff] }
 0x99a   :  { %v39184_v10 = vpop.f32.mrf.mxu1 }
 0x99f   :  { %v31292_v39 = vpop.f32.mrf.mxu0 }
 0x9a0   :  { %v39176_v15 = vadd.f32 %v31292_v39, %v31149_v54  ;;  %v30582_v54 = vadd.f32 %v39916_v18, %v30007_v4  ;;  %v39929_v4 = vld [vmem:[#allocation4_spill] sm:$0xff] }
 0x9a1   :  { %v31294_v58 = vpop.f32.mrf.mxu0  ;;  %v30011_v5 = vadd.f32 %v39929_v4, %v29437_v22 }
 0x9a2   :  { %v31737_v17 = vmul.f32 %v39176_v15, %v39911_v1  ;;  %v39188_v50 = vadd.f32 %v31294_v58, %v31150_v20  ;;  %v39919_v20 = vld [vmem:[#allocation37_spill] sm:$0xff]  ;;  %v30583_v58 = vadd.f32 %v39921_v2, %v30008_v3  ;;  %v31156_v27 = vadd.f32 %v39922_v55, %v30582_v54  ;;  %v39932_v3 = vld [vmem:[#allocation6_spill] sm:$0xff]  ;;  %v39933_v54 = vld [vmem:[#allocation116_spill] sm:$0xff] }
 0x9a3   :  { %v30012_v18 = vadd.f32 %v39932_v3, %v29438_v48  ;;  %v30586_v6 = vadd.f32 %v39933_v54, %v30011_v5  ;;  %v39944_v54 = vld [vmem:[#allocation13_spill] sm:$0xff] }
 0x9a4   :  { %v31738_v44 = vmul.f32 %v39188_v50, %v39912_v23  ;;  %v31363_v36 = vpop.f32.mrf.mxu1  ;;  %v31767_v49 = vmul.f32 %v31737_v17, %v39176_v15  ;;  %v39923_v23 = vld [vmem:[#allocation122_spill] sm:$0xff] }
 0x9a5   :  { %v39203_v57 = vadd.f32 %v31363_v36, %v31151_v30 }
 0x9a6   :  { %v31751_v43 = vadd.f32 %v31738_v44, %v31737_v17  ;;  %v31768_v32 = vmul.f32 %v31738_v44, %v39188_v50  ;;  %v31365_v40 = vpop.f32.mrf.mxu1  ;;  %v39924_v44 = vld [vmem:[#allocation5_spill] sm:$0xff] }
 0x9a7   :  { %v31739_v63 = vmul.f32 %v39203_v57, %v39913_v56  ;;  %v39212_v53 = vadd.f32 %v31365_v40, %v31152_v31  ;;  %v29439_v36 = vadd.f32 %v39924_v44, %v39923_v23  ;;  %v39926_v31 = vld [vmem:[#allocation8_spill] sm:$0xff] }
 0x9a8   :  { %v31781_v0 = vadd.f32 %v31768_v32, %v31767_v49  ;;  %v31434_v46 = vpop.f32.mrf.mxu0  ;;  %v30584_v13 = vadd.f32 %v39926_v31, %v30009_v24  ;;  %v31157_v32 = vadd.f32 %v39157_v60, %v30583_v58  ;;  %v31160_v58 = vadd.f32 %v39167_v47, %v30586_v6 }
 0x9a9   :  { %v31752_v41 = vadd.f32 %v31751_v43, %v31739_v63  ;;  %v31769_v12 = vmul.f32 %v31739_v63, %v39203_v57  ;;  %v31740_v26 = vmul.f32 %v39212_v53, %v39914_v16  ;;  %v39220_v11 = vadd.f32 %v31434_v46, %v31153_v14  ;;  %v39928_v14 = vld [vmem:[#allocation39_spill] sm:$0xff] }
 0x9aa   :  { %v31436_v21 = vpop.f32.mrf.mxu0 }
 0x9ab   :  { %v31782_v7 = vadd.f32 %v31781_v0, %v31769_v12  ;;  %v31753_v28 = vadd.f32 %v31752_v41, %v31740_v26  ;;  %v31770_v39 = vmul.f32 %v31740_v26, %v39212_v53  ;;  %v31741_v42 = vmul.f32 %v39220_v11, %v39919_v20  ;;  %v39931_v26 = vld [vmem:[#allocation41_spill] sm:$0xff] }
 0x9ac   :  { %v39232_v1 = vadd.f32 %v31436_v21, %v31154_v51  ;;  %v31505_v17 = vpop.f32.mrf.mxu1  ;;  %v30585_v0 = vadd.f32 %v39930_v9, %v30010_v45  ;;  %v31158_v12 = vadd.f32 %v39163_v38, %v30584_v13  ;;  %v39939_v45 = vld [vmem:[#allocation42_spill] sm:$0xff] }
 0x9ad   :  { %v31783_v19 = vadd.f32 %v31782_v7, %v31770_v39  ;;  %v31754_v29 = vadd.f32 %v31753_v28, %v31741_v42  ;;  %v31771_v52 = vmul.f32 %v31741_v42, %v39220_v11  ;;  %v39235_v30 = vadd.f32 %v31505_v17, %v31155_v34  ;;  %v39934_v7 = vld [vmem:[#allocation40_spill] sm:$0xff]  ;;  %v39935_v39 = vld [vmem:[#allocation26_spill] sm:$0xff]  ;;  %v39936_v42 = vld [vmem:[#allocation17_spill] sm:$0xff] }
 0x9ae   :  { %v31742_v49 = vmul.f32 %v39232_v1, %v39927_v59  ;;  %v31507_v43 = vpop.f32.mrf.mxu1  ;;  %v31159_v34 = vadd.f32 %v39159_v61, %v30585_v0  ;;  %v30013_v20 = vadd.f32 %v39935_v39, %v29439_v36  ;;  %v30587_v37 = vadd.f32 %v39936_v42, %v30012_v18  ;;  %v39941_v0 = vld [vmem:[#allocation45_spill] sm:$0xff]  ;;  %v39943_v18 = vld [vmem:[#allocation68_spill] sm:$0xff]  ;;  %v39947_v39 = vld [vmem:[#allocation74_spill] sm:$0xff] }
 0x9af   :  { %v31784_v40 = vadd.f32 %v31783_v19, %v31771_v52  ;;  %v31743_v56 = vmul.f32 %v39235_v30, %v39928_v14  ;;  %v39246_v63 = vadd.f32 %v31507_v43, %v31156_v27  ;;  %v39937_v27 = vld [vmem:[#allocation43_spill] sm:$0xff]  ;;  %v39938_v19 = vld [vmem:[#allocation9_spill] sm:$0xff]  ;;  %v31850_v6 = vmul.f32 %v39944_v54, %v39943_v18 }
 0x9b0   :  { %v31755_v46 = vadd.f32 %v31754_v29, %v31742_v49  ;;  %v31772_v8 = vmul.f32 %v31742_v49, %v39232_v1  ;;  %v31576_v41 = vpop.f32.mrf.mxu0  ;;  %v30588_v29 = vadd.f32 %v39938_v19, %v30013_v20  ;;  %v31161_v36 = vadd.f32 %v39169_v35, %v30587_v37 }
 0x9b1   :  { %v31773_v16 = vmul.f32 %v31743_v56, %v39235_v30  ;;  %v31744_v60 = vmul.f32 %v39246_v63, %v39931_v26  ;;  %v39255_v25 = vadd.f32 %v31576_v41, %v31157_v32  ;;  %v31863_v20 = vadd.f32 %v39947_v39, %v31850_v6  ;;  %v39954_v39 = vld [vmem:[#allocation60_spill] sm:$0xff] }
 0x9b2   :  { %v31785_v22 = vadd.f32 %v31784_v40, %v31772_v8  ;;  %v31756_v51 = vadd.f32 %v31755_v46, %v31743_v56  ;;  %v31578_v62 = vpop.f32.mrf.mxu0  ;;  %v31162_v43 = vadd.f32 %v39184_v10, %v30588_v29  ;;  %v39940_v40 = vld [vmem:[#allocation44_spill] sm:$0xff] }
 0x9b3   :  { %v31774_v21 = vmul.f32 %v31744_v60, %v39246_v63  ;;  %v31745_v38 = vmul.f32 %v39255_v25, %v39934_v7  ;;  %v39263_v28 = vadd.f32 %v31578_v62, %v31158_v12 }
 0x9b4   :  { %v31786_v24 = vadd.f32 %v31785_v22, %v31773_v16  ;;  %v31757_v48 = vadd.f32 %v31756_v51, %v31744_v60  ;;  %v31647_v2 = vpop.f32.mrf.mxu1  ;;  %v39942_v16 = vld [vmem:[#allocation46_spill] sm:$0xff] }
 0x9b5   :  { %v31775_v55 = vmul.f32 %v31745_v38, %v39255_v25  ;;  %v31746_v61 = vmul.f32 %v39263_v28, %v39937_v27  ;;  %v39271_v17 = vadd.f32 %v31647_v2, %v31159_v34  ;;  %v39945_v34 = vld [vmem:[#allocation71_spill] sm:$0xff] }
 0x9b6   :  { %v31787_v52 = vadd.f32 %v31786_v24, %v31774_v21  ;;  %v31758_v23 = vadd.f32 %v31757_v48, %v31745_v38  ;;  %v31649_v44 = vpop.f32.mrf.mxu1  ;;  %v39946_v21 = vld [vmem:[#allocation113_spill] sm:$0xff]  ;;  %v31836_v48 = vpop.xlane.xlu1 %31835 }
 0x9b7   :  { %v31776_v33 = vmul.f32 %v31746_v61, %v39263_v28  ;;  %v31747_v31 = vmul.f32 %v39271_v17, %v39939_v45  ;;  %v39278_v47 = vadd.f32 %v31649_v44, %v31160_v58  ;;  %v31851_v7 = vmul.f32 %v39946_v21, %v39945_v34 }
 0x9b8   :  { %v31788_v13 = vadd.f32 %v31787_v52, %v31775_v55  ;;  %v31759_v59 = vadd.f32 %v31758_v23, %v31746_v61  ;;  %v31718_v49 = vpop.f32.mrf.mxu0  ;;  %v31837_v58 = vmul.f32 0.0009765625, %v31836_v48 }
 0x9b9   :  { %v31777_v32 = vmul.f32 %v31747_v31, %v39271_v17  ;;  %v31748_v14 = vmul.f32 %v39278_v47, %v39940_v40  ;;  %v39284_v56 = vadd.f32 %v31718_v49, %v31161_v36  ;;  %v31864_v42 = vadd.f32 %v31863_v20, %v31851_v7  ;;  %v32424_v40 = vld [vmem:[%s39386_s5 + $0x28] sm:$0xff]  ;;  %v39955_v20 = vld [vmem:[#allocation63_spill] sm:$0xff] }
 0x9ba   :  { %v31789_v35 = vadd.f32 %v31788_v13, %v31776_v33  ;;  %v31760_v4 = vadd.f32 %v31759_v59, %v31747_v31  ;;  %v31720_v5 = vpop.f32.mrf.mxu0  ;;  %v31868_v29 = vmul.f32 %v31837_v58, %v31837_v58  ;;  %v32421_v33 = vld [vmem:[%s39386_s5 + $0x10] sm:$0xff]  ;;  %v32423_v13 = vld [vmem:[%s39386_s5 + $0x20] sm:$0xff] }
 0x9bb   :  { %v31778_v9 = vmul.f32 %v31748_v14, %v39278_v47  ;;  %v31749_v46 = vmul.f32 %v39284_v56, %v39941_v0  ;;  %v39289_v8 = vadd.f32 %v31720_v5, %v31162_v43 }
 0x9bc   :  { %v31790_v41 = vadd.f32 %v31789_v35, %v31777_v32  ;;  %v31761_v12 = vadd.f32 %v31760_v4, %v31748_v14  ;;  %v32422_v32 = vld [vmem:[%s39386_s5 + $0x18] sm:$0xff] }
 0x9bd   :  { %v31779_v10 = vmul.f32 %v31749_v46, %v39284_v56  ;;  %v31750_v26 = vmul.f32 %v39289_v8, %v39942_v16 }
 0x9be   :  { %v31791_v60 = vadd.f32 %v31790_v41, %v31778_v9  ;;  %v31762_v3 = vadd.f32 %v31761_v12, %v31749_v46 }
 0x9bf   :  { %v31780_v22 = vmul.f32 %v31750_v26, %v39289_v8 }
 0x9c0   :  { %v31763_v51 = vadd.f32 %v31762_v3, %v31750_v26  ;;  %v31792_v62 = vadd.f32 %v31791_v60, %v31779_v10 }
 0x9c2   :  { %31764 = vadd.xlane.f32.xlu0 %v31763_v51  ;;  %v31793_v38 = vadd.f32 %v31792_v62, %v31780_v22 }
 0x9c6   :  { %31794 = vadd.xlane.f32.xlu0 %v31793_v38 }
 0x9ca   :  { %31865 = vadd.xlane.f32.xlu0 %v31864_v42  ;;  %v39956_v42 = vld [vmem:[#allocation62_spill] sm:$0xff] }
 0xa4b   :  { %v31765_v37 = vpop.xlane.xlu0 %31764 }
 0xa4c   :  { %v31766_v24 = vmul.f32 0.0009765625, %v31765_v37  ;;  %v39957_v37 = vld [vmem:[#allocation65_spill] sm:$0xff] }
 0xa4e   :  { %v31797_v55 = vmul.f32 %v31766_v24, %v31766_v24 }
 0xa4f   :  { %v31795_v2 = vpop.xlane.xlu0 %31794 }
 0xa50   :  { %v31796_v27 = vmul.f32 0.0009765625, %v31795_v2  ;;  %v39959_v2 = vld [vmem:[#allocation69_spill] sm:$0xff] }
 0xa52   :  { %v31798_v61 = vsub.f32 %v31796_v27, %v31797_v55 }
 0xa53   :  { %v31866_v19 = vpop.xlane.xlu0 %31865 }
 0xa54   :  { %v31801_v52 = vadd.f32 1e-05, %v31798_v61  ;;  %v31867_v23 = vmul.f32 0.0009765625, %v31866_v19 }
 0xa56   :  { %32476 = vrsqrt.f32 %v31801_v52  ;;  %v31869_v44 = vsub.f32 %v31867_v23, %v31868_v29 }
 0xa58   :  { %v31872_v36 = vadd.f32 1e-05, %v31869_v44 }
 0xa5a   :  { %32478 = vrsqrt.f32 %v31872_v36 }
 0xa63   :  { %v32477_v45 = vpop.eup %32476 }
 0xa64   :  { %v31803_v31 = vmul.f32 %v32477_v45, %v32421_v33 }
 0xa66   :  { %31881 = vperm.xlu1 %32473, %v31803_v31   ;;  %v31806_v49 = vmul.f32 %v31803_v31, %v31766_v24  ;;  %v39958_v24 = vld [vmem:[#allocation66_spill] sm:$0xff] }
 0xa67   :  { %v32479_v59 = vpop.eup %32478 }
 0xa68   :  { %v31874_v43 = vmul.f32 %v32479_v59, %v32423_v13  ;;  %v31807_v35 = vsub.f32 %v32422_v32, %v31806_v49 }
 0xa6a   :  { %31900 = vperm.xlu0 %32472, %v31874_v43   ;;  %v31877_v14 = vmul.f32 %v31874_v43, %v31837_v58 }
 0xa6c   :  { %v31878_v4 = vsub.f32 %v32424_v40, %v31877_v14 }
 0xa6e   :  { %v31931_v5 = vadd.f32 %v31878_v4, %v31807_v35 }
 0xa70   :  { %31934 = vperm.xlu1 %32473, %v31931_v5  }
 0xae1   :  { %v31882_v9 = vpop.permute.xlu1 %31881 }
 0xae2   :  { %v31884_v0 = vmul.f32 %v31882_v9, %v39176_v15  ;;  %v31885_v46 = vmul.f32 %v31882_v9, %v39188_v50  ;;  %v31886_v41 = vmul.f32 %v31882_v9, %v39203_v57  ;;  %v31887_v12 = vmul.f32 %v31882_v9, %v39212_v53 }
 0xae3   :  { %v31888_v10 = vmul.f32 %v31882_v9, %v39220_v11  ;;  %v31889_v16 = vmul.f32 %v31882_v9, %v39232_v1  ;;  %v31890_v26 = vmul.f32 %v31882_v9, %v39235_v30  ;;  %v31891_v60 = vmul.f32 %v31882_v9, %v39246_v63  ;;  %v39948_v11 = vld [vmem:[#allocation48_spill] sm:$0xff]  ;;  %v39949_v1 = vld [vmem:[#allocation51_spill] sm:$0xff]  ;;  %v39951_v63 = vld [vmem:[#allocation57_spill] sm:$0xff] }
 0xae4   :  { %v31892_v3 = vmul.f32 %v31882_v9, %v39255_v25  ;;  %v31893_v54 = vmul.f32 %v31882_v9, %v39263_v28  ;;  %v31894_v15 = vmul.f32 %v31882_v9, %v39271_v17  ;;  %v31895_v50 = vmul.f32 %v31882_v9, %v39278_v47  ;;  %v39950_v30 = vld [vmem:[#allocation52_spill] sm:$0xff]  ;;  %v39952_v25 = vld [vmem:[#allocation53_spill] sm:$0xff]  ;;  %v39953_v28 = vld [vmem:[#allocation58_spill] sm:$0xff] }
 0xae5   :  { %v31901_v6 = vpop.permute.xlu0 %31900  ;;  %v31896_v57 = vmul.f32 %v31882_v9, %v39284_v56  ;;  %v31897_v53 = vmul.f32 %v31882_v9, %v39289_v8 }
 0xae6   :  { %v31903_v22 = vmul.f32 %v31901_v6, %v39948_v11  ;;  %v31904_v51 = vmul.f32 %v31901_v6, %v39949_v1  ;;  %v31905_v62 = vmul.f32 %v31901_v6, %v39950_v30  ;;  %v31906_v21 = vmul.f32 %v31901_v6, %v39951_v63 }
 0xae7   :  { %v31907_v7 = vmul.f32 %v31901_v6, %v39952_v25  ;;  %v31908_v38 = vmul.f32 %v31901_v6, %v39953_v28  ;;  %v31909_v17 = vmul.f32 %v31901_v6, %v39954_v39  ;;  %v31910_v47 = vmul.f32 %v31901_v6, %v39955_v20 }
 0xae8   :  { %v31911_v56 = vmul.f32 %v31901_v6, %v39956_v42  ;;  %v31912_v8 = vmul.f32 %v31901_v6, %v39957_v37  ;;  %v31913_v48 = vmul.f32 %v31901_v6, %v39958_v24  ;;  %v31914_v58 = vmul.f32 %v31901_v6, %v39959_v2 }
 0xae9   :  { %v31915_v55 = vmul.f32 %v31901_v6, %v39943_v18  ;;  %v31916_v27 = vmul.f32 %v31901_v6, %v39945_v34  ;;  %v31917_v61 = vadd.f32 %v31903_v22, %v31884_v0  ;;  %v31918_v19 = vadd.f32 %v31904_v51, %v31885_v46 }
 0xaea   :  { %v31919_v29 = vadd.f32 %v31905_v62, %v31886_v41  ;;  %v31920_v52 = vadd.f32 %v31906_v21, %v31887_v12  ;;  %v31921_v23 = vadd.f32 %v31907_v7, %v31888_v10  ;;  %v31922_v44 = vadd.f32 %v31908_v38, %v31889_v16 }
 0xaeb   :  { %v31923_v36 = vadd.f32 %v31909_v17, %v31890_v26  ;;  %v31924_v33 = vadd.f32 %v31910_v47, %v31891_v60  ;;  %v31925_v45 = vadd.f32 %v31911_v56, %v31892_v3  ;;  %v31926_v31 = vadd.f32 %v31912_v8, %v31893_v54  ;;  %v31935_v13 = vpop.permute.xlu1 %31934 }
 0xaec   :  { %v31927_v59 = vadd.f32 %v31913_v48, %v31894_v15  ;;  %v31928_v49 = vadd.f32 %v31914_v58, %v31895_v50  ;;  %v31929_v43 = vadd.f32 %v31915_v55, %v31896_v57  ;;  %v31930_v32 = vadd.f32 %v31916_v27, %v31897_v53 }
 0xaed   :  { %v31937_v40 = vadd.f32 %v31935_v13, %v31917_v61  ;;  %v31938_v14 = vadd.f32 %v31935_v13, %v31918_v19  ;;  %v31939_v18 = vadd.f32 %v31935_v13, %v31919_v29  ;;  %v31940_v35 = vadd.f32 %v31935_v13, %v31920_v52 }
 0xaee   :  { %v31941_v34 = vadd.f32 %v31935_v13, %v31921_v23  ;;  %v31942_v4 = vadd.f32 %v31935_v13, %v31922_v44  ;;  %v31943_v5 = vadd.f32 %v31935_v13, %v31923_v36  ;;  %v31944_v9 = vadd.f32 %v31935_v13, %v31924_v33 }
 0xaef   :  { %v31945_v0 = vadd.f32 %v31935_v13, %v31925_v45  ;;  %v31946_v46 = vadd.f32 %v31935_v13, %v31926_v31  ;;  %v31947_v41 = vadd.f32 %v31935_v13, %v31927_v59  ;;  %v31948_v12 = vadd.f32 %v31935_v13, %v31928_v49 }
 0xaf0   :  { %v31949_v10 = vadd.f32 %v31935_v13, %v31929_v43  ;;  %v31950_v16 = vadd.f32 %v31935_v13, %v31930_v32  ;;  %v31951_v26 = vmax.f32 %v31937_v40, 0.0  ;;  %v31952_v60 = vmax.f32 %v31938_v14, 0.0 }
 0xaf1   :  { %v31953_v3 = vmax.f32 %v31939_v18, 0.0  ;;  %v31954_v54 = vmax.f32 %v31940_v35, 0.0  ;;  %v31955_v6 = vmax.f32 %v31941_v34, 0.0  ;;  %v31956_v15 = vmax.f32 %v31942_v4, 0.0 }
 0xaf2   :  { %v31957_v50 = vmax.f32 %v31943_v5, 0.0  ;;  %v31958_v57 = vmax.f32 %v31944_v9, 0.0  ;;  %v31959_v53 = vmax.f32 %v31945_v0, 0.0  ;;  %v31960_v11 = vmax.f32 %v31946_v46, 0.0  ;;  %31965 = vst [vmem:[%s39388_s6] sm:$0xff] %v31951_v26  ;;  %31966 = vst [vmem:[%s39388_s6 + $0x8] sm:$0xff] %v31952_v60 }
 0xaf3   :  { %v31961_v22 = vmax.f32 %v31947_v41, 0.0  ;;  %v31962_v1 = vmax.f32 %v31948_v12, 0.0  ;;  %v31963_v51 = vmax.f32 %v31949_v10, 0.0  ;;  %v31964_v30 = vmax.f32 %v31950_v16, 0.0  ;;  %31967 = vst [vmem:[%s39388_s6 + $0x10] sm:$0xff] %v31953_v3  ;;  %31968 = vst [vmem:[%s39388_s6 + $0x18] sm:$0xff] %v31954_v54 }
 0xaf4   :  { %31969 = vst [vmem:[%s39388_s6 + $0x20] sm:$0xff] %v31955_v6  ;;  %31970 = vst [vmem:[%s39388_s6 + $0x28] sm:$0xff] %v31956_v15 }
 0xaf5   :  { %31971 = vst [vmem:[%s39388_s6 + $0x30] sm:$0xff] %v31957_v50  ;;  %31972 = vst [vmem:[%s39388_s6 + $0x38] sm:$0xff] %v31958_v57 }
 0xaf6   :  { %31973 = vst [vmem:[%s39388_s6 + $0x40] sm:$0xff] %v31959_v53  ;;  %31974 = vst [vmem:[%s39388_s6 + $0x48] sm:$0xff] %v31960_v11 }
 0xaf7   :  { %31975 = vst [vmem:[%s39388_s6 + $0x50] sm:$0xff] %v31961_v22  ;;  %31976 = vst [vmem:[%s39388_s6 + $0x58] sm:$0xff] %v31962_v1 }
 0xaf8   :  { %31977 = vst [vmem:[%s39388_s6 + $0x60] sm:$0xff] %v31963_v51  ;;  %31978 = vst [vmem:[%s39388_s6 + $0x68] sm:$0xff] %v31964_v30 }

</bundles_post_ra>
